<compile_context>
chip_gen: v5e
topology: v5e:2x2
jax: 0.10.0
libtpu: 0.0.40
codegen_flags: <defaults>
</compile_context>

<pallas_src>
import functools
import math

import jax
import jax.numpy as jnp
from jax import lax
from jax.experimental import pallas as pl
from jax.experimental.pallas import tpu as pltpu


# ----------------------------------------------------------------------------
# Fused 3x3 valid conv (stride 1) + bias + ReLU, NHWC, one image per grid step.
#   x_ref : (1, H, W, Cin)   w_ref : (9, Cin, Cout)   b_ref : (1, Cout)
#   o_ref : (1, Ho, Wo, Cout)
# ----------------------------------------------------------------------------
def _conv3x3_kernel(x_ref, w_ref, b_ref, o_ref, *, Ho, Wo, Cin, Cout):
    bias = b_ref[...]                                    # (1, Cout)

    def row_body(r, carry):
        acc = jnp.zeros((Wo, Cout), jnp.float32)
        for t in range(9):                               # 3x3 taps, unrolled
            di, dj = t // 3, t % 3
            patch = x_ref[0, r + di, pl.ds(dj, Wo), :]   # (Wo, Cin)
            if Cin < 8:
                # conv1 (Cin=1): VPU broadcast outer-product, skip the MXU.
                acc = acc + patch * w_ref[t]             # (Wo,1)*(1,Cout)
            else:
                acc = acc + jnp.dot(patch, w_ref[t],
                                    preferred_element_type=jnp.float32)
        o_ref[0, r] = jnp.maximum(acc + bias, 0.0)
        return carry

    lax.fori_loop(0, Ho, row_body, 0)


def conv3x3_relu_pallas(x, w9, b2):
    """x: (N,H,W,Cin) f32, w9: (9,Cin,Cout), b2: (1,Cout) -> (N,H-2,W-2,Cout)."""
    N, H, W, Cin = x.shape
    _, _, Cout = w9.shape
    Ho, Wo = H - 2, W - 2
    kernel = functools.partial(_conv3x3_kernel, Ho=Ho, Wo=Wo, Cin=Cin, Cout=Cout)
    return pl.pallas_call(
        kernel,
        out_shape=jax.ShapeDtypeStruct((N, Ho, Wo, Cout), jnp.float32),
        grid_spec=pltpu.PrefetchScalarGridSpec(
            num_scalar_prefetch=0,
            grid=(N,),
            in_specs=[
                pl.BlockSpec((1, H, W, Cin), lambda n: (n, 0, 0, 0)),
                pl.BlockSpec((9, Cin, Cout), lambda n: (0, 0, 0)),
                pl.BlockSpec((1, Cout), lambda n: (0, 0)),
            ],
            out_specs=pl.BlockSpec((1, Ho, Wo, Cout), lambda n: (n, 0, 0, 0)),
        ),
        compiler_params=pltpu.CompilerParams(
            dimension_semantics=("parallel",),
        ),
    )(x, w9, b2)


# ----------------------------------------------------------------------------
# 2x2 max-pool (stride 2), decimation done in-kernel.
# The wrapper reshapes (N,H,W,C) -> (N,H,W/2,2C) (free, row-major), so the
# kernel only needs a row-pair max plus a lane-half max.
#   x_ref : (1, 2*Ho, Wo, 2*C)    o_ref : (1, Ho, Wo, C)
# ----------------------------------------------------------------------------
def _pool2x2_kernel(x_ref, o_ref, *, Ho, C):
    for r in range(Ho):                                  # Ho <= 30, static loop
        top = x_ref[0, 2 * r]                            # (Wo, 2C)
        bot = x_ref[0, 2 * r + 1]                        # (Wo, 2C)
        m = jnp.maximum(top, bot)
        o_ref[0, r] = jnp.maximum(m[:, :C], m[:, C:])    # (Wo, C)


def maxpool2_pallas(x):
    """x: (N,H,W,C) NHWC with even H, W -> (N,H//2,W//2,C)."""
    N, H, W, C = x.shape
    Ho, Wo = H // 2, W // 2
    xf = x.reshape(N, H, Wo, 2 * C)                      # free reshape
    kernel = functools.partial(_pool2x2_kernel, Ho=Ho, C=C)
    return pl.pallas_call(
        kernel,
        out_shape=jax.ShapeDtypeStruct((N, Ho, Wo, C), x.dtype),
        grid_spec=pltpu.PrefetchScalarGridSpec(
            num_scalar_prefetch=0,
            grid=(N,),
            in_specs=[pl.BlockSpec((1, H, Wo, 2 * C), lambda n: (n, 0, 0, 0))],
            out_specs=pl.BlockSpec((1, Ho, Wo, C), lambda n: (n, 0, 0, 0)),
        ),
        compiler_params=pltpu.CompilerParams(
            dimension_semantics=("parallel",),
        ),
    )(xf)


# ----------------------------------------------------------------------------
# Fused matmul + bias + (optional) ReLU for the FC layers.
#   grid = (N_tiles [parallel], K_tiles [reduction, last]).
#   Accumulates directly into the resident output block (no VMEM scratch).
# ----------------------------------------------------------------------------
def _linear_kernel(a_ref, b_ref, bias_ref, o_ref, *, relu):
    k = pl.program_id(1)

    @pl.when(k == 0)
    def _():
        o_ref[...] = jnp.zeros_like(o_ref)

    o_ref[...] += jnp.dot(a_ref[...], b_ref[...],
                          preferred_element_type=jnp.float32)

    @pl.when(k == pl.num_programs(1) - 1)
    def _():
        out = o_ref[...] + bias_ref[...]
        if relu:
            out = jnp.maximum(out, 0.0)
        o_ref[...] = out


def _pick_tk(K, max_tk=2048):
    """Largest multiple of 128 <= max_tk that divides K exactly (None if none)."""
    if K <= max_tk:
        return K
    for t in range(max_tk - max_tk % 128, 127, -128):
        if K % t == 0:
            return t
    return None


def linear_pallas(a, b, bias2, *, relu):
    """a: (M,K) f32, b: (K,N) f32, bias2: (1,N) f32 -> (M,N) f32.

    M is used as-is (no 256-row padding); N must be a multiple of 128
    (fc3 weights are pre-padded at init so stores stay lane-dense)."""
    M, K = a.shape
    Kb, N = b.shape
    assert K == Kb

    TK = _pick_tk(K)
    if TK is None:                       # generic fallback (unused by this net)
        TK = 2048
        Kp = pl.cdiv(K, TK) * TK
        a = jnp.pad(a, ((0, 0), (0, Kp - K)))
        b = jnp.pad(b, ((0, Kp - K), (0, 0)))
        K = Kp

    TN = 256 if N % 256 == 0 else N      # split N so fc1 can use both v7x cores
    grid = (N // TN, K // TK)
    kernel = functools.partial(_linear_kernel, relu=relu)

    return pl.pallas_call(
        kernel,
        out_shape=jax.ShapeDtypeStruct((M, N), jnp.float32),
        grid_spec=pltpu.PrefetchScalarGridSpec(
            num_scalar_prefetch=0,
            grid=grid,
            in_specs=[
                pl.BlockSpec((M, TK), lambda j, k: (0, k)),
                pl.BlockSpec((TK, TN), lambda j, k: (k, j)),
                pl.BlockSpec((1, TN), lambda j, k: (0, j)),
            ],
            out_specs=pl.BlockSpec((M, TN), lambda j, k: (0, j)),
        ),
        compiler_params=pltpu.CompilerParams(
            dimension_semantics=("parallel", "arbitrary"),
        ),
    )(a, b, bias2)


# ----------------------------------------------------------------------------
# Parameters: PyTorch-like synthetic init + one-time kernel-layout preparation.
# ----------------------------------------------------------------------------
def init_params(key):
    """Synthetic parameters in PyTorch-equivalent layouts:
       conv w: (3,3,Cin,Cout) (HWIO), b: (Cout,)
       fc   w: (Din,Dout) with fc1 rows in PyTorch (C,H,W) flatten order."""
    def conv_p(k, cin, cout):
        k1, k2 = jax.random.split(k)
        scale = 1.0 / math.sqrt(9 * cin)
        w = jax.random.normal(k1, (3, 3, cin, cout), jnp.float32) * scale
        b = jax.random.normal(k2, (cout,), jnp.float32) * 0.01
        return w, b

    def fc_p(k, din, dout):
        k1, k2 = jax.random.split(k)
        scale = 1.0 / math.sqrt(din)
        w = jax.random.normal(k1, (din, dout), jnp.float32) * scale
        b = jax.random.normal(k2, (dout,), jnp.float32) * 0.01
        return w, b

    ks = jax.random.split(key, 9)
    return {
        "conv1": conv_p(ks[0], 1, 16),
        "conv2": conv_p(ks[1], 16, 64),
        "conv3": conv_p(ks[2], 64, 128),
        "conv4": conv_p(ks[3], 128, 128),
        "conv5": conv_p(ks[4], 128, 128),
        "conv6": conv_p(ks[5], 128, 128),
        "fc1": fc_p(ks[6], 15488, 512),
        "fc2": fc_p(ks[7], 512, 128),
        "fc3": fc_p(ks[8], 128, 10),
    }


def prepare_params(params):
    """One-time (outside the traced forward) weight layout preparation."""
    prep = {}
    for name in ("conv1", "conv2", "conv3", "conv4", "conv5", "conv6"):
        w, b = params[name]
        kh, kw, cin, cout = w.shape
        prep[name] = (w.reshape(kh * kw, cin, cout), b.reshape(1, cout))

    # fc1: permute rows from PyTorch (C,H,W) flatten order to NHWC (H,W,C)
    # order so the runtime flatten is a free reshape of the NHWC activations.
    w1, b1 = params["fc1"]
    din, dout = w1.shape
    c = 128
    s = int(round(math.sqrt(din // c)))                  # 11
    w1 = w1.reshape(c, s, s, dout).transpose(1, 2, 0, 3).reshape(din, dout)
    prep["fc1"] = (w1, b1.reshape(1, -1))

    w2, b2 = params["fc2"]
    prep["fc2"] = (w2, b2.reshape(1, -1))

    # fc3: pad the 10 output columns to 128 so stores are lane-dense; the
    # wrapper slices the real columns back out.
    w3, b3 = params["fc3"]
    pad = (-w3.shape[1]) % 128
    prep["fc3"] = (jnp.pad(w3, ((0, 0), (0, pad))),
                   jnp.pad(b3, (0, pad)).reshape(1, -1))
    return prep


# ----------------------------------------------------------------------------
# Forward passes.
# ----------------------------------------------------------------------------
def net_forward(prep, x_nchw, *, num_classes=10):
    x = jnp.transpose(x_nchw, (0, 2, 3, 1))              # NCHW -> NHWC (C=1)
    x = conv3x3_relu_pallas(x, *prep["conv1"])           # (N, 62, 62, 16)
    x = conv3x3_relu_pallas(x, *prep["conv2"])           # (N, 60, 60, 64)
    x = maxpool2_pallas(x)                                # (N, 30, 30, 64)
    x = conv3x3_relu_pallas(x, *prep["conv3"])           # (N, 28, 28, 128)
    x = conv3x3_relu_pallas(x, *prep["conv4"])           # (N, 26, 26, 128)
    x = conv3x3_relu_pallas(x, *prep["conv5"])           # (N, 24, 24, 128)
    x = conv3x3_relu_pallas(x, *prep["conv6"])           # (N, 22, 22, 128)
    x = maxpool2_pallas(x)                                # (N, 11, 11, 128)
    n = x.shape[0]
    x = x.reshape(n, -1)                                  # NHWC flatten (fc1 pre-permuted)
    x = linear_pallas(x, *prep["fc1"], relu=True)         # (N, 512)
    x = linear_pallas(x, *prep["fc2"], relu=True)         # (N, 128)
    x = linear_pallas(x, *prep["fc3"], relu=False)        # (N, 128) padded
    return x[:, :num_classes]                             # (N, 10)


def net_forward_reference(params, x_nchw):
    """Pure-JAX/XLA mirror of the PyTorch forward (for correctness checking)."""
    hi = lax.Precision.HIGHEST

    def conv(x, w, b):
        y = lax.conv_general_dilated(
            x, w, window_strides=(1, 1), padding="VALID",
            dimension_numbers=("NHWC", "HWIO", "NHWC"), precision=hi)
        return jax.nn.relu(y + b)

    def pool(x):
        return lax.reduce_window(x, -jnp.inf, lax.max,
                                 (1, 2, 2, 1), (1, 2, 2, 1), "VALID")

    x = jnp.transpose(x_nchw, (0, 2, 3, 1))
    x = conv(x, *params["conv1"])
    x = conv(x, *params["conv2"])
    x = pool(x)
    x = conv(x, *params["conv3"])
    x = conv(x, *params["conv4"])
    x = conv(x, *params["conv5"])
    x = conv(x, *params["conv6"])
    x = pool(x)
    n = x.shape[0]
    x = jnp.transpose(x, (0, 3, 1, 2)).reshape(n, -1)     # PyTorch (C,H,W) flatten
    w1, b1 = params["fc1"]
    w2, b2 = params["fc2"]
    w3, b3 = params["fc3"]
    x = jax.nn.relu(jnp.dot(x, w1, precision=hi) + b1)
    x = jax.nn.relu(jnp.dot(x, w2, precision=hi) + b2)
    return jnp.dot(x, w3, precision=hi) + b3


if __name__ == "__main__":
    key = jax.random.PRNGKey(0)
    k_param, k_in = jax.random.split(key)
    params = init_params(k_param)
    prep = prepare_params(params)
    # Input spatial size 64x64 is dictated by fc1's 15488 = 128 * 11 * 11.
    x = jax.random.normal(k_in, (2, 1, 64, 64), jnp.float32)

    fwd = jax.jit(net_forward)
    out = fwd(prep, x)
    jax.block_until_ready(out)
    assert out.shape == (2, 10) and out.dtype == jnp.float32

    ref = jax.jit(net_forward_reference)(params, x)
    jax.block_until_ready(ref)
    max_err = float(jnp.max(jnp.abs(out - ref)))
    assert max_err < 2e-2, f"mismatch vs reference: max abs err {max_err}"

    print("KERNEL_OK")
</pallas_src>

<mosaic_0001>
module attributes {stable_mosaic.version = 11 : i64} {
  func.func @_conv3x3_kernel(%arg0: i32, %arg1: memref<1x64x64x1xf32, #tpu.memory_space<vmem>>, %arg2: memref<9x1x16xf32, #tpu.memory_space<vmem>>, %arg3: memref<1x16xf32, #tpu.memory_space<vmem>>, %arg4: memref<1x62x62x16xf32, #tpu.memory_space<vmem>>) attributes {dimension_semantics = [#tpu.dimension_semantics<parallel>], iteration_bounds = array<i64: 2>, scalar_prefetch = 0 : i64, scratch_operands = 0 : i64, tpu.core_type = #tpu.core_type<tc>, window_params = [{transform_indices = @transform_0, window_bounds = array<i64: 1, 64, 64, 1>}, {pipeline_mode = #tpu.pipeline_mode<synchronous>, transform_indices = @transform_1, window_bounds = array<i64: 9, 1, 16>}, {pipeline_mode = #tpu.pipeline_mode<synchronous>, transform_indices = @transform_2, window_bounds = array<i64: 1, 16>}, {transform_indices = @transform_3, window_bounds = array<i64: 1, 62, 62, 16>}]} {
    %c0 = arith.constant 0 : index
    %c0_0 = arith.constant 0 : index
    %0 = vector.load %arg3[%c0, %c0_0] : memref<1x16xf32, #tpu.memory_space<vmem>>, vector<1x16xf32>
    %c0_i32 = arith.constant 0 : i32
    %c62_i32 = arith.constant 62 : i32
    %1 = arith.addi %c0_i32, %c62_i32 : i32
    %c1_i32 = arith.constant 1 : i32
    scf.for %arg5 = %c0_i32 to %1 step %c1_i32  : i32 {
      %cst = arith.constant 0.000000e+00 : f32
      %2 = vector.broadcast %cst : f32 to vector<62x16xf32>
      %c0_i32_2 = arith.constant 0 : i32
      %3 = arith.addi %arg5, %c0_i32_2 : i32
      %c0_3 = arith.constant 0 : index
      %4 = arith.index_cast %3 : i32 to index
      %c0_4 = arith.constant 0 : index
      %c0_5 = arith.constant 0 : index
      %5 = vector.load %arg1[%c0_3, %4, %c0_4, %c0_5] : memref<1x64x64x1xf32, #tpu.memory_space<vmem>>, vector<1x1x62x1xf32>
      %6 = vector.shape_cast %5 : vector<1x1x62x1xf32> to vector<62x1xf32>
      %c0_6 = arith.constant 0 : index
      %c0_7 = arith.constant 0 : index
      %c0_8 = arith.constant 0 : index
      %7 = vector.load %arg2[%c0_6, %c0_7, %c0_8] : memref<9x1x16xf32, #tpu.memory_space<vmem>>, vector<1x1x16xf32>
      %8 = vector.shape_cast %7 : vector<1x1x16xf32> to vector<1x16xf32>
      %9 = vector.broadcast %6 : vector<62x1xf32> to vector<62x16xf32>
      %10 = vector.broadcast %8 : vector<1x16xf32> to vector<62x16xf32>
      %11 = arith.mulf %9, %10 : vector<62x16xf32>
      %12 = arith.addf %2, %11 : vector<62x16xf32>
      %c0_i32_9 = arith.constant 0 : i32
      %13 = arith.addi %arg5, %c0_i32_9 : i32
      %c0_10 = arith.constant 0 : index
      %14 = arith.index_cast %13 : i32 to index
      %c1 = arith.constant 1 : index
      %c0_11 = arith.constant 0 : index
      %15 = vector.load %arg1[%c0_10, %14, %c1, %c0_11] : memref<1x64x64x1xf32, #tpu.memory_space<vmem>>, vector<1x1x62x1xf32>
      %16 = vector.shape_cast %15 : vector<1x1x62x1xf32> to vector<62x1xf32>
      %c1_12 = arith.constant 1 : index
      %c0_13 = arith.constant 0 : index
      %c0_14 = arith.constant 0 : index
      %17 = vector.load %arg2[%c1_12, %c0_13, %c0_14] : memref<9x1x16xf32, #tpu.memory_space<vmem>>, vector<1x1x16xf32>
      %18 = vector.shape_cast %17 : vector<1x1x16xf32> to vector<1x16xf32>
      %19 = vector.broadcast %16 : vector<62x1xf32> to vector<62x16xf32>
      %20 = vector.broadcast %18 : vector<1x16xf32> to vector<62x16xf32>
      %21 = arith.mulf %19, %20 : vector<62x16xf32>
      %22 = arith.addf %12, %21 : vector<62x16xf32>
      %c0_i32_15 = arith.constant 0 : i32
      %23 = arith.addi %arg5, %c0_i32_15 : i32
      %c0_16 = arith.constant 0 : index
      %24 = arith.index_cast %23 : i32 to index
      %c2 = arith.constant 2 : index
      %c0_17 = arith.constant 0 : index
      %25 = vector.load %arg1[%c0_16, %24, %c2, %c0_17] : memref<1x64x64x1xf32, #tpu.memory_space<vmem>>, vector<1x1x62x1xf32>
      %26 = vector.shape_cast %25 : vector<1x1x62x1xf32> to vector<62x1xf32>
      %c2_18 = arith.constant 2 : index
      %c0_19 = arith.constant 0 : index
      %c0_20 = arith.constant 0 : index
      %27 = vector.load %arg2[%c2_18, %c0_19, %c0_20] : memref<9x1x16xf32, #tpu.memory_space<vmem>>, vector<1x1x16xf32>
      %28 = vector.shape_cast %27 : vector<1x1x16xf32> to vector<1x16xf32>
      %29 = vector.broadcast %26 : vector<62x1xf32> to vector<62x16xf32>
      %30 = vector.broadcast %28 : vector<1x16xf32> to vector<62x16xf32>
      %31 = arith.mulf %29, %30 : vector<62x16xf32>
      %32 = arith.addf %22, %31 : vector<62x16xf32>
      %c1_i32_21 = arith.constant 1 : i32
      %33 = arith.addi %arg5, %c1_i32_21 : i32
      %c0_22 = arith.constant 0 : index
      %34 = arith.index_cast %33 : i32 to index
      %c0_23 = arith.constant 0 : index
      %c0_24 = arith.constant 0 : index
      %35 = vector.load %arg1[%c0_22, %34, %c0_23, %c0_24] : memref<1x64x64x1xf32, #tpu.memory_space<vmem>>, vector<1x1x62x1xf32>
      %36 = vector.shape_cast %35 : vector<1x1x62x1xf32> to vector<62x1xf32>
      %c3 = arith.constant 3 : index
      %c0_25 = arith.constant 0 : index
      %c0_26 = arith.constant 0 : index
      %37 = vector.load %arg2[%c3, %c0_25, %c0_26] : memref<9x1x16xf32, #tpu.memory_space<vmem>>, vector<1x1x16xf32>
      %38 = vector.shape_cast %37 : vector<1x1x16xf32> to vector<1x16xf32>
      %39 = vector.broadcast %36 : vector<62x1xf32> to vector<62x16xf32>
      %40 = vector.broadcast %38 : vector<1x16xf32> to vector<62x16xf32>
      %41 = arith.mulf %39, %40 : vector<62x16xf32>
      %42 = arith.addf %32, %41 : vector<62x16xf32>
      %c1_i32_27 = arith.constant 1 : i32
      %43 = arith.addi %arg5, %c1_i32_27 : i32
      %c0_28 = arith.constant 0 : index
      %44 = arith.index_cast %43 : i32 to index
      %c1_29 = arith.constant 1 : index
      %c0_30 = arith.constant 0 : index
      %45 = vector.load %arg1[%c0_28, %44, %c1_29, %c0_30] : memref<1x64x64x1xf32, #tpu.memory_space<vmem>>, vector<1x1x62x1xf32>
      %46 = vector.shape_cast %45 : vector<1x1x62x1xf32> to vector<62x1xf32>
      %c4 = arith.constant 4 : index
      %c0_31 = arith.constant 0 : index
      %c0_32 = arith.constant 0 : index
      %47 = vector.load %arg2[%c4, %c0_31, %c0_32] : memref<9x1x16xf32, #tpu.memory_space<vmem>>, vector<1x1x16xf32>
      %48 = vector.shape_cast %47 : vector<1x1x16xf32> to vector<1x16xf32>
      %49 = vector.broadcast %46 : vector<62x1xf32> to vector<62x16xf32>
      %50 = vector.broadcast %48 : vector<1x16xf32> to vector<62x16xf32>
      %51 = arith.mulf %49, %50 : vector<62x16xf32>
      %52 = arith.addf %42, %51 : vector<62x16xf32>
      %c1_i32_33 = arith.constant 1 : i32
      %53 = arith.addi %arg5, %c1_i32_33 : i32
      %c0_34 = arith.constant 0 : index
      %54 = arith.index_cast %53 : i32 to index
      %c2_35 = arith.constant 2 : index
      %c0_36 = arith.constant 0 : index
      %55 = vector.load %arg1[%c0_34, %54, %c2_35, %c0_36] : memref<1x64x64x1xf32, #tpu.memory_space<vmem>>, vector<1x1x62x1xf32>
      %56 = vector.shape_cast %55 : vector<1x1x62x1xf32> to vector<62x1xf32>
      %c5 = arith.constant 5 : index
      %c0_37 = arith.constant 0 : index
      %c0_38 = arith.constant 0 : index
      %57 = vector.load %arg2[%c5, %c0_37, %c0_38] : memref<9x1x16xf32, #tpu.memory_space<vmem>>, vector<1x1x16xf32>
      %58 = vector.shape_cast %57 : vector<1x1x16xf32> to vector<1x16xf32>
      %59 = vector.broadcast %56 : vector<62x1xf32> to vector<62x16xf32>
      %60 = vector.broadcast %58 : vector<1x16xf32> to vector<62x16xf32>
      %61 = arith.mulf %59, %60 : vector<62x16xf32>
      %62 = arith.addf %52, %61 : vector<62x16xf32>
      %c2_i32 = arith.constant 2 : i32
      %63 = arith.addi %arg5, %c2_i32 : i32
      %c0_39 = arith.constant 0 : index
      %64 = arith.index_cast %63 : i32 to index
      %c0_40 = arith.constant 0 : index
      %c0_41 = arith.constant 0 : index
      %65 = vector.load %arg1[%c0_39, %64, %c0_40, %c0_41] : memref<1x64x64x1xf32, #tpu.memory_space<vmem>>, vector<1x1x62x1xf32>
      %66 = vector.shape_cast %65 : vector<1x1x62x1xf32> to vector<62x1xf32>
      %c6 = arith.constant 6 : index
      %c0_42 = arith.constant 0 : index
      %c0_43 = arith.constant 0 : index
      %67 = vector.load %arg2[%c6, %c0_42, %c0_43] : memref<9x1x16xf32, #tpu.memory_space<vmem>>, vector<1x1x16xf32>
      %68 = vector.shape_cast %67 : vector<1x1x16xf32> to vector<1x16xf32>
      %69 = vector.broadcast %66 : vector<62x1xf32> to vector<62x16xf32>
      %70 = vector.broadcast %68 : vector<1x16xf32> to vector<62x16xf32>
      %71 = arith.mulf %69, %70 : vector<62x16xf32>
      %72 = arith.addf %62, %71 : vector<62x16xf32>
      %c2_i32_44 = arith.constant 2 : i32
      %73 = arith.addi %arg5, %c2_i32_44 : i32
      %c0_45 = arith.constant 0 : index
      %74 = arith.index_cast %73 : i32 to index
      %c1_46 = arith.constant 1 : index
      %c0_47 = arith.constant 0 : index
      %75 = vector.load %arg1[%c0_45, %74, %c1_46, %c0_47] : memref<1x64x64x1xf32, #tpu.memory_space<vmem>>, vector<1x1x62x1xf32>
      %76 = vector.shape_cast %75 : vector<1x1x62x1xf32> to vector<62x1xf32>
      %c7 = arith.constant 7 : index
      %c0_48 = arith.constant 0 : index
      %c0_49 = arith.constant 0 : index
      %77 = vector.load %arg2[%c7, %c0_48, %c0_49] : memref<9x1x16xf32, #tpu.memory_space<vmem>>, vector<1x1x16xf32>
      %78 = vector.shape_cast %77 : vector<1x1x16xf32> to vector<1x16xf32>
      %79 = vector.broadcast %76 : vector<62x1xf32> to vector<62x16xf32>
      %80 = vector.broadcast %78 : vector<1x16xf32> to vector<62x16xf32>
      %81 = arith.mulf %79, %80 : vector<62x16xf32>
      %82 = arith.addf %72, %81 : vector<62x16xf32>
      %c2_i32_50 = arith.constant 2 : i32
      %83 = arith.addi %arg5, %c2_i32_50 : i32
      %c0_51 = arith.constant 0 : index
      %84 = arith.index_cast %83 : i32 to index
      %c2_52 = arith.constant 2 : index
      %c0_53 = arith.constant 0 : index
      %85 = vector.load %arg1[%c0_51, %84, %c2_52, %c0_53] : memref<1x64x64x1xf32, #tpu.memory_space<vmem>>, vector<1x1x62x1xf32>
      %86 = vector.shape_cast %85 : vector<1x1x62x1xf32> to vector<62x1xf32>
      %c8 = arith.constant 8 : index
      %c0_54 = arith.constant 0 : index
      %c0_55 = arith.constant 0 : index
      %87 = vector.load %arg2[%c8, %c0_54, %c0_55] : memref<9x1x16xf32, #tpu.memory_space<vmem>>, vector<1x1x16xf32>
      %88 = vector.shape_cast %87 : vector<1x1x16xf32> to vector<1x16xf32>
      %89 = vector.broadcast %86 : vector<62x1xf32> to vector<62x16xf32>
      %90 = vector.broadcast %88 : vector<1x16xf32> to vector<62x16xf32>
      %91 = arith.mulf %89, %90 : vector<62x16xf32>
      %92 = arith.addf %82, %91 : vector<62x16xf32>
      %93 = vector.broadcast %0 : vector<1x16xf32> to vector<62x16xf32>
      %94 = arith.addf %92, %93 : vector<62x16xf32>
      %cst_56 = arith.constant 0.000000e+00 : f32
      %95 = vector.broadcast %cst_56 : f32 to vector<62x16xf32>
      %96 = arith.maximumf %94, %95 : vector<62x16xf32>
      %c0_57 = arith.constant 0 : index
      %97 = arith.index_cast %arg5 : i32 to index
      %c0_58 = arith.constant 0 : index
      %c0_59 = arith.constant 0 : index
      %98 = vector.load %arg4[%c0_57, %97, %c0_58, %c0_59] : memref<1x62x62x16xf32, #tpu.memory_space<vmem>>, vector<1x1x62x16xf32>
      %99 = vector.shape_cast %98 : vector<1x1x62x16xf32> to vector<62x16xf32>
      %100 = vector.shape_cast %96 : vector<62x16xf32> to vector<1x1x62x16xf32>
      tpu.vector_store %arg4[%c0_57, %97, %c0_58, %c0_59], %100 {strides = array<i32>} : memref<1x62x62x16xf32, #tpu.memory_space<vmem>>, vector<1x1x62x16xf32>,
    }
    %c62_i32_1 = arith.constant 62 : i32
    return
  }
  func.func @transform_0(%arg0: i32) -> (i32, i32, i32, i32) {
    %c0_i32 = arith.constant 0 : i32
    %c0_i32_0 = arith.constant 0 : i32
    %c0_i32_1 = arith.constant 0 : i32
    %c0_i32_2 = arith.constant 0 : i32
    return %arg0, %c0_i32, %c0_i32_0, %c0_i32_1 : i32, i32, i32, i32
  }
  func.func @transform_1(%arg0: i32) -> (i32, i32, i32) {
    %c0_i32 = arith.constant 0 : i32
    %c0_i32_0 = arith.constant 0 : i32
    %c0_i32_1 = arith.constant 0 : i32
    %c0_i32_2 = arith.constant 0 : i32
    return %c0_i32, %c0_i32_0, %c0_i32_1 : i32, i32, i32
  }
  func.func @transform_2(%arg0: i32) -> (i32, i32) {
    %c0_i32 = arith.constant 0 : i32
    %c0_i32_0 = arith.constant 0 : i32
    %c0_i32_1 = arith.constant 0 : i32
    return %c0_i32, %c0_i32_0 : i32, i32
  }
  func.func @transform_3(%arg0: i32) -> (i32, i32, i32, i32) {
    %c0_i32 = arith.constant 0 : i32
    %c0_i32_0 = arith.constant 0 : i32
    %c0_i32_1 = arith.constant 0 : i32
    %c0_i32_2 = arith.constant 0 : i32
    return %arg0, %c0_i32, %c0_i32_0, %c0_i32_1 : i32, i32, i32, i32
  }
}

module attributes {stable_mosaic.version = 11 : i64} {
  func.func @_conv3x3_kernel(%arg0: i32, %arg1: memref<1x62x62x16xf32, #tpu.memory_space<vmem>>, %arg2: memref<9x16x64xf32, #tpu.memory_space<vmem>>, %arg3: memref<1x64xf32, #tpu.memory_space<vmem>>, %arg4: memref<1x60x60x64xf32, #tpu.memory_space<vmem>>) attributes {dimension_semantics = [#tpu.dimension_semantics<parallel>], iteration_bounds = array<i64: 2>, scalar_prefetch = 0 : i64, scratch_operands = 0 : i64, tpu.core_type = #tpu.core_type<tc>, window_params = [{transform_indices = @transform_0, window_bounds = array<i64: 1, 62, 62, 16>}, {pipeline_mode = #tpu.pipeline_mode<synchronous>, transform_indices = @transform_1, window_bounds = array<i64: 9, 16, 64>}, {pipeline_mode = #tpu.pipeline_mode<synchronous>, transform_indices = @transform_2, window_bounds = array<i64: 1, 64>}, {transform_indices = @transform_3, window_bounds = array<i64: 1, 60, 60, 64>}]} {
    %c0 = arith.constant 0 : index
    %c0_0 = arith.constant 0 : index
    %0 = vector.load %arg3[%c0, %c0_0] : memref<1x64xf32, #tpu.memory_space<vmem>>, vector<1x64xf32>
    %c0_i32 = arith.constant 0 : i32
    %c60_i32 = arith.constant 60 : i32
    %1 = arith.addi %c0_i32, %c60_i32 : i32
    %c1_i32 = arith.constant 1 : i32
    scf.for %arg5 = %c0_i32 to %1 step %c1_i32  : i32 {
      %cst = arith.constant 0.000000e+00 : f32
      %2 = vector.broadcast %cst : f32 to vector<60x64xf32>
      %c0_i32_2 = arith.constant 0 : i32
      %3 = arith.addi %arg5, %c0_i32_2 : i32
      %c0_3 = arith.constant 0 : index
      %4 = arith.index_cast %3 : i32 to index
      %c0_4 = arith.constant 0 : index
      %c0_5 = arith.constant 0 : index
      %5 = vector.load %arg1[%c0_3, %4, %c0_4, %c0_5] : memref<1x62x62x16xf32, #tpu.memory_space<vmem>>, vector<1x1x60x16xf32>
      %6 = vector.shape_cast %5 : vector<1x1x60x16xf32> to vector<60x16xf32>
      %c0_6 = arith.constant 0 : index
      %c0_7 = arith.constant 0 : index
      %c0_8 = arith.constant 0 : index
      %7 = vector.load %arg2[%c0_6, %c0_7, %c0_8] : memref<9x16x64xf32, #tpu.memory_space<vmem>>, vector<1x16x64xf32>
      %8 = vector.shape_cast %7 : vector<1x16x64xf32> to vector<16x64xf32>
      %cst_9 = arith.constant dense<0.000000e+00> : vector<60x64xf32>
      %9 = tpu.matmul %6, %8, %cst_9 {dimension_numbers = #tpu.dot_dimension_numbers<[1], [0], [0], [1], [0, 0, 1, 1], [], []>} : vector<60x16xf32>, vector<16x64xf32>, vector<60x64xf32> -> vector<60x64xf32>
      %10 = arith.addf %2, %9 : vector<60x64xf32>
      %c0_i32_10 = arith.constant 0 : i32
      %11 = arith.addi %arg5, %c0_i32_10 : i32
      %c0_11 = arith.constant 0 : index
      %12 = arith.index_cast %11 : i32 to index
      %c1 = arith.constant 1 : index
      %c0_12 = arith.constant 0 : index
      %13 = vector.load %arg1[%c0_11, %12, %c1, %c0_12] : memref<1x62x62x16xf32, #tpu.memory_space<vmem>>, vector<1x1x60x16xf32>
      %14 = vector.shape_cast %13 : vector<1x1x60x16xf32> to vector<60x16xf32>
      %c1_13 = arith.constant 1 : index
      %c0_14 = arith.constant 0 : index
      %c0_15 = arith.constant 0 : index
      %15 = vector.load %arg2[%c1_13, %c0_14, %c0_15] : memref<9x16x64xf32, #tpu.memory_space<vmem>>, vector<1x16x64xf32>
      %16 = vector.shape_cast %15 : vector<1x16x64xf32> to vector<16x64xf32>
      %cst_16 = arith.constant dense<0.000000e+00> : vector<60x64xf32>
      %17 = tpu.matmul %14, %16, %cst_16 {dimension_numbers = #tpu.dot_dimension_numbers<[1], [0], [0], [1], [0, 0, 1, 1], [], []>} : vector<60x16xf32>, vector<16x64xf32>, vector<60x64xf32> -> vector<60x64xf32>
      %18 = arith.addf %10, %17 : vector<60x64xf32>
      %c0_i32_17 = arith.constant 0 : i32
      %19 = arith.addi %arg5, %c0_i32_17 : i32
      %c0_18 = arith.constant 0 : index
      %20 = arith.index_cast %19 : i32 to index
      %c2 = arith.constant 2 : index
      %c0_19 = arith.constant 0 : index
      %21 = vector.load %arg1[%c0_18, %20, %c2, %c0_19] : memref<1x62x62x16xf32, #tpu.memory_space<vmem>>, vector<1x1x60x16xf32>
      %22 = vector.shape_cast %21 : vector<1x1x60x16xf32> to vector<60x16xf32>
      %c2_20 = arith.constant 2 : index
      %c0_21 = arith.constant 0 : index
      %c0_22 = arith.constant 0 : index
      %23 = vector.load %arg2[%c2_20, %c0_21, %c0_22] : memref<9x16x64xf32, #tpu.memory_space<vmem>>, vector<1x16x64xf32>
      %24 = vector.shape_cast %23 : vector<1x16x64xf32> to vector<16x64xf32>
      %cst_23 = arith.constant dense<0.000000e+00> : vector<60x64xf32>
      %25 = tpu.matmul %22, %24, %cst_23 {dimension_numbers = #tpu.dot_dimension_numbers<[1], [0], [0], [1], [0, 0, 1, 1], [], []>} : vector<60x16xf32>, vector<16x64xf32>, vector<60x64xf32> -> vector<60x64xf32>
      %26 = arith.addf %18, %25 : vector<60x64xf32>
      %c1_i32_24 = arith.constant 1 : i32
      %27 = arith.addi %arg5, %c1_i32_24 : i32
      %c0_25 = arith.constant 0 : index
      %28 = arith.index_cast %27 : i32 to index
      %c0_26 = arith.constant 0 : index
      %c0_27 = arith.constant 0 : index
      %29 = vector.load %arg1[%c0_25, %28, %c0_26, %c0_27] : memref<1x62x62x16xf32, #tpu.memory_space<vmem>>, vector<1x1x60x16xf32>
      %30 = vector.shape_cast %29 : vector<1x1x60x16xf32> to vector<60x16xf32>
      %c3 = arith.constant 3 : index
      %c0_28 = arith.constant 0 : index
      %c0_29 = arith.constant 0 : index
      %31 = vector.load %arg2[%c3, %c0_28, %c0_29] : memref<9x16x64xf32, #tpu.memory_space<vmem>>, vector<1x16x64xf32>
      %32 = vector.shape_cast %31 : vector<1x16x64xf32> to vector<16x64xf32>
      %cst_30 = arith.constant dense<0.000000e+00> : vector<60x64xf32>
      %33 = tpu.matmul %30, %32, %cst_30 {dimension_numbers = #tpu.dot_dimension_numbers<[1], [0], [0], [1], [0, 0, 1, 1], [], []>} : vector<60x16xf32>, vector<16x64xf32>, vector<60x64xf32> -> vector<60x64xf32>
      %34 = arith.addf %26, %33 : vector<60x64xf32>
      %c1_i32_31 = arith.constant 1 : i32
      %35 = arith.addi %arg5, %c1_i32_31 : i32
      %c0_32 = arith.constant 0 : index
      %36 = arith.index_cast %35 : i32 to index
      %c1_33 = arith.constant 1 : index
      %c0_34 = arith.constant 0 : index
      %37 = vector.load %arg1[%c0_32, %36, %c1_33, %c0_34] : memref<1x62x62x16xf32, #tpu.memory_space<vmem>>, vector<1x1x60x16xf32>
      %38 = vector.shape_cast %37 : vector<1x1x60x16xf32> to vector<60x16xf32>
      %c4 = arith.constant 4 : index
      %c0_35 = arith.constant 0 : index
      %c0_36 = arith.constant 0 : index
      %39 = vector.load %arg2[%c4, %c0_35, %c0_36] : memref<9x16x64xf32, #tpu.memory_space<vmem>>, vector<1x16x64xf32>
      %40 = vector.shape_cast %39 : vector<1x16x64xf32> to vector<16x64xf32>
      %cst_37 = arith.constant dense<0.000000e+00> : vector<60x64xf32>
      %41 = tpu.matmul %38, %40, %cst_37 {dimension_numbers = #tpu.dot_dimension_numbers<[1], [0], [0], [1], [0, 0, 1, 1], [], []>} : vector<60x16xf32>, vector<16x64xf32>, vector<60x64xf32> -> vector<60x64xf32>
      %42 = arith.addf %34, %41 : vector<60x64xf32>
      %c1_i32_38 = arith.constant 1 : i32
      %43 = arith.addi %arg5, %c1_i32_38 : i32
      %c0_39 = arith.constant 0 : index
      %44 = arith.index_cast %43 : i32 to index
      %c2_40 = arith.constant 2 : index
      %c0_41 = arith.constant 0 : index
      %45 = vector.load %arg1[%c0_39, %44, %c2_40, %c0_41] : memref<1x62x62x16xf32, #tpu.memory_space<vmem>>, vector<1x1x60x16xf32>
      %46 = vector.shape_cast %45 : vector<1x1x60x16xf32> to vector<60x16xf32>
      %c5 = arith.constant 5 : index
      %c0_42 = arith.constant 0 : index
      %c0_43 = arith.constant 0 : index
      %47 = vector.load %arg2[%c5, %c0_42, %c0_43] : memref<9x16x64xf32, #tpu.memory_space<vmem>>, vector<1x16x64xf32>
      %48 = vector.shape_cast %47 : vector<1x16x64xf32> to vector<16x64xf32>
      %cst_44 = arith.constant dense<0.000000e+00> : vector<60x64xf32>
      %49 = tpu.matmul %46, %48, %cst_44 {dimension_numbers = #tpu.dot_dimension_numbers<[1], [0], [0], [1], [0, 0, 1, 1], [], []>} : vector<60x16xf32>, vector<16x64xf32>, vector<60x64xf32> -> vector<60x64xf32>
      %50 = arith.addf %42, %49 : vector<60x64xf32>
      %c2_i32 = arith.constant 2 : i32
      %51 = arith.addi %arg5, %c2_i32 : i32
      %c0_45 = arith.constant 0 : index
      %52 = arith.index_cast %51 : i32 to index
      %c0_46 = arith.constant 0 : index
      %c0_47 = arith.constant 0 : index
      %53 = vector.load %arg1[%c0_45, %52, %c0_46, %c0_47] : memref<1x62x62x16xf32, #tpu.memory_space<vmem>>, vector<1x1x60x16xf32>
      %54 = vector.shape_cast %53 : vector<1x1x60x16xf32> to vector<60x16xf32>
      %c6 = arith.constant 6 : index
      %c0_48 = arith.constant 0 : index
      %c0_49 = arith.constant 0 : index
      %55 = vector.load %arg2[%c6, %c0_48, %c0_49] : memref<9x16x64xf32, #tpu.memory_space<vmem>>, vector<1x16x64xf32>
      %56 = vector.shape_cast %55 : vector<1x16x64xf32> to vector<16x64xf32>
      %cst_50 = arith.constant dense<0.000000e+00> : vector<60x64xf32>
      %57 = tpu.matmul %54, %56, %cst_50 {dimension_numbers = #tpu.dot_dimension_numbers<[1], [0], [0], [1], [0, 0, 1, 1], [], []>} : vector<60x16xf32>, vector<16x64xf32>, vector<60x64xf32> -> vector<60x64xf32>
      %58 = arith.addf %50, %57 : vector<60x64xf32>
      %c2_i32_51 = arith.constant 2 : i32
      %59 = arith.addi %arg5, %c2_i32_51 : i32
      %c0_52 = arith.constant 0 : index
      %60 = arith.index_cast %59 : i32 to index
      %c1_53 = arith.constant 1 : index
      %c0_54 = arith.constant 0 : index
      %61 = vector.load %arg1[%c0_52, %60, %c1_53, %c0_54] : memref<1x62x62x16xf32, #tpu.memory_space<vmem>>, vector<1x1x60x16xf32>
      %62 = vector.shape_cast %61 : vector<1x1x60x16xf32> to vector<60x16xf32>
      %c7 = arith.constant 7 : index
      %c0_55 = arith.constant 0 : index
      %c0_56 = arith.constant 0 : index
      %63 = vector.load %arg2[%c7, %c0_55, %c0_56] : memref<9x16x64xf32, #tpu.memory_space<vmem>>, vector<1x16x64xf32>
      %64 = vector.shape_cast %63 : vector<1x16x64xf32> to vector<16x64xf32>
      %cst_57 = arith.constant dense<0.000000e+00> : vector<60x64xf32>
      %65 = tpu.matmul %62, %64, %cst_57 {dimension_numbers = #tpu.dot_dimension_numbers<[1], [0], [0], [1], [0, 0, 1, 1], [], []>} : vector<60x16xf32>, vector<16x64xf32>, vector<60x64xf32> -> vector<60x64xf32>
      %66 = arith.addf %58, %65 : vector<60x64xf32>
      %c2_i32_58 = arith.constant 2 : i32
      %67 = arith.addi %arg5, %c2_i32_58 : i32
      %c0_59 = arith.constant 0 : index
      %68 = arith.index_cast %67 : i32 to index
      %c2_60 = arith.constant 2 : index
      %c0_61 = arith.constant 0 : index
      %69 = vector.load %arg1[%c0_59, %68, %c2_60, %c0_61] : memref<1x62x62x16xf32, #tpu.memory_space<vmem>>, vector<1x1x60x16xf32>
      %70 = vector.shape_cast %69 : vector<1x1x60x16xf32> to vector<60x16xf32>
      %c8 = arith.constant 8 : index
      %c0_62 = arith.constant 0 : index
      %c0_63 = arith.constant 0 : index
      %71 = vector.load %arg2[%c8, %c0_62, %c0_63] : memref<9x16x64xf32, #tpu.memory_space<vmem>>, vector<1x16x64xf32>
      %72 = vector.shape_cast %71 : vector<1x16x64xf32> to vector<16x64xf32>
      %cst_64 = arith.constant dense<0.000000e+00> : vector<60x64xf32>
      %73 = tpu.matmul %70, %72, %cst_64 {dimension_numbers = #tpu.dot_dimension_numbers<[1], [0], [0], [1], [0, 0, 1, 1], [], []>} : vector<60x16xf32>, vector<16x64xf32>, vector<60x64xf32> -> vector<60x64xf32>
      %74 = arith.addf %66, %73 : vector<60x64xf32>
      %75 = vector.broadcast %0 : vector<1x64xf32> to vector<60x64xf32>
      %76 = arith.addf %74, %75 : vector<60x64xf32>
      %cst_65 = arith.constant 0.000000e+00 : f32
      %77 = vector.broadcast %cst_65 : f32 to vector<60x64xf32>
      %78 = arith.maximumf %76, %77 : vector<60x64xf32>
      %c0_66 = arith.constant 0 : index
      %79 = arith.index_cast %arg5 : i32 to index
      %c0_67 = arith.constant 0 : index
      %c0_68 = arith.constant 0 : index
      %80 = vector.load %arg4[%c0_66, %79, %c0_67, %c0_68] : memref<1x60x60x64xf32, #tpu.memory_space<vmem>>, vector<1x1x60x64xf32>
      %81 = vector.shape_cast %80 : vector<1x1x60x64xf32> to vector<60x64xf32>
      %82 = vector.shape_cast %78 : vector<60x64xf32> to vector<1x1x60x64xf32>
      tpu.vector_store %arg4[%c0_66, %79, %c0_67, %c0_68], %82 {strides = array<i32>} : memref<1x60x60x64xf32, #tpu.memory_space<vmem>>, vector<1x1x60x64xf32>,
    }
    %c60_i32_1 = arith.constant 60 : i32
    return
  }
  func.func @transform_0(%arg0: i32) -> (i32, i32, i32, i32) {
    %c0_i32 = arith.constant 0 : i32
    %c0_i32_0 = arith.constant 0 : i32
    %c0_i32_1 = arith.constant 0 : i32
    %c0_i32_2 = arith.constant 0 : i32
    return %arg0, %c0_i32, %c0_i32_0, %c0_i32_1 : i32, i32, i32, i32
  }
  func.func @transform_1(%arg0: i32) -> (i32, i32, i32) {
    %c0_i32 = arith.constant 0 : i32
    %c0_i32_0 = arith.constant 0 : i32
    %c0_i32_1 = arith.constant 0 : i32
    %c0_i32_2 = arith.constant 0 : i32
    return %c0_i32, %c0_i32_0, %c0_i32_1 : i32, i32, i32
  }
  func.func @transform_2(%arg0: i32) -> (i32, i32) {
    %c0_i32 = arith.constant 0 : i32
    %c0_i32_0 = arith.constant 0 : i32
    %c0_i32_1 = arith.constant 0 : i32
    return %c0_i32, %c0_i32_0 : i32, i32
  }
  func.func @transform_3(%arg0: i32) -> (i32, i32, i32, i32) {
    %c0_i32 = arith.constant 0 : i32
    %c0_i32_0 = arith.constant 0 : i32
    %c0_i32_1 = arith.constant 0 : i32
    %c0_i32_2 = arith.constant 0 : i32
    return %arg0, %c0_i32, %c0_i32_0, %c0_i32_1 : i32, i32, i32, i32
  }
}

module attributes {stable_mosaic.version = 11 : i64} {
  func.func @_conv3x3_kernel(%arg0: i32, %arg1: memref<1x30x30x64xf32, #tpu.memory_space<vmem>>, %arg2: memref<9x64x128xf32, #tpu.memory_space<vmem>>, %arg3: memref<1x128xf32, #tpu.memory_space<vmem>>, %arg4: memref<1x28x28x128xf32, #tpu.memory_space<vmem>>) attributes {dimension_semantics = [#tpu.dimension_semantics<parallel>], iteration_bounds = array<i64: 2>, scalar_prefetch = 0 : i64, scratch_operands = 0 : i64, tpu.core_type = #tpu.core_type<tc>, window_params = [{transform_indices = @transform_0, window_bounds = array<i64: 1, 30, 30, 64>}, {pipeline_mode = #tpu.pipeline_mode<synchronous>, transform_indices = @transform_1, window_bounds = array<i64: 9, 64, 128>}, {pipeline_mode = #tpu.pipeline_mode<synchronous>, transform_indices = @transform_2, window_bounds = array<i64: 1, 128>}, {transform_indices = @transform_3, window_bounds = array<i64: 1, 28, 28, 128>}]} {
    %c0 = arith.constant 0 : index
    %c0_0 = arith.constant 0 : index
    %0 = vector.load %arg3[%c0, %c0_0] : memref<1x128xf32, #tpu.memory_space<vmem>>, vector<1x128xf32>
    %c0_i32 = arith.constant 0 : i32
    %c28_i32 = arith.constant 28 : i32
    %1 = arith.addi %c0_i32, %c28_i32 : i32
    %c1_i32 = arith.constant 1 : i32
    scf.for %arg5 = %c0_i32 to %1 step %c1_i32  : i32 {
      %cst = arith.constant 0.000000e+00 : f32
      %2 = vector.broadcast %cst : f32 to vector<28x128xf32>
      %c0_i32_2 = arith.constant 0 : i32
      %3 = arith.addi %arg5, %c0_i32_2 : i32
      %c0_3 = arith.constant 0 : index
      %4 = arith.index_cast %3 : i32 to index
      %c0_4 = arith.constant 0 : index
      %c0_5 = arith.constant 0 : index
      %5 = vector.load %arg1[%c0_3, %4, %c0_4, %c0_5] : memref<1x30x30x64xf32, #tpu.memory_space<vmem>>, vector<1x1x28x64xf32>
      %6 = vector.shape_cast %5 : vector<1x1x28x64xf32> to vector<28x64xf32>
      %c0_6 = arith.constant 0 : index
      %c0_7 = arith.constant 0 : index
      %c0_8 = arith.constant 0 : index
      %7 = vector.load %arg2[%c0_6, %c0_7, %c0_8] : memref<9x64x128xf32, #tpu.memory_space<vmem>>, vector<1x64x128xf32>
      %8 = vector.shape_cast %7 : vector<1x64x128xf32> to vector<64x128xf32>
      %cst_9 = arith.constant dense<0.000000e+00> : vector<28x128xf32>
      %9 = tpu.matmul %6, %8, %cst_9 {dimension_numbers = #tpu.dot_dimension_numbers<[1], [0], [0], [1], [0, 0, 1, 1], [], []>} : vector<28x64xf32>, vector<64x128xf32>, vector<28x128xf32> -> vector<28x128xf32>
      %10 = arith.addf %2, %9 : vector<28x128xf32>
      %c0_i32_10 = arith.constant 0 : i32
      %11 = arith.addi %arg5, %c0_i32_10 : i32
      %c0_11 = arith.constant 0 : index
      %12 = arith.index_cast %11 : i32 to index
      %c1 = arith.constant 1 : index
      %c0_12 = arith.constant 0 : index
      %13 = vector.load %arg1[%c0_11, %12, %c1, %c0_12] : memref<1x30x30x64xf32, #tpu.memory_space<vmem>>, vector<1x1x28x64xf32>
      %14 = vector.shape_cast %13 : vector<1x1x28x64xf32> to vector<28x64xf32>
      %c1_13 = arith.constant 1 : index
      %c0_14 = arith.constant 0 : index
      %c0_15 = arith.constant 0 : index
      %15 = vector.load %arg2[%c1_13, %c0_14, %c0_15] : memref<9x64x128xf32, #tpu.memory_space<vmem>>, vector<1x64x128xf32>
      %16 = vector.shape_cast %15 : vector<1x64x128xf32> to vector<64x128xf32>
      %cst_16 = arith.constant dense<0.000000e+00> : vector<28x128xf32>
      %17 = tpu.matmul %14, %16, %cst_16 {dimension_numbers = #tpu.dot_dimension_numbers<[1], [0], [0], [1], [0, 0, 1, 1], [], []>} : vector<28x64xf32>, vector<64x128xf32>, vector<28x128xf32> -> vector<28x128xf32>
      %18 = arith.addf %10, %17 : vector<28x128xf32>
      %c0_i32_17 = arith.constant 0 : i32
      %19 = arith.addi %arg5, %c0_i32_17 : i32
      %c0_18 = arith.constant 0 : index
      %20 = arith.index_cast %19 : i32 to index
      %c2 = arith.constant 2 : index
      %c0_19 = arith.constant 0 : index
      %21 = vector.load %arg1[%c0_18, %20, %c2, %c0_19] : memref<1x30x30x64xf32, #tpu.memory_space<vmem>>, vector<1x1x28x64xf32>
      %22 = vector.shape_cast %21 : vector<1x1x28x64xf32> to vector<28x64xf32>
      %c2_20 = arith.constant 2 : index
      %c0_21 = arith.constant 0 : index
      %c0_22 = arith.constant 0 : index
      %23 = vector.load %arg2[%c2_20, %c0_21, %c0_22] : memref<9x64x128xf32, #tpu.memory_space<vmem>>, vector<1x64x128xf32>
      %24 = vector.shape_cast %23 : vector<1x64x128xf32> to vector<64x128xf32>
      %cst_23 = arith.constant dense<0.000000e+00> : vector<28x128xf32>
      %25 = tpu.matmul %22, %24, %cst_23 {dimension_numbers = #tpu.dot_dimension_numbers<[1], [0], [0], [1], [0, 0, 1, 1], [], []>} : vector<28x64xf32>, vector<64x128xf32>, vector<28x128xf32> -> vector<28x128xf32>
      %26 = arith.addf %18, %25 : vector<28x128xf32>
      %c1_i32_24 = arith.constant 1 : i32
      %27 = arith.addi %arg5, %c1_i32_24 : i32
      %c0_25 = arith.constant 0 : index
      %28 = arith.index_cast %27 : i32 to index
      %c0_26 = arith.constant 0 : index
      %c0_27 = arith.constant 0 : index
      %29 = vector.load %arg1[%c0_25, %28, %c0_26, %c0_27] : memref<1x30x30x64xf32, #tpu.memory_space<vmem>>, vector<1x1x28x64xf32>
      %30 = vector.shape_cast %29 : vector<1x1x28x64xf32> to vector<28x64xf32>
      %c3 = arith.constant 3 : index
      %c0_28 = arith.constant 0 : index
      %c0_29 = arith.constant 0 : index
      %31 = vector.load %arg2[%c3, %c0_28, %c0_29] : memref<9x64x128xf32, #tpu.memory_space<vmem>>, vector<1x64x128xf32>
      %32 = vector.shape_cast %31 : vector<1x64x128xf32> to vector<64x128xf32>
      %cst_30 = arith.constant dense<0.000000e+00> : vector<28x128xf32>
      %33 = tpu.matmul %30, %32, %cst_30 {dimension_numbers = #tpu.dot_dimension_numbers<[1], [0], [0], [1], [0, 0, 1, 1], [], []>} : vector<28x64xf32>, vector<64x128xf32>, vector<28x128xf32> -> vector<28x128xf32>
      %34 = arith.addf %26, %33 : vector<28x128xf32>
      %c1_i32_31 = arith.constant 1 : i32
      %35 = arith.addi %arg5, %c1_i32_31 : i32
      %c0_32 = arith.constant 0 : index
      %36 = arith.index_cast %35 : i32 to index
      %c1_33 = arith.constant 1 : index
      %c0_34 = arith.constant 0 : index
      %37 = vector.load %arg1[%c0_32, %36, %c1_33, %c0_34] : memref<1x30x30x64xf32, #tpu.memory_space<vmem>>, vector<1x1x28x64xf32>
      %38 = vector.shape_cast %37 : vector<1x1x28x64xf32> to vector<28x64xf32>
      %c4 = arith.constant 4 : index
      %c0_35 = arith.constant 0 : index
      %c0_36 = arith.constant 0 : index
      %39 = vector.load %arg2[%c4, %c0_35, %c0_36] : memref<9x64x128xf32, #tpu.memory_space<vmem>>, vector<1x64x128xf32>
      %40 = vector.shape_cast %39 : vector<1x64x128xf32> to vector<64x128xf32>
      %cst_37 = arith.constant dense<0.000000e+00> : vector<28x128xf32>
      %41 = tpu.matmul %38, %40, %cst_37 {dimension_numbers = #tpu.dot_dimension_numbers<[1], [0], [0], [1], [0, 0, 1, 1], [], []>} : vector<28x64xf32>, vector<64x128xf32>, vector<28x128xf32> -> vector<28x128xf32>
      %42 = arith.addf %34, %41 : vector<28x128xf32>
      %c1_i32_38 = arith.constant 1 : i32
      %43 = arith.addi %arg5, %c1_i32_38 : i32
      %c0_39 = arith.constant 0 : index
      %44 = arith.index_cast %43 : i32 to index
      %c2_40 = arith.constant 2 : index
      %c0_41 = arith.constant 0 : index
      %45 = vector.load %arg1[%c0_39, %44, %c2_40, %c0_41] : memref<1x30x30x64xf32, #tpu.memory_space<vmem>>, vector<1x1x28x64xf32>
      %46 = vector.shape_cast %45 : vector<1x1x28x64xf32> to vector<28x64xf32>
      %c5 = arith.constant 5 : index
      %c0_42 = arith.constant 0 : index
      %c0_43 = arith.constant 0 : index
      %47 = vector.load %arg2[%c5, %c0_42, %c0_43] : memref<9x64x128xf32, #tpu.memory_space<vmem>>, vector<1x64x128xf32>
      %48 = vector.shape_cast %47 : vector<1x64x128xf32> to vector<64x128xf32>
      %cst_44 = arith.constant dense<0.000000e+00> : vector<28x128xf32>
      %49 = tpu.matmul %46, %48, %cst_44 {dimension_numbers = #tpu.dot_dimension_numbers<[1], [0], [0], [1], [0, 0, 1, 1], [], []>} : vector<28x64xf32>, vector<64x128xf32>, vector<28x128xf32> -> vector<28x128xf32>
      %50 = arith.addf %42, %49 : vector<28x128xf32>
      %c2_i32 = arith.constant 2 : i32
      %51 = arith.addi %arg5, %c2_i32 : i32
      %c0_45 = arith.constant 0 : index
      %52 = arith.index_cast %51 : i32 to index
      %c0_46 = arith.constant 0 : index
      %c0_47 = arith.constant 0 : index
      %53 = vector.load %arg1[%c0_45, %52, %c0_46, %c0_47] : memref<1x30x30x64xf32, #tpu.memory_space<vmem>>, vector<1x1x28x64xf32>
      %54 = vector.shape_cast %53 : vector<1x1x28x64xf32> to vector<28x64xf32>
      %c6 = arith.constant 6 : index
      %c0_48 = arith.constant 0 : index
      %c0_49 = arith.constant 0 : index
      %55 = vector.load %arg2[%c6, %c0_48, %c0_49] : memref<9x64x128xf32, #tpu.memory_space<vmem>>, vector<1x64x128xf32>
      %56 = vector.shape_cast %55 : vector<1x64x128xf32> to vector<64x128xf32>
      %cst_50 = arith.constant dense<0.000000e+00> : vector<28x128xf32>
      %57 = tpu.matmul %54, %56, %cst_50 {dimension_numbers = #tpu.dot_dimension_numbers<[1], [0], [0], [1], [0, 0, 1, 1], [], []>} : vector<28x64xf32>, vector<64x128xf32>, vector<28x128xf32> -> vector<28x128xf32>
      %58 = arith.addf %50, %57 : vector<28x128xf32>
      %c2_i32_51 = arith.constant 2 : i32
      %59 = arith.addi %arg5, %c2_i32_51 : i32
      %c0_52 = arith.constant 0 : index
      %60 = arith.index_cast %59 : i32 to index
      %c1_53 = arith.constant 1 : index
      %c0_54 = arith.constant 0 : index
      %61 = vector.load %arg1[%c0_52, %60, %c1_53, %c0_54] : memref<1x30x30x64xf32, #tpu.memory_space<vmem>>, vector<1x1x28x64xf32>
      %62 = vector.shape_cast %61 : vector<1x1x28x64xf32> to vector<28x64xf32>
      %c7 = arith.constant 7 : index
      %c0_55 = arith.constant 0 : index
      %c0_56 = arith.constant 0 : index
      %63 = vector.load %arg2[%c7, %c0_55, %c0_56] : memref<9x64x128xf32, #tpu.memory_space<vmem>>, vector<1x64x128xf32>
      %64 = vector.shape_cast %63 : vector<1x64x128xf32> to vector<64x128xf32>
      %cst_57 = arith.constant dense<0.000000e+00> : vector<28x128xf32>
      %65 = tpu.matmul %62, %64, %cst_57 {dimension_numbers = #tpu.dot_dimension_numbers<[1], [0], [0], [1], [0, 0, 1, 1], [], []>} : vector<28x64xf32>, vector<64x128xf32>, vector<28x128xf32> -> vector<28x128xf32>
      %66 = arith.addf %58, %65 : vector<28x128xf32>
      %c2_i32_58 = arith.constant 2 : i32
      %67 = arith.addi %arg5, %c2_i32_58 : i32
      %c0_59 = arith.constant 0 : index
      %68 = arith.index_cast %67 : i32 to index
      %c2_60 = arith.constant 2 : index
      %c0_61 = arith.constant 0 : index
      %69 = vector.load %arg1[%c0_59, %68, %c2_60, %c0_61] : memref<1x30x30x64xf32, #tpu.memory_space<vmem>>, vector<1x1x28x64xf32>
      %70 = vector.shape_cast %69 : vector<1x1x28x64xf32> to vector<28x64xf32>
      %c8 = arith.constant 8 : index
      %c0_62 = arith.constant 0 : index
      %c0_63 = arith.constant 0 : index
      %71 = vector.load %arg2[%c8, %c0_62, %c0_63] : memref<9x64x128xf32, #tpu.memory_space<vmem>>, vector<1x64x128xf32>
      %72 = vector.shape_cast %71 : vector<1x64x128xf32> to vector<64x128xf32>
      %cst_64 = arith.constant dense<0.000000e+00> : vector<28x128xf32>
      %73 = tpu.matmul %70, %72, %cst_64 {dimension_numbers = #tpu.dot_dimension_numbers<[1], [0], [0], [1], [0, 0, 1, 1], [], []>} : vector<28x64xf32>, vector<64x128xf32>, vector<28x128xf32> -> vector<28x128xf32>
      %74 = arith.addf %66, %73 : vector<28x128xf32>
      %75 = vector.broadcast %0 : vector<1x128xf32> to vector<28x128xf32>
      %76 = arith.addf %74, %75 : vector<28x128xf32>
      %cst_65 = arith.constant 0.000000e+00 : f32
      %77 = vector.broadcast %cst_65 : f32 to vector<28x128xf32>
      %78 = arith.maximumf %76, %77 : vector<28x128xf32>
      %c0_66 = arith.constant 0 : index
      %79 = arith.index_cast %arg5 : i32 to index
      %c0_67 = arith.constant 0 : index
      %c0_68 = arith.constant 0 : index
      %80 = vector.load %arg4[%c0_66, %79, %c0_67, %c0_68] : memref<1x28x28x128xf32, #tpu.memory_space<vmem>>, vector<1x1x28x128xf32>
      %81 = vector.shape_cast %80 : vector<1x1x28x128xf32> to vector<28x128xf32>
      %82 = vector.shape_cast %78 : vector<28x128xf32> to vector<1x1x28x128xf32>
      tpu.vector_store %arg4[%c0_66, %79, %c0_67, %c0_68], %82 {strides = array<i32>} : memref<1x28x28x128xf32, #tpu.memory_space<vmem>>, vector<1x1x28x128xf32>,
    }
    %c28_i32_1 = arith.constant 28 : i32
    return
  }
  func.func @transform_0(%arg0: i32) -> (i32, i32, i32, i32) {
    %c0_i32 = arith.constant 0 : i32
    %c0_i32_0 = arith.constant 0 : i32
    %c0_i32_1 = arith.constant 0 : i32
    %c0_i32_2 = arith.constant 0 : i32
    return %arg0, %c0_i32, %c0_i32_0, %c0_i32_1 : i32, i32, i32, i32
  }
  func.func @transform_1(%arg0: i32) -> (i32, i32, i32) {
    %c0_i32 = arith.constant 0 : i32
    %c0_i32_0 = arith.constant 0 : i32
    %c0_i32_1 = arith.constant 0 : i32
    %c0_i32_2 = arith.constant 0 : i32
    return %c0_i32, %c0_i32_0, %c0_i32_1 : i32, i32, i32
  }
  func.func @transform_2(%arg0: i32) -> (i32, i32) {
    %c0_i32 = arith.constant 0 : i32
    %c0_i32_0 = arith.constant 0 : i32
    %c0_i32_1 = arith.constant 0 : i32
    return %c0_i32, %c0_i32_0 : i32, i32
  }
  func.func @transform_3(%arg0: i32) -> (i32, i32, i32, i32) {
    %c0_i32 = arith.constant 0 : i32
    %c0_i32_0 = arith.constant 0 : i32
    %c0_i32_1 = arith.constant 0 : i32
    %c0_i32_2 = arith.constant 0 : i32
    return %arg0, %c0_i32, %c0_i32_0, %c0_i32_1 : i32, i32, i32, i32
  }
}

module attributes {stable_mosaic.version = 11 : i64} {
  func.func @_conv3x3_kernel(%arg0: i32, %arg1: memref<1x28x28x128xf32, #tpu.memory_space<vmem>>, %arg2: memref<9x128x128xf32, #tpu.memory_space<vmem>>, %arg3: memref<1x128xf32, #tpu.memory_space<vmem>>, %arg4: memref<1x26x26x128xf32, #tpu.memory_space<vmem>>) attributes {dimension_semantics = [#tpu.dimension_semantics<parallel>], iteration_bounds = array<i64: 2>, scalar_prefetch = 0 : i64, scratch_operands = 0 : i64, tpu.core_type = #tpu.core_type<tc>, window_params = [{transform_indices = @transform_0, window_bounds = array<i64: 1, 28, 28, 128>}, {pipeline_mode = #tpu.pipeline_mode<synchronous>, transform_indices = @transform_1, window_bounds = array<i64: 9, 128, 128>}, {pipeline_mode = #tpu.pipeline_mode<synchronous>, transform_indices = @transform_2, window_bounds = array<i64: 1, 128>}, {transform_indices = @transform_3, window_bounds = array<i64: 1, 26, 26, 128>}]} {
    %c0 = arith.constant 0 : index
    %c0_0 = arith.constant 0 : index
    %0 = vector.load %arg3[%c0, %c0_0] : memref<1x128xf32, #tpu.memory_space<vmem>>, vector<1x128xf32>
    %c0_i32 = arith.constant 0 : i32
    %c26_i32 = arith.constant 26 : i32
    %1 = arith.addi %c0_i32, %c26_i32 : i32
    %c1_i32 = arith.constant 1 : i32
    scf.for %arg5 = %c0_i32 to %1 step %c1_i32  : i32 {
      %cst = arith.constant 0.000000e+00 : f32
      %2 = vector.broadcast %cst : f32 to vector<26x128xf32>
      %c0_i32_2 = arith.constant 0 : i32
      %3 = arith.addi %arg5, %c0_i32_2 : i32
      %c0_3 = arith.constant 0 : index
      %4 = arith.index_cast %3 : i32 to index
      %c0_4 = arith.constant 0 : index
      %c0_5 = arith.constant 0 : index
      %5 = vector.load %arg1[%c0_3, %4, %c0_4, %c0_5] : memref<1x28x28x128xf32, #tpu.memory_space<vmem>>, vector<1x1x26x128xf32>
      %6 = vector.shape_cast %5 : vector<1x1x26x128xf32> to vector<26x128xf32>
      %c0_6 = arith.constant 0 : index
      %c0_7 = arith.constant 0 : index
      %c0_8 = arith.constant 0 : index
      %7 = vector.load %arg2[%c0_6, %c0_7, %c0_8] : memref<9x128x128xf32, #tpu.memory_space<vmem>>, vector<1x128x128xf32>
      %8 = vector.shape_cast %7 : vector<1x128x128xf32> to vector<128x128xf32>
      %cst_9 = arith.constant dense<0.000000e+00> : vector<26x128xf32>
      %9 = tpu.matmul %6, %8, %cst_9 {dimension_numbers = #tpu.dot_dimension_numbers<[1], [0], [0], [1], [0, 0, 1, 1], [], []>} : vector<26x128xf32>, vector<128x128xf32>, vector<26x128xf32> -> vector<26x128xf32>
      %10 = arith.addf %2, %9 : vector<26x128xf32>
      %c0_i32_10 = arith.constant 0 : i32
      %11 = arith.addi %arg5, %c0_i32_10 : i32
      %c0_11 = arith.constant 0 : index
      %12 = arith.index_cast %11 : i32 to index
      %c1 = arith.constant 1 : index
      %c0_12 = arith.constant 0 : index
      %13 = vector.load %arg1[%c0_11, %12, %c1, %c0_12] : memref<1x28x28x128xf32, #tpu.memory_space<vmem>>, vector<1x1x26x128xf32>
      %14 = vector.shape_cast %13 : vector<1x1x26x128xf32> to vector<26x128xf32>
      %c1_13 = arith.constant 1 : index
      %c0_14 = arith.constant 0 : index
      %c0_15 = arith.constant 0 : index
      %15 = vector.load %arg2[%c1_13, %c0_14, %c0_15] : memref<9x128x128xf32, #tpu.memory_space<vmem>>, vector<1x128x128xf32>
      %16 = vector.shape_cast %15 : vector<1x128x128xf32> to vector<128x128xf32>
      %cst_16 = arith.constant dense<0.000000e+00> : vector<26x128xf32>
      %17 = tpu.matmul %14, %16, %cst_16 {dimension_numbers = #tpu.dot_dimension_numbers<[1], [0], [0], [1], [0, 0, 1, 1], [], []>} : vector<26x128xf32>, vector<128x128xf32>, vector<26x128xf32> -> vector<26x128xf32>
      %18 = arith.addf %10, %17 : vector<26x128xf32>
      %c0_i32_17 = arith.constant 0 : i32
      %19 = arith.addi %arg5, %c0_i32_17 : i32
      %c0_18 = arith.constant 0 : index
      %20 = arith.index_cast %19 : i32 to index
      %c2 = arith.constant 2 : index
      %c0_19 = arith.constant 0 : index
      %21 = vector.load %arg1[%c0_18, %20, %c2, %c0_19] : memref<1x28x28x128xf32, #tpu.memory_space<vmem>>, vector<1x1x26x128xf32>
      %22 = vector.shape_cast %21 : vector<1x1x26x128xf32> to vector<26x128xf32>
      %c2_20 = arith.constant 2 : index
      %c0_21 = arith.constant 0 : index
      %c0_22 = arith.constant 0 : index
      %23 = vector.load %arg2[%c2_20, %c0_21, %c0_22] : memref<9x128x128xf32, #tpu.memory_space<vmem>>, vector<1x128x128xf32>
      %24 = vector.shape_cast %23 : vector<1x128x128xf32> to vector<128x128xf32>
      %cst_23 = arith.constant dense<0.000000e+00> : vector<26x128xf32>
      %25 = tpu.matmul %22, %24, %cst_23 {dimension_numbers = #tpu.dot_dimension_numbers<[1], [0], [0], [1], [0, 0, 1, 1], [], []>} : vector<26x128xf32>, vector<128x128xf32>, vector<26x128xf32> -> vector<26x128xf32>
      %26 = arith.addf %18, %25 : vector<26x128xf32>
      %c1_i32_24 = arith.constant 1 : i32
      %27 = arith.addi %arg5, %c1_i32_24 : i32
      %c0_25 = arith.constant 0 : index
      %28 = arith.index_cast %27 : i32 to index
      %c0_26 = arith.constant 0 : index
      %c0_27 = arith.constant 0 : index
      %29 = vector.load %arg1[%c0_25, %28, %c0_26, %c0_27] : memref<1x28x28x128xf32, #tpu.memory_space<vmem>>, vector<1x1x26x128xf32>
      %30 = vector.shape_cast %29 : vector<1x1x26x128xf32> to vector<26x128xf32>
      %c3 = arith.constant 3 : index
      %c0_28 = arith.constant 0 : index
      %c0_29 = arith.constant 0 : index
      %31 = vector.load %arg2[%c3, %c0_28, %c0_29] : memref<9x128x128xf32, #tpu.memory_space<vmem>>, vector<1x128x128xf32>
      %32 = vector.shape_cast %31 : vector<1x128x128xf32> to vector<128x128xf32>
      %cst_30 = arith.constant dense<0.000000e+00> : vector<26x128xf32>
      %33 = tpu.matmul %30, %32, %cst_30 {dimension_numbers = #tpu.dot_dimension_numbers<[1], [0], [0], [1], [0, 0, 1, 1], [], []>} : vector<26x128xf32>, vector<128x128xf32>, vector<26x128xf32> -> vector<26x128xf32>
      %34 = arith.addf %26, %33 : vector<26x128xf32>
      %c1_i32_31 = arith.constant 1 : i32
      %35 = arith.addi %arg5, %c1_i32_31 : i32
      %c0_32 = arith.constant 0 : index
      %36 = arith.index_cast %35 : i32 to index
      %c1_33 = arith.constant 1 : index
      %c0_34 = arith.constant 0 : index
      %37 = vector.load %arg1[%c0_32, %36, %c1_33, %c0_34] : memref<1x28x28x128xf32, #tpu.memory_space<vmem>>, vector<1x1x26x128xf32>
      %38 = vector.shape_cast %37 : vector<1x1x26x128xf32> to vector<26x128xf32>
      %c4 = arith.constant 4 : index
      %c0_35 = arith.constant 0 : index
      %c0_36 = arith.constant 0 : index
      %39 = vector.load %arg2[%c4, %c0_35, %c0_36] : memref<9x128x128xf32, #tpu.memory_space<vmem>>, vector<1x128x128xf32>
      %40 = vector.shape_cast %39 : vector<1x128x128xf32> to vector<128x128xf32>
      %cst_37 = arith.constant dense<0.000000e+00> : vector<26x128xf32>
      %41 = tpu.matmul %38, %40, %cst_37 {dimension_numbers = #tpu.dot_dimension_numbers<[1], [0], [0], [1], [0, 0, 1, 1], [], []>} : vector<26x128xf32>, vector<128x128xf32>, vector<26x128xf32> -> vector<26x128xf32>
      %42 = arith.addf %34, %41 : vector<26x128xf32>
      %c1_i32_38 = arith.constant 1 : i32
      %43 = arith.addi %arg5, %c1_i32_38 : i32
      %c0_39 = arith.constant 0 : index
      %44 = arith.index_cast %43 : i32 to index
      %c2_40 = arith.constant 2 : index
      %c0_41 = arith.constant 0 : index
      %45 = vector.load %arg1[%c0_39, %44, %c2_40, %c0_41] : memref<1x28x28x128xf32, #tpu.memory_space<vmem>>, vector<1x1x26x128xf32>
      %46 = vector.shape_cast %45 : vector<1x1x26x128xf32> to vector<26x128xf32>
      %c5 = arith.constant 5 : index
      %c0_42 = arith.constant 0 : index
      %c0_43 = arith.constant 0 : index
      %47 = vector.load %arg2[%c5, %c0_42, %c0_43] : memref<9x128x128xf32, #tpu.memory_space<vmem>>, vector<1x128x128xf32>
      %48 = vector.shape_cast %47 : vector<1x128x128xf32> to vector<128x128xf32>
      %cst_44 = arith.constant dense<0.000000e+00> : vector<26x128xf32>
      %49 = tpu.matmul %46, %48, %cst_44 {dimension_numbers = #tpu.dot_dimension_numbers<[1], [0], [0], [1], [0, 0, 1, 1], [], []>} : vector<26x128xf32>, vector<128x128xf32>, vector<26x128xf32> -> vector<26x128xf32>
      %50 = arith.addf %42, %49 : vector<26x128xf32>
      %c2_i32 = arith.constant 2 : i32
      %51 = arith.addi %arg5, %c2_i32 : i32
      %c0_45 = arith.constant 0 : index
      %52 = arith.index_cast %51 : i32 to index
      %c0_46 = arith.constant 0 : index
      %c0_47 = arith.constant 0 : index
      %53 = vector.load %arg1[%c0_45, %52, %c0_46, %c0_47] : memref<1x28x28x128xf32, #tpu.memory_space<vmem>>, vector<1x1x26x128xf32>
      %54 = vector.shape_cast %53 : vector<1x1x26x128xf32> to vector<26x128xf32>
      %c6 = arith.constant 6 : index
      %c0_48 = arith.constant 0 : index
      %c0_49 = arith.constant 0 : index
      %55 = vector.load %arg2[%c6, %c0_48, %c0_49] : memref<9x128x128xf32, #tpu.memory_space<vmem>>, vector<1x128x128xf32>
      %56 = vector.shape_cast %55 : vector<1x128x128xf32> to vector<128x128xf32>
      %cst_50 = arith.constant dense<0.000000e+00> : vector<26x128xf32>
      %57 = tpu.matmul %54, %56, %cst_50 {dimension_numbers = #tpu.dot_dimension_numbers<[1], [0], [0], [1], [0, 0, 1, 1], [], []>} : vector<26x128xf32>, vector<128x128xf32>, vector<26x128xf32> -> vector<26x128xf32>
      %58 = arith.addf %50, %57 : vector<26x128xf32>
      %c2_i32_51 = arith.constant 2 : i32
      %59 = arith.addi %arg5, %c2_i32_51 : i32
      %c0_52 = arith.constant 0 : index
      %60 = arith.index_cast %59 : i32 to index
      %c1_53 = arith.constant 1 : index
      %c0_54 = arith.constant 0 : index
      %61 = vector.load %arg1[%c0_52, %60, %c1_53, %c0_54] : memref<1x28x28x128xf32, #tpu.memory_space<vmem>>, vector<1x1x26x128xf32>
      %62 = vector.shape_cast %61 : vector<1x1x26x128xf32> to vector<26x128xf32>
      %c7 = arith.constant 7 : index
      %c0_55 = arith.constant 0 : index
      %c0_56 = arith.constant 0 : index
      %63 = vector.load %arg2[%c7, %c0_55, %c0_56] : memref<9x128x128xf32, #tpu.memory_space<vmem>>, vector<1x128x128xf32>
      %64 = vector.shape_cast %63 : vector<1x128x128xf32> to vector<128x128xf32>
      %cst_57 = arith.constant dense<0.000000e+00> : vector<26x128xf32>
      %65 = tpu.matmul %62, %64, %cst_57 {dimension_numbers = #tpu.dot_dimension_numbers<[1], [0], [0], [1], [0, 0, 1, 1], [], []>} : vector<26x128xf32>, vector<128x128xf32>, vector<26x128xf32> -> vector<26x128xf32>
      %66 = arith.addf %58, %65 : vector<26x128xf32>
      %c2_i32_58 = arith.constant 2 : i32
      %67 = arith.addi %arg5, %c2_i32_58 : i32
      %c0_59 = arith.constant 0 : index
      %68 = arith.index_cast %67 : i32 to index
      %c2_60 = arith.constant 2 : index
      %c0_61 = arith.constant 0 : index
      %69 = vector.load %arg1[%c0_59, %68, %c2_60, %c0_61] : memref<1x28x28x128xf32, #tpu.memory_space<vmem>>, vector<1x1x26x128xf32>
      %70 = vector.shape_cast %69 : vector<1x1x26x128xf32> to vector<26x128xf32>
      %c8 = arith.constant 8 : index
      %c0_62 = arith.constant 0 : index
      %c0_63 = arith.constant 0 : index
      %71 = vector.load %arg2[%c8, %c0_62, %c0_63] : memref<9x128x128xf32, #tpu.memory_space<vmem>>, vector<1x128x128xf32>
      %72 = vector.shape_cast %71 : vector<1x128x128xf32> to vector<128x128xf32>
      %cst_64 = arith.constant dense<0.000000e+00> : vector<26x128xf32>
      %73 = tpu.matmul %70, %72, %cst_64 {dimension_numbers = #tpu.dot_dimension_numbers<[1], [0], [0], [1], [0, 0, 1, 1], [], []>} : vector<26x128xf32>, vector<128x128xf32>, vector<26x128xf32> -> vector<26x128xf32>
      %74 = arith.addf %66, %73 : vector<26x128xf32>
      %75 = vector.broadcast %0 : vector<1x128xf32> to vector<26x128xf32>
      %76 = arith.addf %74, %75 : vector<26x128xf32>
      %cst_65 = arith.constant 0.000000e+00 : f32
      %77 = vector.broadcast %cst_65 : f32 to vector<26x128xf32>
      %78 = arith.maximumf %76, %77 : vector<26x128xf32>
      %c0_66 = arith.constant 0 : index
      %79 = arith.index_cast %arg5 : i32 to index
      %c0_67 = arith.constant 0 : index
      %c0_68 = arith.constant 0 : index
      %80 = vector.load %arg4[%c0_66, %79, %c0_67, %c0_68] : memref<1x26x26x128xf32, #tpu.memory_space<vmem>>, vector<1x1x26x128xf32>
      %81 = vector.shape_cast %80 : vector<1x1x26x128xf32> to vector<26x128xf32>
      %82 = vector.shape_cast %78 : vector<26x128xf32> to vector<1x1x26x128xf32>
      tpu.vector_store %arg4[%c0_66, %79, %c0_67, %c0_68], %82 {strides = array<i32>} : memref<1x26x26x128xf32, #tpu.memory_space<vmem>>, vector<1x1x26x128xf32>,
    }
    %c26_i32_1 = arith.constant 26 : i32
    return
  }
  func.func @transform_0(%arg0: i32) -> (i32, i32, i32, i32) {
    %c0_i32 = arith.constant 0 : i32
    %c0_i32_0 = arith.constant 0 : i32
    %c0_i32_1 = arith.constant 0 : i32
    %c0_i32_2 = arith.constant 0 : i32
    return %arg0, %c0_i32, %c0_i32_0, %c0_i32_1 : i32, i32, i32, i32
  }
  func.func @transform_1(%arg0: i32) -> (i32, i32, i32) {
    %c0_i32 = arith.constant 0 : i32
    %c0_i32_0 = arith.constant 0 : i32
    %c0_i32_1 = arith.constant 0 : i32
    %c0_i32_2 = arith.constant 0 : i32
    return %c0_i32, %c0_i32_0, %c0_i32_1 : i32, i32, i32
  }
  func.func @transform_2(%arg0: i32) -> (i32, i32) {
    %c0_i32 = arith.constant 0 : i32
    %c0_i32_0 = arith.constant 0 : i32
    %c0_i32_1 = arith.constant 0 : i32
    return %c0_i32, %c0_i32_0 : i32, i32
  }
  func.func @transform_3(%arg0: i32) -> (i32, i32, i32, i32) {
    %c0_i32 = arith.constant 0 : i32
    %c0_i32_0 = arith.constant 0 : i32
    %c0_i32_1 = arith.constant 0 : i32
    %c0_i32_2 = arith.constant 0 : i32
    return %arg0, %c0_i32, %c0_i32_0, %c0_i32_1 : i32, i32, i32, i32
  }
}

module attributes {stable_mosaic.version = 11 : i64} {
  func.func @_pool2x2_kernel(%arg0: i32, %arg1: memref<1x60x30x128xf32, #tpu.memory_space<vmem>>, %arg2: memref<1x30x30x64xf32, #tpu.memory_space<vmem>>) attributes {dimension_semantics = [#tpu.dimension_semantics<parallel>], iteration_bounds = array<i64: 2>, scalar_prefetch = 0 : i64, scratch_operands = 0 : i64, tpu.core_type = #tpu.core_type<tc>, window_params = [{transform_indices = @transform_0, window_bounds = array<i64: 1, 60, 30, 128>}, {transform_indices = @transform_1, window_bounds = array<i64: 1, 30, 30, 64>}]} {
    %c0 = arith.constant 0 : index
    %c0_0 = arith.constant 0 : index
    %c0_1 = arith.constant 0 : index
    %c0_2 = arith.constant 0 : index
    %0 = vector.load %arg1[%c0, %c0_0, %c0_1, %c0_2] : memref<1x60x30x128xf32, #tpu.memory_space<vmem>>, vector<1x1x30x128xf32>
    %1 = vector.shape_cast %0 : vector<1x1x30x128xf32> to vector<30x128xf32>
    %c0_3 = arith.constant 0 : index
    %c1 = arith.constant 1 : index
    %c0_4 = arith.constant 0 : index
    %c0_5 = arith.constant 0 : index
    %2 = vector.load %arg1[%c0_3, %c1, %c0_4, %c0_5] : memref<1x60x30x128xf32, #tpu.memory_space<vmem>>, vector<1x1x30x128xf32>
    %3 = vector.shape_cast %2 : vector<1x1x30x128xf32> to vector<30x128xf32>
    %4 = arith.maximumf %1, %3 : vector<30x128xf32>
    %5 = vector.extract_strided_slice %4 {offsets = [0, 0], sizes = [30, 64], strides = [1, 1]} : vector<30x128xf32> to vector<30x64xf32>
    %6 = vector.extract_strided_slice %4 {offsets = [0, 64], sizes = [30, 64], strides = [1, 1]} : vector<30x128xf32> to vector<30x64xf32>
    %7 = arith.maximumf %5, %6 : vector<30x64xf32>
    %c0_6 = arith.constant 0 : index
    %c0_7 = arith.constant 0 : index
    %c0_8 = arith.constant 0 : index
    %c0_9 = arith.constant 0 : index
    %8 = vector.load %arg2[%c0_6, %c0_7, %c0_8, %c0_9] : memref<1x30x30x64xf32, #tpu.memory_space<vmem>>, vector<1x1x30x64xf32>
    %9 = vector.shape_cast %8 : vector<1x1x30x64xf32> to vector<30x64xf32>
    %10 = vector.shape_cast %7 : vector<30x64xf32> to vector<1x1x30x64xf32>
    tpu.vector_store %arg2[%c0_6, %c0_7, %c0_8, %c0_9], %10 {strides = array<i32>} : memref<1x30x30x64xf32, #tpu.memory_space<vmem>>, vector<1x1x30x64xf32>,
    %c0_10 = arith.constant 0 : index
    %c2 = arith.constant 2 : index
    %c0_11 = arith.constant 0 : index
    %c0_12 = arith.constant 0 : index
    %11 = vector.load %arg1[%c0_10, %c2, %c0_11, %c0_12] : memref<1x60x30x128xf32, #tpu.memory_space<vmem>>, vector<1x1x30x128xf32>
    %12 = vector.shape_cast %11 : vector<1x1x30x128xf32> to vector<30x128xf32>
    %c0_13 = arith.constant 0 : index
    %c3 = arith.constant 3 : index
    %c0_14 = arith.constant 0 : index
    %c0_15 = arith.constant 0 : index
    %13 = vector.load %arg1[%c0_13, %c3, %c0_14, %c0_15] : memref<1x60x30x128xf32, #tpu.memory_space<vmem>>, vector<1x1x30x128xf32>
    %14 = vector.shape_cast %13 : vector<1x1x30x128xf32> to vector<30x128xf32>
    %15 = arith.maximumf %12, %14 : vector<30x128xf32>
    %16 = vector.extract_strided_slice %15 {offsets = [0, 0], sizes = [30, 64], strides = [1, 1]} : vector<30x128xf32> to vector<30x64xf32>
    %17 = vector.extract_strided_slice %15 {offsets = [0, 64], sizes = [30, 64], strides = [1, 1]} : vector<30x128xf32> to vector<30x64xf32>
    %18 = arith.maximumf %16, %17 : vector<30x64xf32>
    %c0_16 = arith.constant 0 : index
    %c1_17 = arith.constant 1 : index
    %c0_18 = arith.constant 0 : index
    %c0_19 = arith.constant 0 : index
    %19 = vector.load %arg2[%c0_16, %c1_17, %c0_18, %c0_19] : memref<1x30x30x64xf32, #tpu.memory_space<vmem>>, vector<1x1x30x64xf32>
    %20 = vector.shape_cast %19 : vector<1x1x30x64xf32> to vector<30x64xf32>
    %21 = vector.shape_cast %18 : vector<30x64xf32> to vector<1x1x30x64xf32>
    tpu.vector_store %arg2[%c0_16, %c1_17, %c0_18, %c0_19], %21 {strides = array<i32>} : memref<1x30x30x64xf32, #tpu.memory_space<vmem>>, vector<1x1x30x64xf32>,
    %c0_20 = arith.constant 0 : index
    %c4 = arith.constant 4 : index
    %c0_21 = arith.constant 0 : index
    %c0_22 = arith.constant 0 : index
    %22 = vector.load %arg1[%c0_20, %c4, %c0_21, %c0_22] : memref<1x60x30x128xf32, #tpu.memory_space<vmem>>, vector<1x1x30x128xf32>
    %23 = vector.shape_cast %22 : vector<1x1x30x128xf32> to vector<30x128xf32>
    %c0_23 = arith.constant 0 : index
    %c5 = arith.constant 5 : index
    %c0_24 = arith.constant 0 : index
    %c0_25 = arith.constant 0 : index
    %24 = vector.load %arg1[%c0_23, %c5, %c0_24, %c0_25] : memref<1x60x30x128xf32, #tpu.memory_space<vmem>>, vector<1x1x30x128xf32>
    %25 = vector.shape_cast %24 : vector<1x1x30x128xf32> to vector<30x128xf32>
    %26 = arith.maximumf %23, %25 : vector<30x128xf32>
    %27 = vector.extract_strided_slice %26 {offsets = [0, 0], sizes = [30, 64], strides = [1, 1]} : vector<30x128xf32> to vector<30x64xf32>
    %28 = vector.extract_strided_slice %26 {offsets = [0, 64], sizes = [30, 64], strides = [1, 1]} : vector<30x128xf32> to vector<30x64xf32>
    %29 = arith.maximumf %27, %28 : vector<30x64xf32>
    %c0_26 = arith.constant 0 : index
    %c2_27 = arith.constant 2 : index
    %c0_28 = arith.constant 0 : index
    %c0_29 = arith.constant 0 : index
    %30 = vector.load %arg2[%c0_26, %c2_27, %c0_28, %c0_29] : memref<1x30x30x64xf32, #tpu.memory_space<vmem>>, vector<1x1x30x64xf32>
    %31 = vector.shape_cast %30 : vector<1x1x30x64xf32> to vector<30x64xf32>
    %32 = vector.shape_cast %29 : vector<30x64xf32> to vector<1x1x30x64xf32>
    tpu.vector_store %arg2[%c0_26, %c2_27, %c0_28, %c0_29], %32 {strides = array<i32>} : memref<1x30x30x64xf32, #tpu.memory_space<vmem>>, vector<1x1x30x64xf32>,
    %c0_30 = arith.constant 0 : index
    %c6 = arith.constant 6 : index
    %c0_31 = arith.constant 0 : index
    %c0_32 = arith.constant 0 : index
    %33 = vector.load %arg1[%c0_30, %c6, %c0_31, %c0_32] : memref<1x60x30x128xf32, #tpu.memory_space<vmem>>, vector<1x1x30x128xf32>
    %34 = vector.shape_cast %33 : vector<1x1x30x128xf32> to vector<30x128xf32>
    %c0_33 = arith.constant 0 : index
    %c7 = arith.constant 7 : index
    %c0_34 = arith.constant 0 : index
    %c0_35 = arith.constant 0 : index
    %35 = vector.load %arg1[%c0_33, %c7, %c0_34, %c0_35] : memref<1x60x30x128xf32, #tpu.memory_space<vmem>>, vector<1x1x30x128xf32>
    %36 = vector.shape_cast %35 : vector<1x1x30x128xf32> to vector<30x128xf32>
    %37 = arith.maximumf %34, %36 : vector<30x128xf32>
    %38 = vector.extract_strided_slice %37 {offsets = [0, 0], sizes = [30, 64], strides = [1, 1]} : vector<30x128xf32> to vector<30x64xf32>
    %39 = vector.extract_strided_slice %37 {offsets = [0, 64], sizes = [30, 64], strides = [1, 1]} : vector<30x128xf32> to vector<30x64xf32>
    %40 = arith.maximumf %38, %39 : vector<30x64xf32>
    %c0_36 = arith.constant 0 : index
    %c3_37 = arith.constant 3 : index
    %c0_38 = arith.constant 0 : index
    %c0_39 = arith.constant 0 : index
    %41 = vector.load %arg2[%c0_36, %c3_37, %c0_38, %c0_39] : memref<1x30x30x64xf32, #tpu.memory_space<vmem>>, vector<1x1x30x64xf32>
    %42 = vector.shape_cast %41 : vector<1x1x30x64xf32> to vector<30x64xf32>
    %43 = vector.shape_cast %40 : vector<30x64xf32> to vector<1x1x30x64xf32>
    tpu.vector_store %arg2[%c0_36, %c3_37, %c0_38, %c0_39], %43 {strides = array<i32>} : memref<1x30x30x64xf32, #tpu.memory_space<vmem>>, vector<1x1x30x64xf32>,
    %c0_40 = arith.constant 0 : index
    %c8 = arith.constant 8 : index
    %c0_41 = arith.constant 0 : index
    %c0_42 = arith.constant 0 : index
    %44 = vector.load %arg1[%c0_40, %c8, %c0_41, %c0_42] : memref<1x60x30x128xf32, #tpu.memory_space<vmem>>, vector<1x1x30x128xf32>
    %45 = vector.shape_cast %44 : vector<1x1x30x128xf32> to vector<30x128xf32>
    %c0_43 = arith.constant 0 : index
    %c9 = arith.constant 9 : index
    %c0_44 = arith.constant 0 : index
    %c0_45 = arith.constant 0 : index
    %46 = vector.load %arg1[%c0_43, %c9, %c0_44, %c0_45] : memref<1x60x30x128xf32, #tpu.memory_space<vmem>>, vector<1x1x30x128xf32>
    %47 = vector.shape_cast %46 : vector<1x1x30x128xf32> to vector<30x128xf32>
    %48 = arith.maximumf %45, %47 : vector<30x128xf32>
    %49 = vector.extract_strided_slice %48 {offsets = [0, 0], sizes = [30, 64], strides = [1, 1]} : vector<30x128xf32> to vector<30x64xf32>
    %50 = vector.extract_strided_slice %48 {offsets = [0, 64], sizes = [30, 64], strides = [1, 1]} : vector<30x128xf32> to vector<30x64xf32>
    %51 = arith.maximumf %49, %50 : vector<30x64xf32>
    %c0_46 = arith.constant 0 : index
    %c4_47 = arith.constant 4 : index
    %c0_48 = arith.constant 0 : index
    %c0_49 = arith.constant 0 : index
    %52 = vector.load %arg2[%c0_46, %c4_47, %c0_48, %c0_49] : memref<1x30x30x64xf32, #tpu.memory_space<vmem>>, vector<1x1x30x64xf32>
    %53 = vector.shape_cast %52 : vector<1x1x30x64xf32> to vector<30x64xf32>
    %54 = vector.shape_cast %51 : vector<30x64xf32> to vector<1x1x30x64xf32>
    tpu.vector_store %arg2[%c0_46, %c4_47, %c0_48, %c0_49], %54 {strides = array<i32>} : memref<1x30x30x64xf32, #tpu.memory_space<vmem>>, vector<1x1x30x64xf32>,
    %c0_50 = arith.constant 0 : index
    %c10 = arith.constant 10 : index
    %c0_51 = arith.constant 0 : index
    %c0_52 = arith.constant 0 : index
    %55 = vector.load %arg1[%c0_50, %c10, %c0_51, %c0_52] : memref<1x60x30x128xf32, #tpu.memory_space<vmem>>, vector<1x1x30x128xf32>
    %56 = vector.shape_cast %55 : vector<1x1x30x128xf32> to vector<30x128xf32>
    %c0_53 = arith.constant 0 : index
    %c11 = arith.constant 11 : index
    %c0_54 = arith.constant 0 : index
    %c0_55 = arith.constant 0 : index
    %57 = vector.load %arg1[%c0_53, %c11, %c0_54, %c0_55] : memref<1x60x30x128xf32, #tpu.memory_space<vmem>>, vector<1x1x30x128xf32>
    %58 = vector.shape_cast %57 : vector<1x1x30x128xf32> to vector<30x128xf32>
    %59 = arith.maximumf %56, %58 : vector<30x128xf32>
    %60 = vector.extract_strided_slice %59 {offsets = [0, 0], sizes = [30, 64], strides = [1, 1]} : vector<30x128xf32> to vector<30x64xf32>
    %61 = vector.extract_strided_slice %59 {offsets = [0, 64], sizes = [30, 64], strides = [1, 1]} : vector<30x128xf32> to vector<30x64xf32>
    %62 = arith.maximumf %60, %61 : vector<30x64xf32>
    %c0_56 = arith.constant 0 : index
    %c5_57 = arith.constant 5 : index
    %c0_58 = arith.constant 0 : index
    %c0_59 = arith.constant 0 : index
    %63 = vector.load %arg2[%c0_56, %c5_57, %c0_58, %c0_59] : memref<1x30x30x64xf32, #tpu.memory_space<vmem>>, vector<1x1x30x64xf32>
    %64 = vector.shape_cast %63 : vector<1x1x30x64xf32> to vector<30x64xf32>
    %65 = vector.shape_cast %62 : vector<30x64xf32> to vector<1x1x30x64xf32>
    tpu.vector_store %arg2[%c0_56, %c5_57, %c0_58, %c0_59], %65 {strides = array<i32>} : memref<1x30x30x64xf32, #tpu.memory_space<vmem>>, vector<1x1x30x64xf32>,
    %c0_60 = arith.constant 0 : index
    %c12 = arith.constant 12 : index
    %c0_61 = arith.constant 0 : index
    %c0_62 = arith.constant 0 : index
    %66 = vector.load %arg1[%c0_60, %c12, %c0_61, %c0_62] : memref<1x60x30x128xf32, #tpu.memory_space<vmem>>, vector<1x1x30x128xf32>
    %67 = vector.shape_cast %66 : vector<1x1x30x128xf32> to vector<30x128xf32>
    %c0_63 = arith.constant 0 : index
    %c13 = arith.constant 13 : index
    %c0_64 = arith.constant 0 : index
    %c0_65 = arith.constant 0 : index
    %68 = vector.load %arg1[%c0_63, %c13, %c0_64, %c0_65] : memref<1x60x30x128xf32, #tpu.memory_space<vmem>>, vector<1x1x30x128xf32>
    %69 = vector.shape_cast %68 : vector<1x1x30x128xf32> to vector<30x128xf32>
    %70 = arith.maximumf %67, %69 : vector<30x128xf32>
    %71 = vector.extract_strided_slice %70 {offsets = [0, 0], sizes = [30, 64], strides = [1, 1]} : vector<30x128xf32> to vector<30x64xf32>
    %72 = vector.extract_strided_slice %70 {offsets = [0, 64], sizes = [30, 64], strides = [1, 1]} : vector<30x128xf32> to vector<30x64xf32>
    %73 = arith.maximumf %71, %72 : vector<30x64xf32>
    %c0_66 = arith.constant 0 : index
    %c6_67 = arith.constant 6 : index
    %c0_68 = arith.constant 0 : index
    %c0_69 = arith.constant 0 : index
    %74 = vector.load %arg2[%c0_66, %c6_67, %c0_68, %c0_69] : memref<1x30x30x64xf32, #tpu.memory_space<vmem>>, vector<1x1x30x64xf32>
    %75 = vector.shape_cast %74 : vector<1x1x30x64xf32> to vector<30x64xf32>
    %76 = vector.shape_cast %73 : vector<30x64xf32> to vector<1x1x30x64xf32>
    tpu.vector_store %arg2[%c0_66, %c6_67, %c0_68, %c0_69], %76 {strides = array<i32>} : memref<1x30x30x64xf32, #tpu.memory_space<vmem>>, vector<1x1x30x64xf32>,
    %c0_70 = arith.constant 0 : index
    %c14 = arith.constant 14 : index
    %c0_71 = arith.constant 0 : index
    %c0_72 = arith.constant 0 : index
    %77 = vector.load %arg1[%c0_70, %c14, %c0_71, %c0_72] : memref<1x60x30x128xf32, #tpu.memory_space<vmem>>, vector<1x1x30x128xf32>
    %78 = vector.shape_cast %77 : vector<1x1x30x128xf32> to vector<30x128xf32>
    %c0_73 = arith.constant 0 : index
    %c15 = arith.constant 15 : index
    %c0_74 = arith.constant 0 : index
    %c0_75 = arith.constant 0 : index
    %79 = vector.load %arg1[%c0_73, %c15, %c0_74, %c0_75] : memref<1x60x30x128xf32, #tpu.memory_space<vmem>>, vector<1x1x30x128xf32>
    %80 = vector.shape_cast %79 : vector<1x1x30x128xf32> to vector<30x128xf32>
    %81 = arith.maximumf %78, %80 : vector<30x128xf32>
    %82 = vector.extract_strided_slice %81 {offsets = [0, 0], sizes = [30, 64], strides = [1, 1]} : vector<30x128xf32> to vector<30x64xf32>
    %83 = vector.extract_strided_slice %81 {offsets = [0, 64], sizes = [30, 64], strides = [1, 1]} : vector<30x128xf32> to vector<30x64xf32>
    %84 = arith.maximumf %82, %83 : vector<30x64xf32>
    %c0_76 = arith.constant 0 : index
    %c7_77 = arith.constant 7 : index
    %c0_78 = arith.constant 0 : index
    %c0_79 = arith.constant 0 : index
    %85 = vector.load %arg2[%c0_76, %c7_77, %c0_78, %c0_79] : memref<1x30x30x64xf32, #tpu.memory_space<vmem>>, vector<1x1x30x64xf32>
    %86 = vector.shape_cast %85 : vector<1x1x30x64xf32> to vector<30x64xf32>
    %87 = vector.shape_cast %84 : vector<30x64xf32> to vector<1x1x30x64xf32>
    tpu.vector_store %arg2[%c0_76, %c7_77, %c0_78, %c0_79], %87 {strides = array<i32>} : memref<1x30x30x64xf32, #tpu.memory_space<vmem>>, vector<1x1x30x64xf32>,
    %c0_80 = arith.constant 0 : index
    %c16 = arith.constant 16 : index
    %c0_81 = arith.constant 0 : index
    %c0_82 = arith.constant 0 : index
    %88 = vector.load %arg1[%c0_80, %c16, %c0_81, %c0_82] : memref<1x60x30x128xf32, #tpu.memory_space<vmem>>, vector<1x1x30x128xf32>
    %89 = vector.shape_cast %88 : vector<1x1x30x128xf32> to vector<30x128xf32>
    %c0_83 = arith.constant 0 : index
    %c17 = arith.constant 17 : index
    %c0_84 = arith.constant 0 : index
    %c0_85 = arith.constant 0 : index
    %90 = vector.load %arg1[%c0_83, %c17, %c0_84, %c0_85] : memref<1x60x30x128xf32, #tpu.memory_space<vmem>>, vector<1x1x30x128xf32>
    %91 = vector.shape_cast %90 : vector<1x1x30x128xf32> to vector<30x128xf32>
    %92 = arith.maximumf %89, %91 : vector<30x128xf32>
    %93 = vector.extract_strided_slice %92 {offsets = [0, 0], sizes = [30, 64], strides = [1, 1]} : vector<30x128xf32> to vector<30x64xf32>
    %94 = vector.extract_strided_slice %92 {offsets = [0, 64], sizes = [30, 64], strides = [1, 1]} : vector<30x128xf32> to vector<30x64xf32>
    %95 = arith.maximumf %93, %94 : vector<30x64xf32>
    %c0_86 = arith.constant 0 : index
    %c8_87 = arith.constant 8 : index
    %c0_88 = arith.constant 0 : index
    %c0_89 = arith.constant 0 : index
    %96 = vector.load %arg2[%c0_86, %c8_87, %c0_88, %c0_89] : memref<1x30x30x64xf32, #tpu.memory_space<vmem>>, vector<1x1x30x64xf32>
    %97 = vector.shape_cast %96 : vector<1x1x30x64xf32> to vector<30x64xf32>
    %98 = vector.shape_cast %95 : vector<30x64xf32> to vector<1x1x30x64xf32>
    tpu.vector_store %arg2[%c0_86, %c8_87, %c0_88, %c0_89], %98 {strides = array<i32>} : memref<1x30x30x64xf32, #tpu.memory_space<vmem>>, vector<1x1x30x64xf32>,
    %c0_90 = arith.constant 0 : index
    %c18 = arith.constant 18 : index
    %c0_91 = arith.constant 0 : index
    %c0_92 = arith.constant 0 : index
    %99 = vector.load %arg1[%c0_90, %c18, %c0_91, %c0_92] : memref<1x60x30x128xf32, #tpu.memory_space<vmem>>, vector<1x1x30x128xf32>
    %100 = vector.shape_cast %99 : vector<1x1x30x128xf32> to vector<30x128xf32>
    %c0_93 = arith.constant 0 : index
    %c19 = arith.constant 19 : index
    %c0_94 = arith.constant 0 : index
    %c0_95 = arith.constant 0 : index
    %101 = vector.load %arg1[%c0_93, %c19, %c0_94, %c0_95] : memref<1x60x30x128xf32, #tpu.memory_space<vmem>>, vector<1x1x30x128xf32>
    %102 = vector.shape_cast %101 : vector<1x1x30x128xf32> to vector<30x128xf32>
    %103 = arith.maximumf %100, %102 : vector<30x128xf32>
    %104 = vector.extract_strided_slice %103 {offsets = [0, 0], sizes = [30, 64], strides = [1, 1]} : vector<30x128xf32> to vector<30x64xf32>
    %105 = vector.extract_strided_slice %103 {offsets = [0, 64], sizes = [30, 64], strides = [1, 1]} : vector<30x128xf32> to vector<30x64xf32>
    %106 = arith.maximumf %104, %105 : vector<30x64xf32>
    %c0_96 = arith.constant 0 : index
    %c9_97 = arith.constant 9 : index
    %c0_98 = arith.constant 0 : index
    %c0_99 = arith.constant 0 : index
    %107 = vector.load %arg2[%c0_96, %c9_97, %c0_98, %c0_99] : memref<1x30x30x64xf32, #tpu.memory_space<vmem>>, vector<1x1x30x64xf32>
    %108 = vector.shape_cast %107 : vector<1x1x30x64xf32> to vector<30x64xf32>
    %109 = vector.shape_cast %106 : vector<30x64xf32> to vector<1x1x30x64xf32>
    tpu.vector_store %arg2[%c0_96, %c9_97, %c0_98, %c0_99], %109 {strides = array<i32>} : memref<1x30x30x64xf32, #tpu.memory_space<vmem>>, vector<1x1x30x64xf32>,
    %c0_100 = arith.constant 0 : index
    %c20 = arith.constant 20 : index
    %c0_101 = arith.constant 0 : index
    %c0_102 = arith.constant 0 : index
    %110 = vector.load %arg1[%c0_100, %c20, %c0_101, %c0_102] : memref<1x60x30x128xf32, #tpu.memory_space<vmem>>, vector<1x1x30x128xf32>
    %111 = vector.shape_cast %110 : vector<1x1x30x128xf32> to vector<30x128xf32>
    %c0_103 = arith.constant 0 : index
    %c21 = arith.constant 21 : index
    %c0_104 = arith.constant 0 : index
    %c0_105 = arith.constant 0 : index
    %112 = vector.load %arg1[%c0_103, %c21, %c0_104, %c0_105] : memref<1x60x30x128xf32, #tpu.memory_space<vmem>>, vector<1x1x30x128xf32>
    %113 = vector.shape_cast %112 : vector<1x1x30x128xf32> to vector<30x128xf32>
    %114 = arith.maximumf %111, %113 : vector<30x128xf32>
    %115 = vector.extract_strided_slice %114 {offsets = [0, 0], sizes = [30, 64], strides = [1, 1]} : vector<30x128xf32> to vector<30x64xf32>
    %116 = vector.extract_strided_slice %114 {offsets = [0, 64], sizes = [30, 64], strides = [1, 1]} : vector<30x128xf32> to vector<30x64xf32>
    %117 = arith.maximumf %115, %116 : vector<30x64xf32>
    %c0_106 = arith.constant 0 : index
    %c10_107 = arith.constant 10 : index
    %c0_108 = arith.constant 0 : index
    %c0_109 = arith.constant 0 : index
    %118 = vector.load %arg2[%c0_106, %c10_107, %c0_108, %c0_109] : memref<1x30x30x64xf32, #tpu.memory_space<vmem>>, vector<1x1x30x64xf32>
    %119 = vector.shape_cast %118 : vector<1x1x30x64xf32> to vector<30x64xf32>
    %120 = vector.shape_cast %117 : vector<30x64xf32> to vector<1x1x30x64xf32>
    tpu.vector_store %arg2[%c0_106, %c10_107, %c0_108, %c0_109], %120 {strides = array<i32>} : memref<1x30x30x64xf32, #tpu.memory_space<vmem>>, vector<1x1x30x64xf32>,
    %c0_110 = arith.constant 0 : index
    %c22 = arith.constant 22 : index
    %c0_111 = arith.constant 0 : index
    %c0_112 = arith.constant 0 : index
    %121 = vector.load %arg1[%c0_110, %c22, %c0_111, %c0_112] : memref<1x60x30x128xf32, #tpu.memory_space<vmem>>, vector<1x1x30x128xf32>
    %122 = vector.shape_cast %121 : vector<1x1x30x128xf32> to vector<30x128xf32>
    %c0_113 = arith.constant 0 : index
    %c23 = arith.constant 23 : index
    %c0_114 = arith.constant 0 : index
    %c0_115 = arith.constant 0 : index
    %123 = vector.load %arg1[%c0_113, %c23, %c0_114, %c0_115] : memref<1x60x30x128xf32, #tpu.memory_space<vmem>>, vector<1x1x30x128xf32>
    %124 = vector.shape_cast %123 : vector<1x1x30x128xf32> to vector<30x128xf32>
    %125 = arith.maximumf %122, %124 : vector<30x128xf32>
    %126 = vector.extract_strided_slice %125 {offsets = [0, 0], sizes = [30, 64], strides = [1, 1]} : vector<30x128xf32> to vector<30x64xf32>
    %127 = vector.extract_strided_slice %125 {offsets = [0, 64], sizes = [30, 64], strides = [1, 1]} : vector<30x128xf32> to vector<30x64xf32>
    %128 = arith.maximumf %126, %127 : vector<30x64xf32>
    %c0_116 = arith.constant 0 : index
    %c11_117 = arith.constant 11 : index
    %c0_118 = arith.constant 0 : index
    %c0_119 = arith.constant 0 : index
    %129 = vector.load %arg2[%c0_116, %c11_117, %c0_118, %c0_119] : memref<1x30x30x64xf32, #tpu.memory_space<vmem>>, vector<1x1x30x64xf32>
    %130 = vector.shape_cast %129 : vector<1x1x30x64xf32> to vector<30x64xf32>
    %131 = vector.shape_cast %128 : vector<30x64xf32> to vector<1x1x30x64xf32>
    tpu.vector_store %arg2[%c0_116, %c11_117, %c0_118, %c0_119], %131 {strides = array<i32>} : memref<1x30x30x64xf32, #tpu.memory_space<vmem>>, vector<1x1x30x64xf32>,
    %c0_120 = arith.constant 0 : index
    %c24 = arith.constant 24 : index
    %c0_121 = arith.constant 0 : index
    %c0_122 = arith.constant 0 : index
    %132 = vector.load %arg1[%c0_120, %c24, %c0_121, %c0_122] : memref<1x60x30x128xf32, #tpu.memory_space<vmem>>, vector<1x1x30x128xf32>
    %133 = vector.shape_cast %132 : vector<1x1x30x128xf32> to vector<30x128xf32>
    %c0_123 = arith.constant 0 : index
    %c25 = arith.constant 25 : index
    %c0_124 = arith.constant 0 : index
    %c0_125 = arith.constant 0 : index
    %134 = vector.load %arg1[%c0_123, %c25, %c0_124, %c0_125] : memref<1x60x30x128xf32, #tpu.memory_space<vmem>>, vector<1x1x30x128xf32>
    %135 = vector.shape_cast %134 : vector<1x1x30x128xf32> to vector<30x128xf32>
    %136 = arith.maximumf %133, %135 : vector<30x128xf32>
    %137 = vector.extract_strided_slice %136 {offsets = [0, 0], sizes = [30, 64], strides = [1, 1]} : vector<30x128xf32> to vector<30x64xf32>
    %138 = vector.extract_strided_slice %136 {offsets = [0, 64], sizes = [30, 64], strides = [1, 1]} : vector<30x128xf32> to vector<30x64xf32>
    %139 = arith.maximumf %137, %138 : vector<30x64xf32>
    %c0_126 = arith.constant 0 : index
    %c12_127 = arith.constant 12 : index
    %c0_128 = arith.constant 0 : index
    %c0_129 = arith.constant 0 : index
    %140 = vector.load %arg2[%c0_126, %c12_127, %c0_128, %c0_129] : memref<1x30x30x64xf32, #tpu.memory_space<vmem>>, vector<1x1x30x64xf32>
    %141 = vector.shape_cast %140 : vector<1x1x30x64xf32> to vector<30x64xf32>
    %142 = vector.shape_cast %139 : vector<30x64xf32> to vector<1x1x30x64xf32>
    tpu.vector_store %arg2[%c0_126, %c12_127, %c0_128, %c0_129], %142 {strides = array<i32>} : memref<1x30x30x64xf32, #tpu.memory_space<vmem>>, vector<1x1x30x64xf32>,
    %c0_130 = arith.constant 0 : index
    %c26 = arith.constant 26 : index
    %c0_131 = arith.constant 0 : index
    %c0_132 = arith.constant 0 : index
    %143 = vector.load %arg1[%c0_130, %c26, %c0_131, %c0_132] : memref<1x60x30x128xf32, #tpu.memory_space<vmem>>, vector<1x1x30x128xf32>
    %144 = vector.shape_cast %143 : vector<1x1x30x128xf32> to vector<30x128xf32>
    %c0_133 = arith.constant 0 : index
    %c27 = arith.constant 27 : index
    %c0_134 = arith.constant 0 : index
    %c0_135 = arith.constant 0 : index
    %145 = vector.load %arg1[%c0_133, %c27, %c0_134, %c0_135] : memref<1x60x30x128xf32, #tpu.memory_space<vmem>>, vector<1x1x30x128xf32>
    %146 = vector.shape_cast %145 : vector<1x1x30x128xf32> to vector<30x128xf32>
    %147 = arith.maximumf %144, %146 : vector<30x128xf32>
    %148 = vector.extract_strided_slice %147 {offsets = [0, 0], sizes = [30, 64], strides = [1, 1]} : vector<30x128xf32> to vector<30x64xf32>
    %149 = vector.extract_strided_slice %147 {offsets = [0, 64], sizes = [30, 64], strides = [1, 1]} : vector<30x128xf32> to vector<30x64xf32>
    %150 = arith.maximumf %148, %149 : vector<30x64xf32>
    %c0_136 = arith.constant 0 : index
    %c13_137 = arith.constant 13 : index
    %c0_138 = arith.constant 0 : index
    %c0_139 = arith.constant 0 : index
    %151 = vector.load %arg2[%c0_136, %c13_137, %c0_138, %c0_139] : memref<1x30x30x64xf32, #tpu.memory_space<vmem>>, vector<1x1x30x64xf32>
    %152 = vector.shape_cast %151 : vector<1x1x30x64xf32> to vector<30x64xf32>
    %153 = vector.shape_cast %150 : vector<30x64xf32> to vector<1x1x30x64xf32>
    tpu.vector_store %arg2[%c0_136, %c13_137, %c0_138, %c0_139], %153 {strides = array<i32>} : memref<1x30x30x64xf32, #tpu.memory_space<vmem>>, vector<1x1x30x64xf32>,
    %c0_140 = arith.constant 0 : index
    %c28 = arith.constant 28 : index
    %c0_141 = arith.constant 0 : index
    %c0_142 = arith.constant 0 : index
    %154 = vector.load %arg1[%c0_140, %c28, %c0_141, %c0_142] : memref<1x60x30x128xf32, #tpu.memory_space<vmem>>, vector<1x1x30x128xf32>
    %155 = vector.shape_cast %154 : vector<1x1x30x128xf32> to vector<30x128xf32>
    %c0_143 = arith.constant 0 : index
    %c29 = arith.constant 29 : index
    %c0_144 = arith.constant 0 : index
    %c0_145 = arith.constant 0 : index
    %156 = vector.load %arg1[%c0_143, %c29, %c0_144, %c0_145] : memref<1x60x30x128xf32, #tpu.memory_space<vmem>>, vector<1x1x30x128xf32>
    %157 = vector.shape_cast %156 : vector<1x1x30x128xf32> to vector<30x128xf32>
    %158 = arith.maximumf %155, %157 : vector<30x128xf32>
    %159 = vector.extract_strided_slice %158 {offsets = [0, 0], sizes = [30, 64], strides = [1, 1]} : vector<30x128xf32> to vector<30x64xf32>
    %160 = vector.extract_strided_slice %158 {offsets = [0, 64], sizes = [30, 64], strides = [1, 1]} : vector<30x128xf32> to vector<30x64xf32>
    %161 = arith.maximumf %159, %160 : vector<30x64xf32>
    %c0_146 = arith.constant 0 : index
    %c14_147 = arith.constant 14 : index
    %c0_148 = arith.constant 0 : index
    %c0_149 = arith.constant 0 : index
    %162 = vector.load %arg2[%c0_146, %c14_147, %c0_148, %c0_149] : memref<1x30x30x64xf32, #tpu.memory_space<vmem>>, vector<1x1x30x64xf32>
    %163 = vector.shape_cast %162 : vector<1x1x30x64xf32> to vector<30x64xf32>
    %164 = vector.shape_cast %161 : vector<30x64xf32> to vector<1x1x30x64xf32>
    tpu.vector_store %arg2[%c0_146, %c14_147, %c0_148, %c0_149], %164 {strides = array<i32>} : memref<1x30x30x64xf32, #tpu.memory_space<vmem>>, vector<1x1x30x64xf32>,
    %c0_150 = arith.constant 0 : index
    %c30 = arith.constant 30 : index
    %c0_151 = arith.constant 0 : index
    %c0_152 = arith.constant 0 : index
    %165 = vector.load %arg1[%c0_150, %c30, %c0_151, %c0_152] : memref<1x60x30x128xf32, #tpu.memory_space<vmem>>, vector<1x1x30x128xf32>
    %166 = vector.shape_cast %165 : vector<1x1x30x128xf32> to vector<30x128xf32>
    %c0_153 = arith.constant 0 : index
    %c31 = arith.constant 31 : index
    %c0_154 = arith.constant 0 : index
    %c0_155 = arith.constant 0 : index
    %167 = vector.load %arg1[%c0_153, %c31, %c0_154, %c0_155] : memref<1x60x30x128xf32, #tpu.memory_space<vmem>>, vector<1x1x30x128xf32>
    %168 = vector.shape_cast %167 : vector<1x1x30x128xf32> to vector<30x128xf32>
    %169 = arith.maximumf %166, %168 : vector<30x128xf32>
    %170 = vector.extract_strided_slice %169 {offsets = [0, 0], sizes = [30, 64], strides = [1, 1]} : vector<30x128xf32> to vector<30x64xf32>
    %171 = vector.extract_strided_slice %169 {offsets = [0, 64], sizes = [30, 64], strides = [1, 1]} : vector<30x128xf32> to vector<30x64xf32>
    %172 = arith.maximumf %170, %171 : vector<30x64xf32>
    %c0_156 = arith.constant 0 : index
    %c15_157 = arith.constant 15 : index
    %c0_158 = arith.constant 0 : index
    %c0_159 = arith.constant 0 : index
    %173 = vector.load %arg2[%c0_156, %c15_157, %c0_158, %c0_159] : memref<1x30x30x64xf32, #tpu.memory_space<vmem>>, vector<1x1x30x64xf32>
    %174 = vector.shape_cast %173 : vector<1x1x30x64xf32> to vector<30x64xf32>
    %175 = vector.shape_cast %172 : vector<30x64xf32> to vector<1x1x30x64xf32>
    tpu.vector_store %arg2[%c0_156, %c15_157, %c0_158, %c0_159], %175 {strides = array<i32>} : memref<1x30x30x64xf32, #tpu.memory_space<vmem>>, vector<1x1x30x64xf32>,
    %c0_160 = arith.constant 0 : index
    %c32 = arith.constant 32 : index
    %c0_161 = arith.constant 0 : index
    %c0_162 = arith.constant 0 : index
    %176 = vector.load %arg1[%c0_160, %c32, %c0_161, %c0_162] : memref<1x60x30x128xf32, #tpu.memory_space<vmem>>, vector<1x1x30x128xf32>
    %177 = vector.shape_cast %176 : vector<1x1x30x128xf32> to vector<30x128xf32>
    %c0_163 = arith.constant 0 : index
    %c33 = arith.constant 33 : index
    %c0_164 = arith.constant 0 : index
    %c0_165 = arith.constant 0 : index
    %178 = vector.load %arg1[%c0_163, %c33, %c0_164, %c0_165] : memref<1x60x30x128xf32, #tpu.memory_space<vmem>>, vector<1x1x30x128xf32>
    %179 = vector.shape_cast %178 : vector<1x1x30x128xf32> to vector<30x128xf32>
    %180 = arith.maximumf %177, %179 : vector<30x128xf32>
    %181 = vector.extract_strided_slice %180 {offsets = [0, 0], sizes = [30, 64], strides = [1, 1]} : vector<30x128xf32> to vector<30x64xf32>
    %182 = vector.extract_strided_slice %180 {offsets = [0, 64], sizes = [30, 64], strides = [1, 1]} : vector<30x128xf32> to vector<30x64xf32>
    %183 = arith.maximumf %181, %182 : vector<30x64xf32>
    %c0_166 = arith.constant 0 : index
    %c16_167 = arith.constant 16 : index
    %c0_168 = arith.constant 0 : index
    %c0_169 = arith.constant 0 : index
    %184 = vector.load %arg2[%c0_166, %c16_167, %c0_168, %c0_169] : memref<1x30x30x64xf32, #tpu.memory_space<vmem>>, vector<1x1x30x64xf32>
    %185 = vector.shape_cast %184 : vector<1x1x30x64xf32> to vector<30x64xf32>
    %186 = vector.shape_cast %183 : vector<30x64xf32> to vector<1x1x30x64xf32>
    tpu.vector_store %arg2[%c0_166, %c16_167, %c0_168, %c0_169], %186 {strides = array<i32>} : memref<1x30x30x64xf32, #tpu.memory_space<vmem>>, vector<1x1x30x64xf32>,
    %c0_170 = arith.constant 0 : index
    %c34 = arith.constant 34 : index
    %c0_171 = arith.constant 0 : index
    %c0_172 = arith.constant 0 : index
    %187 = vector.load %arg1[%c0_170, %c34, %c0_171, %c0_172] : memref<1x60x30x128xf32, #tpu.memory_space<vmem>>, vector<1x1x30x128xf32>
    %188 = vector.shape_cast %187 : vector<1x1x30x128xf32> to vector<30x128xf32>
    %c0_173 = arith.constant 0 : index
    %c35 = arith.constant 35 : index
    %c0_174 = arith.constant 0 : index
    %c0_175 = arith.constant 0 : index
    %189 = vector.load %arg1[%c0_173, %c35, %c0_174, %c0_175] : memref<1x60x30x128xf32, #tpu.memory_space<vmem>>, vector<1x1x30x128xf32>
    %190 = vector.shape_cast %189 : vector<1x1x30x128xf32> to vector<30x128xf32>
    %191 = arith.maximumf %188, %190 : vector<30x128xf32>
    %192 = vector.extract_strided_slice %191 {offsets = [0, 0], sizes = [30, 64], strides = [1, 1]} : vector<30x128xf32> to vector<30x64xf32>
    %193 = vector.extract_strided_slice %191 {offsets = [0, 64], sizes = [30, 64], strides = [1, 1]} : vector<30x128xf32> to vector<30x64xf32>
    %194 = arith.maximumf %192, %193 : vector<30x64xf32>
    %c0_176 = arith.constant 0 : index
    %c17_177 = arith.constant 17 : index
    %c0_178 = arith.constant 0 : index
    %c0_179 = arith.constant 0 : index
    %195 = vector.load %arg2[%c0_176, %c17_177, %c0_178, %c0_179] : memref<1x30x30x64xf32, #tpu.memory_space<vmem>>, vector<1x1x30x64xf32>
    %196 = vector.shape_cast %195 : vector<1x1x30x64xf32> to vector<30x64xf32>
    %197 = vector.shape_cast %194 : vector<30x64xf32> to vector<1x1x30x64xf32>
    tpu.vector_store %arg2[%c0_176, %c17_177, %c0_178, %c0_179], %197 {strides = array<i32>} : memref<1x30x30x64xf32, #tpu.memory_space<vmem>>, vector<1x1x30x64xf32>,
    %c0_180 = arith.constant 0 : index
    %c36 = arith.constant 36 : index
    %c0_181 = arith.constant 0 : index
    %c0_182 = arith.constant 0 : index
    %198 = vector.load %arg1[%c0_180, %c36, %c0_181, %c0_182] : memref<1x60x30x128xf32, #tpu.memory_space<vmem>>, vector<1x1x30x128xf32>
    %199 = vector.shape_cast %198 : vector<1x1x30x128xf32> to vector<30x128xf32>
    %c0_183 = arith.constant 0 : index
    %c37 = arith.constant 37 : index
    %c0_184 = arith.constant 0 : index
    %c0_185 = arith.constant 0 : index
    %200 = vector.load %arg1[%c0_183, %c37, %c0_184, %c0_185] : memref<1x60x30x128xf32, #tpu.memory_space<vmem>>, vector<1x1x30x128xf32>
    %201 = vector.shape_cast %200 : vector<1x1x30x128xf32> to vector<30x128xf32>
    %202 = arith.maximumf %199, %201 : vector<30x128xf32>
    %203 = vector.extract_strided_slice %202 {offsets = [0, 0], sizes = [30, 64], strides = [1, 1]} : vector<30x128xf32> to vector<30x64xf32>
    %204 = vector.extract_strided_slice %202 {offsets = [0, 64], sizes = [30, 64], strides = [1, 1]} : vector<30x128xf32> to vector<30x64xf32>
    %205 = arith.maximumf %203, %204 : vector<30x64xf32>
    %c0_186 = arith.constant 0 : index
    %c18_187 = arith.constant 18 : index
    %c0_188 = arith.constant 0 : index
    %c0_189 = arith.constant 0 : index
    %206 = vector.load %arg2[%c0_186, %c18_187, %c0_188, %c0_189] : memref<1x30x30x64xf32, #tpu.memory_space<vmem>>, vector<1x1x30x64xf32>
    %207 = vector.shape_cast %206 : vector<1x1x30x64xf32> to vector<30x64xf32>
    %208 = vector.shape_cast %205 : vector<30x64xf32> to vector<1x1x30x64xf32>
    tpu.vector_store %arg2[%c0_186, %c18_187, %c0_188, %c0_189], %208 {strides = array<i32>} : memref<1x30x30x64xf32, #tpu.memory_space<vmem>>, vector<1x1x30x64xf32>,
    %c0_190 = arith.constant 0 : index
    %c38 = arith.constant 38 : index
    %c0_191 = arith.constant 0 : index
    %c0_192 = arith.constant 0 : index
    %209 = vector.load %arg1[%c0_190, %c38, %c0_191, %c0_192] : memref<1x60x30x128xf32, #tpu.memory_space<vmem>>, vector<1x1x30x128xf32>
    %210 = vector.shape_cast %209 : vector<1x1x30x128xf32> to vector<30x128xf32>
    %c0_193 = arith.constant 0 : index
    %c39 = arith.constant 39 : index
    %c0_194 = arith.constant 0 : index
    %c0_195 = arith.constant 0 : index
    %211 = vector.load %arg1[%c0_193, %c39, %c0_194, %c0_195] : memref<1x60x30x128xf32, #tpu.memory_space<vmem>>, vector<1x1x30x128xf32>
    %212 = vector.shape_cast %211 : vector<1x1x30x128xf32> to vector<30x128xf32>
    %213 = arith.maximumf %210, %212 : vector<30x128xf32>
    %214 = vector.extract_strided_slice %213 {offsets = [0, 0], sizes = [30, 64], strides = [1, 1]} : vector<30x128xf32> to vector<30x64xf32>
    %215 = vector.extract_strided_slice %213 {offsets = [0, 64], sizes = [30, 64], strides = [1, 1]} : vector<30x128xf32> to vector<30x64xf32>
    %216 = arith.maximumf %214, %215 : vector<30x64xf32>
    %c0_196 = arith.constant 0 : index
    %c19_197 = arith.constant 19 : index
    %c0_198 = arith.constant 0 : index
    %c0_199 = arith.constant 0 : index
    %217 = vector.load %arg2[%c0_196, %c19_197, %c0_198, %c0_199] : memref<1x30x30x64xf32, #tpu.memory_space<vmem>>, vector<1x1x30x64xf32>
    %218 = vector.shape_cast %217 : vector<1x1x30x64xf32> to vector<30x64xf32>
    %219 = vector.shape_cast %216 : vector<30x64xf32> to vector<1x1x30x64xf32>
    tpu.vector_store %arg2[%c0_196, %c19_197, %c0_198, %c0_199], %219 {strides = array<i32>} : memref<1x30x30x64xf32, #tpu.memory_space<vmem>>, vector<1x1x30x64xf32>,
    %c0_200 = arith.constant 0 : index
    %c40 = arith.constant 40 : index
    %c0_201 = arith.constant 0 : index
    %c0_202 = arith.constant 0 : index
    %220 = vector.load %arg1[%c0_200, %c40, %c0_201, %c0_202] : memref<1x60x30x128xf32, #tpu.memory_space<vmem>>, vector<1x1x30x128xf32>
    %221 = vector.shape_cast %220 : vector<1x1x30x128xf32> to vector<30x128xf32>
    %c0_203 = arith.constant 0 : index
    %c41 = arith.constant 41 : index
    %c0_204 = arith.constant 0 : index
    %c0_205 = arith.constant 0 : index
    %222 = vector.load %arg1[%c0_203, %c41, %c0_204, %c0_205] : memref<1x60x30x128xf32, #tpu.memory_space<vmem>>, vector<1x1x30x128xf32>
    %223 = vector.shape_cast %222 : vector<1x1x30x128xf32> to vector<30x128xf32>
    %224 = arith.maximumf %221, %223 : vector<30x128xf32>
    %225 = vector.extract_strided_slice %224 {offsets = [0, 0], sizes = [30, 64], strides = [1, 1]} : vector<30x128xf32> to vector<30x64xf32>
    %226 = vector.extract_strided_slice %224 {offsets = [0, 64], sizes = [30, 64], strides = [1, 1]} : vector<30x128xf32> to vector<30x64xf32>
    %227 = arith.maximumf %225, %226 : vector<30x64xf32>
    %c0_206 = arith.constant 0 : index
    %c20_207 = arith.constant 20 : index
    %c0_208 = arith.constant 0 : index
    %c0_209 = arith.constant 0 : index
    %228 = vector.load %arg2[%c0_206, %c20_207, %c0_208, %c0_209] : memref<1x30x30x64xf32, #tpu.memory_space<vmem>>, vector<1x1x30x64xf32>
    %229 = vector.shape_cast %228 : vector<1x1x30x64xf32> to vector<30x64xf32>
    %230 = vector.shape_cast %227 : vector<30x64xf32> to vector<1x1x30x64xf32>
    tpu.vector_store %arg2[%c0_206, %c20_207, %c0_208, %c0_209], %230 {strides = array<i32>} : memref<1x30x30x64xf32, #tpu.memory_space<vmem>>, vector<1x1x30x64xf32>,
    %c0_210 = arith.constant 0 : index
    %c42 = arith.constant 42 : index
    %c0_211 = arith.constant 0 : index
    %c0_212 = arith.constant 0 : index
    %231 = vector.load %arg1[%c0_210, %c42, %c0_211, %c0_212] : memref<1x60x30x128xf32, #tpu.memory_space<vmem>>, vector<1x1x30x128xf32>
    %232 = vector.shape_cast %231 : vector<1x1x30x128xf32> to vector<30x128xf32>
    %c0_213 = arith.constant 0 : index
    %c43 = arith.constant 43 : index
    %c0_214 = arith.constant 0 : index
    %c0_215 = arith.constant 0 : index
    %233 = vector.load %arg1[%c0_213, %c43, %c0_214, %c0_215] : memref<1x60x30x128xf32, #tpu.memory_space<vmem>>, vector<1x1x30x128xf32>
    %234 = vector.shape_cast %233 : vector<1x1x30x128xf32> to vector<30x128xf32>
    %235 = arith.maximumf %232, %234 : vector<30x128xf32>
    %236 = vector.extract_strided_slice %235 {offsets = [0, 0], sizes = [30, 64], strides = [1, 1]} : vector<30x128xf32> to vector<30x64xf32>
    %237 = vector.extract_strided_slice %235 {offsets = [0, 64], sizes = [30, 64], strides = [1, 1]} : vector<30x128xf32> to vector<30x64xf32>
    %238 = arith.maximumf %236, %237 : vector<30x64xf32>
    %c0_216 = arith.constant 0 : index
    %c21_217 = arith.constant 21 : index
    %c0_218 = arith.constant 0 : index
    %c0_219 = arith.constant 0 : index
    %239 = vector.load %arg2[%c0_216, %c21_217, %c0_218, %c0_219] : memref<1x30x30x64xf32, #tpu.memory_space<vmem>>, vector<1x1x30x64xf32>
    %240 = vector.shape_cast %239 : vector<1x1x30x64xf32> to vector<30x64xf32>
    %241 = vector.shape_cast %238 : vector<30x64xf32> to vector<1x1x30x64xf32>
    tpu.vector_store %arg2[%c0_216, %c21_217, %c0_218, %c0_219], %241 {strides = array<i32>} : memref<1x30x30x64xf32, #tpu.memory_space<vmem>>, vector<1x1x30x64xf32>,
    %c0_220 = arith.constant 0 : index
    %c44 = arith.constant 44 : index
    %c0_221 = arith.constant 0 : index
    %c0_222 = arith.constant 0 : index
    %242 = vector.load %arg1[%c0_220, %c44, %c0_221, %c0_222] : memref<1x60x30x128xf32, #tpu.memory_space<vmem>>, vector<1x1x30x128xf32>
    %243 = vector.shape_cast %242 : vector<1x1x30x128xf32> to vector<30x128xf32>
    %c0_223 = arith.constant 0 : index
    %c45 = arith.constant 45 : index
    %c0_224 = arith.constant 0 : index
    %c0_225 = arith.constant 0 : index
    %244 = vector.load %arg1[%c0_223, %c45, %c0_224, %c0_225] : memref<1x60x30x128xf32, #tpu.memory_space<vmem>>, vector<1x1x30x128xf32>
    %245 = vector.shape_cast %244 : vector<1x1x30x128xf32> to vector<30x128xf32>
    %246 = arith.maximumf %243, %245 : vector<30x128xf32>
    %247 = vector.extract_strided_slice %246 {offsets = [0, 0], sizes = [30, 64], strides = [1, 1]} : vector<30x128xf32> to vector<30x64xf32>
    %248 = vector.extract_strided_slice %246 {offsets = [0, 64], sizes = [30, 64], strides = [1, 1]} : vector<30x128xf32> to vector<30x64xf32>
    %249 = arith.maximumf %247, %248 : vector<30x64xf32>
    %c0_226 = arith.constant 0 : index
    %c22_227 = arith.constant 22 : index
    %c0_228 = arith.constant 0 : index
    %c0_229 = arith.constant 0 : index
    %250 = vector.load %arg2[%c0_226, %c22_227, %c0_228, %c0_229] : memref<1x30x30x64xf32, #tpu.memory_space<vmem>>, vector<1x1x30x64xf32>
    %251 = vector.shape_cast %250 : vector<1x1x30x64xf32> to vector<30x64xf32>
    %252 = vector.shape_cast %249 : vector<30x64xf32> to vector<1x1x30x64xf32>
    tpu.vector_store %arg2[%c0_226, %c22_227, %c0_228, %c0_229], %252 {strides = array<i32>} : memref<1x30x30x64xf32, #tpu.memory_space<vmem>>, vector<1x1x30x64xf32>,
    %c0_230 = arith.constant 0 : index
    %c46 = arith.constant 46 : index
    %c0_231 = arith.constant 0 : index
    %c0_232 = arith.constant 0 : index
    %253 = vector.load %arg1[%c0_230, %c46, %c0_231, %c0_232] : memref<1x60x30x128xf32, #tpu.memory_space<vmem>>, vector<1x1x30x128xf32>
    %254 = vector.shape_cast %253 : vector<1x1x30x128xf32> to vector<30x128xf32>
    %c0_233 = arith.constant 0 : index
    %c47 = arith.constant 47 : index
    %c0_234 = arith.constant 0 : index
    %c0_235 = arith.constant 0 : index
    %255 = vector.load %arg1[%c0_233, %c47, %c0_234, %c0_235] : memref<1x60x30x128xf32, #tpu.memory_space<vmem>>, vector<1x1x30x128xf32>
    %256 = vector.shape_cast %255 : vector<1x1x30x128xf32> to vector<30x128xf32>
    %257 = arith.maximumf %254, %256 : vector<30x128xf32>
    %258 = vector.extract_strided_slice %257 {offsets = [0, 0], sizes = [30, 64], strides = [1, 1]} : vector<30x128xf32> to vector<30x64xf32>
    %259 = vector.extract_strided_slice %257 {offsets = [0, 64], sizes = [30, 64], strides = [1, 1]} : vector<30x128xf32> to vector<30x64xf32>
    %260 = arith.maximumf %258, %259 : vector<30x64xf32>
    %c0_236 = arith.constant 0 : index
    %c23_237 = arith.constant 23 : index
    %c0_238 = arith.constant 0 : index
    %c0_239 = arith.constant 0 : index
    %261 = vector.load %arg2[%c0_236, %c23_237, %c0_238, %c0_239] : memref<1x30x30x64xf32, #tpu.memory_space<vmem>>, vector<1x1x30x64xf32>
    %262 = vector.shape_cast %261 : vector<1x1x30x64xf32> to vector<30x64xf32>
    %263 = vector.shape_cast %260 : vector<30x64xf32> to vector<1x1x30x64xf32>
    tpu.vector_store %arg2[%c0_236, %c23_237, %c0_238, %c0_239], %263 {strides = array<i32>} : memref<1x30x30x64xf32, #tpu.memory_space<vmem>>, vector<1x1x30x64xf32>,
    %c0_240 = arith.constant 0 : index
    %c48 = arith.constant 48 : index
    %c0_241 = arith.constant 0 : index
    %c0_242 = arith.constant 0 : index
    %264 = vector.load %arg1[%c0_240, %c48, %c0_241, %c0_242] : memref<1x60x30x128xf32, #tpu.memory_space<vmem>>, vector<1x1x30x128xf32>
    %265 = vector.shape_cast %264 : vector<1x1x30x128xf32> to vector<30x128xf32>
    %c0_243 = arith.constant 0 : index
    %c49 = arith.constant 49 : index
    %c0_244 = arith.constant 0 : index
    %c0_245 = arith.constant 0 : index
    %266 = vector.load %arg1[%c0_243, %c49, %c0_244, %c0_245] : memref<1x60x30x128xf32, #tpu.memory_space<vmem>>, vector<1x1x30x128xf32>
    %267 = vector.shape_cast %266 : vector<1x1x30x128xf32> to vector<30x128xf32>
    %268 = arith.maximumf %265, %267 : vector<30x128xf32>
    %269 = vector.extract_strided_slice %268 {offsets = [0, 0], sizes = [30, 64], strides = [1, 1]} : vector<30x128xf32> to vector<30x64xf32>
    %270 = vector.extract_strided_slice %268 {offsets = [0, 64], sizes = [30, 64], strides = [1, 1]} : vector<30x128xf32> to vector<30x64xf32>
    %271 = arith.maximumf %269, %270 : vector<30x64xf32>
    %c0_246 = arith.constant 0 : index
    %c24_247 = arith.constant 24 : index
    %c0_248 = arith.constant 0 : index
    %c0_249 = arith.constant 0 : index
    %272 = vector.load %arg2[%c0_246, %c24_247, %c0_248, %c0_249] : memref<1x30x30x64xf32, #tpu.memory_space<vmem>>, vector<1x1x30x64xf32>
    %273 = vector.shape_cast %272 : vector<1x1x30x64xf32> to vector<30x64xf32>
    %274 = vector.shape_cast %271 : vector<30x64xf32> to vector<1x1x30x64xf32>
    tpu.vector_store %arg2[%c0_246, %c24_247, %c0_248, %c0_249], %274 {strides = array<i32>} : memref<1x30x30x64xf32, #tpu.memory_space<vmem>>, vector<1x1x30x64xf32>,
    %c0_250 = arith.constant 0 : index
    %c50 = arith.constant 50 : index
    %c0_251 = arith.constant 0 : index
    %c0_252 = arith.constant 0 : index
    %275 = vector.load %arg1[%c0_250, %c50, %c0_251, %c0_252] : memref<1x60x30x128xf32, #tpu.memory_space<vmem>>, vector<1x1x30x128xf32>
    %276 = vector.shape_cast %275 : vector<1x1x30x128xf32> to vector<30x128xf32>
    %c0_253 = arith.constant 0 : index
    %c51 = arith.constant 51 : index
    %c0_254 = arith.constant 0 : index
    %c0_255 = arith.constant 0 : index
    %277 = vector.load %arg1[%c0_253, %c51, %c0_254, %c0_255] : memref<1x60x30x128xf32, #tpu.memory_space<vmem>>, vector<1x1x30x128xf32>
    %278 = vector.shape_cast %277 : vector<1x1x30x128xf32> to vector<30x128xf32>
    %279 = arith.maximumf %276, %278 : vector<30x128xf32>
    %280 = vector.extract_strided_slice %279 {offsets = [0, 0], sizes = [30, 64], strides = [1, 1]} : vector<30x128xf32> to vector<30x64xf32>
    %281 = vector.extract_strided_slice %279 {offsets = [0, 64], sizes = [30, 64], strides = [1, 1]} : vector<30x128xf32> to vector<30x64xf32>
    %282 = arith.maximumf %280, %281 : vector<30x64xf32>
    %c0_256 = arith.constant 0 : index
    %c25_257 = arith.constant 25 : index
    %c0_258 = arith.constant 0 : index
    %c0_259 = arith.constant 0 : index
    %283 = vector.load %arg2[%c0_256, %c25_257, %c0_258, %c0_259] : memref<1x30x30x64xf32, #tpu.memory_space<vmem>>, vector<1x1x30x64xf32>
    %284 = vector.shape_cast %283 : vector<1x1x30x64xf32> to vector<30x64xf32>
    %285 = vector.shape_cast %282 : vector<30x64xf32> to vector<1x1x30x64xf32>
    tpu.vector_store %arg2[%c0_256, %c25_257, %c0_258, %c0_259], %285 {strides = array<i32>} : memref<1x30x30x64xf32, #tpu.memory_space<vmem>>, vector<1x1x30x64xf32>,
    %c0_260 = arith.constant 0 : index
    %c52 = arith.constant 52 : index
    %c0_261 = arith.constant 0 : index
    %c0_262 = arith.constant 0 : index
    %286 = vector.load %arg1[%c0_260, %c52, %c0_261, %c0_262] : memref<1x60x30x128xf32, #tpu.memory_space<vmem>>, vector<1x1x30x128xf32>
    %287 = vector.shape_cast %286 : vector<1x1x30x128xf32> to vector<30x128xf32>
    %c0_263 = arith.constant 0 : index
    %c53 = arith.constant 53 : index
    %c0_264 = arith.constant 0 : index
    %c0_265 = arith.constant 0 : index
    %288 = vector.load %arg1[%c0_263, %c53, %c0_264, %c0_265] : memref<1x60x30x128xf32, #tpu.memory_space<vmem>>, vector<1x1x30x128xf32>
    %289 = vector.shape_cast %288 : vector<1x1x30x128xf32> to vector<30x128xf32>
    %290 = arith.maximumf %287, %289 : vector<30x128xf32>
    %291 = vector.extract_strided_slice %290 {offsets = [0, 0], sizes = [30, 64], strides = [1, 1]} : vector<30x128xf32> to vector<30x64xf32>
    %292 = vector.extract_strided_slice %290 {offsets = [0, 64], sizes = [30, 64], strides = [1, 1]} : vector<30x128xf32> to vector<30x64xf32>
    %293 = arith.maximumf %291, %292 : vector<30x64xf32>
    %c0_266 = arith.constant 0 : index
    %c26_267 = arith.constant 26 : index
    %c0_268 = arith.constant 0 : index
    %c0_269 = arith.constant 0 : index
    %294 = vector.load %arg2[%c0_266, %c26_267, %c0_268, %c0_269] : memref<1x30x30x64xf32, #tpu.memory_space<vmem>>, vector<1x1x30x64xf32>
    %295 = vector.shape_cast %294 : vector<1x1x30x64xf32> to vector<30x64xf32>
    %296 = vector.shape_cast %293 : vector<30x64xf32> to vector<1x1x30x64xf32>
    tpu.vector_store %arg2[%c0_266, %c26_267, %c0_268, %c0_269], %296 {strides = array<i32>} : memref<1x30x30x64xf32, #tpu.memory_space<vmem>>, vector<1x1x30x64xf32>,
    %c0_270 = arith.constant 0 : index
    %c54 = arith.constant 54 : index
    %c0_271 = arith.constant 0 : index
    %c0_272 = arith.constant 0 : index
    %297 = vector.load %arg1[%c0_270, %c54, %c0_271, %c0_272] : memref<1x60x30x128xf32, #tpu.memory_space<vmem>>, vector<1x1x30x128xf32>
    %298 = vector.shape_cast %297 : vector<1x1x30x128xf32> to vector<30x128xf32>
    %c0_273 = arith.constant 0 : index
    %c55 = arith.constant 55 : index
    %c0_274 = arith.constant 0 : index
    %c0_275 = arith.constant 0 : index
    %299 = vector.load %arg1[%c0_273, %c55, %c0_274, %c0_275] : memref<1x60x30x128xf32, #tpu.memory_space<vmem>>, vector<1x1x30x128xf32>
    %300 = vector.shape_cast %299 : vector<1x1x30x128xf32> to vector<30x128xf32>
    %301 = arith.maximumf %298, %300 : vector<30x128xf32>
    %302 = vector.extract_strided_slice %301 {offsets = [0, 0], sizes = [30, 64], strides = [1, 1]} : vector<30x128xf32> to vector<30x64xf32>
    %303 = vector.extract_strided_slice %301 {offsets = [0, 64], sizes = [30, 64], strides = [1, 1]} : vector<30x128xf32> to vector<30x64xf32>
    %304 = arith.maximumf %302, %303 : vector<30x64xf32>
    %c0_276 = arith.constant 0 : index
    %c27_277 = arith.constant 27 : index
    %c0_278 = arith.constant 0 : index
    %c0_279 = arith.constant 0 : index
    %305 = vector.load %arg2[%c0_276, %c27_277, %c0_278, %c0_279] : memref<1x30x30x64xf32, #tpu.memory_space<vmem>>, vector<1x1x30x64xf32>
    %306 = vector.shape_cast %305 : vector<1x1x30x64xf32> to vector<30x64xf32>
    %307 = vector.shape_cast %304 : vector<30x64xf32> to vector<1x1x30x64xf32>
    tpu.vector_store %arg2[%c0_276, %c27_277, %c0_278, %c0_279], %307 {strides = array<i32>} : memref<1x30x30x64xf32, #tpu.memory_space<vmem>>, vector<1x1x30x64xf32>,
    %c0_280 = arith.constant 0 : index
    %c56 = arith.constant 56 : index
    %c0_281 = arith.constant 0 : index
    %c0_282 = arith.constant 0 : index
    %308 = vector.load %arg1[%c0_280, %c56, %c0_281, %c0_282] : memref<1x60x30x128xf32, #tpu.memory_space<vmem>>, vector<1x1x30x128xf32>
    %309 = vector.shape_cast %308 : vector<1x1x30x128xf32> to vector<30x128xf32>
    %c0_283 = arith.constant 0 : index
    %c57 = arith.constant 57 : index
    %c0_284 = arith.constant 0 : index
    %c0_285 = arith.constant 0 : index
    %310 = vector.load %arg1[%c0_283, %c57, %c0_284, %c0_285] : memref<1x60x30x128xf32, #tpu.memory_space<vmem>>, vector<1x1x30x128xf32>
    %311 = vector.shape_cast %310 : vector<1x1x30x128xf32> to vector<30x128xf32>
    %312 = arith.maximumf %309, %311 : vector<30x128xf32>
    %313 = vector.extract_strided_slice %312 {offsets = [0, 0], sizes = [30, 64], strides = [1, 1]} : vector<30x128xf32> to vector<30x64xf32>
    %314 = vector.extract_strided_slice %312 {offsets = [0, 64], sizes = [30, 64], strides = [1, 1]} : vector<30x128xf32> to vector<30x64xf32>
    %315 = arith.maximumf %313, %314 : vector<30x64xf32>
    %c0_286 = arith.constant 0 : index
    %c28_287 = arith.constant 28 : index
    %c0_288 = arith.constant 0 : index
    %c0_289 = arith.constant 0 : index
    %316 = vector.load %arg2[%c0_286, %c28_287, %c0_288, %c0_289] : memref<1x30x30x64xf32, #tpu.memory_space<vmem>>, vector<1x1x30x64xf32>
    %317 = vector.shape_cast %316 : vector<1x1x30x64xf32> to vector<30x64xf32>
    %318 = vector.shape_cast %315 : vector<30x64xf32> to vector<1x1x30x64xf32>
    tpu.vector_store %arg2[%c0_286, %c28_287, %c0_288, %c0_289], %318 {strides = array<i32>} : memref<1x30x30x64xf32, #tpu.memory_space<vmem>>, vector<1x1x30x64xf32>,
    %c0_290 = arith.constant 0 : index
    %c58 = arith.constant 58 : index
    %c0_291 = arith.constant 0 : index
    %c0_292 = arith.constant 0 : index
    %319 = vector.load %arg1[%c0_290, %c58, %c0_291, %c0_292] : memref<1x60x30x128xf32, #tpu.memory_space<vmem>>, vector<1x1x30x128xf32>
    %320 = vector.shape_cast %319 : vector<1x1x30x128xf32> to vector<30x128xf32>
    %c0_293 = arith.constant 0 : index
    %c59 = arith.constant 59 : index
    %c0_294 = arith.constant 0 : index
    %c0_295 = arith.constant 0 : index
    %321 = vector.load %arg1[%c0_293, %c59, %c0_294, %c0_295] : memref<1x60x30x128xf32, #tpu.memory_space<vmem>>, vector<1x1x30x128xf32>
    %322 = vector.shape_cast %321 : vector<1x1x30x128xf32> to vector<30x128xf32>
    %323 = arith.maximumf %320, %322 : vector<30x128xf32>
    %324 = vector.extract_strided_slice %323 {offsets = [0, 0], sizes = [30, 64], strides = [1, 1]} : vector<30x128xf32> to vector<30x64xf32>
    %325 = vector.extract_strided_slice %323 {offsets = [0, 64], sizes = [30, 64], strides = [1, 1]} : vector<30x128xf32> to vector<30x64xf32>
    %326 = arith.maximumf %324, %325 : vector<30x64xf32>
    %c0_296 = arith.constant 0 : index
    %c29_297 = arith.constant 29 : index
    %c0_298 = arith.constant 0 : index
    %c0_299 = arith.constant 0 : index
    %327 = vector.load %arg2[%c0_296, %c29_297, %c0_298, %c0_299] : memref<1x30x30x64xf32, #tpu.memory_space<vmem>>, vector<1x1x30x64xf32>
    %328 = vector.shape_cast %327 : vector<1x1x30x64xf32> to vector<30x64xf32>
    %329 = vector.shape_cast %326 : vector<30x64xf32> to vector<1x1x30x64xf32>
    tpu.vector_store %arg2[%c0_296, %c29_297, %c0_298, %c0_299], %329 {strides = array<i32>} : memref<1x30x30x64xf32, #tpu.memory_space<vmem>>, vector<1x1x30x64xf32>,
    return
  }
  func.func @transform_0(%arg0: i32) -> (i32, i32, i32, i32) {
    %c0_i32 = arith.constant 0 : i32
    %c0_i32_0 = arith.constant 0 : i32
    %c0_i32_1 = arith.constant 0 : i32
    %c0_i32_2 = arith.constant 0 : i32
    return %arg0, %c0_i32, %c0_i32_0, %c0_i32_1 : i32, i32, i32, i32
  }
  func.func @transform_1(%arg0: i32) -> (i32, i32, i32, i32) {
    %c0_i32 = arith.constant 0 : i32
    %c0_i32_0 = arith.constant 0 : i32
    %c0_i32_1 = arith.constant 0 : i32
    %c0_i32_2 = arith.constant 0 : i32
    return %arg0, %c0_i32, %c0_i32_0, %c0_i32_1 : i32, i32, i32, i32
  }
}

module attributes {stable_mosaic.version = 11 : i64} {
  func.func @_conv3x3_kernel(%arg0: i32, %arg1: memref<1x26x26x128xf32, #tpu.memory_space<vmem>>, %arg2: memref<9x128x128xf32, #tpu.memory_space<vmem>>, %arg3: memref<1x128xf32, #tpu.memory_space<vmem>>, %arg4: memref<1x24x24x128xf32, #tpu.memory_space<vmem>>) attributes {dimension_semantics = [#tpu.dimension_semantics<parallel>], iteration_bounds = array<i64: 2>, scalar_prefetch = 0 : i64, scratch_operands = 0 : i64, tpu.core_type = #tpu.core_type<tc>, window_params = [{transform_indices = @transform_0, window_bounds = array<i64: 1, 26, 26, 128>}, {pipeline_mode = #tpu.pipeline_mode<synchronous>, transform_indices = @transform_1, window_bounds = array<i64: 9, 128, 128>}, {pipeline_mode = #tpu.pipeline_mode<synchronous>, transform_indices = @transform_2, window_bounds = array<i64: 1, 128>}, {transform_indices = @transform_3, window_bounds = array<i64: 1, 24, 24, 128>}]} {
    %c0 = arith.constant 0 : index
    %c0_0 = arith.constant 0 : index
    %0 = vector.load %arg3[%c0, %c0_0] : memref<1x128xf32, #tpu.memory_space<vmem>>, vector<1x128xf32>
    %c0_i32 = arith.constant 0 : i32
    %c24_i32 = arith.constant 24 : i32
    %1 = arith.addi %c0_i32, %c24_i32 : i32
    %c1_i32 = arith.constant 1 : i32
    scf.for %arg5 = %c0_i32 to %1 step %c1_i32  : i32 {
      %cst = arith.constant 0.000000e+00 : f32
      %2 = vector.broadcast %cst : f32 to vector<24x128xf32>
      %c0_i32_2 = arith.constant 0 : i32
      %3 = arith.addi %arg5, %c0_i32_2 : i32
      %c0_3 = arith.constant 0 : index
      %4 = arith.index_cast %3 : i32 to index
      %c0_4 = arith.constant 0 : index
      %c0_5 = arith.constant 0 : index
      %5 = vector.load %arg1[%c0_3, %4, %c0_4, %c0_5] : memref<1x26x26x128xf32, #tpu.memory_space<vmem>>, vector<1x1x24x128xf32>
      %6 = vector.shape_cast %5 : vector<1x1x24x128xf32> to vector<24x128xf32>
      %c0_6 = arith.constant 0 : index
      %c0_7 = arith.constant 0 : index
      %c0_8 = arith.constant 0 : index
      %7 = vector.load %arg2[%c0_6, %c0_7, %c0_8] : memref<9x128x128xf32, #tpu.memory_space<vmem>>, vector<1x128x128xf32>
      %8 = vector.shape_cast %7 : vector<1x128x128xf32> to vector<128x128xf32>
      %cst_9 = arith.constant dense<0.000000e+00> : vector<24x128xf32>
      %9 = tpu.matmul %6, %8, %cst_9 {dimension_numbers = #tpu.dot_dimension_numbers<[1], [0], [0], [1], [0, 0, 1, 1], [], []>} : vector<24x128xf32>, vector<128x128xf32>, vector<24x128xf32> -> vector<24x128xf32>
      %10 = arith.addf %2, %9 : vector<24x128xf32>
      %c0_i32_10 = arith.constant 0 : i32
      %11 = arith.addi %arg5, %c0_i32_10 : i32
      %c0_11 = arith.constant 0 : index
      %12 = arith.index_cast %11 : i32 to index
      %c1 = arith.constant 1 : index
      %c0_12 = arith.constant 0 : index
      %13 = vector.load %arg1[%c0_11, %12, %c1, %c0_12] : memref<1x26x26x128xf32, #tpu.memory_space<vmem>>, vector<1x1x24x128xf32>
      %14 = vector.shape_cast %13 : vector<1x1x24x128xf32> to vector<24x128xf32>
      %c1_13 = arith.constant 1 : index
      %c0_14 = arith.constant 0 : index
      %c0_15 = arith.constant 0 : index
      %15 = vector.load %arg2[%c1_13, %c0_14, %c0_15] : memref<9x128x128xf32, #tpu.memory_space<vmem>>, vector<1x128x128xf32>
      %16 = vector.shape_cast %15 : vector<1x128x128xf32> to vector<128x128xf32>
      %cst_16 = arith.constant dense<0.000000e+00> : vector<24x128xf32>
      %17 = tpu.matmul %14, %16, %cst_16 {dimension_numbers = #tpu.dot_dimension_numbers<[1], [0], [0], [1], [0, 0, 1, 1], [], []>} : vector<24x128xf32>, vector<128x128xf32>, vector<24x128xf32> -> vector<24x128xf32>
      %18 = arith.addf %10, %17 : vector<24x128xf32>
      %c0_i32_17 = arith.constant 0 : i32
      %19 = arith.addi %arg5, %c0_i32_17 : i32
      %c0_18 = arith.constant 0 : index
      %20 = arith.index_cast %19 : i32 to index
      %c2 = arith.constant 2 : index
      %c0_19 = arith.constant 0 : index
      %21 = vector.load %arg1[%c0_18, %20, %c2, %c0_19] : memref<1x26x26x128xf32, #tpu.memory_space<vmem>>, vector<1x1x24x128xf32>
      %22 = vector.shape_cast %21 : vector<1x1x24x128xf32> to vector<24x128xf32>
      %c2_20 = arith.constant 2 : index
      %c0_21 = arith.constant 0 : index
      %c0_22 = arith.constant 0 : index
      %23 = vector.load %arg2[%c2_20, %c0_21, %c0_22] : memref<9x128x128xf32, #tpu.memory_space<vmem>>, vector<1x128x128xf32>
      %24 = vector.shape_cast %23 : vector<1x128x128xf32> to vector<128x128xf32>
      %cst_23 = arith.constant dense<0.000000e+00> : vector<24x128xf32>
      %25 = tpu.matmul %22, %24, %cst_23 {dimension_numbers = #tpu.dot_dimension_numbers<[1], [0], [0], [1], [0, 0, 1, 1], [], []>} : vector<24x128xf32>, vector<128x128xf32>, vector<24x128xf32> -> vector<24x128xf32>
      %26 = arith.addf %18, %25 : vector<24x128xf32>
      %c1_i32_24 = arith.constant 1 : i32
      %27 = arith.addi %arg5, %c1_i32_24 : i32
      %c0_25 = arith.constant 0 : index
      %28 = arith.index_cast %27 : i32 to index
      %c0_26 = arith.constant 0 : index
      %c0_27 = arith.constant 0 : index
      %29 = vector.load %arg1[%c0_25, %28, %c0_26, %c0_27] : memref<1x26x26x128xf32, #tpu.memory_space<vmem>>, vector<1x1x24x128xf32>
      %30 = vector.shape_cast %29 : vector<1x1x24x128xf32> to vector<24x128xf32>
      %c3 = arith.constant 3 : index
      %c0_28 = arith.constant 0 : index
      %c0_29 = arith.constant 0 : index
      %31 = vector.load %arg2[%c3, %c0_28, %c0_29] : memref<9x128x128xf32, #tpu.memory_space<vmem>>, vector<1x128x128xf32>
      %32 = vector.shape_cast %31 : vector<1x128x128xf32> to vector<128x128xf32>
      %cst_30 = arith.constant dense<0.000000e+00> : vector<24x128xf32>
      %33 = tpu.matmul %30, %32, %cst_30 {dimension_numbers = #tpu.dot_dimension_numbers<[1], [0], [0], [1], [0, 0, 1, 1], [], []>} : vector<24x128xf32>, vector<128x128xf32>, vector<24x128xf32> -> vector<24x128xf32>
      %34 = arith.addf %26, %33 : vector<24x128xf32>
      %c1_i32_31 = arith.constant 1 : i32
      %35 = arith.addi %arg5, %c1_i32_31 : i32
      %c0_32 = arith.constant 0 : index
      %36 = arith.index_cast %35 : i32 to index
      %c1_33 = arith.constant 1 : index
      %c0_34 = arith.constant 0 : index
      %37 = vector.load %arg1[%c0_32, %36, %c1_33, %c0_34] : memref<1x26x26x128xf32, #tpu.memory_space<vmem>>, vector<1x1x24x128xf32>
      %38 = vector.shape_cast %37 : vector<1x1x24x128xf32> to vector<24x128xf32>
      %c4 = arith.constant 4 : index
      %c0_35 = arith.constant 0 : index
      %c0_36 = arith.constant 0 : index
      %39 = vector.load %arg2[%c4, %c0_35, %c0_36] : memref<9x128x128xf32, #tpu.memory_space<vmem>>, vector<1x128x128xf32>
      %40 = vector.shape_cast %39 : vector<1x128x128xf32> to vector<128x128xf32>
      %cst_37 = arith.constant dense<0.000000e+00> : vector<24x128xf32>
      %41 = tpu.matmul %38, %40, %cst_37 {dimension_numbers = #tpu.dot_dimension_numbers<[1], [0], [0], [1], [0, 0, 1, 1], [], []>} : vector<24x128xf32>, vector<128x128xf32>, vector<24x128xf32> -> vector<24x128xf32>
      %42 = arith.addf %34, %41 : vector<24x128xf32>
      %c1_i32_38 = arith.constant 1 : i32
      %43 = arith.addi %arg5, %c1_i32_38 : i32
      %c0_39 = arith.constant 0 : index
      %44 = arith.index_cast %43 : i32 to index
      %c2_40 = arith.constant 2 : index
      %c0_41 = arith.constant 0 : index
      %45 = vector.load %arg1[%c0_39, %44, %c2_40, %c0_41] : memref<1x26x26x128xf32, #tpu.memory_space<vmem>>, vector<1x1x24x128xf32>
      %46 = vector.shape_cast %45 : vector<1x1x24x128xf32> to vector<24x128xf32>
      %c5 = arith.constant 5 : index
      %c0_42 = arith.constant 0 : index
      %c0_43 = arith.constant 0 : index
      %47 = vector.load %arg2[%c5, %c0_42, %c0_43] : memref<9x128x128xf32, #tpu.memory_space<vmem>>, vector<1x128x128xf32>
      %48 = vector.shape_cast %47 : vector<1x128x128xf32> to vector<128x128xf32>
      %cst_44 = arith.constant dense<0.000000e+00> : vector<24x128xf32>
      %49 = tpu.matmul %46, %48, %cst_44 {dimension_numbers = #tpu.dot_dimension_numbers<[1], [0], [0], [1], [0, 0, 1, 1], [], []>} : vector<24x128xf32>, vector<128x128xf32>, vector<24x128xf32> -> vector<24x128xf32>
      %50 = arith.addf %42, %49 : vector<24x128xf32>
      %c2_i32 = arith.constant 2 : i32
      %51 = arith.addi %arg5, %c2_i32 : i32
      %c0_45 = arith.constant 0 : index
      %52 = arith.index_cast %51 : i32 to index
      %c0_46 = arith.constant 0 : index
      %c0_47 = arith.constant 0 : index
      %53 = vector.load %arg1[%c0_45, %52, %c0_46, %c0_47] : memref<1x26x26x128xf32, #tpu.memory_space<vmem>>, vector<1x1x24x128xf32>
      %54 = vector.shape_cast %53 : vector<1x1x24x128xf32> to vector<24x128xf32>
      %c6 = arith.constant 6 : index
      %c0_48 = arith.constant 0 : index
      %c0_49 = arith.constant 0 : index
      %55 = vector.load %arg2[%c6, %c0_48, %c0_49] : memref<9x128x128xf32, #tpu.memory_space<vmem>>, vector<1x128x128xf32>
      %56 = vector.shape_cast %55 : vector<1x128x128xf32> to vector<128x128xf32>
      %cst_50 = arith.constant dense<0.000000e+00> : vector<24x128xf32>
      %57 = tpu.matmul %54, %56, %cst_50 {dimension_numbers = #tpu.dot_dimension_numbers<[1], [0], [0], [1], [0, 0, 1, 1], [], []>} : vector<24x128xf32>, vector<128x128xf32>, vector<24x128xf32> -> vector<24x128xf32>
      %58 = arith.addf %50, %57 : vector<24x128xf32>
      %c2_i32_51 = arith.constant 2 : i32
      %59 = arith.addi %arg5, %c2_i32_51 : i32
      %c0_52 = arith.constant 0 : index
      %60 = arith.index_cast %59 : i32 to index
      %c1_53 = arith.constant 1 : index
      %c0_54 = arith.constant 0 : index
      %61 = vector.load %arg1[%c0_52, %60, %c1_53, %c0_54] : memref<1x26x26x128xf32, #tpu.memory_space<vmem>>, vector<1x1x24x128xf32>
      %62 = vector.shape_cast %61 : vector<1x1x24x128xf32> to vector<24x128xf32>
      %c7 = arith.constant 7 : index
      %c0_55 = arith.constant 0 : index
      %c0_56 = arith.constant 0 : index
      %63 = vector.load %arg2[%c7, %c0_55, %c0_56] : memref<9x128x128xf32, #tpu.memory_space<vmem>>, vector<1x128x128xf32>
      %64 = vector.shape_cast %63 : vector<1x128x128xf32> to vector<128x128xf32>
      %cst_57 = arith.constant dense<0.000000e+00> : vector<24x128xf32>
      %65 = tpu.matmul %62, %64, %cst_57 {dimension_numbers = #tpu.dot_dimension_numbers<[1], [0], [0], [1], [0, 0, 1, 1], [], []>} : vector<24x128xf32>, vector<128x128xf32>, vector<24x128xf32> -> vector<24x128xf32>
      %66 = arith.addf %58, %65 : vector<24x128xf32>
      %c2_i32_58 = arith.constant 2 : i32
      %67 = arith.addi %arg5, %c2_i32_58 : i32
      %c0_59 = arith.constant 0 : index
      %68 = arith.index_cast %67 : i32 to index
      %c2_60 = arith.constant 2 : index
      %c0_61 = arith.constant 0 : index
      %69 = vector.load %arg1[%c0_59, %68, %c2_60, %c0_61] : memref<1x26x26x128xf32, #tpu.memory_space<vmem>>, vector<1x1x24x128xf32>
      %70 = vector.shape_cast %69 : vector<1x1x24x128xf32> to vector<24x128xf32>
      %c8 = arith.constant 8 : index
      %c0_62 = arith.constant 0 : index
      %c0_63 = arith.constant 0 : index
      %71 = vector.load %arg2[%c8, %c0_62, %c0_63] : memref<9x128x128xf32, #tpu.memory_space<vmem>>, vector<1x128x128xf32>
      %72 = vector.shape_cast %71 : vector<1x128x128xf32> to vector<128x128xf32>
      %cst_64 = arith.constant dense<0.000000e+00> : vector<24x128xf32>
      %73 = tpu.matmul %70, %72, %cst_64 {dimension_numbers = #tpu.dot_dimension_numbers<[1], [0], [0], [1], [0, 0, 1, 1], [], []>} : vector<24x128xf32>, vector<128x128xf32>, vector<24x128xf32> -> vector<24x128xf32>
      %74 = arith.addf %66, %73 : vector<24x128xf32>
      %75 = vector.broadcast %0 : vector<1x128xf32> to vector<24x128xf32>
      %76 = arith.addf %74, %75 : vector<24x128xf32>
      %cst_65 = arith.constant 0.000000e+00 : f32
      %77 = vector.broadcast %cst_65 : f32 to vector<24x128xf32>
      %78 = arith.maximumf %76, %77 : vector<24x128xf32>
      %c0_66 = arith.constant 0 : index
      %79 = arith.index_cast %arg5 : i32 to index
      %c0_67 = arith.constant 0 : index
      %c0_68 = arith.constant 0 : index
      %80 = vector.load %arg4[%c0_66, %79, %c0_67, %c0_68] : memref<1x24x24x128xf32, #tpu.memory_space<vmem>>, vector<1x1x24x128xf32>
      %81 = vector.shape_cast %80 : vector<1x1x24x128xf32> to vector<24x128xf32>
      %82 = vector.shape_cast %78 : vector<24x128xf32> to vector<1x1x24x128xf32>
      tpu.vector_store %arg4[%c0_66, %79, %c0_67, %c0_68], %82 {strides = array<i32>} : memref<1x24x24x128xf32, #tpu.memory_space<vmem>>, vector<1x1x24x128xf32>,
    }
    %c24_i32_1 = arith.constant 24 : i32
    return
  }
  func.func @transform_0(%arg0: i32) -> (i32, i32, i32, i32) {
    %c0_i32 = arith.constant 0 : i32
    %c0_i32_0 = arith.constant 0 : i32
    %c0_i32_1 = arith.constant 0 : i32
    %c0_i32_2 = arith.constant 0 : i32
    return %arg0, %c0_i32, %c0_i32_0, %c0_i32_1 : i32, i32, i32, i32
  }
  func.func @transform_1(%arg0: i32) -> (i32, i32, i32) {
    %c0_i32 = arith.constant 0 : i32
    %c0_i32_0 = arith.constant 0 : i32
    %c0_i32_1 = arith.constant 0 : i32
    %c0_i32_2 = arith.constant 0 : i32
    return %c0_i32, %c0_i32_0, %c0_i32_1 : i32, i32, i32
  }
  func.func @transform_2(%arg0: i32) -> (i32, i32) {
    %c0_i32 = arith.constant 0 : i32
    %c0_i32_0 = arith.constant 0 : i32
    %c0_i32_1 = arith.constant 0 : i32
    return %c0_i32, %c0_i32_0 : i32, i32
  }
  func.func @transform_3(%arg0: i32) -> (i32, i32, i32, i32) {
    %c0_i32 = arith.constant 0 : i32
    %c0_i32_0 = arith.constant 0 : i32
    %c0_i32_1 = arith.constant 0 : i32
    %c0_i32_2 = arith.constant 0 : i32
    return %arg0, %c0_i32, %c0_i32_0, %c0_i32_1 : i32, i32, i32, i32
  }
}

module attributes {stable_mosaic.version = 11 : i64} {
  func.func @_conv3x3_kernel(%arg0: i32, %arg1: memref<1x24x24x128xf32, #tpu.memory_space<vmem>>, %arg2: memref<9x128x128xf32, #tpu.memory_space<vmem>>, %arg3: memref<1x128xf32, #tpu.memory_space<vmem>>, %arg4: memref<1x22x22x128xf32, #tpu.memory_space<vmem>>) attributes {dimension_semantics = [#tpu.dimension_semantics<parallel>], iteration_bounds = array<i64: 2>, scalar_prefetch = 0 : i64, scratch_operands = 0 : i64, tpu.core_type = #tpu.core_type<tc>, window_params = [{transform_indices = @transform_0, window_bounds = array<i64: 1, 24, 24, 128>}, {pipeline_mode = #tpu.pipeline_mode<synchronous>, transform_indices = @transform_1, window_bounds = array<i64: 9, 128, 128>}, {pipeline_mode = #tpu.pipeline_mode<synchronous>, transform_indices = @transform_2, window_bounds = array<i64: 1, 128>}, {transform_indices = @transform_3, window_bounds = array<i64: 1, 22, 22, 128>}]} {
    %c0 = arith.constant 0 : index
    %c0_0 = arith.constant 0 : index
    %0 = vector.load %arg3[%c0, %c0_0] : memref<1x128xf32, #tpu.memory_space<vmem>>, vector<1x128xf32>
    %c0_i32 = arith.constant 0 : i32
    %c22_i32 = arith.constant 22 : i32
    %1 = arith.addi %c0_i32, %c22_i32 : i32
    %c1_i32 = arith.constant 1 : i32
    scf.for %arg5 = %c0_i32 to %1 step %c1_i32  : i32 {
      %cst = arith.constant 0.000000e+00 : f32
      %2 = vector.broadcast %cst : f32 to vector<22x128xf32>
      %c0_i32_2 = arith.constant 0 : i32
      %3 = arith.addi %arg5, %c0_i32_2 : i32
      %c0_3 = arith.constant 0 : index
      %4 = arith.index_cast %3 : i32 to index
      %c0_4 = arith.constant 0 : index
      %c0_5 = arith.constant 0 : index
      %5 = vector.load %arg1[%c0_3, %4, %c0_4, %c0_5] : memref<1x24x24x128xf32, #tpu.memory_space<vmem>>, vector<1x1x22x128xf32>
      %6 = vector.shape_cast %5 : vector<1x1x22x128xf32> to vector<22x128xf32>
      %c0_6 = arith.constant 0 : index
      %c0_7 = arith.constant 0 : index
      %c0_8 = arith.constant 0 : index
      %7 = vector.load %arg2[%c0_6, %c0_7, %c0_8] : memref<9x128x128xf32, #tpu.memory_space<vmem>>, vector<1x128x128xf32>
      %8 = vector.shape_cast %7 : vector<1x128x128xf32> to vector<128x128xf32>
      %cst_9 = arith.constant dense<0.000000e+00> : vector<22x128xf32>
      %9 = tpu.matmul %6, %8, %cst_9 {dimension_numbers = #tpu.dot_dimension_numbers<[1], [0], [0], [1], [0, 0, 1, 1], [], []>} : vector<22x128xf32>, vector<128x128xf32>, vector<22x128xf32> -> vector<22x128xf32>
      %10 = arith.addf %2, %9 : vector<22x128xf32>
      %c0_i32_10 = arith.constant 0 : i32
      %11 = arith.addi %arg5, %c0_i32_10 : i32
      %c0_11 = arith.constant 0 : index
      %12 = arith.index_cast %11 : i32 to index
      %c1 = arith.constant 1 : index
      %c0_12 = arith.constant 0 : index
      %13 = vector.load %arg1[%c0_11, %12, %c1, %c0_12] : memref<1x24x24x128xf32, #tpu.memory_space<vmem>>, vector<1x1x22x128xf32>
      %14 = vector.shape_cast %13 : vector<1x1x22x128xf32> to vector<22x128xf32>
      %c1_13 = arith.constant 1 : index
      %c0_14 = arith.constant 0 : index
      %c0_15 = arith.constant 0 : index
      %15 = vector.load %arg2[%c1_13, %c0_14, %c0_15] : memref<9x128x128xf32, #tpu.memory_space<vmem>>, vector<1x128x128xf32>
      %16 = vector.shape_cast %15 : vector<1x128x128xf32> to vector<128x128xf32>
      %cst_16 = arith.constant dense<0.000000e+00> : vector<22x128xf32>
      %17 = tpu.matmul %14, %16, %cst_16 {dimension_numbers = #tpu.dot_dimension_numbers<[1], [0], [0], [1], [0, 0, 1, 1], [], []>} : vector<22x128xf32>, vector<128x128xf32>, vector<22x128xf32> -> vector<22x128xf32>
      %18 = arith.addf %10, %17 : vector<22x128xf32>
      %c0_i32_17 = arith.constant 0 : i32
      %19 = arith.addi %arg5, %c0_i32_17 : i32
      %c0_18 = arith.constant 0 : index
      %20 = arith.index_cast %19 : i32 to index
      %c2 = arith.constant 2 : index
      %c0_19 = arith.constant 0 : index
      %21 = vector.load %arg1[%c0_18, %20, %c2, %c0_19] : memref<1x24x24x128xf32, #tpu.memory_space<vmem>>, vector<1x1x22x128xf32>
      %22 = vector.shape_cast %21 : vector<1x1x22x128xf32> to vector<22x128xf32>
      %c2_20 = arith.constant 2 : index
      %c0_21 = arith.constant 0 : index
      %c0_22 = arith.constant 0 : index
      %23 = vector.load %arg2[%c2_20, %c0_21, %c0_22] : memref<9x128x128xf32, #tpu.memory_space<vmem>>, vector<1x128x128xf32>
      %24 = vector.shape_cast %23 : vector<1x128x128xf32> to vector<128x128xf32>
      %cst_23 = arith.constant dense<0.000000e+00> : vector<22x128xf32>
      %25 = tpu.matmul %22, %24, %cst_23 {dimension_numbers = #tpu.dot_dimension_numbers<[1], [0], [0], [1], [0, 0, 1, 1], [], []>} : vector<22x128xf32>, vector<128x128xf32>, vector<22x128xf32> -> vector<22x128xf32>
      %26 = arith.addf %18, %25 : vector<22x128xf32>
      %c1_i32_24 = arith.constant 1 : i32
      %27 = arith.addi %arg5, %c1_i32_24 : i32
      %c0_25 = arith.constant 0 : index
      %28 = arith.index_cast %27 : i32 to index
      %c0_26 = arith.constant 0 : index
      %c0_27 = arith.constant 0 : index
      %29 = vector.load %arg1[%c0_25, %28, %c0_26, %c0_27] : memref<1x24x24x128xf32, #tpu.memory_space<vmem>>, vector<1x1x22x128xf32>
      %30 = vector.shape_cast %29 : vector<1x1x22x128xf32> to vector<22x128xf32>
      %c3 = arith.constant 3 : index
      %c0_28 = arith.constant 0 : index
      %c0_29 = arith.constant 0 : index
      %31 = vector.load %arg2[%c3, %c0_28, %c0_29] : memref<9x128x128xf32, #tpu.memory_space<vmem>>, vector<1x128x128xf32>
      %32 = vector.shape_cast %31 : vector<1x128x128xf32> to vector<128x128xf32>
      %cst_30 = arith.constant dense<0.000000e+00> : vector<22x128xf32>
      %33 = tpu.matmul %30, %32, %cst_30 {dimension_numbers = #tpu.dot_dimension_numbers<[1], [0], [0], [1], [0, 0, 1, 1], [], []>} : vector<22x128xf32>, vector<128x128xf32>, vector<22x128xf32> -> vector<22x128xf32>
      %34 = arith.addf %26, %33 : vector<22x128xf32>
      %c1_i32_31 = arith.constant 1 : i32
      %35 = arith.addi %arg5, %c1_i32_31 : i32
      %c0_32 = arith.constant 0 : index
      %36 = arith.index_cast %35 : i32 to index
      %c1_33 = arith.constant 1 : index
      %c0_34 = arith.constant 0 : index
      %37 = vector.load %arg1[%c0_32, %36, %c1_33, %c0_34] : memref<1x24x24x128xf32, #tpu.memory_space<vmem>>, vector<1x1x22x128xf32>
      %38 = vector.shape_cast %37 : vector<1x1x22x128xf32> to vector<22x128xf32>
      %c4 = arith.constant 4 : index
      %c0_35 = arith.constant 0 : index
      %c0_36 = arith.constant 0 : index
      %39 = vector.load %arg2[%c4, %c0_35, %c0_36] : memref<9x128x128xf32, #tpu.memory_space<vmem>>, vector<1x128x128xf32>
      %40 = vector.shape_cast %39 : vector<1x128x128xf32> to vector<128x128xf32>
      %cst_37 = arith.constant dense<0.000000e+00> : vector<22x128xf32>
      %41 = tpu.matmul %38, %40, %cst_37 {dimension_numbers = #tpu.dot_dimension_numbers<[1], [0], [0], [1], [0, 0, 1, 1], [], []>} : vector<22x128xf32>, vector<128x128xf32>, vector<22x128xf32> -> vector<22x128xf32>
      %42 = arith.addf %34, %41 : vector<22x128xf32>
      %c1_i32_38 = arith.constant 1 : i32
      %43 = arith.addi %arg5, %c1_i32_38 : i32
      %c0_39 = arith.constant 0 : index
      %44 = arith.index_cast %43 : i32 to index
      %c2_40 = arith.constant 2 : index
      %c0_41 = arith.constant 0 : index
      %45 = vector.load %arg1[%c0_39, %44, %c2_40, %c0_41] : memref<1x24x24x128xf32, #tpu.memory_space<vmem>>, vector<1x1x22x128xf32>
      %46 = vector.shape_cast %45 : vector<1x1x22x128xf32> to vector<22x128xf32>
      %c5 = arith.constant 5 : index
      %c0_42 = arith.constant 0 : index
      %c0_43 = arith.constant 0 : index
      %47 = vector.load %arg2[%c5, %c0_42, %c0_43] : memref<9x128x128xf32, #tpu.memory_space<vmem>>, vector<1x128x128xf32>
      %48 = vector.shape_cast %47 : vector<1x128x128xf32> to vector<128x128xf32>
      %cst_44 = arith.constant dense<0.000000e+00> : vector<22x128xf32>
      %49 = tpu.matmul %46, %48, %cst_44 {dimension_numbers = #tpu.dot_dimension_numbers<[1], [0], [0], [1], [0, 0, 1, 1], [], []>} : vector<22x128xf32>, vector<128x128xf32>, vector<22x128xf32> -> vector<22x128xf32>
      %50 = arith.addf %42, %49 : vector<22x128xf32>
      %c2_i32 = arith.constant 2 : i32
      %51 = arith.addi %arg5, %c2_i32 : i32
      %c0_45 = arith.constant 0 : index
      %52 = arith.index_cast %51 : i32 to index
      %c0_46 = arith.constant 0 : index
      %c0_47 = arith.constant 0 : index
      %53 = vector.load %arg1[%c0_45, %52, %c0_46, %c0_47] : memref<1x24x24x128xf32, #tpu.memory_space<vmem>>, vector<1x1x22x128xf32>
      %54 = vector.shape_cast %53 : vector<1x1x22x128xf32> to vector<22x128xf32>
      %c6 = arith.constant 6 : index
      %c0_48 = arith.constant 0 : index
      %c0_49 = arith.constant 0 : index
      %55 = vector.load %arg2[%c6, %c0_48, %c0_49] : memref<9x128x128xf32, #tpu.memory_space<vmem>>, vector<1x128x128xf32>
      %56 = vector.shape_cast %55 : vector<1x128x128xf32> to vector<128x128xf32>
      %cst_50 = arith.constant dense<0.000000e+00> : vector<22x128xf32>
      %57 = tpu.matmul %54, %56, %cst_50 {dimension_numbers = #tpu.dot_dimension_numbers<[1], [0], [0], [1], [0, 0, 1, 1], [], []>} : vector<22x128xf32>, vector<128x128xf32>, vector<22x128xf32> -> vector<22x128xf32>
      %58 = arith.addf %50, %57 : vector<22x128xf32>
      %c2_i32_51 = arith.constant 2 : i32
      %59 = arith.addi %arg5, %c2_i32_51 : i32
      %c0_52 = arith.constant 0 : index
      %60 = arith.index_cast %59 : i32 to index
      %c1_53 = arith.constant 1 : index
      %c0_54 = arith.constant 0 : index
      %61 = vector.load %arg1[%c0_52, %60, %c1_53, %c0_54] : memref<1x24x24x128xf32, #tpu.memory_space<vmem>>, vector<1x1x22x128xf32>
      %62 = vector.shape_cast %61 : vector<1x1x22x128xf32> to vector<22x128xf32>
      %c7 = arith.constant 7 : index
      %c0_55 = arith.constant 0 : index
      %c0_56 = arith.constant 0 : index
      %63 = vector.load %arg2[%c7, %c0_55, %c0_56] : memref<9x128x128xf32, #tpu.memory_space<vmem>>, vector<1x128x128xf32>
      %64 = vector.shape_cast %63 : vector<1x128x128xf32> to vector<128x128xf32>
      %cst_57 = arith.constant dense<0.000000e+00> : vector<22x128xf32>
      %65 = tpu.matmul %62, %64, %cst_57 {dimension_numbers = #tpu.dot_dimension_numbers<[1], [0], [0], [1], [0, 0, 1, 1], [], []>} : vector<22x128xf32>, vector<128x128xf32>, vector<22x128xf32> -> vector<22x128xf32>
      %66 = arith.addf %58, %65 : vector<22x128xf32>
      %c2_i32_58 = arith.constant 2 : i32
      %67 = arith.addi %arg5, %c2_i32_58 : i32
      %c0_59 = arith.constant 0 : index
      %68 = arith.index_cast %67 : i32 to index
      %c2_60 = arith.constant 2 : index
      %c0_61 = arith.constant 0 : index
      %69 = vector.load %arg1[%c0_59, %68, %c2_60, %c0_61] : memref<1x24x24x128xf32, #tpu.memory_space<vmem>>, vector<1x1x22x128xf32>
      %70 = vector.shape_cast %69 : vector<1x1x22x128xf32> to vector<22x128xf32>
      %c8 = arith.constant 8 : index
      %c0_62 = arith.constant 0 : index
      %c0_63 = arith.constant 0 : index
      %71 = vector.load %arg2[%c8, %c0_62, %c0_63] : memref<9x128x128xf32, #tpu.memory_space<vmem>>, vector<1x128x128xf32>
      %72 = vector.shape_cast %71 : vector<1x128x128xf32> to vector<128x128xf32>
      %cst_64 = arith.constant dense<0.000000e+00> : vector<22x128xf32>
      %73 = tpu.matmul %70, %72, %cst_64 {dimension_numbers = #tpu.dot_dimension_numbers<[1], [0], [0], [1], [0, 0, 1, 1], [], []>} : vector<22x128xf32>, vector<128x128xf32>, vector<22x128xf32> -> vector<22x128xf32>
      %74 = arith.addf %66, %73 : vector<22x128xf32>
      %75 = vector.broadcast %0 : vector<1x128xf32> to vector<22x128xf32>
      %76 = arith.addf %74, %75 : vector<22x128xf32>
      %cst_65 = arith.constant 0.000000e+00 : f32
      %77 = vector.broadcast %cst_65 : f32 to vector<22x128xf32>
      %78 = arith.maximumf %76, %77 : vector<22x128xf32>
      %c0_66 = arith.constant 0 : index
      %79 = arith.index_cast %arg5 : i32 to index
      %c0_67 = arith.constant 0 : index
      %c0_68 = arith.constant 0 : index
      %80 = vector.load %arg4[%c0_66, %79, %c0_67, %c0_68] : memref<1x22x22x128xf32, #tpu.memory_space<vmem>>, vector<1x1x22x128xf32>
      %81 = vector.shape_cast %80 : vector<1x1x22x128xf32> to vector<22x128xf32>
      %82 = vector.shape_cast %78 : vector<22x128xf32> to vector<1x1x22x128xf32>
      tpu.vector_store %arg4[%c0_66, %79, %c0_67, %c0_68], %82 {strides = array<i32>} : memref<1x22x22x128xf32, #tpu.memory_space<vmem>>, vector<1x1x22x128xf32>,
    }
    %c22_i32_1 = arith.constant 22 : i32
    return
  }
  func.func @transform_0(%arg0: i32) -> (i32, i32, i32, i32) {
    %c0_i32 = arith.constant 0 : i32
    %c0_i32_0 = arith.constant 0 : i32
    %c0_i32_1 = arith.constant 0 : i32
    %c0_i32_2 = arith.constant 0 : i32
    return %arg0, %c0_i32, %c0_i32_0, %c0_i32_1 : i32, i32, i32, i32
  }
  func.func @transform_1(%arg0: i32) -> (i32, i32, i32) {
    %c0_i32 = arith.constant 0 : i32
    %c0_i32_0 = arith.constant 0 : i32
    %c0_i32_1 = arith.constant 0 : i32
    %c0_i32_2 = arith.constant 0 : i32
    return %c0_i32, %c0_i32_0, %c0_i32_1 : i32, i32, i32
  }
  func.func @transform_2(%arg0: i32) -> (i32, i32) {
    %c0_i32 = arith.constant 0 : i32
    %c0_i32_0 = arith.constant 0 : i32
    %c0_i32_1 = arith.constant 0 : i32
    return %c0_i32, %c0_i32_0 : i32, i32
  }
  func.func @transform_3(%arg0: i32) -> (i32, i32, i32, i32) {
    %c0_i32 = arith.constant 0 : i32
    %c0_i32_0 = arith.constant 0 : i32
    %c0_i32_1 = arith.constant 0 : i32
    %c0_i32_2 = arith.constant 0 : i32
    return %arg0, %c0_i32, %c0_i32_0, %c0_i32_1 : i32, i32, i32, i32
  }
}

module attributes {stable_mosaic.version = 11 : i64} {
  func.func @_pool2x2_kernel(%arg0: i32, %arg1: memref<1x22x11x256xf32, #tpu.memory_space<vmem>>, %arg2: memref<1x11x11x128xf32, #tpu.memory_space<vmem>>) attributes {dimension_semantics = [#tpu.dimension_semantics<parallel>], iteration_bounds = array<i64: 2>, scalar_prefetch = 0 : i64, scratch_operands = 0 : i64, tpu.core_type = #tpu.core_type<tc>, window_params = [{transform_indices = @transform_0, window_bounds = array<i64: 1, 22, 11, 256>}, {transform_indices = @transform_1, window_bounds = array<i64: 1, 11, 11, 128>}]} {
    %c0 = arith.constant 0 : index
    %c0_0 = arith.constant 0 : index
    %c0_1 = arith.constant 0 : index
    %c0_2 = arith.constant 0 : index
    %0 = vector.load %arg1[%c0, %c0_0, %c0_1, %c0_2] : memref<1x22x11x256xf32, #tpu.memory_space<vmem>>, vector<1x1x11x256xf32>
    %1 = vector.shape_cast %0 : vector<1x1x11x256xf32> to vector<11x256xf32>
    %c0_3 = arith.constant 0 : index
    %c1 = arith.constant 1 : index
    %c0_4 = arith.constant 0 : index
    %c0_5 = arith.constant 0 : index
    %2 = vector.load %arg1[%c0_3, %c1, %c0_4, %c0_5] : memref<1x22x11x256xf32, #tpu.memory_space<vmem>>, vector<1x1x11x256xf32>
    %3 = vector.shape_cast %2 : vector<1x1x11x256xf32> to vector<11x256xf32>
    %4 = arith.maximumf %1, %3 : vector<11x256xf32>
    %5 = vector.extract_strided_slice %4 {offsets = [0, 0], sizes = [11, 128], strides = [1, 1]} : vector<11x256xf32> to vector<11x128xf32>
    %6 = vector.extract_strided_slice %4 {offsets = [0, 128], sizes = [11, 128], strides = [1, 1]} : vector<11x256xf32> to vector<11x128xf32>
    %7 = arith.maximumf %5, %6 : vector<11x128xf32>
    %c0_6 = arith.constant 0 : index
    %c0_7 = arith.constant 0 : index
    %c0_8 = arith.constant 0 : index
    %c0_9 = arith.constant 0 : index
    %8 = vector.load %arg2[%c0_6, %c0_7, %c0_8, %c0_9] : memref<1x11x11x128xf32, #tpu.memory_space<vmem>>, vector<1x1x11x128xf32>
    %9 = vector.shape_cast %8 : vector<1x1x11x128xf32> to vector<11x128xf32>
    %10 = vector.shape_cast %7 : vector<11x128xf32> to vector<1x1x11x128xf32>
    tpu.vector_store %arg2[%c0_6, %c0_7, %c0_8, %c0_9], %10 {strides = array<i32>} : memref<1x11x11x128xf32, #tpu.memory_space<vmem>>, vector<1x1x11x128xf32>,
    %c0_10 = arith.constant 0 : index
    %c2 = arith.constant 2 : index
    %c0_11 = arith.constant 0 : index
    %c0_12 = arith.constant 0 : index
    %11 = vector.load %arg1[%c0_10, %c2, %c0_11, %c0_12] : memref<1x22x11x256xf32, #tpu.memory_space<vmem>>, vector<1x1x11x256xf32>
    %12 = vector.shape_cast %11 : vector<1x1x11x256xf32> to vector<11x256xf32>
    %c0_13 = arith.constant 0 : index
    %c3 = arith.constant 3 : index
    %c0_14 = arith.constant 0 : index
    %c0_15 = arith.constant 0 : index
    %13 = vector.load %arg1[%c0_13, %c3, %c0_14, %c0_15] : memref<1x22x11x256xf32, #tpu.memory_space<vmem>>, vector<1x1x11x256xf32>
    %14 = vector.shape_cast %13 : vector<1x1x11x256xf32> to vector<11x256xf32>
    %15 = arith.maximumf %12, %14 : vector<11x256xf32>
    %16 = vector.extract_strided_slice %15 {offsets = [0, 0], sizes = [11, 128], strides = [1, 1]} : vector<11x256xf32> to vector<11x128xf32>
    %17 = vector.extract_strided_slice %15 {offsets = [0, 128], sizes = [11, 128], strides = [1, 1]} : vector<11x256xf32> to vector<11x128xf32>
    %18 = arith.maximumf %16, %17 : vector<11x128xf32>
    %c0_16 = arith.constant 0 : index
    %c1_17 = arith.constant 1 : index
    %c0_18 = arith.constant 0 : index
    %c0_19 = arith.constant 0 : index
    %19 = vector.load %arg2[%c0_16, %c1_17, %c0_18, %c0_19] : memref<1x11x11x128xf32, #tpu.memory_space<vmem>>, vector<1x1x11x128xf32>
    %20 = vector.shape_cast %19 : vector<1x1x11x128xf32> to vector<11x128xf32>
    %21 = vector.shape_cast %18 : vector<11x128xf32> to vector<1x1x11x128xf32>
    tpu.vector_store %arg2[%c0_16, %c1_17, %c0_18, %c0_19], %21 {strides = array<i32>} : memref<1x11x11x128xf32, #tpu.memory_space<vmem>>, vector<1x1x11x128xf32>,
    %c0_20 = arith.constant 0 : index
    %c4 = arith.constant 4 : index
    %c0_21 = arith.constant 0 : index
    %c0_22 = arith.constant 0 : index
    %22 = vector.load %arg1[%c0_20, %c4, %c0_21, %c0_22] : memref<1x22x11x256xf32, #tpu.memory_space<vmem>>, vector<1x1x11x256xf32>
    %23 = vector.shape_cast %22 : vector<1x1x11x256xf32> to vector<11x256xf32>
    %c0_23 = arith.constant 0 : index
    %c5 = arith.constant 5 : index
    %c0_24 = arith.constant 0 : index
    %c0_25 = arith.constant 0 : index
    %24 = vector.load %arg1[%c0_23, %c5, %c0_24, %c0_25] : memref<1x22x11x256xf32, #tpu.memory_space<vmem>>, vector<1x1x11x256xf32>
    %25 = vector.shape_cast %24 : vector<1x1x11x256xf32> to vector<11x256xf32>
    %26 = arith.maximumf %23, %25 : vector<11x256xf32>
    %27 = vector.extract_strided_slice %26 {offsets = [0, 0], sizes = [11, 128], strides = [1, 1]} : vector<11x256xf32> to vector<11x128xf32>
    %28 = vector.extract_strided_slice %26 {offsets = [0, 128], sizes = [11, 128], strides = [1, 1]} : vector<11x256xf32> to vector<11x128xf32>
    %29 = arith.maximumf %27, %28 : vector<11x128xf32>
    %c0_26 = arith.constant 0 : index
    %c2_27 = arith.constant 2 : index
    %c0_28 = arith.constant 0 : index
    %c0_29 = arith.constant 0 : index
    %30 = vector.load %arg2[%c0_26, %c2_27, %c0_28, %c0_29] : memref<1x11x11x128xf32, #tpu.memory_space<vmem>>, vector<1x1x11x128xf32>
    %31 = vector.shape_cast %30 : vector<1x1x11x128xf32> to vector<11x128xf32>
    %32 = vector.shape_cast %29 : vector<11x128xf32> to vector<1x1x11x128xf32>
    tpu.vector_store %arg2[%c0_26, %c2_27, %c0_28, %c0_29], %32 {strides = array<i32>} : memref<1x11x11x128xf32, #tpu.memory_space<vmem>>, vector<1x1x11x128xf32>,
    %c0_30 = arith.constant 0 : index
    %c6 = arith.constant 6 : index
    %c0_31 = arith.constant 0 : index
    %c0_32 = arith.constant 0 : index
    %33 = vector.load %arg1[%c0_30, %c6, %c0_31, %c0_32] : memref<1x22x11x256xf32, #tpu.memory_space<vmem>>, vector<1x1x11x256xf32>
    %34 = vector.shape_cast %33 : vector<1x1x11x256xf32> to vector<11x256xf32>
    %c0_33 = arith.constant 0 : index
    %c7 = arith.constant 7 : index
    %c0_34 = arith.constant 0 : index
    %c0_35 = arith.constant 0 : index
    %35 = vector.load %arg1[%c0_33, %c7, %c0_34, %c0_35] : memref<1x22x11x256xf32, #tpu.memory_space<vmem>>, vector<1x1x11x256xf32>
    %36 = vector.shape_cast %35 : vector<1x1x11x256xf32> to vector<11x256xf32>
    %37 = arith.maximumf %34, %36 : vector<11x256xf32>
    %38 = vector.extract_strided_slice %37 {offsets = [0, 0], sizes = [11, 128], strides = [1, 1]} : vector<11x256xf32> to vector<11x128xf32>
    %39 = vector.extract_strided_slice %37 {offsets = [0, 128], sizes = [11, 128], strides = [1, 1]} : vector<11x256xf32> to vector<11x128xf32>
    %40 = arith.maximumf %38, %39 : vector<11x128xf32>
    %c0_36 = arith.constant 0 : index
    %c3_37 = arith.constant 3 : index
    %c0_38 = arith.constant 0 : index
    %c0_39 = arith.constant 0 : index
    %41 = vector.load %arg2[%c0_36, %c3_37, %c0_38, %c0_39] : memref<1x11x11x128xf32, #tpu.memory_space<vmem>>, vector<1x1x11x128xf32>
    %42 = vector.shape_cast %41 : vector<1x1x11x128xf32> to vector<11x128xf32>
    %43 = vector.shape_cast %40 : vector<11x128xf32> to vector<1x1x11x128xf32>
    tpu.vector_store %arg2[%c0_36, %c3_37, %c0_38, %c0_39], %43 {strides = array<i32>} : memref<1x11x11x128xf32, #tpu.memory_space<vmem>>, vector<1x1x11x128xf32>,
    %c0_40 = arith.constant 0 : index
    %c8 = arith.constant 8 : index
    %c0_41 = arith.constant 0 : index
    %c0_42 = arith.constant 0 : index
    %44 = vector.load %arg1[%c0_40, %c8, %c0_41, %c0_42] : memref<1x22x11x256xf32, #tpu.memory_space<vmem>>, vector<1x1x11x256xf32>
    %45 = vector.shape_cast %44 : vector<1x1x11x256xf32> to vector<11x256xf32>
    %c0_43 = arith.constant 0 : index
    %c9 = arith.constant 9 : index
    %c0_44 = arith.constant 0 : index
    %c0_45 = arith.constant 0 : index
    %46 = vector.load %arg1[%c0_43, %c9, %c0_44, %c0_45] : memref<1x22x11x256xf32, #tpu.memory_space<vmem>>, vector<1x1x11x256xf32>
    %47 = vector.shape_cast %46 : vector<1x1x11x256xf32> to vector<11x256xf32>
    %48 = arith.maximumf %45, %47 : vector<11x256xf32>
    %49 = vector.extract_strided_slice %48 {offsets = [0, 0], sizes = [11, 128], strides = [1, 1]} : vector<11x256xf32> to vector<11x128xf32>
    %50 = vector.extract_strided_slice %48 {offsets = [0, 128], sizes = [11, 128], strides = [1, 1]} : vector<11x256xf32> to vector<11x128xf32>
    %51 = arith.maximumf %49, %50 : vector<11x128xf32>
    %c0_46 = arith.constant 0 : index
    %c4_47 = arith.constant 4 : index
    %c0_48 = arith.constant 0 : index
    %c0_49 = arith.constant 0 : index
    %52 = vector.load %arg2[%c0_46, %c4_47, %c0_48, %c0_49] : memref<1x11x11x128xf32, #tpu.memory_space<vmem>>, vector<1x1x11x128xf32>
    %53 = vector.shape_cast %52 : vector<1x1x11x128xf32> to vector<11x128xf32>
    %54 = vector.shape_cast %51 : vector<11x128xf32> to vector<1x1x11x128xf32>
    tpu.vector_store %arg2[%c0_46, %c4_47, %c0_48, %c0_49], %54 {strides = array<i32>} : memref<1x11x11x128xf32, #tpu.memory_space<vmem>>, vector<1x1x11x128xf32>,
    %c0_50 = arith.constant 0 : index
    %c10 = arith.constant 10 : index
    %c0_51 = arith.constant 0 : index
    %c0_52 = arith.constant 0 : index
    %55 = vector.load %arg1[%c0_50, %c10, %c0_51, %c0_52] : memref<1x22x11x256xf32, #tpu.memory_space<vmem>>, vector<1x1x11x256xf32>
    %56 = vector.shape_cast %55 : vector<1x1x11x256xf32> to vector<11x256xf32>
    %c0_53 = arith.constant 0 : index
    %c11 = arith.constant 11 : index
    %c0_54 = arith.constant 0 : index
    %c0_55 = arith.constant 0 : index
    %57 = vector.load %arg1[%c0_53, %c11, %c0_54, %c0_55] : memref<1x22x11x256xf32, #tpu.memory_space<vmem>>, vector<1x1x11x256xf32>
    %58 = vector.shape_cast %57 : vector<1x1x11x256xf32> to vector<11x256xf32>
    %59 = arith.maximumf %56, %58 : vector<11x256xf32>
    %60 = vector.extract_strided_slice %59 {offsets = [0, 0], sizes = [11, 128], strides = [1, 1]} : vector<11x256xf32> to vector<11x128xf32>
    %61 = vector.extract_strided_slice %59 {offsets = [0, 128], sizes = [11, 128], strides = [1, 1]} : vector<11x256xf32> to vector<11x128xf32>
    %62 = arith.maximumf %60, %61 : vector<11x128xf32>
    %c0_56 = arith.constant 0 : index
    %c5_57 = arith.constant 5 : index
    %c0_58 = arith.constant 0 : index
    %c0_59 = arith.constant 0 : index
    %63 = vector.load %arg2[%c0_56, %c5_57, %c0_58, %c0_59] : memref<1x11x11x128xf32, #tpu.memory_space<vmem>>, vector<1x1x11x128xf32>
    %64 = vector.shape_cast %63 : vector<1x1x11x128xf32> to vector<11x128xf32>
    %65 = vector.shape_cast %62 : vector<11x128xf32> to vector<1x1x11x128xf32>
    tpu.vector_store %arg2[%c0_56, %c5_57, %c0_58, %c0_59], %65 {strides = array<i32>} : memref<1x11x11x128xf32, #tpu.memory_space<vmem>>, vector<1x1x11x128xf32>,
    %c0_60 = arith.constant 0 : index
    %c12 = arith.constant 12 : index
    %c0_61 = arith.constant 0 : index
    %c0_62 = arith.constant 0 : index
    %66 = vector.load %arg1[%c0_60, %c12, %c0_61, %c0_62] : memref<1x22x11x256xf32, #tpu.memory_space<vmem>>, vector<1x1x11x256xf32>
    %67 = vector.shape_cast %66 : vector<1x1x11x256xf32> to vector<11x256xf32>
    %c0_63 = arith.constant 0 : index
    %c13 = arith.constant 13 : index
    %c0_64 = arith.constant 0 : index
    %c0_65 = arith.constant 0 : index
    %68 = vector.load %arg1[%c0_63, %c13, %c0_64, %c0_65] : memref<1x22x11x256xf32, #tpu.memory_space<vmem>>, vector<1x1x11x256xf32>
    %69 = vector.shape_cast %68 : vector<1x1x11x256xf32> to vector<11x256xf32>
    %70 = arith.maximumf %67, %69 : vector<11x256xf32>
    %71 = vector.extract_strided_slice %70 {offsets = [0, 0], sizes = [11, 128], strides = [1, 1]} : vector<11x256xf32> to vector<11x128xf32>
    %72 = vector.extract_strided_slice %70 {offsets = [0, 128], sizes = [11, 128], strides = [1, 1]} : vector<11x256xf32> to vector<11x128xf32>
    %73 = arith.maximumf %71, %72 : vector<11x128xf32>
    %c0_66 = arith.constant 0 : index
    %c6_67 = arith.constant 6 : index
    %c0_68 = arith.constant 0 : index
    %c0_69 = arith.constant 0 : index
    %74 = vector.load %arg2[%c0_66, %c6_67, %c0_68, %c0_69] : memref<1x11x11x128xf32, #tpu.memory_space<vmem>>, vector<1x1x11x128xf32>
    %75 = vector.shape_cast %74 : vector<1x1x11x128xf32> to vector<11x128xf32>
    %76 = vector.shape_cast %73 : vector<11x128xf32> to vector<1x1x11x128xf32>
    tpu.vector_store %arg2[%c0_66, %c6_67, %c0_68, %c0_69], %76 {strides = array<i32>} : memref<1x11x11x128xf32, #tpu.memory_space<vmem>>, vector<1x1x11x128xf32>,
    %c0_70 = arith.constant 0 : index
    %c14 = arith.constant 14 : index
    %c0_71 = arith.constant 0 : index
    %c0_72 = arith.constant 0 : index
    %77 = vector.load %arg1[%c0_70, %c14, %c0_71, %c0_72] : memref<1x22x11x256xf32, #tpu.memory_space<vmem>>, vector<1x1x11x256xf32>
    %78 = vector.shape_cast %77 : vector<1x1x11x256xf32> to vector<11x256xf32>
    %c0_73 = arith.constant 0 : index
    %c15 = arith.constant 15 : index
    %c0_74 = arith.constant 0 : index
    %c0_75 = arith.constant 0 : index
    %79 = vector.load %arg1[%c0_73, %c15, %c0_74, %c0_75] : memref<1x22x11x256xf32, #tpu.memory_space<vmem>>, vector<1x1x11x256xf32>
    %80 = vector.shape_cast %79 : vector<1x1x11x256xf32> to vector<11x256xf32>
    %81 = arith.maximumf %78, %80 : vector<11x256xf32>
    %82 = vector.extract_strided_slice %81 {offsets = [0, 0], sizes = [11, 128], strides = [1, 1]} : vector<11x256xf32> to vector<11x128xf32>
    %83 = vector.extract_strided_slice %81 {offsets = [0, 128], sizes = [11, 128], strides = [1, 1]} : vector<11x256xf32> to vector<11x128xf32>
    %84 = arith.maximumf %82, %83 : vector<11x128xf32>
    %c0_76 = arith.constant 0 : index
    %c7_77 = arith.constant 7 : index
    %c0_78 = arith.constant 0 : index
    %c0_79 = arith.constant 0 : index
    %85 = vector.load %arg2[%c0_76, %c7_77, %c0_78, %c0_79] : memref<1x11x11x128xf32, #tpu.memory_space<vmem>>, vector<1x1x11x128xf32>
    %86 = vector.shape_cast %85 : vector<1x1x11x128xf32> to vector<11x128xf32>
    %87 = vector.shape_cast %84 : vector<11x128xf32> to vector<1x1x11x128xf32>
    tpu.vector_store %arg2[%c0_76, %c7_77, %c0_78, %c0_79], %87 {strides = array<i32>} : memref<1x11x11x128xf32, #tpu.memory_space<vmem>>, vector<1x1x11x128xf32>,
    %c0_80 = arith.constant 0 : index
    %c16 = arith.constant 16 : index
    %c0_81 = arith.constant 0 : index
    %c0_82 = arith.constant 0 : index
    %88 = vector.load %arg1[%c0_80, %c16, %c0_81, %c0_82] : memref<1x22x11x256xf32, #tpu.memory_space<vmem>>, vector<1x1x11x256xf32>
    %89 = vector.shape_cast %88 : vector<1x1x11x256xf32> to vector<11x256xf32>
    %c0_83 = arith.constant 0 : index
    %c17 = arith.constant 17 : index
    %c0_84 = arith.constant 0 : index
    %c0_85 = arith.constant 0 : index
    %90 = vector.load %arg1[%c0_83, %c17, %c0_84, %c0_85] : memref<1x22x11x256xf32, #tpu.memory_space<vmem>>, vector<1x1x11x256xf32>
    %91 = vector.shape_cast %90 : vector<1x1x11x256xf32> to vector<11x256xf32>
    %92 = arith.maximumf %89, %91 : vector<11x256xf32>
    %93 = vector.extract_strided_slice %92 {offsets = [0, 0], sizes = [11, 128], strides = [1, 1]} : vector<11x256xf32> to vector<11x128xf32>
    %94 = vector.extract_strided_slice %92 {offsets = [0, 128], sizes = [11, 128], strides = [1, 1]} : vector<11x256xf32> to vector<11x128xf32>
    %95 = arith.maximumf %93, %94 : vector<11x128xf32>
    %c0_86 = arith.constant 0 : index
    %c8_87 = arith.constant 8 : index
    %c0_88 = arith.constant 0 : index
    %c0_89 = arith.constant 0 : index
    %96 = vector.load %arg2[%c0_86, %c8_87, %c0_88, %c0_89] : memref<1x11x11x128xf32, #tpu.memory_space<vmem>>, vector<1x1x11x128xf32>
    %97 = vector.shape_cast %96 : vector<1x1x11x128xf32> to vector<11x128xf32>
    %98 = vector.shape_cast %95 : vector<11x128xf32> to vector<1x1x11x128xf32>
    tpu.vector_store %arg2[%c0_86, %c8_87, %c0_88, %c0_89], %98 {strides = array<i32>} : memref<1x11x11x128xf32, #tpu.memory_space<vmem>>, vector<1x1x11x128xf32>,
    %c0_90 = arith.constant 0 : index
    %c18 = arith.constant 18 : index
    %c0_91 = arith.constant 0 : index
    %c0_92 = arith.constant 0 : index
    %99 = vector.load %arg1[%c0_90, %c18, %c0_91, %c0_92] : memref<1x22x11x256xf32, #tpu.memory_space<vmem>>, vector<1x1x11x256xf32>
    %100 = vector.shape_cast %99 : vector<1x1x11x256xf32> to vector<11x256xf32>
    %c0_93 = arith.constant 0 : index
    %c19 = arith.constant 19 : index
    %c0_94 = arith.constant 0 : index
    %c0_95 = arith.constant 0 : index
    %101 = vector.load %arg1[%c0_93, %c19, %c0_94, %c0_95] : memref<1x22x11x256xf32, #tpu.memory_space<vmem>>, vector<1x1x11x256xf32>
    %102 = vector.shape_cast %101 : vector<1x1x11x256xf32> to vector<11x256xf32>
    %103 = arith.maximumf %100, %102 : vector<11x256xf32>
    %104 = vector.extract_strided_slice %103 {offsets = [0, 0], sizes = [11, 128], strides = [1, 1]} : vector<11x256xf32> to vector<11x128xf32>
    %105 = vector.extract_strided_slice %103 {offsets = [0, 128], sizes = [11, 128], strides = [1, 1]} : vector<11x256xf32> to vector<11x128xf32>
    %106 = arith.maximumf %104, %105 : vector<11x128xf32>
    %c0_96 = arith.constant 0 : index
    %c9_97 = arith.constant 9 : index
    %c0_98 = arith.constant 0 : index
    %c0_99 = arith.constant 0 : index
    %107 = vector.load %arg2[%c0_96, %c9_97, %c0_98, %c0_99] : memref<1x11x11x128xf32, #tpu.memory_space<vmem>>, vector<1x1x11x128xf32>
    %108 = vector.shape_cast %107 : vector<1x1x11x128xf32> to vector<11x128xf32>
    %109 = vector.shape_cast %106 : vector<11x128xf32> to vector<1x1x11x128xf32>
    tpu.vector_store %arg2[%c0_96, %c9_97, %c0_98, %c0_99], %109 {strides = array<i32>} : memref<1x11x11x128xf32, #tpu.memory_space<vmem>>, vector<1x1x11x128xf32>,
    %c0_100 = arith.constant 0 : index
    %c20 = arith.constant 20 : index
    %c0_101 = arith.constant 0 : index
    %c0_102 = arith.constant 0 : index
    %110 = vector.load %arg1[%c0_100, %c20, %c0_101, %c0_102] : memref<1x22x11x256xf32, #tpu.memory_space<vmem>>, vector<1x1x11x256xf32>
    %111 = vector.shape_cast %110 : vector<1x1x11x256xf32> to vector<11x256xf32>
    %c0_103 = arith.constant 0 : index
    %c21 = arith.constant 21 : index
    %c0_104 = arith.constant 0 : index
    %c0_105 = arith.constant 0 : index
    %112 = vector.load %arg1[%c0_103, %c21, %c0_104, %c0_105] : memref<1x22x11x256xf32, #tpu.memory_space<vmem>>, vector<1x1x11x256xf32>
    %113 = vector.shape_cast %112 : vector<1x1x11x256xf32> to vector<11x256xf32>
    %114 = arith.maximumf %111, %113 : vector<11x256xf32>
    %115 = vector.extract_strided_slice %114 {offsets = [0, 0], sizes = [11, 128], strides = [1, 1]} : vector<11x256xf32> to vector<11x128xf32>
    %116 = vector.extract_strided_slice %114 {offsets = [0, 128], sizes = [11, 128], strides = [1, 1]} : vector<11x256xf32> to vector<11x128xf32>
    %117 = arith.maximumf %115, %116 : vector<11x128xf32>
    %c0_106 = arith.constant 0 : index
    %c10_107 = arith.constant 10 : index
    %c0_108 = arith.constant 0 : index
    %c0_109 = arith.constant 0 : index
    %118 = vector.load %arg2[%c0_106, %c10_107, %c0_108, %c0_109] : memref<1x11x11x128xf32, #tpu.memory_space<vmem>>, vector<1x1x11x128xf32>
    %119 = vector.shape_cast %118 : vector<1x1x11x128xf32> to vector<11x128xf32>
    %120 = vector.shape_cast %117 : vector<11x128xf32> to vector<1x1x11x128xf32>
    tpu.vector_store %arg2[%c0_106, %c10_107, %c0_108, %c0_109], %120 {strides = array<i32>} : memref<1x11x11x128xf32, #tpu.memory_space<vmem>>, vector<1x1x11x128xf32>,
    return
  }
  func.func @transform_0(%arg0: i32) -> (i32, i32, i32, i32) {
    %c0_i32 = arith.constant 0 : i32
    %c0_i32_0 = arith.constant 0 : i32
    %c0_i32_1 = arith.constant 0 : i32
    %c0_i32_2 = arith.constant 0 : i32
    return %arg0, %c0_i32, %c0_i32_0, %c0_i32_1 : i32, i32, i32, i32
  }
  func.func @transform_1(%arg0: i32) -> (i32, i32, i32, i32) {
    %c0_i32 = arith.constant 0 : i32
    %c0_i32_0 = arith.constant 0 : i32
    %c0_i32_1 = arith.constant 0 : i32
    %c0_i32_2 = arith.constant 0 : i32
    return %arg0, %c0_i32, %c0_i32_0, %c0_i32_1 : i32, i32, i32, i32
  }
}

module attributes {stable_mosaic.version = 11 : i64} {
  func.func @_linear_kernel(%arg0: i32, %arg1: i32, %arg2: memref<2x1408xf32, #tpu.memory_space<vmem>>, %arg3: memref<1408x256xf32, #tpu.memory_space<vmem>>, %arg4: memref<1x256xf32, #tpu.memory_space<vmem>>, %arg5: memref<2x256xf32, #tpu.memory_space<vmem>>) attributes {dimension_semantics = [#tpu.dimension_semantics<parallel>, #tpu.dimension_semantics<arbitrary>], iteration_bounds = array<i64: 2, 11>, scalar_prefetch = 0 : i64, scratch_operands = 0 : i64, tpu.core_type = #tpu.core_type<tc>, window_params = [{transform_indices = @transform_0, window_bounds = array<i64: 2, 1408>}, {transform_indices = @transform_1, window_bounds = array<i64: 1408, 256>}, {transform_indices = @transform_2, window_bounds = array<i64: 1, 256>}, {transform_indices = @transform_3, window_bounds = array<i64: 2, 256>}]} {
    %c0_i32 = arith.constant 0 : i32
    %0 = arith.cmpi eq, %arg1, %c0_i32 : i32
    %1 = arith.extui %0 : i1 to i32
    %c0_i32_0 = arith.constant 0 : i32
    %2 = arith.cmpi ne, %1, %c0_i32_0 : i32
    scf.if %2 {
      %cst_9 = arith.constant 0.000000e+00 : f32
      %12 = vector.broadcast %cst_9 : f32 to vector<2x256xf32>
      %c0_10 = arith.constant 0 : index
      %c0_11 = arith.constant 0 : index
      %13 = vector.load %arg5[%c0_10, %c0_11] : memref<2x256xf32, #tpu.memory_space<vmem>>, vector<2x256xf32>
      tpu.vector_store %arg5[%c0_10, %c0_11], %12 {strides = array<i32>} : memref<2x256xf32, #tpu.memory_space<vmem>>, vector<2x256xf32>,
    } else {
    }
    %c0 = arith.constant 0 : index
    %c0_1 = arith.constant 0 : index
    %3 = vector.load %arg5[%c0, %c0_1] : memref<2x256xf32, #tpu.memory_space<vmem>>, vector<2x256xf32>
    %c0_2 = arith.constant 0 : index
    %c0_3 = arith.constant 0 : index
    %4 = vector.load %arg2[%c0_2, %c0_3] : memref<2x1408xf32, #tpu.memory_space<vmem>>, vector<2x1408xf32>
    %c0_4 = arith.constant 0 : index
    %c0_5 = arith.constant 0 : index
    %5 = vector.load %arg3[%c0_4, %c0_5] : memref<1408x256xf32, #tpu.memory_space<vmem>>, vector<1408x256xf32>
    %cst = arith.constant dense<0.000000e+00> : vector<2x256xf32>
    %6 = tpu.matmul %4, %5, %cst {dimension_numbers = #tpu.dot_dimension_numbers<[1], [0], [0], [1], [0, 0, 1, 1], [], []>} : vector<2x1408xf32>, vector<1408x256xf32>, vector<2x256xf32> -> vector<2x256xf32>
    %7 = arith.addf %3, %6 : vector<2x256xf32>
    %c0_6 = arith.constant 0 : index
    %c0_7 = arith.constant 0 : index
    %8 = vector.load %arg5[%c0_6, %c0_7] : memref<2x256xf32, #tpu.memory_space<vmem>>, vector<2x256xf32>
    tpu.vector_store %arg5[%c0_6, %c0_7], %7 {strides = array<i32>} : memref<2x256xf32, #tpu.memory_space<vmem>>, vector<2x256xf32>,
    %c10_i32 = arith.constant 10 : i32
    %9 = arith.cmpi eq, %arg1, %c10_i32 : i32
    %10 = arith.extui %9 : i1 to i32
    %c0_i32_8 = arith.constant 0 : i32
    %11 = arith.cmpi ne, %10, %c0_i32_8 : i32
    scf.if %11 {
      %c0_9 = arith.constant 0 : index
      %c0_10 = arith.constant 0 : index
      %12 = vector.load %arg5[%c0_9, %c0_10] : memref<2x256xf32, #tpu.memory_space<vmem>>, vector<2x256xf32>
      %c0_11 = arith.constant 0 : index
      %c0_12 = arith.constant 0 : index
      %13 = vector.load %arg4[%c0_11, %c0_12] : memref<1x256xf32, #tpu.memory_space<vmem>>, vector<1x256xf32>
      %14 = vector.broadcast %13 : vector<1x256xf32> to vector<2x256xf32>
      %15 = arith.addf %12, %14 : vector<2x256xf32>
      %cst_13 = arith.constant 0.000000e+00 : f32
      %16 = vector.broadcast %cst_13 : f32 to vector<2x256xf32>
      %17 = arith.maximumf %15, %16 : vector<2x256xf32>
      %c0_14 = arith.constant 0 : index
      %c0_15 = arith.constant 0 : index
      %18 = vector.load %arg5[%c0_14, %c0_15] : memref<2x256xf32, #tpu.memory_space<vmem>>, vector<2x256xf32>
      tpu.vector_store %arg5[%c0_14, %c0_15], %17 {strides = array<i32>} : memref<2x256xf32, #tpu.memory_space<vmem>>, vector<2x256xf32>,
    } else {
    }
    return
  }
  func.func @transform_0(%arg0: i32, %arg1: i32) -> (i32, i32) {
    %c0_i32 = arith.constant 0 : i32
    %c0_i32_0 = arith.constant 0 : i32
    return %c0_i32, %arg1 : i32, i32
  }
  func.func @transform_1(%arg0: i32, %arg1: i32) -> (i32, i32) {
    %c0_i32 = arith.constant 0 : i32
    return %arg1, %arg0 : i32, i32
  }
  func.func @transform_2(%arg0: i32, %arg1: i32) -> (i32, i32) {
    %c0_i32 = arith.constant 0 : i32
    %c0_i32_0 = arith.constant 0 : i32
    return %c0_i32, %arg0 : i32, i32
  }
  func.func @transform_3(%arg0: i32, %arg1: i32) -> (i32, i32) {
    %c0_i32 = arith.constant 0 : i32
    %c0_i32_0 = arith.constant 0 : i32
    return %c0_i32, %arg0 : i32, i32
  }
}

module attributes {stable_mosaic.version = 11 : i64} {
  func.func @_linear_kernel(%arg0: i32, %arg1: i32, %arg2: memref<2x128xf32, #tpu.memory_space<vmem>>, %arg3: memref<128x128xf32, #tpu.memory_space<vmem>>, %arg4: memref<1x128xf32, #tpu.memory_space<vmem>>, %arg5: memref<2x128xf32, #tpu.memory_space<vmem>>) attributes {dimension_semantics = [#tpu.dimension_semantics<parallel>, #tpu.dimension_semantics<arbitrary>], iteration_bounds = array<i64: 1, 1>, scalar_prefetch = 0 : i64, scratch_operands = 0 : i64, tpu.core_type = #tpu.core_type<tc>, window_params = [{transform_indices = @transform_0, window_bounds = array<i64: 2, 128>}, {transform_indices = @transform_1, window_bounds = array<i64: 128, 128>}, {transform_indices = @transform_2, window_bounds = array<i64: 1, 128>}, {transform_indices = @transform_3, window_bounds = array<i64: 2, 128>}]} {
    %c0_i32 = arith.constant 0 : i32
    %0 = arith.cmpi eq, %arg1, %c0_i32 : i32
    %1 = arith.extui %0 : i1 to i32
    %c0_i32_0 = arith.constant 0 : i32
    %2 = arith.cmpi ne, %1, %c0_i32_0 : i32
    scf.if %2 {
      %cst_10 = arith.constant 0.000000e+00 : f32
      %12 = vector.broadcast %cst_10 : f32 to vector<2x128xf32>
      %c0_11 = arith.constant 0 : index
      %c0_12 = arith.constant 0 : index
      %13 = vector.load %arg5[%c0_11, %c0_12] : memref<2x128xf32, #tpu.memory_space<vmem>>, vector<2x128xf32>
      tpu.vector_store %arg5[%c0_11, %c0_12], %12 {strides = array<i32>} : memref<2x128xf32, #tpu.memory_space<vmem>>, vector<2x128xf32>,
    } else {
    }
    %c0 = arith.constant 0 : index
    %c0_1 = arith.constant 0 : index
    %3 = vector.load %arg5[%c0, %c0_1] : memref<2x128xf32, #tpu.memory_space<vmem>>, vector<2x128xf32>
    %c0_2 = arith.constant 0 : index
    %c0_3 = arith.constant 0 : index
    %4 = vector.load %arg2[%c0_2, %c0_3] : memref<2x128xf32, #tpu.memory_space<vmem>>, vector<2x128xf32>
    %c0_4 = arith.constant 0 : index
    %c0_5 = arith.constant 0 : index
    %5 = vector.load %arg3[%c0_4, %c0_5] : memref<128x128xf32, #tpu.memory_space<vmem>>, vector<128x128xf32>
    %cst = arith.constant dense<0.000000e+00> : vector<2x128xf32>
    %6 = tpu.matmul %4, %5, %cst {dimension_numbers = #tpu.dot_dimension_numbers<[1], [0], [0], [1], [0, 0, 1, 1], [], []>} : vector<2x128xf32>, vector<128x128xf32>, vector<2x128xf32> -> vector<2x128xf32>
    %7 = arith.addf %3, %6 : vector<2x128xf32>
    %c0_6 = arith.constant 0 : index
    %c0_7 = arith.constant 0 : index
    %8 = vector.load %arg5[%c0_6, %c0_7] : memref<2x128xf32, #tpu.memory_space<vmem>>, vector<2x128xf32>
    tpu.vector_store %arg5[%c0_6, %c0_7], %7 {strides = array<i32>} : memref<2x128xf32, #tpu.memory_space<vmem>>, vector<2x128xf32>,
    %c0_i32_8 = arith.constant 0 : i32
    %9 = arith.cmpi eq, %arg1, %c0_i32_8 : i32
    %10 = arith.extui %9 : i1 to i32
    %c0_i32_9 = arith.constant 0 : i32
    %11 = arith.cmpi ne, %10, %c0_i32_9 : i32
    scf.if %11 {
      %c0_10 = arith.constant 0 : index
      %c0_11 = arith.constant 0 : index
      %12 = vector.load %arg5[%c0_10, %c0_11] : memref<2x128xf32, #tpu.memory_space<vmem>>, vector<2x128xf32>
      %c0_12 = arith.constant 0 : index
      %c0_13 = arith.constant 0 : index
      %13 = vector.load %arg4[%c0_12, %c0_13] : memref<1x128xf32, #tpu.memory_space<vmem>>, vector<1x128xf32>
      %14 = vector.broadcast %13 : vector<1x128xf32> to vector<2x128xf32>
      %15 = arith.addf %12, %14 : vector<2x128xf32>
      %c0_14 = arith.constant 0 : index
      %c0_15 = arith.constant 0 : index
      %16 = vector.load %arg5[%c0_14, %c0_15] : memref<2x128xf32, #tpu.memory_space<vmem>>, vector<2x128xf32>
      tpu.vector_store %arg5[%c0_14, %c0_15], %15 {strides = array<i32>} : memref<2x128xf32, #tpu.memory_space<vmem>>, vector<2x128xf32>,
    } else {
    }
    return
  }
  func.func @transform_0(%arg0: i32, %arg1: i32) -> (i32, i32) {
    %c0_i32 = arith.constant 0 : i32
    %c0_i32_0 = arith.constant 0 : i32
    return %c0_i32, %arg1 : i32, i32
  }
  func.func @transform_1(%arg0: i32, %arg1: i32) -> (i32, i32) {
    %c0_i32 = arith.constant 0 : i32
    return %arg1, %arg0 : i32, i32
  }
  func.func @transform_2(%arg0: i32, %arg1: i32) -> (i32, i32) {
    %c0_i32 = arith.constant 0 : i32
    %c0_i32_0 = arith.constant 0 : i32
    return %c0_i32, %arg0 : i32, i32
  }
  func.func @transform_3(%arg0: i32, %arg1: i32) -> (i32, i32) {
    %c0_i32 = arith.constant 0 : i32
    %c0_i32_0 = arith.constant 0 : i32
    return %c0_i32, %arg0 : i32, i32
  }
}

module attributes {stable_mosaic.version = 11 : i64} {
  func.func @_linear_kernel(%arg0: i32, %arg1: i32, %arg2: memref<2x512xf32, #tpu.memory_space<vmem>>, %arg3: memref<512x128xf32, #tpu.memory_space<vmem>>, %arg4: memref<1x128xf32, #tpu.memory_space<vmem>>, %arg5: memref<2x128xf32, #tpu.memory_space<vmem>>) attributes {dimension_semantics = [#tpu.dimension_semantics<parallel>, #tpu.dimension_semantics<arbitrary>], iteration_bounds = array<i64: 1, 1>, scalar_prefetch = 0 : i64, scratch_operands = 0 : i64, tpu.core_type = #tpu.core_type<tc>, window_params = [{transform_indices = @transform_0, window_bounds = array<i64: 2, 512>}, {transform_indices = @transform_1, window_bounds = array<i64: 512, 128>}, {transform_indices = @transform_2, window_bounds = array<i64: 1, 128>}, {transform_indices = @transform_3, window_bounds = array<i64: 2, 128>}]} {
    %c0_i32 = arith.constant 0 : i32
    %0 = arith.cmpi eq, %arg1, %c0_i32 : i32
    %1 = arith.extui %0 : i1 to i32
    %c0_i32_0 = arith.constant 0 : i32
    %2 = arith.cmpi ne, %1, %c0_i32_0 : i32
    scf.if %2 {
      %cst_10 = arith.constant 0.000000e+00 : f32
      %12 = vector.broadcast %cst_10 : f32 to vector<2x128xf32>
      %c0_11 = arith.constant 0 : index
      %c0_12 = arith.constant 0 : index
      %13 = vector.load %arg5[%c0_11, %c0_12] : memref<2x128xf32, #tpu.memory_space<vmem>>, vector<2x128xf32>
      tpu.vector_store %arg5[%c0_11, %c0_12], %12 {strides = array<i32>} : memref<2x128xf32, #tpu.memory_space<vmem>>, vector<2x128xf32>,
    } else {
    }
    %c0 = arith.constant 0 : index
    %c0_1 = arith.constant 0 : index
    %3 = vector.load %arg5[%c0, %c0_1] : memref<2x128xf32, #tpu.memory_space<vmem>>, vector<2x128xf32>
    %c0_2 = arith.constant 0 : index
    %c0_3 = arith.constant 0 : index
    %4 = vector.load %arg2[%c0_2, %c0_3] : memref<2x512xf32, #tpu.memory_space<vmem>>, vector<2x512xf32>
    %c0_4 = arith.constant 0 : index
    %c0_5 = arith.constant 0 : index
    %5 = vector.load %arg3[%c0_4, %c0_5] : memref<512x128xf32, #tpu.memory_space<vmem>>, vector<512x128xf32>
    %cst = arith.constant dense<0.000000e+00> : vector<2x128xf32>
    %6 = tpu.matmul %4, %5, %cst {dimension_numbers = #tpu.dot_dimension_numbers<[1], [0], [0], [1], [0, 0, 1, 1], [], []>} : vector<2x512xf32>, vector<512x128xf32>, vector<2x128xf32> -> vector<2x128xf32>
    %7 = arith.addf %3, %6 : vector<2x128xf32>
    %c0_6 = arith.constant 0 : index
    %c0_7 = arith.constant 0 : index
    %8 = vector.load %arg5[%c0_6, %c0_7] : memref<2x128xf32, #tpu.memory_space<vmem>>, vector<2x128xf32>
    tpu.vector_store %arg5[%c0_6, %c0_7], %7 {strides = array<i32>} : memref<2x128xf32, #tpu.memory_space<vmem>>, vector<2x128xf32>,
    %c0_i32_8 = arith.constant 0 : i32
    %9 = arith.cmpi eq, %arg1, %c0_i32_8 : i32
    %10 = arith.extui %9 : i1 to i32
    %c0_i32_9 = arith.constant 0 : i32
    %11 = arith.cmpi ne, %10, %c0_i32_9 : i32
    scf.if %11 {
      %c0_10 = arith.constant 0 : index
      %c0_11 = arith.constant 0 : index
      %12 = vector.load %arg5[%c0_10, %c0_11] : memref<2x128xf32, #tpu.memory_space<vmem>>, vector<2x128xf32>
      %c0_12 = arith.constant 0 : index
      %c0_13 = arith.constant 0 : index
      %13 = vector.load %arg4[%c0_12, %c0_13] : memref<1x128xf32, #tpu.memory_space<vmem>>, vector<1x128xf32>
      %14 = vector.broadcast %13 : vector<1x128xf32> to vector<2x128xf32>
      %15 = arith.addf %12, %14 : vector<2x128xf32>
      %cst_14 = arith.constant 0.000000e+00 : f32
      %16 = vector.broadcast %cst_14 : f32 to vector<2x128xf32>
      %17 = arith.maximumf %15, %16 : vector<2x128xf32>
      %c0_15 = arith.constant 0 : index
      %c0_16 = arith.constant 0 : index
      %18 = vector.load %arg5[%c0_15, %c0_16] : memref<2x128xf32, #tpu.memory_space<vmem>>, vector<2x128xf32>
      tpu.vector_store %arg5[%c0_15, %c0_16], %17 {strides = array<i32>} : memref<2x128xf32, #tpu.memory_space<vmem>>, vector<2x128xf32>,
    } else {
    }
    return
  }
  func.func @transform_0(%arg0: i32, %arg1: i32) -> (i32, i32) {
    %c0_i32 = arith.constant 0 : i32
    %c0_i32_0 = arith.constant 0 : i32
    return %c0_i32, %arg1 : i32, i32
  }
  func.func @transform_1(%arg0: i32, %arg1: i32) -> (i32, i32) {
    %c0_i32 = arith.constant 0 : i32
    return %arg1, %arg0 : i32, i32
  }
  func.func @transform_2(%arg0: i32, %arg1: i32) -> (i32, i32) {
    %c0_i32 = arith.constant 0 : i32
    %c0_i32_0 = arith.constant 0 : i32
    return %c0_i32, %arg0 : i32, i32
  }
  func.func @transform_3(%arg0: i32, %arg1: i32) -> (i32, i32) {
    %c0_i32 = arith.constant 0 : i32
    %c0_i32_0 = arith.constant 0 : i32
    return %c0_i32, %arg0 : i32, i32
  }
}

</mosaic_0001>

<bundles_post_ra>
// kernel: net_forward.11
= control target key start
LH: loop header
LB: loop body
LE: loop exit
PB: predicated region body
PF: predicated region fallthrough
CT: control target
= control target key end

     0   :  { %s1043_s12 = smov 0   ;;  %s1362_s0 = inlined_call_operand.vmem [shape: f32[2,64,64,1], index: 0, kind: input, shape index: {}]   ;;  %s1363_s1 = inlined_call_operand.vmem [shape: f32[9,1,16], index: 1, kind: input, shape index: {}]   ;;  %s1364_s2 = inlined_call_operand.vmem [shape: f32[1,16], index: 2, kind: input, shape index: {}]   ;;  %s1365_s3 = inlined_call_operand.vmem [shape: f32[2,62,62,16], index: 3, kind: output, shape index: {}]  }
   0x1 LB: > { %s906_s13 = sadd.s32 4294967295, %s1016_s12   ;;  %p910_p0 = scmp.ge.s32.totalorder %s1016_s12, 1  ;;  %s1016_s12 = sphi %s1043_s12, %s13_s12  }
   0x2   : > { %p137_p1 = scmp.lt.s32.totalorder %s1016_s12, 3 }
   0x4   : > { %p138_p2 = pnand %p910_p0, %p137_p1 }
   0x5   : > { %p161_p3 = scmp.lt.s32.totalorder (!%p138_p2), %s906_s13, 1  ;;  %s1066_s24 = smov (!%p138_p2), 0  }
   0x6   : > { %141 = sbr.rel (%p138_p2) target bundleno = 327 (0x147), region = 32 }
   0xb   : > { %v1054_v0 = vld [vmem:[%s1364_s2] sm:$0x1]  ;;  %s1367_s13 = smov (!%p161_p3, %s906_s13), 1 }
   0xc   : > { %s975_s16 = sshll.u32 %s1367_s13, 12  ;;  %s976_s17 = smul.u32 3968, %s1367_s13 }
   0xd   : > { %s1059_s20 = scalar_lea.vmem %s1362_s0, %s975_s16 }
   0xe   : > { %s1064_s23 = scalar_lea.vmem %s1365_s3, %s976_s17 }
   0xf LB: >> { %v1022_v1 = vmov 0   ;;  %s914_s25 = sshll.u32 %s1020_s24, 6  ;;  %v1128_v49 = vld [vmem:[%s1363_s1 + $0x1] ss:$0 sm:$0xff]  ;;  %v1134_v51 = vld [vmem:[%s1363_s1] ss:$0 sm:$0xff]  ;;  %s1020_s24 = sphi %s1066_s24, %s177_s24  }
  0x10   : >> { %996 = vset.pattern.permute.xlu2 %v1022_v1  ;;  %995 = vset.pattern.permute.xlu1 %v1022_v1  ;;  %s1075_s26 = scalar_lea.vmem %s1059_s20, %s914_s25  ;;  %s1293_s19 = scalar_lea.vmem %s1064_s23, %s914_s25  ;;  %vm826_vm0 = vcmask 130048   ;;  %vm834_vm1 = vcmask 128000  }
  0x11   : >> { %994 = vset.pattern.permute.xlu0 %v1022_v1  ;;  %v184_v2 = vld [vmem:[%s1075_s26 + $0x20] sm:$0xff]  ;;  %v182_v3 = vld [vmem:[%s1075_s26 + $0x10] sm:$0xff]  ;;  %v185_v5 = vld [vmem:[%s1075_s26 + $0x28] sm:$0xff]  ;;  %s177_s24 = sadd.s32 1, %s1020_s24  }
  0x12   : >> { %v180_v4 = vld [vmem:[%s1075_s26] sm:$0xff]  ;;  %211 = vperm.xlu2 %996, %v184_v2   ;;  %201 = vperm.xlu1 %995, %v182_v3   ;;  %v183_v6 = vld [vmem:[%s1075_s26 + $0x18] sm:$0xff]  ;;  %v181_v7 = vld [vmem:[%s1075_s26 + $0x8] sm:$0xff]  ;;  %p174_p4 = scmp.ge.s32.totalorder %s177_s24, 62  }
  0x13   : >> { %191 = vperm.xlu0 %994, %v180_v4   ;;  %v248_v8 = vld [vmem:[%s1075_s26 + $0x1] sm:$0xff]  ;;  %v187_v9 = vld [vmem:[%s1075_s26 + $0x38] sm:$0x3f]  ;;  %v186_v10 = vld [vmem:[%s1075_s26 + $0x30] sm:$0xff] }
  0x14   : >> { %v251_v11 = vld [vmem:[%s1075_s26 + $0x19] sm:$0xff]  ;;  %v250_v12 = vld [vmem:[%s1075_s26 + $0x11] sm:$0xff]  ;;  %v249_v13 = vld [vmem:[%s1075_s26 + $0x9] sm:$0xff] }
  0x15   : >> { %v254_v14 = vld [vmem:[%s1075_s26 + $0x31] sm:$0xff]  ;;  %v253_v15 = vld [vmem:[%s1075_s26 + $0x29] sm:$0xff]  ;;  %v252_v16 = vld [vmem:[%s1075_s26 + $0x21] sm:$0xff] }
  0x16   : >> { %v318_v17 = vld [vmem:[%s1075_s26 + $0xa] sm:$0xff]  ;;  %v317_v18 = vld [vmem:[%s1075_s26 + $0x2] sm:$0xff]  ;;  %v255_v19 = vld [vmem:[%s1075_s26 + $0x39] sm:$0x3f] }
  0x17   : >> { %v321_v20 = vld [vmem:[%s1075_s26 + $0x22] sm:$0xff]  ;;  %v320_v21 = vld [vmem:[%s1075_s26 + $0x1a] sm:$0xff]  ;;  %v319_v22 = vld [vmem:[%s1075_s26 + $0x12] sm:$0xff] }
  0x18   : >> { %v324_v23 = vld [vmem:[%s1075_s26 + $0x3a] sm:$0x3f]  ;;  %v323_v24 = vld [vmem:[%s1075_s26 + $0x32] sm:$0xff]  ;;  %v322_v25 = vld [vmem:[%s1075_s26 + $0x2a] sm:$0xff] }
  0x19   : >> { %v920_v26 = vld [vmem:[%s1075_s26 + $0x50] sm:$0xff]  ;;  %v919_v27 = vld [vmem:[%s1075_s26 + $0x48] sm:$0xff]  ;;  %v918_v28 = vld [vmem:[%s1075_s26 + $0x40] sm:$0xff] }
  0x1a   : >> { %216 = vperm.xlu2 %996, %v185_v5   ;;  %206 = vperm.xlu1 %995, %v183_v6   ;;  %v923_v29 = vld [vmem:[%s1075_s26 + $0x68] sm:$0xff]  ;;  %v922_v30 = vld [vmem:[%s1075_s26 + $0x60] sm:$0xff]  ;;  %v921_v31 = vld [vmem:[%s1075_s26 + $0x58] sm:$0xff] }
  0x1b   : >> { %196 = vperm.xlu0 %994, %v181_v7   ;;  %v927_v32 = vld [vmem:[%s1075_s26 + $0x41] sm:$0xff]  ;;  %v925_v33 = vld [vmem:[%s1075_s26 + $0x78] sm:$0x3f]  ;;  %v924_v34 = vld [vmem:[%s1075_s26 + $0x70] sm:$0xff] }
  0x1c   : >> { %v930_v35 = vld [vmem:[%s1075_s26 + $0x59] sm:$0xff]  ;;  %v929_v36 = vld [vmem:[%s1075_s26 + $0x51] sm:$0xff]  ;;  %v928_v37 = vld [vmem:[%s1075_s26 + $0x49] sm:$0xff] }
  0x1d   : >> { %v933_v39 = vld [vmem:[%s1075_s26 + $0x71] sm:$0xff]  ;;  %v932_v40 = vld [vmem:[%s1075_s26 + $0x69] sm:$0xff]  ;;  %v931_v41 = vld [vmem:[%s1075_s26 + $0x61] sm:$0xff] }
  0x1e   : >> { %v937_v43 = vld [vmem:[%s1075_s26 + $0x4a] sm:$0xff]  ;;  %v936_v44 = vld [vmem:[%s1075_s26 + $0x42] sm:$0xff]  ;;  %v934_v45 = vld [vmem:[%s1075_s26 + $0x79] sm:$0x3f] }
  0x1f   : >> { %v940_v47 = vld [vmem:[%s1075_s26 + $0x62] sm:$0xff]  ;;  %v939_v48 = vld [vmem:[%s1075_s26 + $0x5a] sm:$0xff]  ;;  %v938_v50 = vld [vmem:[%s1075_s26 + $0x52] sm:$0xff] }
  0x20   : >> { %v943_v57 = vld [vmem:[%s1075_s26 + $0x7a] sm:$0x3f]  ;;  %v942_v58 = vld [vmem:[%s1075_s26 + $0x72] sm:$0xff]  ;;  %v941_v60 = vld [vmem:[%s1075_s26 + $0x6a] sm:$0xff] }
  0x21   : >> { %v948_v4 = vld [vmem:[%s1075_s26 + $0x90] sm:$0xff]  ;;  %v947_v5 = vld [vmem:[%s1075_s26 + $0x88] sm:$0xff]  ;;  %v946_v6 = vld [vmem:[%s1075_s26 + $0x80] sm:$0xff] }
  0x22   : >> { %260 = vperm.xlu2 %996, %v248_v8   ;;  %226 = vperm.xlu1 %995, %v187_v9  }
  0x23   : >> { %221 = vperm.xlu0 %994, %v186_v10  }
  0x2a   : >> { %275 = vperm.xlu2 %996, %v251_v11   ;;  %270 = vperm.xlu1 %995, %v250_v12   ;;  %v951_v12 = vld [vmem:[%s1075_s26 + $0xa8] sm:$0xff] }
  0x2b   : >> { %265 = vperm.xlu0 %994, %v249_v13   ;;  %v950_v13 = vld [vmem:[%s1075_s26 + $0xa0] sm:$0xff] }
  0x32   : >> { %290 = vperm.xlu2 %996, %v254_v14   ;;  %285 = vperm.xlu1 %995, %v253_v15   ;;  %v949_v15 = vld [vmem:[%s1075_s26 + $0x98] sm:$0xff] }
  0x33   : >> { %280 = vperm.xlu0 %994, %v252_v16   ;;  %v1160_v16 = vld [vmem:[%s1363_s1 + $0x2] ss:$0 sm:$0xff] }
  0x3a   : >> { %334 = vperm.xlu2 %996, %v318_v17   ;;  %329 = vperm.xlu1 %995, %v317_v18  }
  0x3b   : >> { %295 = vperm.xlu0 %994, %v255_v19  }
  0x42   : >> { %349 = vperm.xlu2 %996, %v321_v20   ;;  %344 = vperm.xlu1 %995, %v320_v21  }
  0x43   : >> { %339 = vperm.xlu0 %994, %v319_v22  }
  0x4a   : >> { %364 = vperm.xlu2 %996, %v324_v23   ;;  %359 = vperm.xlu1 %995, %v323_v24  }
  0x4b   : >> { %354 = vperm.xlu0 %994, %v322_v25   ;;  %v955_v25 = vld [vmem:[%s1075_s26 + $0x81] sm:$0xff] }
  0x52   : >> { %411 = vperm.xlu2 %996, %v920_v26   ;;  %406 = vperm.xlu1 %995, %v919_v27   ;;  %v953_v26 = vld [vmem:[%s1075_s26 + $0xb8] sm:$0x3f] }
  0x53   : >> { %401 = vperm.xlu0 %994, %v918_v28  }
  0x5a   : >> { %426 = vperm.xlu2 %996, %v923_v29   ;;  %421 = vperm.xlu1 %995, %v922_v30   ;;  %v952_v29 = vld [vmem:[%s1075_s26 + $0xb0] sm:$0xff] }
  0x5b   : >> { %416 = vperm.xlu0 %994, %v921_v31  }
  0x62   : >> { %470 = vperm.xlu2 %996, %v927_v32   ;;  %436 = vperm.xlu1 %995, %v925_v33  }
  0x63   : >> { %431 = vperm.xlu0 %994, %v924_v34  }
  0x6a   : >> { %485 = vperm.xlu2 %996, %v930_v35   ;;  %480 = vperm.xlu1 %995, %v929_v36  }
  0x6b   : >> { %475 = vperm.xlu0 %994, %v928_v37  }
  0x6c   : >> { %v1113_v38 = vpop.permute.xlu2 %211 }
  0x6d   : >> { %v236_v36 = vmul.f32 %v1134_v51, %v1113_v38 }
  0x72   : >> { %500 = vperm.xlu2 %996, %v933_v39   ;;  %495 = vperm.xlu1 %995, %v932_v40   ;;  %v958_v40 = vld [vmem:[%s1075_s26 + $0x99] sm:$0xff] }
  0x73   : >> { %490 = vperm.xlu0 %994, %v931_v41   ;;  %v957_v41 = vld [vmem:[%s1075_s26 + $0x91] sm:$0xff] }
  0x74   : >> { %v1118_v42 = vpop.permute.xlu2 %216 }
  0x75   : >> { %v237_v33 = vmul.f32 %v1134_v51, %v1118_v42 }
  0x7a   : >> { %544 = vperm.xlu2 %996, %v937_v43   ;;  %539 = vperm.xlu1 %995, %v936_v44  }
  0x7b   : >> { %505 = vperm.xlu0 %994, %v934_v45   ;;  %v956_v45 = vld [vmem:[%s1075_s26 + $0x89] sm:$0xff] }
  0x7c   : >> { %v261_v46 = vpop.permute.xlu2 %260 }
  0x7d   : >> { %v301_v52 = vmul.f32 %v1128_v49, %v261_v46 }
  0x82   : >> { %559 = vperm.xlu2 %996, %v940_v47   ;;  %554 = vperm.xlu1 %995, %v939_v48  }
  0x83   : >> { %549 = vperm.xlu0 %994, %v938_v50  }
  0x84   : >> { %v276_v53 = vpop.permute.xlu2 %275  ;;  %v202_v54 = vpop.permute.xlu1 %201 }
  0x85   : >> { %v192_v55 = vpop.permute.xlu0 %191  ;;  %v304_v63 = vmul.f32 %v1128_v49, %v276_v53  ;;  %v234_v19 = vmul.f32 %v1134_v51, %v202_v54  ;;  %v961_v54 = vld [vmem:[%s1075_s26 + $0xb1] sm:$0xff] }
  0x86   : >> { %v232_v56 = vmul.f32 %v1134_v51, %v192_v55  ;;  %v960_v55 = vld [vmem:[%s1075_s26 + $0xa9] sm:$0xff] }
  0x88   : >> { %v1140_v59 = vadd.f32 %v301_v52, %v232_v56 }
  0x8a   : >> { %574 = vperm.xlu2 %996, %v943_v57   ;;  %569 = vperm.xlu1 %995, %v942_v58   ;;  %v959_v58 = vld [vmem:[%s1075_s26 + $0xa1] sm:$0xff] }
  0x8b   : >> { %564 = vperm.xlu0 %994, %v941_v60  }
  0x8c   : >> { %v291_v61 = vpop.permute.xlu2 %290  ;;  %v207_v62 = vpop.permute.xlu1 %206 }
  0x8d   : >> { %v235_v1 = vmul.f32 %v1134_v51, %v207_v62  ;;  %v197_v2 = vpop.permute.xlu0 %196  ;;  %v307_v10 = vmul.f32 %v1128_v49, %v291_v61 }
  0x8e   : >> { %v233_v22 = vmul.f32 %v1134_v51, %v197_v2  ;;  %v965_v2 = vld [vmem:[%s1075_s26 + $0x8a] sm:$0xff] }
  0x8f   : >> { %v1145_v3 = vadd.f32 %v304_v63, %v235_v1 }
  0x92   : >> { %621 = vperm.xlu2 %996, %v948_v4   ;;  %616 = vperm.xlu1 %995, %v947_v5   ;;  %v964_v4 = vld [vmem:[%s1075_s26 + $0x82] sm:$0xff] }
  0x93   : >> { %611 = vperm.xlu0 %994, %v946_v6  }
  0x94   : >> { %v335_v7 = vpop.permute.xlu2 %334  ;;  %v227_v8 = vpop.permute.xlu1 %226 }
  0x95   : >> { %v222_v9 = vpop.permute.xlu0 %221  ;;  %v371_v27 = vmul.f32 %v1160_v16, %v335_v7  ;;  %v239_v50 = vmul.f32 %v1134_v51, %v227_v8  ;;  %v962_v7 = vld [vmem:[%s1075_s26 + $0xb9] sm:$0x3f] }
  0x96   : >> { %v238_v11 = vmul.f32 %v1134_v51, %v222_v9 }
  0x98   : >> { %v1154_v14 = vadd.f32 %v307_v10, %v238_v11 }
  0x9a   : >> { %636 = vperm.xlu2 %996, %v951_v12   ;;  %631 = vperm.xlu1 %995, %v950_v13  }
  0x9b   : >> { %626 = vperm.xlu0 %994, %v949_v15   ;;  %v968_v15 = vld [vmem:[%s1075_s26 + $0xa2] sm:$0xff] }
  0x9c   : >> { %v350_v17 = vpop.permute.xlu2 %349  ;;  %v271_v18 = vpop.permute.xlu1 %270 }
  0x9d   : >> { %v303_v20 = vmul.f32 %v1128_v49, %v271_v18  ;;  %v266_v21 = vpop.permute.xlu0 %265  ;;  %v374_v43 = vmul.f32 %v1160_v16, %v350_v17  ;;  %v967_v17 = vld [vmem:[%s1075_s26 + $0x9a] sm:$0xff] }
  0x9e   : >> { %v302_v23 = vmul.f32 %v1128_v49, %v266_v21 }
  0x9f   : >> { %v311_v24 = vadd.f32 %v303_v20, %v234_v19  ;;  %v966_v20 = vld [vmem:[%s1075_s26 + $0x92] sm:$0xff] }
  0xa0   : >> { %v310_v28 = vadd.f32 %v302_v23, %v233_v22  ;;  %v1212_v22 = vld [vmem:[%s1363_s1 + $0x4] ss:$0 sm:$0xff] }
  0xa2   : >> { %680 = vperm.xlu2 %996, %v955_v25   ;;  %646 = vperm.xlu1 %995, %v953_v26   ;;  %v1170_v30 = vadd.f32 %v371_v27, %v310_v28  ;;  %v971_v27 = vld [vmem:[%s1075_s26 + $0xba] sm:$0x3f]  ;;  %v970_v28 = vld [vmem:[%s1075_s26 + $0xb2] sm:$0xff] }
  0xa3   : >> { %641 = vperm.xlu0 %994, %v952_v29  }
  0xa4   : >> { %v365_v31 = vpop.permute.xlu2 %364  ;;  %v286_v32 = vpop.permute.xlu1 %285 }
  0xa5   : >> { %v306_v34 = vmul.f32 %v1128_v49, %v286_v32  ;;  %v281_v35 = vpop.permute.xlu0 %280  ;;  %v377_v56 = vmul.f32 %v1160_v16, %v365_v31  ;;  %v969_v32 = vld [vmem:[%s1075_s26 + $0xaa] sm:$0xff] }
  0xa6   : >> { %v305_v37 = vmul.f32 %v1128_v49, %v281_v35 }
  0xa7   : >> { %v314_v39 = vadd.f32 %v306_v34, %v237_v33 }
  0xa8   : >> { %v313_v44 = vadd.f32 %v305_v37, %v236_v36 }
  0xaa   : >> { %695 = vperm.xlu2 %996, %v958_v40   ;;  %690 = vperm.xlu1 %995, %v957_v41   ;;  %v1182_v42 = vadd.f32 %v374_v43, %v313_v44 }
  0xab   : >> { %685 = vperm.xlu0 %994, %v956_v45  }
  0xac   : >> { %v412_v46 = vpop.permute.xlu2 %411  ;;  %v330_v47 = vpop.permute.xlu1 %329 }
  0xad   : >> { %v370_v38 = vmul.f32 %v1160_v16, %v330_v47  ;;  %v296_v48 = vpop.permute.xlu0 %295 }
  0xae   : >> { %v308_v52 = vmul.f32 %v1128_v49, %v296_v48  ;;  %v1000_v49 = vld [vmem:[%s1363_s1 + $0x3] ss:$0 sm:$0xff] }
  0xaf   : >> { %v378_v53 = vadd.f32 %v370_v38, %v1140_v59  ;;  %v444_v5 = vmul.f32 %v1000_v49, %v412_v46 }
  0xb0   : >> { %v316_v57 = vadd.f32 %v308_v52, %v239_v50 }
  0xb2   : >> { %710 = vperm.xlu2 %996, %v961_v54   ;;  %705 = vperm.xlu1 %995, %v960_v55   ;;  %v1192_v60 = vadd.f32 %v377_v56, %v316_v57 }
  0xb3   : >> { %700 = vperm.xlu0 %994, %v959_v58  }
  0xb4   : >> { %v427_v51 = vpop.permute.xlu2 %426  ;;  %v345_v59 = vpop.permute.xlu1 %344 }
  0xb5   : >> { %v373_v61 = vmul.f32 %v1160_v16, %v345_v59  ;;  %v340_v62 = vpop.permute.xlu0 %339  ;;  %v447_v18 = vmul.f32 %v1000_v49, %v427_v51 }
  0xb6   : >> { %v372_v63 = vmul.f32 %v1160_v16, %v340_v62 }
  0xb7   : >> { %v381_v1 = vadd.f32 %v373_v61, %v1145_v3 }
  0xb8   : >> { %v380_v6 = vadd.f32 %v372_v63, %v311_v24 }
  0xba   : >> { %754 = vperm.xlu2 %996, %v965_v2   ;;  %749 = vperm.xlu1 %995, %v964_v4   ;;  %v452_v8 = vadd.f32 %v444_v5, %v380_v6 }
  0xbb   : >> { %715 = vperm.xlu0 %994, %v962_v7  }
  0xbc   : >> { %v471_v9 = vpop.permute.xlu2 %470  ;;  %v360_v10 = vpop.permute.xlu1 %359 }
  0xbd   : >> { %v376_v11 = vmul.f32 %v1160_v16, %v360_v10  ;;  %v355_v12 = vpop.permute.xlu0 %354  ;;  %v511_v29 = vmul.f32 %v1212_v22, %v471_v9 }
  0xbe   : >> { %v375_v13 = vmul.f32 %v1160_v16, %v355_v12 }
  0xbf   : >> { %v384_v3 = vadd.f32 %v376_v11, %v1154_v14 }
  0xc0   : >> { %v383_v19 = vadd.f32 %v375_v13, %v314_v39 }
  0xc2   : >> { %769 = vperm.xlu2 %996, %v968_v15   ;;  %764 = vperm.xlu1 %995, %v967_v17   ;;  %v455_v21 = vadd.f32 %v447_v18, %v383_v19  ;;  %v1257_v18 = vld [vmem:[%s1363_s1 + $0x5] ss:$0 sm:$0xff] }
  0xc3   : >> { %759 = vperm.xlu0 %994, %v966_v20   ;;  %v1262_v20 = vld [vmem:[%s1363_s1 + $0x6] ss:$0 sm:$0xff] }
  0xc4   : >> { %v486_v16 = vpop.permute.xlu2 %485  ;;  %v407_v23 = vpop.permute.xlu1 %406 }
  0xc5   : >> { %v443_v14 = vmul.f32 %v1000_v49, %v407_v23  ;;  %v402_v24 = vpop.permute.xlu0 %401 }
  0xc6   : >> { %v442_v25 = vmul.f32 %v1000_v49, %v402_v24  ;;  %v1270_v24 = vld [vmem:[%s1363_s1 + $0x7] ss:$0 sm:$0xff] }
  0xc7   : >> { %v451_v26 = vadd.f32 %v443_v14, %v1170_v30  ;;  %v514_v30 = vmul.f32 %v1212_v22, %v486_v16 }
  0xc8   : >> { %v450_v31 = vadd.f32 %v442_v25, %v378_v53 }
  0xca   : >> { %784 = vperm.xlu2 %996, %v971_v27   ;;  %779 = vperm.xlu1 %995, %v970_v28   ;;  %v1219_v33 = vadd.f32 %v511_v29, %v450_v31 }
  0xcb   : >> { %774 = vperm.xlu0 %994, %v969_v32  }
  0xcc   : >> { %v501_v34 = vpop.permute.xlu2 %500  ;;  %v422_v35 = vpop.permute.xlu1 %421 }
  0xcd   : >> { %v446_v36 = vmul.f32 %v1000_v49, %v422_v35  ;;  %v417_v37 = vpop.permute.xlu0 %416  ;;  %v517_v50 = vmul.f32 %v1212_v22, %v501_v34  ;;  %v1280_v35 = vperm.slane %v1054_v0, 0 }
  0xce   : >> { %v445_v39 = vmul.f32 %v1000_v49, %v417_v37 }
  0xcf   : >> { %v454_v40 = vadd.f32 %v446_v36, %v1182_v42 }
  0xd0   : >> { %v453_v41 = vadd.f32 %v445_v39, %v381_v1 }
  0xd2   : >> { %v1223_v43 = vadd.f32 %v514_v30, %v453_v41 }
  0xd4   : >> { %v545_v44 = vpop.permute.xlu2 %544  ;;  %v437_v45 = vpop.permute.xlu1 %436 }
  0xd5   : >> { %v449_v46 = vmul.f32 %v1000_v49, %v437_v45  ;;  %v432_v47 = vpop.permute.xlu0 %431  ;;  %v581_v16 = vmul.f32 %v1257_v18, %v545_v44 }
  0xd6   : >> { %v448_v38 = vmul.f32 %v1000_v49, %v432_v47 }
  0xd7   : >> { %v1226_v48 = vadd.f32 %v449_v46, %v1192_v60 }
  0xd8   : >> { %v456_v52 = vadd.f32 %v448_v38, %v384_v3 }
  0xda   : >> { %v1229_v53 = vadd.f32 %v517_v50, %v456_v52 }
  0xdc   : >> { %v560_v54 = vpop.permute.xlu2 %559  ;;  %v481_v42 = vpop.permute.xlu1 %480 }
  0xdd   : >> { %v513_v55 = vmul.f32 %v1212_v22, %v481_v42  ;;  %v476_v56 = vpop.permute.xlu0 %475  ;;  %v584_v37 = vmul.f32 %v1257_v18, %v560_v54 }
  0xde   : >> { %v512_v3 = vmul.f32 %v1212_v22, %v476_v56 }
  0xdf   : >> { %v1232_v57 = vadd.f32 %v513_v55, %v452_v8 }
  0xe0   : >> { %v520_v19 = vadd.f32 %v512_v3, %v451_v26  ;;  %v1275_v26 = vld [vmem:[%s1363_s1 + $0x8] ss:$0 sm:$0xff] }
  0xe2   : >> { %v589_v25 = vadd.f32 %v581_v16, %v520_v19 }
  0xe4   : >> { %v1234_v58 = vpop.permute.xlu2 %574  ;;  %v496_v51 = vpop.permute.xlu1 %495 }
  0xe5   : >> { %v516_v49 = vmul.f32 %v1212_v22, %v496_v51  ;;  %v491_v59 = vpop.permute.xlu0 %490 }
  0xe6   : >> { %v515_v14 = vmul.f32 %v1212_v22, %v491_v59  ;;  %v587_v59 = vmul.f32 %v1257_v18, %v1234_v58 }
  0xe7   : >> { %v1237_v60 = vadd.f32 %v516_v49, %v455_v21 }
  0xe8   : >> { %v523_v32 = vadd.f32 %v515_v14, %v454_v40 }
  0xea   : >> { %v592_v46 = vadd.f32 %v584_v37, %v523_v32 }
  0xec   : >> { %v1239_v61 = vpop.permute.xlu2 %621  ;;  %v540_v62 = vpop.permute.xlu1 %539 }
  0xed   : >> { %v506_v63 = vpop.permute.xlu0 %505  ;;  %v580_v41 = vmul.f32 %v1257_v18, %v540_v62  ;;  %v654_v32 = vmul.f32 %v1262_v20, %v1239_v61 }
  0xee   : >> { %v518_v45 = vmul.f32 %v1212_v22, %v506_v63 }
  0xef   : >> { %v588_v55 = vadd.f32 %v580_v41, %v1219_v33 }
  0xf0   : >> { %v526_v22 = vadd.f32 %v518_v45, %v1226_v48 }
  0xf2   : >> { %v595_v48 = vadd.f32 %v587_v59, %v526_v22 }
  0xf4   : >> { %v1241_v1 = vpop.permute.xlu2 %636  ;;  %v555_v2 = vpop.permute.xlu1 %554 }
  0xf5   : >> { %v550_v4 = vpop.permute.xlu0 %549 }
  0xf6   : >> { %v582_v33 = vmul.f32 %v1257_v18, %v550_v4 }
  0xf8   : >> { %v590_v4 = vadd.f32 %v582_v33, %v1232_v57 }
  0xfc   : >> { %v681_v5 = vpop.permute.xlu2 %680  ;;  %v1243_v6 = vpop.permute.xlu1 %569 }
  0xfd   : >> { %v1245_v7 = vpop.permute.xlu0 %564 }
 0x104   : >> { %v617_v8 = vpop.permute.xlu1 %616  ;;  %v1247_v9 = vpop.permute.xlu2 %695 }
 0x105   : >> { %v612_v10 = vpop.permute.xlu0 %611  ;;  %v653_v23 = vmul.f32 %v1262_v20, %v617_v8  ;;  %v583_v8 = vmul.f32 %v1257_v18, %v555_v2  ;;  %v724_v57 = vmul.f32 %v1270_v24, %v1247_v9 }
 0x106   : >> { %v652_v38 = vmul.f32 %v1262_v20, %v612_v10  ;;  %v721_v10 = vmul.f32 %v1270_v24, %v681_v5 }
 0x107   : >> { %v661_v29 = vadd.f32 %v653_v23, %v589_v25  ;;  %v591_v5 = vadd.f32 %v583_v8, %v1223_v43  ;;  %v586_v43 = vmul.f32 %v1257_v18, %v1243_v6 }
 0x108   : >> { %v660_v49 = vadd.f32 %v652_v38, %v588_v55 }
 0x10a   : >> { %v729_v16 = vadd.f32 %v721_v10, %v660_v49 }
 0x10c   : >> { %v632_v11 = vpop.permute.xlu1 %631  ;;  %v1249_v13 = vpop.permute.xlu2 %710 }
 0x10d   : >> { %v627_v12 = vpop.permute.xlu0 %626  ;;  %v656_v39 = vmul.f32 %v1262_v20, %v632_v11 }
 0x10e   : >> { %v655_v19 = vmul.f32 %v1262_v20, %v627_v12 }
 0x10f   : >> { %v664_v52 = vadd.f32 %v656_v39, %v592_v46  ;;  %v585_v39 = vmul.f32 %v1257_v18, %v1245_v7  ;;  %v594_v7 = vadd.f32 %v586_v43, %v1229_v53  ;;  %v727_v53 = vmul.f32 %v1270_v24, %v1249_v13 }
 0x111   : >> { %v593_v38 = vadd.f32 %v585_v39, %v1237_v60 }
 0x114   : >> { %v647_v15 = vpop.permute.xlu1 %646  ;;  %v755_v21 = vpop.permute.xlu2 %754 }
 0x115   : >> { %v1252_v17 = vpop.permute.xlu0 %641  ;;  %v791_v34 = vmul.f32 %v1275_v26, %v755_v21  ;;  %v659_v62 = vmul.f32 %v1262_v20, %v647_v15 }
 0x116   : >> { %v658_v61 = vmul.f32 %v1262_v20, %v1252_v17 }
 0x117   : >> { %v667_v15 = vadd.f32 %v659_v62, %v595_v48 }
 0x118   : >> { %v666_v17 = vadd.f32 %v658_v61, %v594_v7 }
 0x11a   : >> { %v735_v49 = vadd.f32 %v727_v53, %v666_v17 }
 0x11c   : >> { %v691_v27 = vpop.permute.xlu1 %690  ;;  %v770_v44 = vpop.permute.xlu2 %769 }
 0x11d   : >> { %v686_v28 = vpop.permute.xlu0 %685  ;;  %v794_v56 = vmul.f32 %v1275_v26, %v770_v44 }
 0x11e   : >> { %v722_v31 = vmul.f32 %v1270_v24, %v686_v28 }
 0x120   : >> { %v730_v36 = vadd.f32 %v722_v31, %v661_v29  ;;  %v663_v29 = vadd.f32 %v655_v19, %v591_v5 }
 0x122   : >> { %v799_v30 = vadd.f32 %v791_v34, %v730_v36  ;;  %v723_v34 = vmul.f32 %v1270_v24, %v691_v27  ;;  %v732_v27 = vadd.f32 %v724_v57, %v663_v29 }
 0x124   : >> { %v810_v47 = vadd.f32 %v1280_v35, %v799_v30  ;;  %v1287_v40 = vpop.permute.xlu1 %705  ;;  %v785_v21 = vpop.permute.xlu2 %784  ;;  %v662_v30 = vadd.f32 %v654_v32, %v590_v4 }
 0x125   : >> { %v701_v50 = vpop.permute.xlu0 %700  ;;  %v797_v28 = vmul.f32 %v1275_v26, %v785_v21 }
 0x126   : >> { %v818_v54 = vmax.f32 %v810_v47, 0.0  ;;  %v725_v42 = vmul.f32 %v1270_v24, %v701_v50  ;;  %v731_v9 = vadd.f32 %v723_v34, %v662_v30 }
 0x128   : >> { %828 = vst.msk [vmem:[%s1293_s19 + $0x8] sm:$0xff] %vm826_vm0, %v818_v54  ;;  %v733_v51 = vadd.f32 %v725_v42, %v664_v52  ;;  %v657_v54 = vmul.f32 %v1262_v20, %v1241_v1  ;;  %v726_v42 = vmul.f32 %v1270_v24, %v1287_v40 }
 0x12a   : >> { %v802_v63 = vadd.f32 %v794_v56, %v733_v51  ;;  %v665_v56 = vadd.f32 %v657_v54, %v593_v38 }
 0x12c   : >> { %v813_v11 = vadd.f32 %v1280_v35, %v802_v63  ;;  %v750_v3 = vpop.permute.xlu1 %749  ;;  %v734_v20 = vadd.f32 %v726_v42, %v665_v56 }
 0x12d   : >> { %v790_v58 = vmul.f32 %v1275_v26, %v750_v3  ;;  %v716_v23 = vpop.permute.xlu0 %715 }
 0x12e   : >> { %v821_v14 = vmax.f32 %v813_v11, 0.0  ;;  %v728_v2 = vmul.f32 %v1270_v24, %v716_v23 }
 0x12f   : >> { %v798_v25 = vadd.f32 %v790_v58, %v729_v16 }
 0x130   : >> { %831 = vst.msk [vmem:[%s1293_s19 + $0x20] sm:$0xff] %vm826_vm0, %v821_v14  ;;  %v736_v12 = vadd.f32 %v728_v2, %v667_v15 }
 0x131   : >> { %v809_v31 = vadd.f32 %v1280_v35, %v798_v25 }
 0x132   : >> { %v805_v36 = vadd.f32 %v797_v28, %v736_v12 }
 0x133   : >> { %v817_v37 = vmax.f32 %v809_v31, 0.0 }
 0x134   : >> { %v816_v41 = vadd.f32 %v1280_v35, %v805_v36  ;;  %v765_v44 = vpop.permute.xlu1 %764 }
 0x135   : >> { %827 = vst.msk [vmem:[%s1293_s19] sm:$0xff] %vm826_vm0, %v817_v37  ;;  %v793_v6 = vmul.f32 %v1275_v26, %v765_v44  ;;  %v760_v45 = vpop.permute.xlu0 %759 }
 0x136   : >> { %v824_v46 = vmax.f32 %v816_v41, 0.0  ;;  %v792_v47 = vmul.f32 %v1275_v26, %v760_v45 }
 0x137   : >> { %v801_v18 = vadd.f32 %v793_v6, %v732_v27 }
 0x138   : >> { %835 = vst.msk [vmem:[%s1293_s19 + $0x38] sm:$0x3f] %vm834_vm1, %v824_v46  ;;  %v800_v50 = vadd.f32 %v792_v47, %v731_v9 }
 0x139   : >> { %v812_v52 = vadd.f32 %v1280_v35, %v801_v18 }
 0x13a   : >> { %v811_v55 = vadd.f32 %v1280_v35, %v800_v50 }
 0x13b   : >> { %v820_v22 = vmax.f32 %v812_v52, 0.0 }
 0x13c   : >> { %v819_v60 = vmax.f32 %v811_v55, 0.0  ;;  %v780_v51 = vpop.permute.xlu1 %779 }
 0x13d   : >> { %830 = vst.msk [vmem:[%s1293_s19 + $0x18] sm:$0xff] %vm826_vm0, %v820_v22  ;;  %v796_v59 = vmul.f32 %v1275_v26, %v780_v51  ;;  %v775_v1 = vpop.permute.xlu0 %774 }
 0x13e   : >> { %829 = vst.msk [vmem:[%s1293_s19 + $0x10] sm:$0xff] %vm826_vm0, %v819_v60  ;;  %v795_v40 = vmul.f32 %v1275_v26, %v775_v1 }
 0x13f   : >> { %v804_v62 = vadd.f32 %v796_v59, %v735_v49 }
 0x140   : >> { %v803_v63 = vadd.f32 %v795_v40, %v734_v20 }
 0x141   : >> { %v815_v13 = vadd.f32 %v1280_v35, %v804_v62 }
 0x142   : >> { %v814_v24 = vadd.f32 %v1280_v35, %v803_v63  ;;  %176 = sbr.rel (!%p174_p4) target bundleno = 15 (0xf), region = 81 }
 0x143   : >> { %v823_v8 = vmax.f32 %v815_v13, 0.0 }
 0x144   : >> { %v822_v10 = vmax.f32 %v814_v24, 0.0 }
 0x145   : >> { %833 = vst.msk [vmem:[%s1293_s19 + $0x30] sm:$0xff] %vm826_vm0, %v823_v8 }
 0x146   : >> { %832 = vst.msk [vmem:[%s1293_s19 + $0x28] sm:$0xff] %vm826_vm0, %v822_v10 }
 0x147 PF: > { %s13_s12 = sadd.s32 1, %s1016_s12  }
 0x148   : > { %p10_p5 = scmp.ge.s32.totalorder %s13_s12, 4  }
 0x14a   :  { %12 = sbr.rel (!%p10_p5) target bundleno = 1 (0x1), region = 92 }

// kernel: net_forward.12
= control target key start
LH: loop header
LB: loop body
LE: loop exit
PB: predicated region body
PF: predicated region fallthrough
CT: control target
= control target key end

     0   :  { %s1234_s12 = smov 0   ;;  %s1569_s0 = inlined_call_operand.vmem [shape: f32[2,62,62,16], index: 0, kind: input, shape index: {}]   ;;  %s1570_s1 = inlined_call_operand.vmem [shape: f32[9,16,64], index: 1, kind: input, shape index: {}]   ;;  %s1571_s2 = inlined_call_operand.vmem [shape: f32[1,64], index: 2, kind: input, shape index: {}]   ;;  %s1572_s3 = inlined_call_operand.vmem [shape: f32[2,60,60,64], index: 3, kind: output, shape index: {}]  }
   0x1 LB: > { %s1026_s13 = sadd.s32 4294967295, %s1208_s12   ;;  %p1030_p0 = scmp.ge.s32.totalorder %s1208_s12, 1  ;;  %s1208_s12 = sphi %s1234_s12, %s13_s12  }
   0x2   : > { %p137_p1 = scmp.lt.s32.totalorder %s1208_s12, 3 }
   0x4   : > { %p138_p2 = pnand %p1030_p0, %p137_p1 }
   0x5   : > { %p161_p3 = scmp.lt.s32.totalorder (!%p138_p2), %s1026_s13, 1  ;;  %s1257_s24 = smov (!%p138_p2), 0  }
   0x6   : > { %141 = sbr.rel (%p138_p2) target bundleno = 301 (0x12d), region = 32 }
   0xb   : > { %v1245_v0 = vld [vmem:[%s1571_s2] sm:$0x1]  ;;  %s1574_s13 = smov (!%p161_p3, %s1026_s13), 1 }
   0xc   : > { %s1180_s16 = smul.u32 3968, %s1574_s13 }
   0xd   : > { %s1181_s17 = smul.u32 3840, %s1574_s13 }
   0xe   : > { %s1250_s20 = scalar_lea.vmem %s1569_s0, %s1180_s16 }
   0xf   : > { %s1255_s23 = scalar_lea.vmem %s1572_s3, %s1181_s17 }
  0x10 LB: >> { %v1035_v1 = vld [vmem:[%s1570_s1 + $0x18] sm:$0xff]  ;;  %v1034_v2 = vld [vmem:[%s1570_s1 + $0x10] sm:$0xff]  ;;  %v1053_v3 = vld [vmem:[%s1570_s1 + $0x28] sm:$0xff]  ;;  %s1033_s4 = sshll.u32 %s1212_s24, 6  ;;  %vm201_vm0 = vcmask 130048   ;;  %vm946_vm1 = vcmask 523264   ;;  %s1212_s24 = sphi %s1257_s24, %s177_s24  }
  0x11   : >> { %1174 = vmatpush.msra.mxu1 %v1035_v1  ;;  %1175 = vmatpush.msra.mxu2 %v1035_v1  ;;  %s1275_s5 = scalar_lea.vmem %s1250_s20, %s1033_s4  ;;  %v1072_v4 = vld [vmem:[%s1570_s1 + $0x38] sm:$0xff]  ;;  %v189_v5 = vld [vmem:[%s1570_s1 + $0x8] sm:$0xff]  ;;  %v1052_v6 = vld [vmem:[%s1570_s1 + $0x20] sm:$0xff]  ;;  %vm954_vm2 = vcmask 519168   ;;  %s177_s24 = sadd.s32 1, %s1212_s24  }
  0x12   : >> { %1176 = vmatpush.msra.mxu3 %v1035_v1  ;;  %240 = vmatpush.msra.mxu0 %v1035_v1  ;;  %v192_v7 = vld [vmem:[%s1275_s5 + $0x11] sm:$0xff]  ;;  %v194_v8 = vld [vmem:[%s1275_s5 + $0x21] sm:$0xff]  ;;  %v193_v18 = vld [vmem:[%s1275_s5 + $0x19] sm:$0xff]  ;;  %p174_p4 = scmp.ge.s32.totalorder %s177_s24, 60  }
  0x13   : >> { %1177 = vmatpush.msra.mxu1 %v1034_v2  ;;  %1178 = vmatpush.msra.mxu2 %v1034_v2  ;;  %v196_v9 = vld [vmem:[%s1275_s5 + $0x31] sm:$0xff]  ;;  %v188_v10 = vld [vmem:[%s1570_s1] sm:$0xff]  ;;  %v1090_v13 = vld [vmem:[%s1570_s1 + $0x48] sm:$0xff] }
  0x14   : >> { %1179 = vmatpush.msra.mxu3 %v1034_v2  ;;  %1038 = vmatmul.msk.f32.vlgmr.msra.gmra.mxu1 %vm201_vm0, %v192_v7  ;;  %v190_v11 = vld [vmem:[%s1275_s5 + $0x1] sm:$0xff]  ;;  %v1071_v12 = vld [vmem:[%s1570_s1 + $0x30] sm:$0xff]  ;;  %v1145_v15 = vld [vmem:[%s1570_s1 + $0x78] sm:$0xff] }
  0x15   : >> { %381 = vmatpush.msrb.mxu2 %v1053_v3  ;;  %1042 = vmatmul.msk.f32.vlgmr.msra.gmra.mxu3 %vm201_vm0, %v196_v9  ;;  %v1127_v14 = vld [vmem:[%s1570_s1 + $0x68] sm:$0xff]  ;;  %v1108_v16 = vld [vmem:[%s1570_s1 + $0x58] sm:$0xff]  ;;  %v1089_v17 = vld [vmem:[%s1570_s1 + $0x40] sm:$0xff] }
  0x16   : >> { %1040 = vmatmul.msk.f32.vlgmr.msra.gmra.mxu2 %vm201_vm0, %v194_v8  ;;  %305 = vmatpush.msrb.mxu1 %v189_v5  ;;  %v195_v19 = vld [vmem:[%s1275_s5 + $0x29] sm:$0xff]  ;;  %v197_v20 = vld [vmem:[%s1275_s5 + $0x39] sm:$0xf]  ;;  %v180_v23 = vld [vmem:[%s1275_s5] sm:$0xff] }
  0x17   : >> { %468 = vmatpush.msrb.mxu3 %v1072_v4  ;;  %382 = vmatpush.msrb.mxu2 %v1052_v6  ;;  %v1163_v21 = vld [vmem:[%s1570_s1 + $0x88] sm:$0xff]  ;;  %v1063_v25 = vld [vmem:[%s1275_s5 + $0x40] sm:$0xff]  ;;  %v1144_v28 = vld [vmem:[%s1570_s1 + $0x70] sm:$0xff] }
  0x18   : >> { %241 = vmatpush.msra.mxu0 %v1034_v2  ;;  %306 = vmatpush.msrb.mxu1 %v188_v10  ;;  %v191_v22 = vld [vmem:[%s1275_s5 + $0x9] sm:$0xff]  ;;  %v1126_v26 = vld [vmem:[%s1570_s1 + $0x60] sm:$0xff]  ;;  %v334_v36 = vld [vmem:[%s1275_s5 + $0x12] sm:$0xff] }
  0x19   : >> { %1036 = vmatmul.msk.f32.vlgmr.msra.gmra.mxu0 %vm201_vm0, %v190_v11  ;;  %469 = vmatpush.msrb.mxu3 %v1071_v12  ;;  %v332_v24 = vld [vmem:[%s1275_s5 + $0x2] sm:$0xff]  ;;  %v1107_v29 = vld [vmem:[%s1570_s1 + $0x50] sm:$0xff]  ;;  %v183_v39 = vld [vmem:[%s1275_s5 + $0x18] sm:$0xff] }
  0x1a   : >> { %552 = vmatpush.msrb.mxu0 %v1090_v13  ;;  %723 = vmatpush.msra.mxu2 %v1127_v14  ;;  %v1081_v27 = vld [vmem:[%s1275_s5 + $0x41] sm:$0xff]  ;;  %v333_v31 = vld [vmem:[%s1275_s5 + $0xa] sm:$0xff]  ;;  %v1066_v41 = vld [vmem:[%s1275_s5 + $0x58] sm:$0xff] }
  0x1b   : >> { %807 = vmatpush.msra.mxu3 %v1145_v15  ;;  %636 = vmatpush.msra.mxu1 %v1108_v16  ;;  %v181_v30 = vld [vmem:[%s1275_s5 + $0x8] sm:$0xff]  ;;  %v1162_v34 = vld [vmem:[%s1570_s1 + $0x80] sm:$0xff]  ;;  %v182_v35 = vld [vmem:[%s1275_s5 + $0x10] sm:$0xff] }
  0x1c   : >> { %553 = vmatpush.msrb.mxu0 %v1089_v17  ;;  %1039 = vmatmul.msk.f32.gmra.mxu1 %vm201_vm0, %v193_v18  ;;  %v1064_v32 = vld [vmem:[%s1275_s5 + $0x48] sm:$0xff]  ;;  %v1065_v37 = vld [vmem:[%s1275_s5 + $0x50] sm:$0xff]  ;;  %v335_v40 = vld [vmem:[%s1275_s5 + $0x1a] sm:$0xff] }
  0x1d   : >> { %1043 = vmatmul.msk.f32.gmra.mxu3 %vm201_vm0, %v197_v20  ;;  %724 = vmatpush.msra.mxu2 %v1126_v26  ;;  %v1082_v33 = vld [vmem:[%s1275_s5 + $0x49] sm:$0xff]  ;;  %v1083_v38 = vld [vmem:[%s1275_s5 + $0x51] sm:$0xff]  ;;  %v1084_v42 = vld [vmem:[%s1275_s5 + $0x59] sm:$0xff] }
  0x1e   : >> { %1041 = vmatmul.msk.f32.gmra.mxu2 %vm201_vm0, %v195_v19  ;;  %891 = vmatpush.msra.mxu0 %v1163_v21  ;;  %v184_v43 = vld [vmem:[%s1275_s5 + $0x20] sm:$0xff]  ;;  %v185_v47 = vld [vmem:[%s1275_s5 + $0x28] sm:$0xff]  ;;  %v186_v51 = vld [vmem:[%s1275_s5 + $0x30] sm:$0xff] }
  0x1f   : >> { %808 = vmatpush.msra.mxu3 %v1144_v28  ;;  %637 = vmatpush.msra.mxu1 %v1107_v29  ;;  %v336_v44 = vld [vmem:[%s1275_s5 + $0x22] sm:$0xff]  ;;  %v337_v48 = vld [vmem:[%s1275_s5 + $0x2a] sm:$0xff]  ;;  %v338_v52 = vld [vmem:[%s1275_s5 + $0x32] sm:$0xff] }
  0x20   : >> { %892 = vmatpush.msra.mxu0 %v1162_v34  ;;  %v1067_v45 = vld [vmem:[%s1275_s5 + $0x60] sm:$0xff]  ;;  %v1068_v49 = vld [vmem:[%s1275_s5 + $0x68] sm:$0xff]  ;;  %v1069_v53 = vld [vmem:[%s1275_s5 + $0x70] sm:$0xff] }
  0x21   : >> { %1037 = vmatmul.msk.f32.gmra.mxu0 %vm201_vm0, %v191_v22  ;;  %v1085_v46 = vld [vmem:[%s1275_s5 + $0x61] sm:$0xff]  ;;  %v1086_v50 = vld [vmem:[%s1275_s5 + $0x69] sm:$0xff]  ;;  %v1087_v54 = vld [vmem:[%s1275_s5 + $0x71] sm:$0xff] }
  0x22   : >> { %v187_v55 = vld [vmem:[%s1275_s5 + $0x38] sm:$0xf]  ;;  %v1099_v59 = vld [vmem:[%s1275_s5 + $0x42] sm:$0xff]  ;;  %v1100_v63 = vld [vmem:[%s1275_s5 + $0x4a] sm:$0xff] }
  0x23   : >> { %v339_v56 = vld [vmem:[%s1275_s5 + $0x3a] sm:$0xf]  ;;  %v1118_v60 = vld [vmem:[%s1275_s5 + $0x80] sm:$0xff]  ;;  %v1119_v1 = vld [vmem:[%s1275_s5 + $0x88] sm:$0xff] }
  0x24   : >> { %1044 = vmatmul.msk.f32.vlgmr.msrb.gmra.mxu1 %vm201_vm0, %v180_v23  ;;  %v1070_v57 = vld [vmem:[%s1275_s5 + $0x78] sm:$0xf]  ;;  %v1136_v61 = vld [vmem:[%s1275_s5 + $0x81] sm:$0xff]  ;;  %v1137_v2 = vld [vmem:[%s1275_s5 + $0x89] sm:$0xff] }
  0x25   : >> { %1073 = vmatmul.msk.f32.vlgmr.msrb.gmra.mxu3 %vm201_vm0, %v1063_v25  ;;  %v1088_v58 = vld [vmem:[%s1275_s5 + $0x79] sm:$0xf]  ;;  %v1154_v62 = vld [vmem:[%s1275_s5 + $0x82] sm:$0xff]  ;;  %v1155_v3 = vld [vmem:[%s1275_s5 + $0x8a] sm:$0xff] }
  0x26   : >> { %1054 = vmatmul.msk.f32.vlgmr.msrb.gmra.mxu2 %vm201_vm0, %v332_v24  ;;  %v1101_v4 = vld [vmem:[%s1275_s5 + $0x52] sm:$0xff]  ;;  %v1102_v8 = vld [vmem:[%s1275_s5 + $0x5a] sm:$0xff]  ;;  %v1103_v12 = vld [vmem:[%s1275_s5 + $0x62] sm:$0xff] }
  0x27   : >> { %v1120_v5 = vld [vmem:[%s1275_s5 + $0x90] sm:$0xff]  ;;  %v1121_v9 = vld [vmem:[%s1275_s5 + $0x98] sm:$0xff]  ;;  %v1122_v13 = vld [vmem:[%s1275_s5 + $0xa0] sm:$0xff] }
  0x28   : >> { %v1138_v6 = vld [vmem:[%s1275_s5 + $0x91] sm:$0xff]  ;;  %v1139_v10 = vld [vmem:[%s1275_s5 + $0x99] sm:$0xff]  ;;  %v1140_v14 = vld [vmem:[%s1275_s5 + $0xa1] sm:$0xff] }
  0x29   : >> { %1091 = vmatmul.msk.f32.vlgmr.msrb.gmra.mxu0 %vm201_vm0, %v1081_v27  ;;  %v1156_v7 = vld [vmem:[%s1275_s5 + $0x92] sm:$0xff]  ;;  %v1157_v11 = vld [vmem:[%s1275_s5 + $0x9a] sm:$0xff]  ;;  %v1158_v15 = vld [vmem:[%s1275_s5 + $0xa2] sm:$0xff] }
  0x2a   : >> { %v1104_v16 = vld [vmem:[%s1275_s5 + $0x6a] sm:$0xff]  ;;  %v1105_v21 = vld [vmem:[%s1275_s5 + $0x72] sm:$0xff]  ;;  %v1106_v29 = vld [vmem:[%s1275_s5 + $0x7a] sm:$0xf] }
  0x2b   : >> { %v1123_v17 = vld [vmem:[%s1275_s5 + $0xa8] sm:$0xff]  ;;  %v1124_v22 = vld [vmem:[%s1275_s5 + $0xb0] sm:$0xff] }
  0x2c   : >> { %1045 = vmatmul.msk.f32.gmra.mxu1 %vm201_vm0, %v181_v30  ;;  %v1141_v18 = vld [vmem:[%s1275_s5 + $0xa9] sm:$0xff]  ;;  %v1142_v23 = vld [vmem:[%s1275_s5 + $0xb1] sm:$0xff] }
  0x2d   : >> { %1074 = vmatmul.msk.f32.gmra.mxu3 %vm201_vm0, %v1064_v32  ;;  %v1159_v19 = vld [vmem:[%s1275_s5 + $0xaa] sm:$0xff]  ;;  %v1160_v25 = vld [vmem:[%s1275_s5 + $0xb2] sm:$0xff] }
  0x2e   : >> { %1055 = vmatmul.msk.f32.gmra.mxu2 %vm201_vm0, %v333_v31  ;;  %v1125_v30 = vld [vmem:[%s1275_s5 + $0xb8] sm:$0xf] }
  0x2f   : >> { %v1143_v31 = vld [vmem:[%s1275_s5 + $0xb9] sm:$0xf] }
  0x31   : >> { %1092 = vmatmul.msk.f32.gmra.mxu0 %vm201_vm0, %v1082_v33  ;;  %v1161_v33 = vld [vmem:[%s1275_s5 + $0xba] sm:$0xf]  ;;  %s1518_s5 = scalar_lea.vmem %s1255_s23, %s1033_s4 }
  0x34   : >> { %1046 = vmatmul.msk.f32.gmra.mxu1 %vm201_vm0, %v182_v35 }
  0x35   : >> { %1075 = vmatmul.msk.f32.gmra.mxu3 %vm201_vm0, %v1065_v37 }
  0x36   : >> { %1056 = vmatmul.msk.f32.gmra.mxu2 %vm201_vm0, %v334_v36 }
  0x39   : >> { %1093 = vmatmul.msk.f32.gmra.mxu0 %vm201_vm0, %v1083_v38 }
  0x3c   : >> { %1047 = vmatmul.msk.f32.gmra.mxu1 %vm201_vm0, %v183_v39 }
  0x3d   : >> { %1076 = vmatmul.msk.f32.gmra.mxu3 %vm201_vm0, %v1066_v41 }
  0x3e   : >> { %1057 = vmatmul.msk.f32.gmra.mxu2 %vm201_vm0, %v335_v40 }
  0x41   : >> { %1094 = vmatmul.msk.f32.gmra.mxu0 %vm201_vm0, %v1084_v42 }
  0x44   : >> { %1048 = vmatmul.msk.f32.gmra.mxu1 %vm201_vm0, %v184_v43 }
  0x45   : >> { %1077 = vmatmul.msk.f32.gmra.mxu3 %vm201_vm0, %v1067_v45 }
  0x46   : >> { %1058 = vmatmul.msk.f32.gmra.mxu2 %vm201_vm0, %v336_v44 }
  0x49   : >> { %1095 = vmatmul.msk.f32.gmra.mxu0 %vm201_vm0, %v1085_v46 }
  0x4c   : >> { %1049 = vmatmul.msk.f32.gmra.mxu1 %vm201_vm0, %v185_v47 }
  0x4d   : >> { %1078 = vmatmul.msk.f32.gmra.mxu3 %vm201_vm0, %v1068_v49 }
  0x4e   : >> { %1059 = vmatmul.msk.f32.gmra.mxu2 %vm201_vm0, %v337_v48 }
  0x51   : >> { %1096 = vmatmul.msk.f32.gmra.mxu0 %vm201_vm0, %v1086_v50 }
  0x54   : >> { %1050 = vmatmul.msk.f32.gmra.mxu1 %vm201_vm0, %v186_v51 }
  0x55   : >> { %1079 = vmatmul.msk.f32.gmra.mxu3 %vm201_vm0, %v1069_v53 }
  0x56   : >> { %1060 = vmatmul.msk.f32.gmra.mxu2 %vm201_vm0, %v338_v52 }
  0x59   : >> { %1097 = vmatmul.msk.f32.gmra.mxu0 %vm201_vm0, %v1087_v54 }
  0x5c   : >> { %1051 = vmatmul.msk.f32.gmra.mxu1 %vm201_vm0, %v187_v55 }
  0x5d   : >> { %1080 = vmatmul.msk.f32.gmra.mxu3 %vm201_vm0, %v1070_v57 }
  0x5e   : >> { %1061 = vmatmul.msk.f32.gmra.mxu2 %vm201_vm0, %v339_v56 }
  0x61   : >> { %1098 = vmatmul.msk.f32.gmra.mxu0 %vm201_vm0, %v1088_v58 }
  0x64   : >> { %1109 = vmatmul.msk.f32.vlgmr.msra.gmra.mxu1 %vm201_vm0, %v1099_v59 }
  0x65   : >> { %1146 = vmatmul.msk.f32.vlgmr.msra.gmra.mxu3 %vm201_vm0, %v1136_v61 }
  0x66   : >> { %1128 = vmatmul.msk.f32.vlgmr.msra.gmra.mxu2 %vm201_vm0, %v1118_v60 }
  0x69   : >> { %1164 = vmatmul.msk.f32.vlgmr.msra.gmra.mxu0 %vm201_vm0, %v1154_v62 }
  0x6c   : >> { %1110 = vmatmul.msk.f32.gmra.mxu1 %vm201_vm0, %v1100_v63 }
  0x6d   : >> { %1147 = vmatmul.msk.f32.gmra.mxu3 %vm201_vm0, %v1137_v2 }
  0x6e   : >> { %1129 = vmatmul.msk.f32.gmra.mxu2 %vm201_vm0, %v1119_v1 }
  0x71   : >> { %1165 = vmatmul.msk.f32.gmra.mxu0 %vm201_vm0, %v1155_v3 }
  0x74   : >> { %1111 = vmatmul.msk.f32.gmra.mxu1 %vm201_vm0, %v1101_v4 }
  0x75   : >> { %1148 = vmatmul.msk.f32.gmra.mxu3 %vm201_vm0, %v1138_v6 }
  0x76   : >> { %1130 = vmatmul.msk.f32.gmra.mxu2 %vm201_vm0, %v1120_v5 }
  0x79   : >> { %1166 = vmatmul.msk.f32.gmra.mxu0 %vm201_vm0, %v1156_v7 }
  0x7c   : >> { %1112 = vmatmul.msk.f32.gmra.mxu1 %vm201_vm0, %v1102_v8 }
  0x7d   : >> { %1149 = vmatmul.msk.f32.gmra.mxu3 %vm201_vm0, %v1139_v10 }
  0x7e   : >> { %1131 = vmatmul.msk.f32.gmra.mxu2 %vm201_vm0, %v1121_v9 }
  0x81   : >> { %1167 = vmatmul.msk.f32.gmra.mxu0 %vm201_vm0, %v1157_v11 }
  0x84   : >> { %1113 = vmatmul.msk.f32.gmra.mxu1 %vm201_vm0, %v1103_v12 }
  0x85   : >> { %1150 = vmatmul.msk.f32.gmra.mxu3 %vm201_vm0, %v1140_v14 }
  0x86   : >> { %1132 = vmatmul.msk.f32.gmra.mxu2 %vm201_vm0, %v1122_v13 }
  0x89   : >> { %1168 = vmatmul.msk.f32.gmra.mxu0 %vm201_vm0, %v1158_v15 }
  0x8c   : >> { %1114 = vmatmul.msk.f32.gmra.mxu1 %vm201_vm0, %v1104_v16 }
  0x8d   : >> { %1151 = vmatmul.msk.f32.gmra.mxu3 %vm201_vm0, %v1141_v18 }
  0x8e   : >> { %1133 = vmatmul.msk.f32.gmra.mxu2 %vm201_vm0, %v1123_v17 }
  0x91   : >> { %1169 = vmatmul.msk.f32.gmra.mxu0 %vm201_vm0, %v1159_v19  ;;  %v1450_v20 = vpop.f32.mrf.mxu1 }
  0x94   : >> { %1115 = vmatmul.msk.f32.gmra.mxu1 %vm201_vm0, %v1105_v21 }
  0x95   : >> { %1152 = vmatmul.msk.f32.gmra.mxu3 %vm201_vm0, %v1142_v23 }
  0x96   : >> { %1134 = vmatmul.msk.f32.gmra.mxu2 %vm201_vm0, %v1124_v22  ;;  %v243_v24 = vpop.f32.mrf.mxu0  ;;  %v1512_v22 = vperm.slane %v1245_v0, 0 }
  0x98   : >> { %v1461_v27 = vpop.f32.mrf.mxu3 }
  0x99   : >> { %v1459_v26 = vpop.f32.mrf.mxu2  ;;  %1170 = vmatmul.msk.f32.gmra.mxu0 %vm201_vm0, %v1160_v25  ;;  %v1464_v28 = vpop.f32.mrf.mxu1 }
  0x9c   : >> { %1116 = vmatmul.msk.f32.gmra.mxu1 %vm201_vm0, %v1106_v29 }
  0x9d   : >> { %1153 = vmatmul.msk.f32.gmra.mxu3 %vm201_vm0, %v1143_v31 }
  0x9e   : >> { %1135 = vmatmul.msk.f32.gmra.mxu2 %vm201_vm0, %v1125_v30  ;;  %v246_v32 = vpop.f32.mrf.mxu0 }
  0xa0   : >> { %v1475_v35 = vpop.f32.mrf.mxu3 }
  0xa1   : >> { %v1473_v34 = vpop.f32.mrf.mxu2  ;;  %1171 = vmatmul.msk.f32.gmra.mxu0 %vm201_vm0, %v1161_v33  ;;  %v308_v36 = vpop.f32.mrf.mxu1 }
  0xa2   : >> { %v309_v2 = vadd.f32 %v308_v36, %v243_v24 }
  0xa6   : >> { %v555_v37 = vpop.f32.mrf.mxu0 }
  0xa8   : >> { %v471_v39 = vpop.f32.mrf.mxu3 }
  0xa9   : >> { %v384_v38 = vpop.f32.mrf.mxu2  ;;  %v311_v40 = vpop.f32.mrf.mxu1 }
  0xaa   : >> { %v408_v3 = vadd.f32 %v384_v38, %v309_v2  ;;  %v312_v9 = vadd.f32 %v311_v40, %v246_v32 }
  0xac   : >> { %v495_v6 = vadd.f32 %v471_v39, %v408_v3 }
  0xae   : >> { %v558_v41 = vpop.f32.mrf.mxu0  ;;  %v579_v10 = vadd.f32 %v555_v37, %v495_v6 }
  0xb0   : >> { %v474_v43 = vpop.f32.mrf.mxu3 }
  0xb1   : >> { %v387_v42 = vpop.f32.mrf.mxu2  ;;  %v314_v44 = vpop.f32.mrf.mxu1 }
  0xb2   : >> { %v409_v11 = vadd.f32 %v387_v42, %v312_v9  ;;  %v315_v19 = vadd.f32 %v314_v44, %v1450_v20 }
  0xb4   : >> { %v496_v15 = vadd.f32 %v474_v43, %v409_v11 }
  0xb6   : >> { %v561_v45 = vpop.f32.mrf.mxu0  ;;  %v580_v23 = vadd.f32 %v558_v41, %v496_v15 }
  0xb8   : >> { %v477_v47 = vpop.f32.mrf.mxu3 }
  0xb9   : >> { %v390_v46 = vpop.f32.mrf.mxu2  ;;  %v317_v48 = vpop.f32.mrf.mxu1 }
  0xba   : >> { %v410_v24 = vadd.f32 %v390_v46, %v315_v19  ;;  %v318_v39 = vadd.f32 %v317_v48, %v1464_v28 }
  0xbc   : >> { %v497_v33 = vadd.f32 %v477_v47, %v410_v24 }
  0xbe   : >> { %v1478_v49 = vpop.f32.mrf.mxu0  ;;  %v581_v41 = vadd.f32 %v561_v45, %v497_v33 }
  0xc0   : >> { %v480_v51 = vpop.f32.mrf.mxu3 }
  0xc1   : >> { %v393_v50 = vpop.f32.mrf.mxu2  ;;  %v320_v52 = vpop.f32.mrf.mxu1 }
  0xc2   : >> { %v411_v42 = vadd.f32 %v393_v50, %v318_v39  ;;  %v321_v11 = vadd.f32 %v320_v52, %v1459_v26 }
  0xc4   : >> { %v498_v6 = vadd.f32 %v480_v51, %v411_v42 }
  0xc6   : >> { %v1480_v53 = vpop.f32.mrf.mxu0  ;;  %v582_v45 = vadd.f32 %v1478_v49, %v498_v6 }
  0xc8   : >> { %v1484_v55 = vpop.f32.mrf.mxu3 }
  0xc9   : >> { %v1482_v54 = vpop.f32.mrf.mxu2  ;;  %v1486_v56 = vpop.f32.mrf.mxu1 }
  0xca   : >> { %v412_v48 = vadd.f32 %v1482_v54, %v321_v11  ;;  %v324_v52 = vadd.f32 %v1486_v56, %v1473_v34 }
  0xcc   : >> { %v499_v15 = vadd.f32 %v1484_v55, %v412_v48 }
  0xce   : >> { %v1488_v57 = vpop.f32.mrf.mxu0  ;;  %v583_v54 = vadd.f32 %v1480_v53, %v499_v15 }
  0xd0   : >> { %v1492_v59 = vpop.f32.mrf.mxu3 }
  0xd1   : >> { %v1490_v58 = vpop.f32.mrf.mxu2  ;;  %v1494_v60 = vpop.f32.mrf.mxu1 }
  0xd2   : >> { %v413_v19 = vadd.f32 %v1490_v58, %v324_v52  ;;  %v327_v56 = vadd.f32 %v1494_v60, %v1461_v27 }
  0xd6   : >> { %v1496_v61 = vpop.f32.mrf.mxu0 }
  0xd8   : >> { %v1500_v63 = vpop.f32.mrf.mxu3 }
  0xd9   : >> { %v1498_v62 = vpop.f32.mrf.mxu2  ;;  %v1502_v1 = vpop.f32.mrf.mxu1 }
  0xda   : >> { %v414_v33 = vadd.f32 %v1498_v62, %v327_v56  ;;  %v330_v60 = vadd.f32 %v1502_v1, %v1475_v35 }
  0xdc   : >> { %v501_v39 = vadd.f32 %v1500_v63, %v414_v33 }
  0xde   : >> { %v1504_v4 = vpop.f32.mrf.mxu0  ;;  %v585_v62 = vadd.f32 %v1496_v61, %v501_v39 }
  0xe0   : >> { %v1508_v7 = vpop.f32.mrf.mxu3 }
  0xe1   : >> { %v1506_v5 = vpop.f32.mrf.mxu2  ;;  %v639_v8 = vpop.f32.mrf.mxu1 }
  0xe2   : >> { %v663_v13 = vadd.f32 %v639_v8, %v579_v10 }
  0xe6   : >> { %v894_v12 = vpop.f32.mrf.mxu0 }
  0xe8   : >> { %v810_v17 = vpop.f32.mrf.mxu3 }
  0xe9   : >> { %v726_v14 = vpop.f32.mrf.mxu2  ;;  %v642_v18 = vpop.f32.mrf.mxu1 }
  0xea   : >> { %v750_v16 = vadd.f32 %v726_v14, %v663_v13  ;;  %v664_v30 = vadd.f32 %v642_v18, %v580_v23 }
  0xec   : >> { %v834_v21 = vadd.f32 %v810_v17, %v750_v16 }
  0xee   : >> { %v918_v25 = vadd.f32 %v894_v12, %v834_v21  ;;  %v897_v29 = vpop.f32.mrf.mxu0 }
  0xf0   : >> { %v929_v31 = vadd.f32 %v1512_v22, %v918_v25  ;;  %v813_v37 = vpop.f32.mrf.mxu3 }
  0xf1   : >> { %v729_v32 = vpop.f32.mrf.mxu2  ;;  %v645_v38 = vpop.f32.mrf.mxu1 }
  0xf2   : >> { %v937_v36 = vmax.f32 %v929_v31, 0.0  ;;  %v751_v20 = vadd.f32 %v729_v32, %v664_v30  ;;  %v665_v46 = vadd.f32 %v645_v38, %v581_v41 }
  0xf4   : >> { %947 = vst.msk [vmem:[%s1518_s5] sm:$0xff] %vm946_vm1, %v937_v36  ;;  %v835_v40 = vadd.f32 %v813_v37, %v751_v20 }
  0xf6   : >> { %v919_v43 = vadd.f32 %v897_v29, %v835_v40  ;;  %v900_v44 = vpop.f32.mrf.mxu0  ;;  %v500_v29 = vadd.f32 %v1492_v59, %v413_v19 }
  0xf8   : >> { %v930_v2 = vadd.f32 %v1512_v22, %v919_v43  ;;  %v816_v9 = vpop.f32.mrf.mxu3  ;;  %v584_v58 = vadd.f32 %v1488_v57, %v500_v29  ;;  %v415_v43 = vadd.f32 %v1506_v5, %v330_v60 }
  0xf9   : >> { %v732_v3 = vpop.f32.mrf.mxu2  ;;  %v648_v10 = vpop.f32.mrf.mxu1 }
  0xfa   : >> { %v938_v47 = vmax.f32 %v930_v2, 0.0  ;;  %v752_v8 = vadd.f32 %v732_v3, %v665_v46  ;;  %v666_v13 = vadd.f32 %v648_v10, %v582_v45  ;;  %v502_v6 = vadd.f32 %v1508_v7, %v415_v43 }
  0xfc   : >> { %948 = vst.msk [vmem:[%s1518_s5 + $0x8] sm:$0xff] %vm946_vm1, %v938_v47  ;;  %v836_v28 = vadd.f32 %v816_v9, %v752_v8  ;;  %v586_v61 = vadd.f32 %v1504_v4, %v502_v6 }
  0xfe   : >> { %v920_v50 = vadd.f32 %v900_v44, %v836_v28  ;;  %v903_v12 = vpop.f32.mrf.mxu0 }
 0x100   : >> { %v931_v14 = vadd.f32 %v1512_v22, %v920_v50  ;;  %v819_v18 = vpop.f32.mrf.mxu3 }
 0x101   : >> { %v735_v51 = vpop.f32.mrf.mxu2  ;;  %v651_v26 = vpop.f32.mrf.mxu1 }
 0x102   : >> { %v939_v16 = vmax.f32 %v931_v14, 0.0  ;;  %v753_v17 = vadd.f32 %v735_v51, %v666_v13  ;;  %v667_v24 = vadd.f32 %v651_v26, %v583_v54 }
 0x104   : >> { %949 = vst.msk [vmem:[%s1518_s5 + $0x10] sm:$0xff] %vm946_vm1, %v939_v16  ;;  %v837_v49 = vadd.f32 %v819_v18, %v753_v17 }
 0x106   : >> { %v921_v21 = vadd.f32 %v903_v12, %v837_v49  ;;  %v906_v23 = vpop.f32.mrf.mxu0 }
 0x108   : >> { %v932_v55 = vadd.f32 %v1512_v22, %v921_v21  ;;  %v822_v32 = vpop.f32.mrf.mxu3 }
 0x109   : >> { %v738_v25 = vpop.f32.mrf.mxu2  ;;  %v654_v34 = vpop.f32.mrf.mxu1 }
 0x10a   : >> { %v940_v30 = vmax.f32 %v932_v55, 0.0  ;;  %v754_v31 = vadd.f32 %v738_v25, %v667_v24  ;;  %v668_v37 = vadd.f32 %v654_v34, %v584_v58 }
 0x10c   : >> { %950 = vst.msk [vmem:[%s1518_s5 + $0x18] sm:$0xff] %vm946_vm1, %v940_v30  ;;  %v838_v53 = vadd.f32 %v822_v32, %v754_v31 }
 0x10e   : >> { %v922_v36 = vadd.f32 %v906_v23, %v838_v53  ;;  %v909_v20 = vpop.f32.mrf.mxu0 }
 0x110   : >> { %v933_v59 = vadd.f32 %v1512_v22, %v922_v36  ;;  %v825_v42 = vpop.f32.mrf.mxu3 }
 0x111   : >> { %v741_v38 = vpop.f32.mrf.mxu2  ;;  %v657_v27 = vpop.f32.mrf.mxu1 }
 0x112   : >> { %v941_v40 = vmax.f32 %v933_v59, 0.0  ;;  %v755_v41 = vadd.f32 %v741_v38, %v668_v37  ;;  %v669_v46 = vadd.f32 %v657_v27, %v585_v62 }
 0x114   : >> { %951 = vst.msk [vmem:[%s1518_s5 + $0x20] sm:$0xff] %vm946_vm1, %v941_v40  ;;  %v839_v57 = vadd.f32 %v825_v42, %v755_v41 }
 0x116   : >> { %v923_v44 = vadd.f32 %v909_v20, %v839_v57  ;;  %v912_v3 = vpop.f32.mrf.mxu0 }
 0x118   : >> { %v934_v2 = vadd.f32 %v1512_v22, %v923_v44  ;;  %v828_v9 = vpop.f32.mrf.mxu3 }
 0x119   : >> { %v744_v63 = vpop.f32.mrf.mxu2  ;;  %v660_v1 = vpop.f32.mrf.mxu1 }
 0x11a   : >> { %v942_v47 = vmax.f32 %v934_v2, 0.0  ;;  %v756_v8 = vadd.f32 %v744_v63, %v669_v46  ;;  %v670_v10 = vadd.f32 %v660_v1, %v586_v61 }
 0x11c   : >> { %952 = vst.msk [vmem:[%s1518_s5 + $0x28] sm:$0xff] %vm946_vm1, %v942_v47  ;;  %v840_v35 = vadd.f32 %v828_v9, %v756_v8 }
 0x11e   : >> { %v924_v5 = vadd.f32 %v912_v3, %v840_v35  ;;  %v915_v7 = vpop.f32.mrf.mxu0 }
 0x120   : >> { %v935_v11 = vadd.f32 %v1512_v22, %v924_v5  ;;  %v831_v50 = vpop.f32.mrf.mxu3 }
 0x121   : >> { %v747_v28 = vpop.f32.mrf.mxu2 }
 0x122   : >> { %v943_v45 = vmax.f32 %v935_v11, 0.0  ;;  %v757_v48 = vadd.f32 %v747_v28, %v670_v10 }
 0x124   : >> { %953 = vst.msk [vmem:[%s1518_s5 + $0x30] sm:$0xff] %vm946_vm1, %v943_v45  ;;  %v841_v12 = vadd.f32 %v831_v50, %v757_v48 }
 0x126   : >> { %v925_v13 = vadd.f32 %v915_v7, %v841_v12 }
 0x128   : >> { %v936_v14 = vadd.f32 %v1512_v22, %v925_v13  ;;  %176 = sbr.rel (!%p174_p4) target bundleno = 16 (0x10), region = 81 }
 0x12a   : >> { %v944_v51 = vmax.f32 %v936_v14, 0.0 }
 0x12c   : >> { %955 = vst.msk [vmem:[%s1518_s5 + $0x38] sm:$0xf] %vm954_vm2, %v944_v51 }
 0x12d PF: > { %s13_s12 = sadd.s32 1, %s1208_s12  }
 0x12e   : > { %p10_p5 = scmp.ge.s32.totalorder %s13_s12, 4  }
 0x130   :  { %12 = sbr.rel (!%p10_p5) target bundleno = 1 (0x1), region = 92 }

// kernel: net_forward.14
= control target key start
LH: loop header
LB: loop body
LE: loop exit
PB: predicated region body
PF: predicated region fallthrough
CT: control target
= control target key end

     0   :  { %s992_s12 = smov 0   ;;  %s1330_s0 = inlined_call_operand.vmem [shape: f32[2,30,30,64], index: 0, kind: input, shape index: {}]   ;;  %s1331_s1 = inlined_call_operand.vmem [shape: f32[9,64,128], index: 1, kind: input, shape index: {}]   ;;  %s1332_s2 = inlined_call_operand.vmem [shape: f32[1,128], index: 2, kind: input, shape index: {}]   ;;  %s1333_s3 = inlined_call_operand.vmem [shape: f32[2,28,28,128], index: 3, kind: output, shape index: {}]  }
   0x1 LB: > { %s786_s13 = sadd.s32 4294967295, %s966_s12   ;;  %p790_p0 = scmp.ge.s32.totalorder %s966_s12, 1  ;;  %s966_s12 = sphi %s992_s12, %s13_s12  }
   0x2   : > { %p137_p1 = scmp.lt.s32.totalorder %s966_s12, 3 }
   0x4   : > { %p138_p2 = pnand %p790_p0, %p137_p1 }
   0x5   : > { %p161_p3 = scmp.lt.s32.totalorder (!%p138_p2), %s786_s13, 1  ;;  %s1015_s24 = smov (!%p138_p2), 0  }
   0x6   : > { %141 = sbr.rel (%p138_p2) target bundleno = 243 (0xf3), region = 32 }
   0xb   : > { %v1003_v0 = vld [vmem:[%s1332_s2] sm:$0x1]  ;;  %s1335_s13 = smov (!%p161_p3, %s786_s13), 1 }
   0xc   : > { %s938_s16 = smul.u32 960, %s1335_s13 }
   0xd   : > { %s939_s17 = smul.u32 896, %s1335_s13 }
   0xe   : > { %s1008_s20 = scalar_lea.vmem %s1330_s0, %s938_s16 }
   0xf   : > { %s1013_s23 = scalar_lea.vmem %s1333_s3, %s939_s17 }
  0x10 LB: >> { %v801_v1 = vld [vmem:[%s1331_s1 + $0x78] sm:$0xff]  ;;  %v800_v2 = vld [vmem:[%s1331_s1 + $0x70] sm:$0xff]  ;;  %v799_v4 = vld [vmem:[%s1331_s1 + $0x68] sm:$0xff]  ;;  %s793_s22 = sshll.u32 %s970_s24, 5  ;;  %vm205_vm0 = vcmask 523264   ;;  %s177_s24 = sadd.s32 1, %s970_s24   ;;  %s970_s24 = sphi %s1015_s24, %s177_s24  }
  0x11   : >> { %922 = vmatpush.msra.mxu1 %v801_v1  ;;  %226 = vmatpush.msra.mxu0 %v801_v1  ;;  %v817_v3 = vld [vmem:[%s1331_s1 + $0xb8] sm:$0xff]  ;;  %v816_v5 = vld [vmem:[%s1331_s1 + $0xb0] sm:$0xff]  ;;  %v815_v6 = vld [vmem:[%s1331_s1 + $0xa8] sm:$0xff]  ;;  %s1075_s10 = scalar_lea.vmem %s1008_s20, %s793_s22  ;;  %p174_p4 = scmp.ge.s32.totalorder %s177_s24, 28  }
  0x12   : >> { %321 = vmatpush.msra.mxu2 %v817_v3  ;;  %v798_v7 = vld [vmem:[%s1331_s1 + $0x60] sm:$0xff]  ;;  %v834_v8 = vld [vmem:[%s1331_s1 + $0xf8] sm:$0xff]  ;;  %v833_v10 = vld [vmem:[%s1331_s1 + $0xf0] sm:$0xff] }
  0x13   : >> { %923 = vmatpush.msra.mxu1 %v800_v2  ;;  %227 = vmatpush.msra.mxu0 %v800_v2  ;;  %v814_v9 = vld [vmem:[%s1331_s1 + $0xa0] sm:$0xff]  ;;  %v797_v11 = vld [vmem:[%s1331_s1 + $0x58] sm:$0xff]  ;;  %v832_v13 = vld [vmem:[%s1331_s1 + $0xe8] sm:$0xff] }
  0x14   : >> { %322 = vmatpush.msra.mxu2 %v816_v5  ;;  %382 = vmatpush.msra.mxu3 %v834_v8  ;;  %v813_v12 = vld [vmem:[%s1331_s1 + $0x98] sm:$0xff]  ;;  %v796_v14 = vld [vmem:[%s1331_s1 + $0x50] sm:$0xff]  ;;  %v831_v16 = vld [vmem:[%s1331_s1 + $0xe0] sm:$0xff] }
  0x15   : >> { %924 = vmatpush.msra.mxu1 %v799_v4  ;;  %228 = vmatpush.msra.mxu0 %v799_v4  ;;  %v812_v15 = vld [vmem:[%s1331_s1 + $0x90] sm:$0xff]  ;;  %v795_v17 = vld [vmem:[%s1331_s1 + $0x48] sm:$0xff]  ;;  %v830_v19 = vld [vmem:[%s1331_s1 + $0xd8] sm:$0xff] }
  0x16   : >> { %323 = vmatpush.msra.mxu2 %v815_v6  ;;  %383 = vmatpush.msra.mxu3 %v833_v10  ;;  %v811_v18 = vld [vmem:[%s1331_s1 + $0x88] sm:$0xff]  ;;  %v794_v20 = vld [vmem:[%s1331_s1 + $0x40] sm:$0xff]  ;;  %v194_v21 = vld [vmem:[%s1075_s10 + $0x11] sm:$0xff] }
  0x17   : >> { %925 = vmatpush.msra.mxu1 %v798_v7  ;;  %229 = vmatpush.msra.mxu0 %v798_v7  ;;  %v192_v22 = vld [vmem:[%s1075_s10 + $0x1] sm:$0xff]  ;;  %v191_v23 = vld [vmem:[%s1331_s1 + $0x38] sm:$0xff]  ;;  %v190_v27 = vld [vmem:[%s1331_s1 + $0x30] sm:$0xff] }
  0x18   : >> { %324 = vmatpush.msra.mxu2 %v814_v9  ;;  %384 = vmatpush.msra.mxu3 %v832_v13  ;;  %v810_v24 = vld [vmem:[%s1331_s1 + $0x80] sm:$0xff]  ;;  %v850_v25 = vld [vmem:[%s1331_s1 + $0x138] sm:$0xff]  ;;  %v829_v29 = vld [vmem:[%s1331_s1 + $0xd0] sm:$0xff] }
  0x19   : >> { %926 = vmatpush.msra.mxu1 %v797_v11  ;;  %230 = vmatpush.msra.mxu0 %v797_v11  ;;  %v288_v26 = vld [vmem:[%s1075_s10 + $0x2] sm:$0xff]  ;;  %v883_v28 = vld [vmem:[%s1331_s1 + $0x1b8] sm:$0xff]  ;;  %v849_v30 = vld [vmem:[%s1331_s1 + $0x130] sm:$0xff] }
  0x1a   : >> { %325 = vmatpush.msra.mxu2 %v813_v12  ;;  %385 = vmatpush.msra.mxu3 %v831_v16  ;;  %v189_v31 = vld [vmem:[%s1331_s1 + $0x28] sm:$0xff]  ;;  %v882_v32 = vld [vmem:[%s1331_s1 + $0x1b0] sm:$0xff]  ;;  %v188_v35 = vld [vmem:[%s1331_s1 + $0x20] sm:$0xff] }
  0x1b   : >> { %927 = vmatpush.msra.mxu1 %v796_v14  ;;  %231 = vmatpush.msra.mxu0 %v796_v14  ;;  %v828_v33 = vld [vmem:[%s1331_s1 + $0xc8] sm:$0xff]  ;;  %v195_v37 = vld [vmem:[%s1075_s10 + $0x19] sm:$0xf]  ;;  %v827_v38 = vld [vmem:[%s1331_s1 + $0xc0] sm:$0xff] }
  0x1c   : >> { %326 = vmatpush.msra.mxu2 %v812_v15  ;;  %386 = vmatpush.msra.mxu3 %v830_v19  ;;  %v848_v34 = vld [vmem:[%s1331_s1 + $0x128] sm:$0xff]  ;;  %v187_v39 = vld [vmem:[%s1331_s1 + $0x18] sm:$0xff]  ;;  %v847_v40 = vld [vmem:[%s1331_s1 + $0x120] sm:$0xff] }
  0x1d   : >> { %928 = vmatpush.msra.mxu1 %v795_v17  ;;  %232 = vmatpush.msra.mxu0 %v795_v17  ;;  %v881_v36 = vld [vmem:[%s1331_s1 + $0x1a8] sm:$0xff]  ;;  %v823_v42 = vld [vmem:[%s1075_s10 + $0x20] sm:$0xff]  ;;  %v186_v43 = vld [vmem:[%s1331_s1 + $0x10] sm:$0xff] }
  0x1e   : >> { %327 = vmatpush.msra.mxu2 %v811_v18  ;;  %387 = vmatpush.msra.mxu3 %v829_v29  ;;  %v193_v41 = vld [vmem:[%s1075_s10 + $0x9] sm:$0xff]  ;;  %v899_v44 = vld [vmem:[%s1331_s1 + $0x1f8] sm:$0xff]  ;;  %v880_v50 = vld [vmem:[%s1331_s1 + $0x1a0] sm:$0xff] }
  0x1f   : >> { %929 = vmatpush.msra.mxu1 %v794_v20  ;;  %233 = vmatpush.msra.mxu0 %v794_v20  ;;  %v846_v45 = vld [vmem:[%s1331_s1 + $0x118] sm:$0xff]  ;;  %v289_v46 = vld [vmem:[%s1075_s10 + $0xa] sm:$0xff]  ;;  %v184_v51 = vld [vmem:[%s1331_s1] sm:$0xff] }
  0x20   : >> { %804 = vmatmul.msk.f32.vlgmr.msra.gmra.mxu1 %vm205_vm0, %v194_v21  ;;  %802 = vmatmul.msk.f32.vlgmr.msra.gmra.mxu0 %vm205_vm0, %v192_v22  ;;  %v185_v47 = vld [vmem:[%s1331_s1 + $0x8] sm:$0xff]  ;;  %v898_v48 = vld [vmem:[%s1331_s1 + $0x1f0] sm:$0xff]  ;;  %v180_v53 = vld [vmem:[%s1075_s10] sm:$0xff] }
  0x21   : >> { %267 = vmatpush.msrb.mxu1 %v191_v23  ;;  %328 = vmatpush.msra.mxu2 %v810_v24  ;;  %v845_v49 = vld [vmem:[%s1331_s1 + $0x110] sm:$0xff]  ;;  %v897_v52 = vld [vmem:[%s1331_s1 + $0x1e8] sm:$0xff]  ;;  %v866_v55 = vld [vmem:[%s1331_s1 + $0x178] sm:$0xff] }
  0x22   : >> { %440 = vmatpush.msrb.mxu0 %v850_v25  ;;  %818 = vmatmul.msk.f32.vlgmr.msra.gmra.mxu2 %vm205_vm0, %v288_v26  ;;  %v844_v54 = vld [vmem:[%s1331_s1 + $0x108] sm:$0xff]  ;;  %v879_v56 = vld [vmem:[%s1331_s1 + $0x198] sm:$0xff]  ;;  %v843_v57 = vld [vmem:[%s1331_s1 + $0x100] sm:$0xff] }
  0x23   : >> { %268 = vmatpush.msrb.mxu1 %v190_v27  ;;  %559 = vmatpush.msrb.mxu2 %v883_v28  ;;  %v824_v58 = vld [vmem:[%s1075_s10 + $0x28] sm:$0xff]  ;;  %v865_v59 = vld [vmem:[%s1331_s1 + $0x170] sm:$0xff]  ;;  %v896_v62 = vld [vmem:[%s1331_s1 + $0x1e0] sm:$0xff] }
  0x24   : >> { %441 = vmatpush.msrb.mxu0 %v849_v30  ;;  %388 = vmatpush.msra.mxu3 %v828_v33  ;;  %v839_v60 = vld [vmem:[%s1075_s10 + $0x21] sm:$0xff]  ;;  %v290_v61 = vld [vmem:[%s1075_s10 + $0x12] sm:$0xff]  ;;  %v840_v12 = vld [vmem:[%s1075_s10 + $0x29] sm:$0xff] }
  0x25   : >> { %269 = vmatpush.msrb.mxu1 %v189_v31  ;;  %560 = vmatpush.msrb.mxu2 %v882_v32  ;;  %v864_v63 = vld [vmem:[%s1331_s1 + $0x168] sm:$0xff]  ;;  %v878_v1 = vld [vmem:[%s1331_s1 + $0x190] sm:$0xff]  ;;  %v895_v2 = vld [vmem:[%s1331_s1 + $0x1d8] sm:$0xff] }
  0x26   : >> { %442 = vmatpush.msrb.mxu0 %v848_v34  ;;  %389 = vmatpush.msra.mxu3 %v827_v38  ;;  %v915_v3 = vld [vmem:[%s1331_s1 + $0x238] sm:$0xff]  ;;  %v863_v4 = vld [vmem:[%s1331_s1 + $0x160] sm:$0xff]  ;;  %v877_v5 = vld [vmem:[%s1331_s1 + $0x188] sm:$0xff] }
  0x27   : >> { %270 = vmatpush.msrb.mxu1 %v188_v35  ;;  %561 = vmatpush.msrb.mxu2 %v881_v36  ;;  %v181_v6 = vld [vmem:[%s1075_s10 + $0x8] sm:$0xff]  ;;  %v894_v7 = vld [vmem:[%s1331_s1 + $0x1d0] sm:$0xff]  ;;  %v862_v8 = vld [vmem:[%s1331_s1 + $0x158] sm:$0xff] }
  0x28   : >> { %805 = vmatmul.msk.f32.gmra.mxu1 %vm205_vm0, %v195_v37  ;;  %443 = vmatpush.msrb.mxu0 %v847_v40  ;;  %v914_v9 = vld [vmem:[%s1331_s1 + $0x230] sm:$0xff]  ;;  %v876_v11 = vld [vmem:[%s1331_s1 + $0x180] sm:$0xff]  ;;  %v291_v14 = vld [vmem:[%s1075_s10 + $0x1a] sm:$0xf] }
  0x29   : >> { %271 = vmatpush.msrb.mxu1 %v187_v39  ;;  %803 = vmatmul.msk.f32.gmra.mxu0 %vm205_vm0, %v193_v41  ;;  %v825_v10 = vld [vmem:[%s1075_s10 + $0x30] sm:$0xff]  ;;  %v893_v15 = vld [vmem:[%s1331_s1 + $0x1c8] sm:$0xff]  ;;  %v892_v18 = vld [vmem:[%s1331_s1 + $0x1c0] sm:$0xff] }
  0x2a   : >> { %835 = vmatmul.msk.f32.vlgmr.msra.gmra.mxu3 %vm205_vm0, %v823_v42  ;;  %444 = vmatpush.msrb.mxu0 %v846_v45  ;;  %v861_v13 = vld [vmem:[%s1331_s1 + $0x150] sm:$0xff]  ;;  %v913_v16 = vld [vmem:[%s1331_s1 + $0x228] sm:$0xff]  ;;  %v912_v19 = vld [vmem:[%s1331_s1 + $0x220] sm:$0xff] }
  0x2b   : >> { %272 = vmatpush.msrb.mxu1 %v186_v43  ;;  %617 = vmatpush.msrb.mxu3 %v899_v44  ;;  %v860_v17 = vld [vmem:[%s1331_s1 + $0x148] sm:$0xff]  ;;  %v859_v20 = vld [vmem:[%s1331_s1 + $0x140] sm:$0xff]  ;;  %v182_v21 = vld [vmem:[%s1075_s10 + $0x10] sm:$0xff] }
  0x2c   : >> { %819 = vmatmul.msk.f32.gmra.mxu2 %vm205_vm0, %v289_v46  ;;  %445 = vmatpush.msrb.mxu0 %v845_v49  ;;  %v911_v22 = vld [vmem:[%s1331_s1 + $0x218] sm:$0xff]  ;;  %v872_v25 = vld [vmem:[%s1075_s10 + $0x40] sm:$0xff]  ;;  %v910_v26 = vld [vmem:[%s1331_s1 + $0x210] sm:$0xff] }
  0x2d   : >> { %273 = vmatpush.msrb.mxu1 %v185_v47  ;;  %618 = vmatpush.msrb.mxu3 %v898_v48  ;;  %v826_v23 = vld [vmem:[%s1075_s10 + $0x38] sm:$0xf]  ;;  %v909_v27 = vld [vmem:[%s1331_s1 + $0x208] sm:$0xff]  ;;  %v908_v29 = vld [vmem:[%s1331_s1 + $0x200] sm:$0xff] }
  0x2e   : >> { %562 = vmatpush.msrb.mxu2 %v880_v50  ;;  %446 = vmatpush.msrb.mxu0 %v844_v54  ;;  %v841_v24 = vld [vmem:[%s1075_s10 + $0x31] sm:$0xff]  ;;  %v888_v30 = vld [vmem:[%s1075_s10 + $0x41] sm:$0xff]  ;;  %v842_v31 = vld [vmem:[%s1075_s10 + $0x39] sm:$0xf] }
  0x2f   : >> { %274 = vmatpush.msrb.mxu1 %v184_v51  ;;  %619 = vmatpush.msrb.mxu3 %v897_v52  ;;  %v183_v28 = vld [vmem:[%s1075_s10 + $0x18] sm:$0xf]  ;;  %v873_v32 = vld [vmem:[%s1075_s10 + $0x48] sm:$0xff]  ;;  %v874_v36 = vld [vmem:[%s1075_s10 + $0x50] sm:$0xff] }
  0x30   : >> { %806 = vmatmul.msk.f32.vlgmr.msrb.gmra.mxu1 %vm205_vm0, %v180_v53  ;;  %563 = vmatpush.msrb.mxu2 %v879_v56  ;;  %v855_v33 = vld [vmem:[%s1075_s10 + $0x22] sm:$0xff]  ;;  %v856_v37 = vld [vmem:[%s1075_s10 + $0x2a] sm:$0xff]  ;;  %v875_v40 = vld [vmem:[%s1075_s10 + $0x58] sm:$0xf] }
  0x31   : >> { %498 = vmatpush.msra.mxu1 %v866_v55  ;;  %447 = vmatpush.msrb.mxu0 %v843_v57  ;;  %v889_v34 = vld [vmem:[%s1075_s10 + $0x49] sm:$0xff]  ;;  %v890_v38 = vld [vmem:[%s1075_s10 + $0x51] sm:$0xff]  ;;  %v891_v42 = vld [vmem:[%s1075_s10 + $0x59] sm:$0xf] }
  0x32   : >> { %836 = vmatmul.msk.f32.gmra.mxu3 %vm205_vm0, %v824_v58  ;;  %851 = vmatmul.msk.f32.vlgmr.msrb.gmra.mxu0 %vm205_vm0, %v839_v60  ;;  %v904_v35 = vld [vmem:[%s1075_s10 + $0x42] sm:$0xff]  ;;  %v905_v39 = vld [vmem:[%s1075_s10 + $0x4a] sm:$0xff]  ;;  %v857_v41 = vld [vmem:[%s1075_s10 + $0x32] sm:$0xff] }
  0x33   : >> { %499 = vmatpush.msra.mxu1 %v865_v59  ;;  %620 = vmatpush.msrb.mxu3 %v896_v62  ;;  %v906_v43 = vld [vmem:[%s1075_s10 + $0x52] sm:$0xff]  ;;  %v907_v44 = vld [vmem:[%s1075_s10 + $0x5a] sm:$0xf] }
  0x34   : >> { %820 = vmatmul.msk.f32.gmra.mxu2 %vm205_vm0, %v290_v61  ;;  %675 = vmatpush.msra.mxu0 %v915_v3  ;;  %v858_v45 = vld [vmem:[%s1075_s10 + $0x3a] sm:$0xf]  ;;  %s1318_s10 = scalar_lea.vmem %s1013_s23, %s793_s22 }
  0x35   : >> { %500 = vmatpush.msra.mxu1 %v864_v63  ;;  %564 = vmatpush.msrb.mxu2 %v878_v1 }
  0x36   : >> { %621 = vmatpush.msrb.mxu3 %v895_v2  ;;  %676 = vmatpush.msra.mxu0 %v914_v9 }
  0x37   : >> { %501 = vmatpush.msra.mxu1 %v863_v4  ;;  %565 = vmatpush.msrb.mxu2 %v877_v5 }
  0x38   : >> { %807 = vmatmul.msk.f32.gmra.mxu1 %vm205_vm0, %v181_v6  ;;  %622 = vmatpush.msrb.mxu3 %v894_v7 }
  0x39   : >> { %502 = vmatpush.msra.mxu1 %v862_v8  ;;  %566 = vmatpush.msrb.mxu2 %v876_v11 }
  0x3a   : >> { %837 = vmatmul.msk.f32.gmra.mxu3 %vm205_vm0, %v825_v10  ;;  %852 = vmatmul.msk.f32.gmra.mxu0 %vm205_vm0, %v840_v12 }
  0x3b   : >> { %503 = vmatpush.msra.mxu1 %v861_v13  ;;  %623 = vmatpush.msrb.mxu3 %v893_v15 }
  0x3c   : >> { %821 = vmatmul.msk.f32.gmra.mxu2 %vm205_vm0, %v291_v14  ;;  %677 = vmatpush.msra.mxu0 %v913_v16 }
  0x3d   : >> { %504 = vmatpush.msra.mxu1 %v860_v17  ;;  %930 = vmatpush.msra.mxu2 %v915_v3 }
  0x3e   : >> { %624 = vmatpush.msrb.mxu3 %v892_v18  ;;  %678 = vmatpush.msra.mxu0 %v912_v19 }
  0x3f   : >> { %505 = vmatpush.msra.mxu1 %v859_v20  ;;  %931 = vmatpush.msra.mxu2 %v914_v9 }
  0x40   : >> { %808 = vmatmul.msk.f32.gmra.mxu1 %vm205_vm0, %v182_v21  ;;  %679 = vmatpush.msra.mxu0 %v911_v22 }
  0x41   : >> { %932 = vmatpush.msra.mxu2 %v913_v16 }
  0x42   : >> { %838 = vmatmul.msk.f32.gmra.mxu3 %vm205_vm0, %v826_v23  ;;  %853 = vmatmul.msk.f32.gmra.mxu0 %vm205_vm0, %v841_v24 }
  0x43   : >> { %680 = vmatpush.msra.mxu0 %v910_v26  ;;  %933 = vmatpush.msra.mxu2 %v912_v19  ;;  %v701_v19 = vperm.slane %v1003_v0, 0 }
  0x44   : >> { %884 = vmatmul.msk.f32.vlgmr.msrb.gmra.mxu2 %vm205_vm0, %v872_v25 }
  0x45   : >> { %681 = vmatpush.msra.mxu0 %v909_v27  ;;  %934 = vmatpush.msra.mxu2 %v911_v22 }
  0x47   : >> { %682 = vmatpush.msra.mxu0 %v908_v29  ;;  %935 = vmatpush.msra.mxu2 %v910_v26 }
  0x48   : >> { %809 = vmatmul.msk.f32.gmra.mxu1 %vm205_vm0, %v183_v28 }
  0x49   : >> { %936 = vmatpush.msra.mxu2 %v909_v27 }
  0x4a   : >> { %900 = vmatmul.msk.f32.vlgmr.msrb.gmra.mxu3 %vm205_vm0, %v888_v30  ;;  %854 = vmatmul.msk.f32.gmra.mxu0 %vm205_vm0, %v842_v31 }
  0x4b   : >> { %937 = vmatpush.msra.mxu2 %v908_v29 }
  0x4c   : >> { %885 = vmatmul.msk.f32.gmra.mxu2 %vm205_vm0, %v873_v32 }
  0x50   : >> { %867 = vmatmul.msk.f32.vlgmr.msra.gmra.mxu1 %vm205_vm0, %v855_v33 }
  0x52   : >> { %901 = vmatmul.msk.f32.gmra.mxu3 %vm205_vm0, %v889_v34  ;;  %916 = vmatmul.msk.f32.vlgmr.msra.gmra.mxu0 %vm205_vm0, %v904_v35 }
  0x54   : >> { %886 = vmatmul.msk.f32.gmra.mxu2 %vm205_vm0, %v874_v36 }
  0x58   : >> { %868 = vmatmul.msk.f32.gmra.mxu1 %vm205_vm0, %v856_v37 }
  0x5a   : >> { %902 = vmatmul.msk.f32.gmra.mxu3 %vm205_vm0, %v890_v38  ;;  %917 = vmatmul.msk.f32.gmra.mxu0 %vm205_vm0, %v905_v39 }
  0x5c   : >> { %887 = vmatmul.msk.f32.gmra.mxu2 %vm205_vm0, %v875_v40 }
  0x60   : >> { %869 = vmatmul.msk.f32.gmra.mxu1 %vm205_vm0, %v857_v41 }
  0x62   : >> { %903 = vmatmul.msk.f32.gmra.mxu3 %vm205_vm0, %v891_v42  ;;  %918 = vmatmul.msk.f32.gmra.mxu0 %vm205_vm0, %v906_v43 }
  0x64   : >> { %919 = vmatmul.msk.f32.vlgmr.msra.gmra.mxu2 %vm205_vm0, %v907_v44 }
  0x68   : >> { %870 = vmatmul.msk.f32.gmra.mxu1 %vm205_vm0, %v858_v45 }
  0x9d   : >> { %v241_v46 = vpop.f32.mrf.mxu1  ;;  %v235_v47 = vpop.f32.mrf.mxu0 }
  0xa5   : >> { %v244_v48 = vpop.f32.mrf.mxu1  ;;  %v330_v49 = vpop.f32.mrf.mxu2 }
  0xa6   : >> { %v238_v50 = vpop.f32.mrf.mxu0 }
  0xad   : >> { %v276_v51 = vpop.f32.mrf.mxu1  ;;  %v391_v52 = vpop.f32.mrf.mxu3 }
  0xae   : >> { %v277_v62 = vadd.f32 %v276_v51, %v235_v47 }
  0xaf   : >> { %v333_v53 = vpop.f32.mrf.mxu2  ;;  %v449_v54 = vpop.f32.mrf.mxu0 }
  0xb0   : >> { %v342_v1 = vadd.f32 %v330_v49, %v277_v62 }
  0xb2   : >> { %v403_v5 = vadd.f32 %v391_v52, %v342_v1 }
  0xb4   : >> { %v461_v8 = vadd.f32 %v449_v54, %v403_v5 }
  0xb5   : >> { %v279_v55 = vpop.f32.mrf.mxu1  ;;  %v394_v56 = vpop.f32.mrf.mxu3 }
  0xb6   : >> { %v280_v6 = vadd.f32 %v279_v55, %v238_v50 }
  0xb7   : >> { %v336_v57 = vpop.f32.mrf.mxu2  ;;  %v452_v58 = vpop.f32.mrf.mxu0 }
  0xb8   : >> { %v343_v9 = vadd.f32 %v333_v53, %v280_v6 }
  0xba   : >> { %v404_v14 = vadd.f32 %v394_v56, %v343_v9 }
  0xbc   : >> { %v462_v20 = vadd.f32 %v452_v58, %v404_v14 }
  0xbd   : >> { %v282_v59 = vpop.f32.mrf.mxu1  ;;  %v397_v60 = vpop.f32.mrf.mxu3 }
  0xbe   : >> { %v283_v15 = vadd.f32 %v282_v59, %v241_v46 }
  0xbf   : >> { %v339_v61 = vpop.f32.mrf.mxu2  ;;  %v455_v63 = vpop.f32.mrf.mxu0 }
  0xc0   : >> { %v344_v21 = vadd.f32 %v336_v57, %v283_v15 }
  0xc2   : >> { %v405_v28 = vadd.f32 %v397_v60, %v344_v21 }
  0xc4   : >> { %v463_v34 = vadd.f32 %v455_v63, %v405_v28 }
  0xc5   : >> { %v285_v2 = vpop.f32.mrf.mxu1  ;;  %v400_v3 = vpop.f32.mrf.mxu3 }
  0xc6   : >> { %v286_v29 = vadd.f32 %v285_v2, %v244_v48 }
  0xc7   : >> { %v568_v4 = vpop.f32.mrf.mxu2  ;;  %v458_v7 = vpop.f32.mrf.mxu0 }
  0xc8   : >> { %v345_v35 = vadd.f32 %v339_v61, %v286_v29 }
  0xca   : >> { %v406_v42 = vadd.f32 %v400_v3, %v345_v35 }
  0xcc   : >> { %v464_v47 = vadd.f32 %v458_v7, %v406_v42 }
  0xcd   : >> { %v507_v10 = vpop.f32.mrf.mxu1  ;;  %v626_v11 = vpop.f32.mrf.mxu3 }
  0xce   : >> { %v519_v12 = vadd.f32 %v507_v10, %v461_v8 }
  0xcf   : >> { %v571_v13 = vpop.f32.mrf.mxu2  ;;  %v684_v17 = vpop.f32.mrf.mxu0 }
  0xd0   : >> { %v580_v16 = vadd.f32 %v568_v4, %v519_v12 }
  0xd2   : >> { %v638_v18 = vadd.f32 %v626_v11, %v580_v16 }
  0xd4   : >> { %v696_v22 = vadd.f32 %v684_v17, %v638_v18 }
  0xd5   : >> { %v510_v23 = vpop.f32.mrf.mxu1  ;;  %v629_v24 = vpop.f32.mrf.mxu3 }
  0xd6   : >> { %v703_v25 = vadd.f32 %v701_v19, %v696_v22  ;;  %v520_v26 = vadd.f32 %v510_v23, %v462_v20 }
  0xd7   : >> { %v574_v27 = vpop.f32.mrf.mxu2  ;;  %v687_v32 = vpop.f32.mrf.mxu0 }
  0xd8   : >> { %v707_v30 = vmax.f32 %v703_v25, 0.0  ;;  %v581_v31 = vadd.f32 %v571_v13, %v520_v26 }
  0xda   : >> { %712 = vst [vmem:[%s1318_s10] sm:$0xff] %v707_v30  ;;  %v639_v33 = vadd.f32 %v629_v24, %v581_v31 }
  0xdc   : >> { %v697_v36 = vadd.f32 %v687_v32, %v639_v33 }
  0xdd   : >> { %v513_v37 = vpop.f32.mrf.mxu1  ;;  %v632_v38 = vpop.f32.mrf.mxu3 }
  0xde   : >> { %v704_v39 = vadd.f32 %v701_v19, %v697_v36  ;;  %v521_v40 = vadd.f32 %v513_v37, %v463_v34 }
  0xdf   : >> { %v577_v41 = vpop.f32.mrf.mxu2  ;;  %v690_v45 = vpop.f32.mrf.mxu0 }
  0xe0   : >> { %v708_v43 = vmax.f32 %v704_v39, 0.0  ;;  %v582_v44 = vadd.f32 %v574_v27, %v521_v40 }
  0xe2   : >> { %713 = vst [vmem:[%s1318_s10 + $0x8] sm:$0xff] %v708_v43  ;;  %v640_v46 = vadd.f32 %v632_v38, %v582_v44 }
  0xe4   : >> { %v698_v48 = vadd.f32 %v690_v45, %v640_v46 }
  0xe5   : >> { %v516_v49 = vpop.f32.mrf.mxu1  ;;  %v635_v52 = vpop.f32.mrf.mxu3 }
  0xe6   : >> { %v705_v50 = vadd.f32 %v701_v19, %v698_v48  ;;  %v522_v51 = vadd.f32 %v516_v49, %v464_v47 }
  0xe7   : >> { %v693_v55 = vpop.f32.mrf.mxu2 }
  0xe8   : >> { %v709_v53 = vmax.f32 %v705_v50, 0.0  ;;  %v583_v54 = vadd.f32 %v577_v41, %v522_v51 }
  0xea   : >> { %714 = vst [vmem:[%s1318_s10 + $0x10] sm:$0xff] %v709_v53  ;;  %v641_v56 = vadd.f32 %v635_v52, %v583_v54 }
  0xec   : >> { %v699_v57 = vadd.f32 %v693_v55, %v641_v56 }
  0xee   : >> { %v706_v58 = vadd.f32 %v701_v19, %v699_v57  ;;  %176 = sbr.rel (!%p174_p4) target bundleno = 16 (0x10), region = 81 }
  0xf0   : >> { %v710_v59 = vmax.f32 %v706_v58, 0.0 }
  0xf2   : >> { %715 = vst [vmem:[%s1318_s10 + $0x18] sm:$0xf] %v710_v59 }
  0xf3 PF: > { %s13_s12 = sadd.s32 1, %s966_s12  }
  0xf4   : > { %p10_p5 = scmp.ge.s32.totalorder %s13_s12, 4  }
  0xf6   :  { %12 = sbr.rel (!%p10_p5) target bundleno = 1 (0x1), region = 92 }

// kernel: net_forward.15
= control target key start
LH: loop header
LB: loop body
LE: loop exit
PB: predicated region body
PF: predicated region fallthrough
CT: control target
= control target key end

     0   :  { %s1015_s12 = smov 0   ;;  %s1527_s0 = inlined_call_operand.vmem [shape: f32[2,28,28,128], index: 0, kind: input, shape index: {}]   ;;  %s1528_s1 = inlined_call_operand.vmem [shape: f32[9,128,128], index: 1, kind: input, shape index: {}]   ;;  %s1529_s2 = inlined_call_operand.vmem [shape: f32[1,128], index: 2, kind: input, shape index: {}]   ;;  %s1530_s3 = inlined_call_operand.vmem [shape: f32[2,26,26,128], index: 3, kind: output, shape index: {}]  }
   0x1 LB: > { %s749_s13 = sadd.s32 4294967295, %s989_s12   ;;  %p753_p0 = scmp.ge.s32.totalorder %s989_s12, 1  ;;  %s989_s12 = sphi %s1015_s12, %s13_s12  }
   0x2   : > { %p137_p1 = scmp.lt.s32.totalorder %s989_s12, 3 }
   0x4   : > { %p138_p2 = pnand %p753_p0, %p137_p1 }
   0x5   : > { %p161_p3 = scmp.lt.s32.totalorder (!%p138_p2), %s749_s13, 1  ;;  %s1038_s24 = smov (!%p138_p2), 0  }
   0x6   : > { %141 = sbr.rel (%p138_p2) target bundleno = 271 (0x10f), region = 32 }
   0xb   : > { %v1026_v0 = vld [vmem:[%s1529_s2] sm:$0x1]  ;;  %s1532_s13 = smov (!%p161_p3, %s749_s13), 1 }
   0xc   : > { %s961_s16 = smul.u32 896, %s1532_s13 }
   0xd   : > { %s962_s17 = smul.u32 832, %s1532_s13 }
   0xe   : > { %s1031_s20 = scalar_lea.vmem %s1527_s0, %s961_s16 }
   0xf   : > { %s1036_s23 = scalar_lea.vmem %s1530_s3, %s962_s17 }
  0x10 LB: >> { %v772_v1 = vld [vmem:[%s1528_s1 + $0xf8] sm:$0xff]  ;;  %v771_v5 = vld [vmem:[%s1528_s1 + $0xf0] sm:$0xff]  ;;  %v770_v9 = vld [vmem:[%s1528_s1 + $0xe8] sm:$0xff]  ;;  %s756_s15 = sshll.u32 %s993_s24, 5  ;;  %s177_s24 = sadd.s32 1, %s993_s24   ;;  %s993_s24 = sphi %s1038_s24, %s177_s24  }
  0x11   : >> { %v199_v2 = vld [vmem:[%s1528_s1 + $0x78] sm:$0xff]  ;;  %221 = vmatpush.msra.mxu0 %v772_v1  ;;  %v198_v6 = vld [vmem:[%s1528_s1 + $0x70] sm:$0xff]  ;;  %v197_v10 = vld [vmem:[%s1528_s1 + $0x68] sm:$0xff]  ;;  %s1227_s4 = scalar_lea.vmem %s1031_s20, %s756_s15  ;;  %p174_p4 = scmp.ge.s32.totalorder %s177_s24, 26  }
  0x12   : >> { %v788_v3 = vld [vmem:[%s1528_s1 + $0x178] sm:$0xff]  ;;  %250 = vmatpush.msra.mxu1 %v199_v2  ;;  %v787_v7 = vld [vmem:[%s1528_s1 + $0x170] sm:$0xff]  ;;  %v786_v11 = vld [vmem:[%s1528_s1 + $0x168] sm:$0xff] }
  0x13   : >> { %v809_v4 = vld [vmem:[%s1528_s1 + $0x1f8] sm:$0xff]  ;;  %300 = vmatpush.msra.mxu2 %v788_v3  ;;  %v808_v8 = vld [vmem:[%s1528_s1 + $0x1f0] sm:$0xff]  ;;  %222 = vmatpush.msra.mxu0 %v771_v5  ;;  %v807_v12 = vld [vmem:[%s1528_s1 + $0x1e8] sm:$0xff] }
  0x14   : >> { %357 = vmatpush.msra.mxu3 %v809_v4  ;;  %251 = vmatpush.msra.mxu1 %v198_v6  ;;  %v769_v13 = vld [vmem:[%s1528_s1 + $0xe0] sm:$0xff]  ;;  %v768_v17 = vld [vmem:[%s1528_s1 + $0xd8] sm:$0xff]  ;;  %v767_v21 = vld [vmem:[%s1528_s1 + $0xd0] sm:$0xff] }
  0x15   : >> { %301 = vmatpush.msra.mxu2 %v787_v7  ;;  %v196_v14 = vld [vmem:[%s1528_s1 + $0x60] sm:$0xff]  ;;  %223 = vmatpush.msra.mxu0 %v770_v9  ;;  %v195_v18 = vld [vmem:[%s1528_s1 + $0x58] sm:$0xff]  ;;  %v194_v22 = vld [vmem:[%s1528_s1 + $0x50] sm:$0xff] }
  0x16   : >> { %358 = vmatpush.msra.mxu3 %v808_v8  ;;  %252 = vmatpush.msra.mxu1 %v197_v10  ;;  %v785_v15 = vld [vmem:[%s1528_s1 + $0x160] sm:$0xff]  ;;  %v784_v19 = vld [vmem:[%s1528_s1 + $0x158] sm:$0xff]  ;;  %v783_v23 = vld [vmem:[%s1528_s1 + $0x150] sm:$0xff] }
  0x17   : >> { %v806_v16 = vld [vmem:[%s1528_s1 + $0x1e0] sm:$0xff]  ;;  %302 = vmatpush.msra.mxu2 %v786_v11  ;;  %224 = vmatpush.msra.mxu0 %v769_v13  ;;  %v805_v20 = vld [vmem:[%s1528_s1 + $0x1d8] sm:$0xff]  ;;  %v804_v24 = vld [vmem:[%s1528_s1 + $0x1d0] sm:$0xff] }
  0x18   : >> { %359 = vmatpush.msra.mxu3 %v807_v12  ;;  %253 = vmatpush.msra.mxu1 %v196_v14  ;;  %v766_v25 = vld [vmem:[%s1528_s1 + $0xc8] sm:$0xff]  ;;  %v765_v29 = vld [vmem:[%s1528_s1 + $0xc0] sm:$0xff]  ;;  %v764_v33 = vld [vmem:[%s1528_s1 + $0xb8] sm:$0xff] }
  0x19   : >> { %303 = vmatpush.msra.mxu2 %v785_v15  ;;  %225 = vmatpush.msra.mxu0 %v768_v17  ;;  %v193_v26 = vld [vmem:[%s1528_s1 + $0x48] sm:$0xff]  ;;  %v192_v30 = vld [vmem:[%s1528_s1 + $0x40] sm:$0xff]  ;;  %v191_v34 = vld [vmem:[%s1528_s1 + $0x38] sm:$0xff] }
  0x1a   : >> { %360 = vmatpush.msra.mxu3 %v806_v16  ;;  %254 = vmatpush.msra.mxu1 %v195_v18  ;;  %v782_v27 = vld [vmem:[%s1528_s1 + $0x148] sm:$0xff]  ;;  %v781_v31 = vld [vmem:[%s1528_s1 + $0x140] sm:$0xff]  ;;  %v780_v35 = vld [vmem:[%s1528_s1 + $0x138] sm:$0xff] }
  0x1b   : >> { %304 = vmatpush.msra.mxu2 %v784_v19  ;;  %226 = vmatpush.msra.mxu0 %v767_v21  ;;  %v803_v28 = vld [vmem:[%s1528_s1 + $0x1c8] sm:$0xff]  ;;  %v802_v32 = vld [vmem:[%s1528_s1 + $0x1c0] sm:$0xff]  ;;  %v801_v36 = vld [vmem:[%s1528_s1 + $0x1b8] sm:$0xff] }
  0x1c   : >> { %361 = vmatpush.msra.mxu3 %v805_v20  ;;  %255 = vmatpush.msra.mxu1 %v194_v22  ;;  %v763_v37 = vld [vmem:[%s1528_s1 + $0xb0] sm:$0xff]  ;;  %v762_v41 = vld [vmem:[%s1528_s1 + $0xa8] sm:$0xff]  ;;  %v761_v45 = vld [vmem:[%s1528_s1 + $0xa0] sm:$0xff] }
  0x1d   : >> { %305 = vmatpush.msra.mxu2 %v783_v23  ;;  %227 = vmatpush.msra.mxu0 %v766_v25  ;;  %v190_v38 = vld [vmem:[%s1528_s1 + $0x30] sm:$0xff]  ;;  %v189_v42 = vld [vmem:[%s1528_s1 + $0x28] sm:$0xff]  ;;  %v188_v46 = vld [vmem:[%s1528_s1 + $0x20] sm:$0xff] }
  0x1e   : >> { %362 = vmatpush.msra.mxu3 %v804_v24  ;;  %256 = vmatpush.msra.mxu1 %v193_v26  ;;  %v779_v39 = vld [vmem:[%s1528_s1 + $0x130] sm:$0xff]  ;;  %v778_v43 = vld [vmem:[%s1528_s1 + $0x128] sm:$0xff]  ;;  %v777_v47 = vld [vmem:[%s1528_s1 + $0x120] sm:$0xff] }
  0x1f   : >> { %306 = vmatpush.msra.mxu2 %v782_v27  ;;  %228 = vmatpush.msra.mxu0 %v765_v29  ;;  %v800_v40 = vld [vmem:[%s1528_s1 + $0x1b0] sm:$0xff]  ;;  %v799_v44 = vld [vmem:[%s1528_s1 + $0x1a8] sm:$0xff]  ;;  %v798_v48 = vld [vmem:[%s1528_s1 + $0x1a0] sm:$0xff] }
  0x20   : >> { %363 = vmatpush.msra.mxu3 %v803_v28  ;;  %257 = vmatpush.msra.mxu1 %v192_v30  ;;  %v760_v49 = vld [vmem:[%s1528_s1 + $0x98] sm:$0xff]  ;;  %v759_v53 = vld [vmem:[%s1528_s1 + $0x90] sm:$0xff]  ;;  %v758_v57 = vld [vmem:[%s1528_s1 + $0x88] sm:$0xff] }
  0x21   : >> { %307 = vmatpush.msra.mxu2 %v781_v31  ;;  %229 = vmatpush.msra.mxu0 %v764_v33  ;;  %v187_v50 = vld [vmem:[%s1528_s1 + $0x18] sm:$0xff]  ;;  %v186_v54 = vld [vmem:[%s1528_s1 + $0x10] sm:$0xff]  ;;  %v185_v58 = vld [vmem:[%s1528_s1 + $0x8] sm:$0xff] }
  0x22   : >> { %364 = vmatpush.msra.mxu3 %v802_v32  ;;  %258 = vmatpush.msra.mxu1 %v191_v34  ;;  %v776_v51 = vld [vmem:[%s1528_s1 + $0x118] sm:$0xff]  ;;  %v775_v55 = vld [vmem:[%s1528_s1 + $0x110] sm:$0xff]  ;;  %v774_v59 = vld [vmem:[%s1528_s1 + $0x108] sm:$0xff] }
  0x23   : >> { %308 = vmatpush.msra.mxu2 %v780_v35  ;;  %230 = vmatpush.msra.mxu0 %v763_v37  ;;  %v797_v52 = vld [vmem:[%s1528_s1 + $0x198] sm:$0xff]  ;;  %v796_v56 = vld [vmem:[%s1528_s1 + $0x190] sm:$0xff]  ;;  %v795_v60 = vld [vmem:[%s1528_s1 + $0x188] sm:$0xff] }
  0x24   : >> { %365 = vmatpush.msra.mxu3 %v801_v36  ;;  %259 = vmatpush.msra.mxu1 %v190_v38  ;;  %v757_v61 = vld [vmem:[%s1528_s1 + $0x80] sm:$0xff]  ;;  %v870_v6 = vld [vmem:[%s1528_s1 + $0x378] sm:$0xff]  ;;  %v869_v10 = vld [vmem:[%s1528_s1 + $0x370] sm:$0xff] }
  0x25   : >> { %309 = vmatpush.msra.mxu2 %v779_v39  ;;  %231 = vmatpush.msra.mxu0 %v762_v41  ;;  %v184_v62 = vld [vmem:[%s1528_s1] sm:$0xff]  ;;  %v890_v7 = vld [vmem:[%s1528_s1 + $0x3f8] sm:$0xff]  ;;  %v889_v11 = vld [vmem:[%s1528_s1 + $0x3f0] sm:$0xff] }
  0x26   : >> { %366 = vmatpush.msra.mxu3 %v800_v40  ;;  %260 = vmatpush.msra.mxu1 %v189_v42  ;;  %v773_v63 = vld [vmem:[%s1528_s1 + $0x100] sm:$0xff]  ;;  %v829_v8 = vld [vmem:[%s1528_s1 + $0x278] sm:$0xff]  ;;  %v828_v12 = vld [vmem:[%s1528_s1 + $0x270] sm:$0xff] }
  0x27   : >> { %310 = vmatpush.msra.mxu2 %v778_v43  ;;  %232 = vmatpush.msra.mxu0 %v761_v45  ;;  %v794_v1 = vld [vmem:[%s1528_s1 + $0x180] sm:$0xff]  ;;  %v849_v9 = vld [vmem:[%s1528_s1 + $0x2f8] sm:$0xff]  ;;  %v848_v13 = vld [vmem:[%s1528_s1 + $0x2f0] sm:$0xff] }
  0x28   : >> { %367 = vmatpush.msra.mxu3 %v799_v44  ;;  %261 = vmatpush.msra.mxu1 %v188_v46  ;;  %v200_v2 = vld [vmem:[%s1227_s4 + $0x1] sm:$0xff]  ;;  %v201_v22 = vld [vmem:[%s1227_s4 + $0x9] sm:$0xff]  ;;  %v866_v26 = vld [vmem:[%s1528_s1 + $0x358] sm:$0xff] }
  0x29   : >> { %311 = vmatpush.msra.mxu2 %v777_v47  ;;  %233 = vmatpush.msra.mxu0 %v760_v49  ;;  %v180_v3 = vld [vmem:[%s1227_s4] sm:$0xff]  ;;  %v868_v14 = vld [vmem:[%s1528_s1 + $0x368] sm:$0xff]  ;;  %v886_v27 = vld [vmem:[%s1528_s1 + $0x3d8] sm:$0xff] }
  0x2a   : >> { %368 = vmatpush.msra.mxu3 %v798_v48  ;;  %262 = vmatpush.msra.mxu1 %v187_v50  ;;  %v279_v4 = vld [vmem:[%s1227_s4 + $0x2] sm:$0xff]  ;;  %v280_v24 = vld [vmem:[%s1227_s4 + $0xa] sm:$0xff]  ;;  %v825_v28 = vld [vmem:[%s1528_s1 + $0x258] sm:$0xff] }
  0x2b   : >> { %312 = vmatpush.msra.mxu2 %v776_v51  ;;  %234 = vmatpush.msra.mxu0 %v759_v53  ;;  %v790_v5 = vld [vmem:[%s1227_s4 + $0x20] sm:$0xff]  ;;  %v888_v15 = vld [vmem:[%s1528_s1 + $0x3e8] sm:$0xff]  ;;  %v845_v29 = vld [vmem:[%s1528_s1 + $0x2d8] sm:$0xff] }
  0x2c   : >> { %369 = vmatpush.msra.mxu3 %v797_v52  ;;  %263 = vmatpush.msra.mxu1 %v186_v54  ;;  %v827_v16 = vld [vmem:[%s1528_s1 + $0x268] sm:$0xff]  ;;  %v867_v18 = vld [vmem:[%s1528_s1 + $0x360] sm:$0xff]  ;;  %v865_v30 = vld [vmem:[%s1528_s1 + $0x350] sm:$0xff] }
  0x2d   : >> { %313 = vmatpush.msra.mxu2 %v775_v55  ;;  %235 = vmatpush.msra.mxu0 %v758_v57  ;;  %v847_v17 = vld [vmem:[%s1528_s1 + $0x2e8] sm:$0xff]  ;;  %v887_v19 = vld [vmem:[%s1528_s1 + $0x3e0] sm:$0xff]  ;;  %v885_v31 = vld [vmem:[%s1528_s1 + $0x3d0] sm:$0xff] }
  0x2e   : >> { %370 = vmatpush.msra.mxu3 %v796_v56  ;;  %264 = vmatpush.msra.mxu1 %v185_v58  ;;  %v826_v20 = vld [vmem:[%s1528_s1 + $0x260] sm:$0xff]  ;;  %v181_v23 = vld [vmem:[%s1227_s4 + $0x8] sm:$0xff]  ;;  %v824_v32 = vld [vmem:[%s1528_s1 + $0x250] sm:$0xff] }
  0x2f   : >> { %314 = vmatpush.msra.mxu2 %v774_v59  ;;  %236 = vmatpush.msra.mxu0 %v757_v61  ;;  %v846_v21 = vld [vmem:[%s1528_s1 + $0x2e0] sm:$0xff]  ;;  %v791_v25 = vld [vmem:[%s1227_s4 + $0x28] sm:$0xff]  ;;  %v844_v33 = vld [vmem:[%s1528_s1 + $0x2d0] sm:$0xff] }
  0x30   : >> { %371 = vmatpush.msra.mxu3 %v795_v60  ;;  %265 = vmatpush.msra.mxu1 %v184_v62  ;;  %v864_v34 = vld [vmem:[%s1528_s1 + $0x348] sm:$0xff]  ;;  %v863_v38 = vld [vmem:[%s1528_s1 + $0x340] sm:$0xff]  ;;  %v202_v42 = vld [vmem:[%s1227_s4 + $0x11] sm:$0xff] }
  0x31   : >> { %315 = vmatpush.msra.mxu2 %v773_v63  ;;  %237 = vmatmul.f32.vlgmr.msra.gmra.mxu0 %v200_v2  ;;  %v884_v35 = vld [vmem:[%s1528_s1 + $0x3c8] sm:$0xff]  ;;  %v883_v39 = vld [vmem:[%s1528_s1 + $0x3c0] sm:$0xff]  ;;  %v182_v43 = vld [vmem:[%s1227_s4 + $0x10] sm:$0xff] }
  0x32   : >> { %372 = vmatpush.msra.mxu3 %v794_v1  ;;  %266 = vmatmul.f32.vlgmr.msra.gmra.mxu1 %v180_v3  ;;  %v823_v36 = vld [vmem:[%s1528_s1 + $0x248] sm:$0xff]  ;;  %v822_v40 = vld [vmem:[%s1528_s1 + $0x240] sm:$0xff]  ;;  %v281_v44 = vld [vmem:[%s1227_s4 + $0x12] sm:$0xff] }
  0x33   : >> { %316 = vmatmul.f32.vlgmr.msra.gmra.mxu2 %v279_v4  ;;  %373 = vmatmul.f32.vlgmr.msra.gmra.mxu3 %v790_v5  ;;  %v843_v37 = vld [vmem:[%s1528_s1 + $0x2c8] sm:$0xff]  ;;  %v842_v41 = vld [vmem:[%s1528_s1 + $0x2c0] sm:$0xff]  ;;  %v792_v45 = vld [vmem:[%s1227_s4 + $0x30] sm:$0xff] }
  0x34   : >> { %522 = vmatpush.msrb.mxu2 %v870_v6  ;;  %576 = vmatpush.msrb.mxu3 %v890_v7  ;;  %v862_v46 = vld [vmem:[%s1528_s1 + $0x338] sm:$0xff]  ;;  %v861_v50 = vld [vmem:[%s1528_s1 + $0x330] sm:$0xff]  ;;  %v860_v54 = vld [vmem:[%s1528_s1 + $0x328] sm:$0xff] }
  0x35   : >> { %411 = vmatpush.msrb.mxu0 %v829_v8  ;;  %465 = vmatpush.msrb.mxu1 %v849_v9  ;;  %v882_v47 = vld [vmem:[%s1528_s1 + $0x3b8] sm:$0xff]  ;;  %v881_v51 = vld [vmem:[%s1528_s1 + $0x3b0] sm:$0xff]  ;;  %v880_v55 = vld [vmem:[%s1528_s1 + $0x3a8] sm:$0xff] }
  0x36   : >> { %523 = vmatpush.msrb.mxu2 %v869_v10  ;;  %577 = vmatpush.msrb.mxu3 %v889_v11  ;;  %v821_v48 = vld [vmem:[%s1528_s1 + $0x238] sm:$0xff]  ;;  %v820_v52 = vld [vmem:[%s1528_s1 + $0x230] sm:$0xff]  ;;  %v819_v56 = vld [vmem:[%s1528_s1 + $0x228] sm:$0xff] }
  0x37   : >> { %412 = vmatpush.msrb.mxu0 %v828_v12  ;;  %466 = vmatpush.msrb.mxu1 %v848_v13  ;;  %v841_v49 = vld [vmem:[%s1528_s1 + $0x2b8] sm:$0xff]  ;;  %v840_v53 = vld [vmem:[%s1528_s1 + $0x2b0] sm:$0xff]  ;;  %v839_v57 = vld [vmem:[%s1528_s1 + $0x2a8] sm:$0xff] }
  0x38   : >> { %524 = vmatpush.msrb.mxu2 %v868_v14  ;;  %578 = vmatpush.msrb.mxu3 %v888_v15  ;;  %v859_v58 = vld [vmem:[%s1528_s1 + $0x320] sm:$0xff]  ;;  %v203_v62 = vld [vmem:[%s1227_s4 + $0x19] sm:$0x3]  ;;  %v857_v7 = vld [vmem:[%s1528_s1 + $0x310] sm:$0xff] }
  0x39   : >> { %413 = vmatpush.msrb.mxu0 %v827_v16  ;;  %467 = vmatpush.msrb.mxu1 %v847_v17  ;;  %v879_v59 = vld [vmem:[%s1528_s1 + $0x3a0] sm:$0xff]  ;;  %v183_v63 = vld [vmem:[%s1227_s4 + $0x18] sm:$0x3]  ;;  %v282_v1 = vld [vmem:[%s1227_s4 + $0x1a] sm:$0x3] }
  0x3a   : >> { %525 = vmatpush.msrb.mxu2 %v867_v18  ;;  %579 = vmatpush.msrb.mxu3 %v887_v19  ;;  %v818_v60 = vld [vmem:[%s1528_s1 + $0x220] sm:$0xff]  ;;  %v793_v2 = vld [vmem:[%s1227_s4 + $0x38] sm:$0x3]  ;;  %v877_v8 = vld [vmem:[%s1528_s1 + $0x390] sm:$0xff] }
  0x3b   : >> { %414 = vmatpush.msrb.mxu0 %v826_v20  ;;  %468 = vmatpush.msrb.mxu1 %v846_v21  ;;  %v838_v61 = vld [vmem:[%s1528_s1 + $0x2a0] sm:$0xff]  ;;  %v858_v3 = vld [vmem:[%s1528_s1 + $0x318] sm:$0xff]  ;;  %v816_v9 = vld [vmem:[%s1528_s1 + $0x210] sm:$0xff] }
  0x3c   : >> { %240 = vmatmul.f32.gmra.mxu0 %v201_v22  ;;  %269 = vmatmul.f32.gmra.mxu1 %v181_v23  ;;  %v878_v4 = vld [vmem:[%s1528_s1 + $0x398] sm:$0xff]  ;;  %v836_v10 = vld [vmem:[%s1528_s1 + $0x290] sm:$0xff]  ;;  %v856_v11 = vld [vmem:[%s1528_s1 + $0x308] sm:$0xff] }
  0x3d   : >> { %319 = vmatmul.f32.gmra.mxu2 %v280_v24  ;;  %376 = vmatmul.f32.gmra.mxu3 %v791_v25  ;;  %v817_v5 = vld [vmem:[%s1528_s1 + $0x218] sm:$0xff]  ;;  %v876_v12 = vld [vmem:[%s1528_s1 + $0x388] sm:$0xff]  ;;  %v855_v15 = vld [vmem:[%s1528_s1 + $0x300] sm:$0xff] }
  0x3e   : >> { %526 = vmatpush.msrb.mxu2 %v866_v26  ;;  %580 = vmatpush.msrb.mxu3 %v886_v27  ;;  %v837_v6 = vld [vmem:[%s1528_s1 + $0x298] sm:$0xff]  ;;  %v815_v13 = vld [vmem:[%s1528_s1 + $0x208] sm:$0xff]  ;;  %v875_v16 = vld [vmem:[%s1528_s1 + $0x380] sm:$0xff] }
  0x3f   : >> { %415 = vmatpush.msrb.mxu0 %v825_v28  ;;  %469 = vmatpush.msrb.mxu1 %v845_v29  ;;  %v835_v14 = vld [vmem:[%s1528_s1 + $0x288] sm:$0xff]  ;;  %v814_v17 = vld [vmem:[%s1528_s1 + $0x200] sm:$0xff]  ;;  %v910_v23 = vld [vmem:[%s1528_s1 + $0x478] sm:$0xff] }
  0x40   : >> { %527 = vmatpush.msrb.mxu2 %v865_v30  ;;  %581 = vmatpush.msrb.mxu3 %v885_v31  ;;  %v834_v18 = vld [vmem:[%s1528_s1 + $0x280] sm:$0xff]  ;;  %v909_v24 = vld [vmem:[%s1528_s1 + $0x470] sm:$0xff]  ;;  %v908_v25 = vld [vmem:[%s1528_s1 + $0x468] sm:$0xff] }
  0x41   : >> { %416 = vmatpush.msrb.mxu0 %v824_v32  ;;  %470 = vmatpush.msrb.mxu1 %v844_v33  ;;  %v810_v19 = vld [vmem:[%s1227_s4 + $0x21] sm:$0xff]  ;;  %v811_v27 = vld [vmem:[%s1227_s4 + $0x29] sm:$0xff]  ;;  %v906_v31 = vld [vmem:[%s1528_s1 + $0x458] sm:$0xff] }
  0x42   : >> { %528 = vmatpush.msrb.mxu2 %v864_v34  ;;  %582 = vmatpush.msrb.mxu3 %v884_v35  ;;  %v830_v20 = vld [vmem:[%s1227_s4 + $0x22] sm:$0xff]  ;;  %v831_v28 = vld [vmem:[%s1227_s4 + $0x2a] sm:$0xff] }
  0x43   : >> { %417 = vmatpush.msrb.mxu0 %v823_v36  ;;  %471 = vmatpush.msrb.mxu1 %v843_v37  ;;  %v851_v21 = vld [vmem:[%s1227_s4 + $0x40] sm:$0xff]  ;;  %v852_v29 = vld [vmem:[%s1227_s4 + $0x48] sm:$0xff]  ;;  %v905_v32 = vld [vmem:[%s1528_s1 + $0x450] sm:$0xff] }
  0x44   : >> { %529 = vmatpush.msrb.mxu2 %v863_v38  ;;  %583 = vmatpush.msrb.mxu3 %v883_v39  ;;  %v871_v22 = vld [vmem:[%s1227_s4 + $0x41] sm:$0xff]  ;;  %v872_v30 = vld [vmem:[%s1227_s4 + $0x49] sm:$0xff]  ;;  %v812_v35 = vld [vmem:[%s1227_s4 + $0x31] sm:$0xff] }
  0x45   : >> { %418 = vmatpush.msrb.mxu0 %v822_v40  ;;  %472 = vmatpush.msrb.mxu1 %v842_v41  ;;  %v907_v26 = vld [vmem:[%s1528_s1 + $0x460] sm:$0xff]  ;;  %v904_v33 = vld [vmem:[%s1528_s1 + $0x448] sm:$0xff]  ;;  %v832_v36 = vld [vmem:[%s1227_s4 + $0x32] sm:$0xff] }
  0x46   : >> { %243 = vmatmul.f32.gmra.mxu0 %v202_v42  ;;  %272 = vmatmul.f32.gmra.mxu1 %v182_v43  ;;  %v903_v34 = vld [vmem:[%s1528_s1 + $0x440] sm:$0xff]  ;;  %v853_v37 = vld [vmem:[%s1227_s4 + $0x50] sm:$0xff]  ;;  %v902_v39 = vld [vmem:[%s1528_s1 + $0x438] sm:$0xff] }
  0x47   : >> { %322 = vmatmul.f32.gmra.mxu2 %v281_v44  ;;  %379 = vmatmul.f32.gmra.mxu3 %v792_v45  ;;  %v873_v38 = vld [vmem:[%s1227_s4 + $0x51] sm:$0xff]  ;;  %v900_v41 = vld [vmem:[%s1528_s1 + $0x428] sm:$0xff]  ;;  %v899_v42 = vld [vmem:[%s1528_s1 + $0x420] sm:$0xff] }
  0x48   : >> { %530 = vmatpush.msrb.mxu2 %v862_v46  ;;  %584 = vmatpush.msrb.mxu3 %v882_v47  ;;  %v901_v40 = vld [vmem:[%s1528_s1 + $0x430] sm:$0xff]  ;;  %v813_v43 = vld [vmem:[%s1227_s4 + $0x39] sm:$0x3] }
  0x49   : >> { %419 = vmatpush.msrb.mxu0 %v821_v48  ;;  %473 = vmatpush.msrb.mxu1 %v841_v49  ;;  %v833_v44 = vld [vmem:[%s1227_s4 + $0x3a] sm:$0x3]  ;;  %v854_v45 = vld [vmem:[%s1227_s4 + $0x58] sm:$0x3]  ;;  %v897_v48 = vld [vmem:[%s1528_s1 + $0x410] sm:$0xff] }
  0x4a   : >> { %531 = vmatpush.msrb.mxu2 %v861_v50  ;;  %585 = vmatpush.msrb.mxu3 %v881_v51  ;;  %v874_v46 = vld [vmem:[%s1227_s4 + $0x59] sm:$0x3]  ;;  %v896_v49 = vld [vmem:[%s1528_s1 + $0x408] sm:$0xff]  ;;  %v895_v50 = vld [vmem:[%s1528_s1 + $0x400] sm:$0xff] }
  0x4b   : >> { %420 = vmatpush.msrb.mxu0 %v820_v52  ;;  %474 = vmatpush.msrb.mxu1 %v840_v53  ;;  %v898_v47 = vld [vmem:[%s1528_s1 + $0x418] sm:$0xff]  ;;  %v891_v51 = vld [vmem:[%s1227_s4 + $0x42] sm:$0xff]  ;;  %v892_v52 = vld [vmem:[%s1227_s4 + $0x4a] sm:$0xff] }
  0x4c   : >> { %532 = vmatpush.msrb.mxu2 %v860_v54  ;;  %586 = vmatpush.msrb.mxu3 %v880_v55  ;;  %v893_v53 = vld [vmem:[%s1227_s4 + $0x52] sm:$0xff]  ;;  %v894_v54 = vld [vmem:[%s1227_s4 + $0x5a] sm:$0x3]  ;;  %s674_s4 = scalar_lea.vmem %s1036_s23, %s756_s15 }
  0x4d   : >> { %421 = vmatpush.msrb.mxu0 %v819_v56  ;;  %475 = vmatpush.msrb.mxu1 %v839_v57 }
  0x4e   : >> { %533 = vmatpush.msrb.mxu2 %v859_v58  ;;  %587 = vmatpush.msrb.mxu3 %v879_v59 }
  0x4f   : >> { %422 = vmatpush.msrb.mxu0 %v818_v60  ;;  %476 = vmatpush.msrb.mxu1 %v838_v61 }
  0x50   : >> { %246 = vmatmul.f32.gmra.mxu0 %v203_v62  ;;  %275 = vmatmul.f32.gmra.mxu1 %v183_v63 }
  0x51   : >> { %325 = vmatmul.f32.gmra.mxu2 %v282_v1  ;;  %382 = vmatmul.f32.gmra.mxu3 %v793_v2 }
  0x52   : >> { %534 = vmatpush.msrb.mxu2 %v858_v3  ;;  %588 = vmatpush.msrb.mxu3 %v878_v4 }
  0x53   : >> { %423 = vmatpush.msrb.mxu0 %v817_v5  ;;  %477 = vmatpush.msrb.mxu1 %v837_v6 }
  0x54   : >> { %535 = vmatpush.msrb.mxu2 %v857_v7  ;;  %589 = vmatpush.msrb.mxu3 %v877_v8 }
  0x55   : >> { %424 = vmatpush.msrb.mxu0 %v816_v9  ;;  %478 = vmatpush.msrb.mxu1 %v836_v10 }
  0x56   : >> { %536 = vmatpush.msrb.mxu2 %v856_v11  ;;  %590 = vmatpush.msrb.mxu3 %v876_v12 }
  0x57   : >> { %425 = vmatpush.msrb.mxu0 %v815_v13  ;;  %479 = vmatpush.msrb.mxu1 %v835_v14 }
  0x58   : >> { %537 = vmatpush.msrb.mxu2 %v855_v15  ;;  %591 = vmatpush.msrb.mxu3 %v875_v16 }
  0x59   : >> { %426 = vmatpush.msrb.mxu0 %v814_v17  ;;  %480 = vmatpush.msrb.mxu1 %v834_v18 }
  0x5a   : >> { %427 = vmatmul.f32.vlgmr.msrb.gmra.mxu0 %v810_v19  ;;  %481 = vmatmul.f32.vlgmr.msrb.gmra.mxu1 %v830_v20 }
  0x5b   : >> { %538 = vmatmul.f32.vlgmr.msrb.gmra.mxu2 %v851_v21  ;;  %592 = vmatmul.f32.vlgmr.msrb.gmra.mxu3 %v871_v22 }
  0x5c   : >> { %914 = vmatpush.msra.mxu2 %v910_v23  ;;  %915 = vmatpush.msra.mxu3 %v910_v23 }
  0x5d   : >> { %630 = vmatpush.msra.mxu0 %v910_v23  ;;  %913 = vmatpush.msra.mxu1 %v910_v23 }
  0x5e   : >> { %917 = vmatpush.msra.mxu2 %v909_v24  ;;  %918 = vmatpush.msra.mxu3 %v909_v24 }
  0x5f   : >> { %631 = vmatpush.msra.mxu0 %v909_v24  ;;  %916 = vmatpush.msra.mxu1 %v909_v24 }
  0x60   : >> { %920 = vmatpush.msra.mxu2 %v908_v25  ;;  %921 = vmatpush.msra.mxu3 %v908_v25 }
  0x61   : >> { %632 = vmatpush.msra.mxu0 %v908_v25  ;;  %919 = vmatpush.msra.mxu1 %v908_v25 }
  0x62   : >> { %923 = vmatpush.msra.mxu2 %v907_v26  ;;  %924 = vmatpush.msra.mxu3 %v907_v26 }
  0x63   : >> { %633 = vmatpush.msra.mxu0 %v907_v26  ;;  %922 = vmatpush.msra.mxu1 %v907_v26 }
  0x64   : >> { %430 = vmatmul.f32.gmra.mxu0 %v811_v27  ;;  %484 = vmatmul.f32.gmra.mxu1 %v831_v28 }
  0x65   : >> { %541 = vmatmul.f32.gmra.mxu2 %v852_v29  ;;  %595 = vmatmul.f32.gmra.mxu3 %v872_v30 }
  0x66   : >> { %926 = vmatpush.msra.mxu2 %v906_v31  ;;  %927 = vmatpush.msra.mxu3 %v906_v31 }
  0x67   : >> { %634 = vmatpush.msra.mxu0 %v906_v31  ;;  %925 = vmatpush.msra.mxu1 %v906_v31 }
  0x68   : >> { %929 = vmatpush.msra.mxu2 %v905_v32  ;;  %930 = vmatpush.msra.mxu3 %v905_v32 }
  0x69   : >> { %635 = vmatpush.msra.mxu0 %v905_v32  ;;  %928 = vmatpush.msra.mxu1 %v905_v32 }
  0x6a   : >> { %932 = vmatpush.msra.mxu2 %v904_v33  ;;  %933 = vmatpush.msra.mxu3 %v904_v33 }
  0x6b   : >> { %636 = vmatpush.msra.mxu0 %v904_v33  ;;  %931 = vmatpush.msra.mxu1 %v904_v33 }
  0x6c   : >> { %935 = vmatpush.msra.mxu2 %v903_v34  ;;  %936 = vmatpush.msra.mxu3 %v903_v34 }
  0x6d   : >> { %637 = vmatpush.msra.mxu0 %v903_v34  ;;  %934 = vmatpush.msra.mxu1 %v903_v34 }
  0x6e   : >> { %433 = vmatmul.f32.gmra.mxu0 %v812_v35  ;;  %487 = vmatmul.f32.gmra.mxu1 %v832_v36 }
  0x6f   : >> { %544 = vmatmul.f32.gmra.mxu2 %v853_v37  ;;  %598 = vmatmul.f32.gmra.mxu3 %v873_v38 }
  0x70   : >> { %938 = vmatpush.msra.mxu2 %v902_v39  ;;  %939 = vmatpush.msra.mxu3 %v902_v39 }
  0x71   : >> { %638 = vmatpush.msra.mxu0 %v902_v39  ;;  %937 = vmatpush.msra.mxu1 %v902_v39 }
  0x72   : >> { %941 = vmatpush.msra.mxu2 %v901_v40  ;;  %942 = vmatpush.msra.mxu3 %v901_v40 }
  0x73   : >> { %639 = vmatpush.msra.mxu0 %v901_v40  ;;  %940 = vmatpush.msra.mxu1 %v901_v40 }
  0x74   : >> { %944 = vmatpush.msra.mxu2 %v900_v41  ;;  %945 = vmatpush.msra.mxu3 %v900_v41 }
  0x75   : >> { %640 = vmatpush.msra.mxu0 %v900_v41  ;;  %943 = vmatpush.msra.mxu1 %v900_v41 }
  0x76   : >> { %947 = vmatpush.msra.mxu2 %v899_v42  ;;  %948 = vmatpush.msra.mxu3 %v899_v42 }
  0x77   : >> { %641 = vmatpush.msra.mxu0 %v899_v42  ;;  %946 = vmatpush.msra.mxu1 %v899_v42 }
  0x78   : >> { %436 = vmatmul.f32.gmra.mxu0 %v813_v43  ;;  %490 = vmatmul.f32.gmra.mxu1 %v833_v44 }
  0x79   : >> { %547 = vmatmul.f32.gmra.mxu2 %v854_v45  ;;  %601 = vmatmul.f32.gmra.mxu3 %v874_v46  ;;  %v664_v46 = vperm.slane %v1026_v0, 0 }
  0x7a   : >> { %950 = vmatpush.msra.mxu2 %v898_v47  ;;  %951 = vmatpush.msra.mxu3 %v898_v47 }
  0x7b   : >> { %642 = vmatpush.msra.mxu0 %v898_v47  ;;  %949 = vmatpush.msra.mxu1 %v898_v47 }
  0x7c   : >> { %953 = vmatpush.msra.mxu2 %v897_v48  ;;  %954 = vmatpush.msra.mxu3 %v897_v48 }
  0x7d   : >> { %643 = vmatpush.msra.mxu0 %v897_v48  ;;  %952 = vmatpush.msra.mxu1 %v897_v48 }
  0x7e   : >> { %956 = vmatpush.msra.mxu2 %v896_v49  ;;  %957 = vmatpush.msra.mxu3 %v896_v49 }
  0x7f   : >> { %644 = vmatpush.msra.mxu0 %v896_v49  ;;  %955 = vmatpush.msra.mxu1 %v896_v49 }
  0x80   : >> { %959 = vmatpush.msra.mxu2 %v895_v50  ;;  %960 = vmatpush.msra.mxu3 %v895_v50 }
  0x81   : >> { %645 = vmatpush.msra.mxu0 %v895_v50  ;;  %958 = vmatpush.msra.mxu1 %v895_v50 }
  0x82   : >> { %646 = vmatmul.f32.vlgmr.msra.gmra.mxu0 %v891_v51  ;;  %649 = vmatmul.f32.vlgmr.msra.gmra.mxu1 %v892_v52 }
  0x83   : >> { %652 = vmatmul.f32.vlgmr.msra.gmra.mxu2 %v893_v53  ;;  %655 = vmatmul.f32.vlgmr.msra.gmra.mxu3 %v894_v54 }
  0xae   : >> { %v238_v55 = vpop.f32.mrf.mxu0 }
  0xaf   : >> { %v267_v56 = vpop.f32.mrf.mxu1 }
  0xb0   : >> { %v268_v16 = vadd.f32 %v267_v56, %v238_v55 }
  0xb6   : >> { %v317_v57 = vpop.f32.mrf.mxu2  ;;  %v374_v58 = vpop.f32.mrf.mxu3 }
  0xb7   : >> { %v329_v20 = vadd.f32 %v317_v57, %v268_v16 }
  0xb9   : >> { %v241_v59 = vpop.f32.mrf.mxu0  ;;  %v270_v60 = vpop.f32.mrf.mxu1  ;;  %v386_v24 = vadd.f32 %v374_v58, %v329_v20 }
  0xba   : >> { %v271_v17 = vadd.f32 %v270_v60, %v241_v59 }
  0xc0   : >> { %v320_v61 = vpop.f32.mrf.mxu2  ;;  %v377_v62 = vpop.f32.mrf.mxu3 }
  0xc1   : >> { %v330_v21 = vadd.f32 %v320_v61, %v271_v17 }
  0xc3   : >> { %v244_v63 = vpop.f32.mrf.mxu0  ;;  %v273_v1 = vpop.f32.mrf.mxu1  ;;  %v387_v25 = vadd.f32 %v377_v62, %v330_v21 }
  0xc4   : >> { %v274_v22 = vadd.f32 %v273_v1, %v244_v63 }
  0xca   : >> { %v323_v2 = vpop.f32.mrf.mxu2  ;;  %v380_v3 = vpop.f32.mrf.mxu3 }
  0xcb   : >> { %v331_v30 = vadd.f32 %v323_v2, %v274_v22 }
  0xcd   : >> { %v247_v4 = vpop.f32.mrf.mxu0  ;;  %v276_v5 = vpop.f32.mrf.mxu1  ;;  %v388_v36 = vadd.f32 %v380_v3, %v331_v30 }
  0xce   : >> { %v277_v23 = vadd.f32 %v276_v5, %v247_v4 }
  0xd4   : >> { %v326_v6 = vpop.f32.mrf.mxu2  ;;  %v383_v7 = vpop.f32.mrf.mxu3 }
  0xd5   : >> { %v332_v31 = vadd.f32 %v326_v6, %v277_v23 }
  0xd7   : >> { %v428_v8 = vpop.f32.mrf.mxu0  ;;  %v482_v9 = vpop.f32.mrf.mxu1  ;;  %v389_v37 = vadd.f32 %v383_v7, %v332_v31 }
  0xd8   : >> { %v440_v28 = vadd.f32 %v428_v8, %v386_v24 }
  0xda   : >> { %v494_v34 = vadd.f32 %v482_v9, %v440_v28 }
  0xde   : >> { %v539_v10 = vpop.f32.mrf.mxu2  ;;  %v593_v11 = vpop.f32.mrf.mxu3 }
  0xdf   : >> { %v551_v38 = vadd.f32 %v539_v10, %v494_v34 }
  0xe1   : >> { %v431_v12 = vpop.f32.mrf.mxu0  ;;  %v485_v13 = vpop.f32.mrf.mxu1  ;;  %v605_v44 = vadd.f32 %v593_v11, %v551_v38 }
  0xe2   : >> { %v441_v29 = vadd.f32 %v431_v12, %v387_v25 }
  0xe4   : >> { %v495_v35 = vadd.f32 %v485_v13, %v441_v29 }
  0xe8   : >> { %v542_v14 = vpop.f32.mrf.mxu2  ;;  %v596_v15 = vpop.f32.mrf.mxu3 }
  0xe9   : >> { %v552_v39 = vadd.f32 %v542_v14, %v495_v35 }
  0xeb   : >> { %v434_v18 = vpop.f32.mrf.mxu0  ;;  %v488_v19 = vpop.f32.mrf.mxu1  ;;  %v606_v45 = vadd.f32 %v596_v15, %v552_v39 }
  0xec   : >> { %v442_v40 = vadd.f32 %v434_v18, %v388_v36 }
  0xee   : >> { %v496_v47 = vadd.f32 %v488_v19, %v442_v40 }
  0xf2   : >> { %v545_v26 = vpop.f32.mrf.mxu2  ;;  %v599_v27 = vpop.f32.mrf.mxu3 }
  0xf3   : >> { %v553_v53 = vadd.f32 %v545_v26, %v496_v47 }
  0xf5   : >> { %v437_v32 = vpop.f32.mrf.mxu0  ;;  %v491_v33 = vpop.f32.mrf.mxu1  ;;  %v607_v59 = vadd.f32 %v599_v27, %v553_v53 }
  0xf6   : >> { %v443_v41 = vadd.f32 %v437_v32, %v389_v37 }
  0xf8   : >> { %v497_v48 = vadd.f32 %v491_v33, %v443_v41 }
  0xfc   : >> { %v548_v42 = vpop.f32.mrf.mxu2  ;;  %v602_v43 = vpop.f32.mrf.mxu3 }
  0xfd   : >> { %v554_v54 = vadd.f32 %v548_v42, %v497_v48 }
  0xff   : >> { %v647_v49 = vpop.f32.mrf.mxu0  ;;  %v650_v50 = vpop.f32.mrf.mxu1  ;;  %v608_v60 = vadd.f32 %v602_v43, %v554_v54 }
 0x100   : >> { %v659_v51 = vadd.f32 %v647_v49, %v605_v44  ;;  %v660_v52 = vadd.f32 %v650_v50, %v606_v45 }
 0x102   : >> { %v666_v55 = vadd.f32 %v664_v46, %v659_v51  ;;  %v667_v56 = vadd.f32 %v664_v46, %v660_v52 }
 0x104   : >> { %v670_v57 = vmax.f32 %v666_v55, 0.0  ;;  %v671_v58 = vmax.f32 %v667_v56, 0.0 }
 0x106   : >> { %675 = vst [vmem:[%s674_s4] sm:$0xff] %v670_v57  ;;  %v653_v61 = vpop.f32.mrf.mxu2  ;;  %v656_v62 = vpop.f32.mrf.mxu3 }
 0x107   : >> { %676 = vst [vmem:[%s674_s4 + $0x8] sm:$0xff] %v671_v58  ;;  %v661_v63 = vadd.f32 %v653_v61, %v607_v59  ;;  %v662_v1 = vadd.f32 %v656_v62, %v608_v60 }
 0x109   : >> { %v668_v2 = vadd.f32 %v664_v46, %v661_v63  ;;  %v669_v3 = vadd.f32 %v664_v46, %v662_v1 }
 0x10a   : > { %176 = sbr.rel (!%p174_p4) target bundleno = 16 (0x10), region = 81 }
 0x10b   : >> { %v672_v4 = vmax.f32 %v668_v2, 0.0  ;;  %v673_v5 = vmax.f32 %v669_v3, 0.0 }
 0x10d   : >> { %677 = vst [vmem:[%s674_s4 + $0x10] sm:$0xff] %v672_v4 }
 0x10e   : >> { %678 = vst [vmem:[%s674_s4 + $0x18] sm:$0x3] %v673_v5 }
 0x10f PF: > { %s13_s12 = sadd.s32 1, %s989_s12  }
 0x110   : > { %p10_p5 = scmp.ge.s32.totalorder %s13_s12, 4  }
 0x112   :  { %12 = sbr.rel (!%p10_p5) target bundleno = 1 (0x1), region = 92 }

// kernel: net_forward.16
= control target key start
LH: loop header
LB: loop body
LE: loop exit
PB: predicated region body
PF: predicated region fallthrough
CT: control target
= control target key end

     0   :  { %s948_s12 = smov 0   ;;  %s1448_s0 = inlined_call_operand.vmem [shape: f32[2,26,26,128], index: 0, kind: input, shape index: {}]   ;;  %s1449_s1 = inlined_call_operand.vmem [shape: f32[9,128,128], index: 1, kind: input, shape index: {}]   ;;  %s1450_s2 = inlined_call_operand.vmem [shape: f32[1,128], index: 2, kind: input, shape index: {}]   ;;  %s1451_s3 = inlined_call_operand.vmem [shape: f32[2,24,24,128], index: 3, kind: output, shape index: {}]  }
   0x1 LB: > { %s704_s13 = sadd.s32 4294967295, %s922_s12   ;;  %p708_p0 = scmp.ge.s32.totalorder %s922_s12, 1  ;;  %s922_s12 = sphi %s948_s12, %s13_s12  }
   0x2   : > { %p137_p1 = scmp.lt.s32.totalorder %s922_s12, 3 }
   0x4   : > { %p138_p2 = pnand %p708_p0, %p137_p1 }
   0x5   : > { %p161_p3 = scmp.lt.s32.totalorder (!%p138_p2), %s704_s13, 1  ;;  %s971_s24 = smov (!%p138_p2), 0  }
   0x6   : > { %141 = sbr.rel (%p138_p2) target bundleno = 263 (0x107), region = 32 }
   0xb   : > { %v959_v0 = vld [vmem:[%s1450_s2] sm:$0x1]  ;;  %s1453_s13 = smov (!%p161_p3, %s704_s13), 1 }
   0xc   : > { %s894_s16 = smul.u32 832, %s1453_s13 }
   0xd   : > { %s895_s17 = smul.u32 576, %s1453_s13 }
   0xe   : > { %s964_s20 = scalar_lea.vmem %s1448_s0, %s894_s16 }
   0xf   : > { %s969_s23 = scalar_lea.vmem %s1451_s3, %s895_s17 }
  0x10 LB: >> { %v727_v1 = vld [vmem:[%s1449_s1 + $0xf8] sm:$0xff]  ;;  %v726_v4 = vld [vmem:[%s1449_s1 + $0xf0] sm:$0xff]  ;;  %v725_v8 = vld [vmem:[%s1449_s1 + $0xe8] sm:$0xff]  ;;  %s711_s25 = sshll.u32 %s926_s24, 5  ;;  %s926_s24 = sphi %s971_s24, %s177_s24  }
  0x11   : >> { %v198_v2 = vld [vmem:[%s1449_s1 + $0x78] sm:$0xff]  ;;  %219 = vmatpush.msra.mxu0 %v727_v1  ;;  %v197_v5 = vld [vmem:[%s1449_s1 + $0x70] sm:$0xff]  ;;  %v196_v9 = vld [vmem:[%s1449_s1 + $0x68] sm:$0xff]  ;;  %s1203_s11 = scalar_lea.vmem %s964_s20, %s711_s25 }
  0x12   : >> { %v743_v3 = vld [vmem:[%s1449_s1 + $0x178] sm:$0xff]  ;;  %245 = vmatpush.msra.mxu1 %v198_v2  ;;  %v742_v6 = vld [vmem:[%s1449_s1 + $0x170] sm:$0xff]  ;;  %v741_v10 = vld [vmem:[%s1449_s1 + $0x168] sm:$0xff] }
  0x13   : >> { %291 = vmatpush.msra.mxu2 %v743_v3  ;;  %v763_v7 = vld [vmem:[%s1449_s1 + $0x1f8] sm:$0xff]  ;;  %220 = vmatpush.msra.mxu0 %v726_v4  ;;  %v762_v11 = vld [vmem:[%s1449_s1 + $0x1f0] sm:$0xff]  ;;  %v724_v12 = vld [vmem:[%s1449_s1 + $0xe0] sm:$0xff] }
  0x14   : >> { %246 = vmatpush.msra.mxu1 %v197_v5  ;;  %343 = vmatpush.msra.mxu3 %v763_v7  ;;  %v195_v13 = vld [vmem:[%s1449_s1 + $0x60] sm:$0xff]  ;;  %v761_v15 = vld [vmem:[%s1449_s1 + $0x1e8] sm:$0xff]  ;;  %v723_v16 = vld [vmem:[%s1449_s1 + $0xd8] sm:$0xff] }
  0x15   : >> { %292 = vmatpush.msra.mxu2 %v742_v6  ;;  %221 = vmatpush.msra.mxu0 %v725_v8  ;;  %v740_v14 = vld [vmem:[%s1449_s1 + $0x160] sm:$0xff]  ;;  %v194_v17 = vld [vmem:[%s1449_s1 + $0x58] sm:$0xff]  ;;  %v722_v20 = vld [vmem:[%s1449_s1 + $0xd0] sm:$0xff] }
  0x16   : >> { %247 = vmatpush.msra.mxu1 %v196_v9  ;;  %344 = vmatpush.msra.mxu3 %v762_v11  ;;  %v739_v18 = vld [vmem:[%s1449_s1 + $0x158] sm:$0xff]  ;;  %v760_v19 = vld [vmem:[%s1449_s1 + $0x1e0] sm:$0xff]  ;;  %v193_v21 = vld [vmem:[%s1449_s1 + $0x50] sm:$0xff] }
  0x17   : >> { %293 = vmatpush.msra.mxu2 %v741_v10  ;;  %222 = vmatpush.msra.mxu0 %v724_v12  ;;  %v738_v22 = vld [vmem:[%s1449_s1 + $0x150] sm:$0xff]  ;;  %v759_v23 = vld [vmem:[%s1449_s1 + $0x1d8] sm:$0xff]  ;;  %v721_v24 = vld [vmem:[%s1449_s1 + $0xc8] sm:$0xff] }
  0x18   : >> { %248 = vmatpush.msra.mxu1 %v195_v13  ;;  %345 = vmatpush.msra.mxu3 %v761_v15  ;;  %v192_v25 = vld [vmem:[%s1449_s1 + $0x48] sm:$0xff]  ;;  %v758_v27 = vld [vmem:[%s1449_s1 + $0x1d0] sm:$0xff]  ;;  %v720_v28 = vld [vmem:[%s1449_s1 + $0xc0] sm:$0xff] }
  0x19   : >> { %294 = vmatpush.msra.mxu2 %v740_v14  ;;  %223 = vmatpush.msra.mxu0 %v723_v16  ;;  %v737_v26 = vld [vmem:[%s1449_s1 + $0x148] sm:$0xff]  ;;  %v191_v29 = vld [vmem:[%s1449_s1 + $0x40] sm:$0xff]  ;;  %v719_v32 = vld [vmem:[%s1449_s1 + $0xb8] sm:$0xff] }
  0x1a   : >> { %249 = vmatpush.msra.mxu1 %v194_v17  ;;  %346 = vmatpush.msra.mxu3 %v760_v19  ;;  %v736_v30 = vld [vmem:[%s1449_s1 + $0x140] sm:$0xff]  ;;  %v757_v31 = vld [vmem:[%s1449_s1 + $0x1c8] sm:$0xff]  ;;  %v190_v33 = vld [vmem:[%s1449_s1 + $0x38] sm:$0xff] }
  0x1b   : >> { %295 = vmatpush.msra.mxu2 %v739_v18  ;;  %224 = vmatpush.msra.mxu0 %v722_v20  ;;  %v735_v34 = vld [vmem:[%s1449_s1 + $0x138] sm:$0xff]  ;;  %v756_v35 = vld [vmem:[%s1449_s1 + $0x1c0] sm:$0xff]  ;;  %v718_v36 = vld [vmem:[%s1449_s1 + $0xb0] sm:$0xff] }
  0x1c   : >> { %250 = vmatpush.msra.mxu1 %v193_v21  ;;  %347 = vmatpush.msra.mxu3 %v759_v23  ;;  %v189_v37 = vld [vmem:[%s1449_s1 + $0x30] sm:$0xff]  ;;  %v755_v39 = vld [vmem:[%s1449_s1 + $0x1b8] sm:$0xff]  ;;  %v717_v40 = vld [vmem:[%s1449_s1 + $0xa8] sm:$0xff] }
  0x1d   : >> { %296 = vmatpush.msra.mxu2 %v738_v22  ;;  %225 = vmatpush.msra.mxu0 %v721_v24  ;;  %v734_v38 = vld [vmem:[%s1449_s1 + $0x130] sm:$0xff]  ;;  %v188_v41 = vld [vmem:[%s1449_s1 + $0x28] sm:$0xff]  ;;  %v716_v44 = vld [vmem:[%s1449_s1 + $0xa0] sm:$0xff] }
  0x1e   : >> { %251 = vmatpush.msra.mxu1 %v192_v25  ;;  %348 = vmatpush.msra.mxu3 %v758_v27  ;;  %v733_v42 = vld [vmem:[%s1449_s1 + $0x128] sm:$0xff]  ;;  %v754_v43 = vld [vmem:[%s1449_s1 + $0x1b0] sm:$0xff]  ;;  %v187_v45 = vld [vmem:[%s1449_s1 + $0x20] sm:$0xff] }
  0x1f   : >> { %297 = vmatpush.msra.mxu2 %v737_v26  ;;  %226 = vmatpush.msra.mxu0 %v720_v28  ;;  %v732_v46 = vld [vmem:[%s1449_s1 + $0x120] sm:$0xff]  ;;  %v753_v47 = vld [vmem:[%s1449_s1 + $0x1a8] sm:$0xff]  ;;  %v715_v48 = vld [vmem:[%s1449_s1 + $0x98] sm:$0xff] }
  0x20   : >> { %252 = vmatpush.msra.mxu1 %v191_v29  ;;  %349 = vmatpush.msra.mxu3 %v757_v31  ;;  %v186_v49 = vld [vmem:[%s1449_s1 + $0x18] sm:$0xff]  ;;  %v752_v51 = vld [vmem:[%s1449_s1 + $0x1a0] sm:$0xff]  ;;  %v714_v52 = vld [vmem:[%s1449_s1 + $0x90] sm:$0xff] }
  0x21   : >> { %298 = vmatpush.msra.mxu2 %v736_v30  ;;  %227 = vmatpush.msra.mxu0 %v719_v32  ;;  %v731_v50 = vld [vmem:[%s1449_s1 + $0x118] sm:$0xff]  ;;  %v185_v53 = vld [vmem:[%s1449_s1 + $0x10] sm:$0xff]  ;;  %v713_v56 = vld [vmem:[%s1449_s1 + $0x88] sm:$0xff] }
  0x22   : >> { %253 = vmatpush.msra.mxu1 %v190_v33  ;;  %350 = vmatpush.msra.mxu3 %v756_v35  ;;  %v730_v54 = vld [vmem:[%s1449_s1 + $0x110] sm:$0xff]  ;;  %v751_v55 = vld [vmem:[%s1449_s1 + $0x198] sm:$0xff]  ;;  %v184_v57 = vld [vmem:[%s1449_s1 + $0x8] sm:$0xff] }
  0x23   : >> { %299 = vmatpush.msra.mxu2 %v735_v34  ;;  %228 = vmatpush.msra.mxu0 %v718_v36  ;;  %v729_v58 = vld [vmem:[%s1449_s1 + $0x108] sm:$0xff]  ;;  %v750_v59 = vld [vmem:[%s1449_s1 + $0x190] sm:$0xff]  ;;  %v712_v60 = vld [vmem:[%s1449_s1 + $0x80] sm:$0xff] }
  0x24   : >> { %254 = vmatpush.msra.mxu1 %v189_v37  ;;  %351 = vmatpush.msra.mxu3 %v755_v39  ;;  %v183_v61 = vld [vmem:[%s1449_s1] sm:$0xff]  ;;  %v749_v63 = vld [vmem:[%s1449_s1 + $0x188] sm:$0xff]  ;;  %v782_v1 = vld [vmem:[%s1449_s1 + $0x278] sm:$0xff] }
  0x25   : >> { %300 = vmatpush.msra.mxu2 %v734_v38  ;;  %229 = vmatpush.msra.mxu0 %v717_v40  ;;  %v728_v62 = vld [vmem:[%s1449_s1 + $0x100] sm:$0xff]  ;;  %v801_v2 = vld [vmem:[%s1449_s1 + $0x2f8] sm:$0xff]  ;;  %v781_v5 = vld [vmem:[%s1449_s1 + $0x270] sm:$0xff] }
  0x26   : >> { %255 = vmatpush.msra.mxu1 %v188_v41  ;;  %352 = vmatpush.msra.mxu3 %v754_v43  ;;  %v821_v3 = vld [vmem:[%s1449_s1 + $0x378] sm:$0xff]  ;;  %v748_v4 = vld [vmem:[%s1449_s1 + $0x180] sm:$0xff]  ;;  %v800_v6 = vld [vmem:[%s1449_s1 + $0x2f0] sm:$0xff] }
  0x27   : >> { %301 = vmatpush.msra.mxu2 %v733_v42  ;;  %230 = vmatpush.msra.mxu0 %v716_v44  ;;  %v820_v7 = vld [vmem:[%s1449_s1 + $0x370] sm:$0xff]  ;;  %v840_v8 = vld [vmem:[%s1449_s1 + $0x3f8] sm:$0xff]  ;;  %v780_v9 = vld [vmem:[%s1449_s1 + $0x268] sm:$0xff] }
  0x28   : >> { %256 = vmatpush.msra.mxu1 %v187_v45  ;;  %353 = vmatpush.msra.mxu3 %v753_v47  ;;  %v799_v10 = vld [vmem:[%s1449_s1 + $0x2e8] sm:$0xff]  ;;  %v839_v12 = vld [vmem:[%s1449_s1 + $0x3f0] sm:$0xff]  ;;  %v779_v13 = vld [vmem:[%s1449_s1 + $0x260] sm:$0xff] }
  0x29   : >> { %302 = vmatpush.msra.mxu2 %v732_v46  ;;  %231 = vmatpush.msra.mxu0 %v715_v48  ;;  %v819_v11 = vld [vmem:[%s1449_s1 + $0x368] sm:$0xff]  ;;  %v798_v14 = vld [vmem:[%s1449_s1 + $0x2e0] sm:$0xff]  ;;  %v778_v19 = vld [vmem:[%s1449_s1 + $0x258] sm:$0xff] }
  0x2a   : >> { %257 = vmatpush.msra.mxu1 %v186_v49  ;;  %354 = vmatpush.msra.mxu3 %v752_v51  ;;  %v818_v15 = vld [vmem:[%s1449_s1 + $0x360] sm:$0xff]  ;;  %v838_v16 = vld [vmem:[%s1449_s1 + $0x3e8] sm:$0xff]  ;;  %v797_v20 = vld [vmem:[%s1449_s1 + $0x2d8] sm:$0xff] }
  0x2b   : >> { %303 = vmatpush.msra.mxu2 %v731_v50  ;;  %232 = vmatpush.msra.mxu0 %v714_v52  ;;  %v199_v17 = vld [vmem:[%s1203_s11 + $0x1] sm:$0xff]  ;;  %v817_v21 = vld [vmem:[%s1449_s1 + $0x358] sm:$0xff]  ;;  %v777_v25 = vld [vmem:[%s1449_s1 + $0x250] sm:$0xff] }
  0x2c   : >> { %258 = vmatpush.msra.mxu1 %v185_v53  ;;  %355 = vmatpush.msra.mxu3 %v751_v55  ;;  %v271_v18 = vld [vmem:[%s1203_s11 + $0x2] sm:$0xff]  ;;  %v796_v26 = vld [vmem:[%s1449_s1 + $0x2d0] sm:$0xff]  ;;  %v836_v28 = vld [vmem:[%s1449_s1 + $0x3d8] sm:$0xff] }
  0x2d   : >> { %304 = vmatpush.msra.mxu2 %v730_v54  ;;  %233 = vmatpush.msra.mxu0 %v713_v56  ;;  %v837_v22 = vld [vmem:[%s1449_s1 + $0x3e0] sm:$0xff]  ;;  %v816_v27 = vld [vmem:[%s1449_s1 + $0x350] sm:$0xff]  ;;  %v776_v29 = vld [vmem:[%s1449_s1 + $0x248] sm:$0xff] }
  0x2e   : >> { %259 = vmatpush.msra.mxu1 %v184_v57  ;;  %356 = vmatpush.msra.mxu3 %v750_v59  ;;  %v180_v23 = vld [vmem:[%s1203_s11] sm:$0xff]  ;;  %v795_v30 = vld [vmem:[%s1449_s1 + $0x2c8] sm:$0xff]  ;;  %v835_v32 = vld [vmem:[%s1449_s1 + $0x3d0] sm:$0xff] }
  0x2f   : >> { %305 = vmatpush.msra.mxu2 %v729_v58  ;;  %234 = vmatpush.msra.mxu0 %v712_v60  ;;  %v745_v24 = vld [vmem:[%s1203_s11 + $0x20] sm:$0xff]  ;;  %v815_v31 = vld [vmem:[%s1449_s1 + $0x348] sm:$0xff]  ;;  %v774_v39 = vld [vmem:[%s1449_s1 + $0x238] sm:$0xff] }
  0x30   : >> { %260 = vmatpush.msra.mxu1 %v183_v61  ;;  %357 = vmatpush.msra.mxu3 %v749_v63  ;;  %v775_v33 = vld [vmem:[%s1449_s1 + $0x240] sm:$0xff]  ;;  %v834_v36 = vld [vmem:[%s1449_s1 + $0x3c8] sm:$0xff]  ;;  %v793_v40 = vld [vmem:[%s1449_s1 + $0x2b8] sm:$0xff] }
  0x31   : >> { %306 = vmatpush.msra.mxu2 %v728_v62  ;;  %392 = vmatpush.msrb.mxu0 %v782_v1  ;;  %v794_v34 = vld [vmem:[%s1449_s1 + $0x2c0] sm:$0xff]  ;;  %v200_v37 = vld [vmem:[%s1203_s11 + $0x9] sm:$0xff]  ;;  %v813_v41 = vld [vmem:[%s1449_s1 + $0x338] sm:$0xff] }
  0x32   : >> { %441 = vmatpush.msrb.mxu1 %v801_v2  ;;  %358 = vmatpush.msra.mxu3 %v748_v4  ;;  %v814_v35 = vld [vmem:[%s1449_s1 + $0x340] sm:$0xff]  ;;  %v272_v38 = vld [vmem:[%s1203_s11 + $0xa] sm:$0xff]  ;;  %v832_v48 = vld [vmem:[%s1449_s1 + $0x3b8] sm:$0xff] }
  0x33   : >> { %493 = vmatpush.msrb.mxu2 %v821_v3  ;;  %393 = vmatpush.msrb.mxu0 %v781_v5  ;;  %v833_v42 = vld [vmem:[%s1449_s1 + $0x3c0] sm:$0xff]  ;;  %v181_v43 = vld [vmem:[%s1203_s11 + $0x8] sm:$0xff]  ;;  %v773_v45 = vld [vmem:[%s1449_s1 + $0x230] sm:$0xff] }
  0x34   : >> { %442 = vmatpush.msrb.mxu1 %v800_v6  ;;  %542 = vmatpush.msrb.mxu3 %v840_v8  ;;  %v746_v44 = vld [vmem:[%s1203_s11 + $0x28] sm:$0xff]  ;;  %v792_v46 = vld [vmem:[%s1449_s1 + $0x2b0] sm:$0xff]  ;;  %v771_v53 = vld [vmem:[%s1449_s1 + $0x220] sm:$0xff] }
  0x35   : >> { %494 = vmatpush.msrb.mxu2 %v820_v7  ;;  %394 = vmatpush.msrb.mxu0 %v780_v9  ;;  %v812_v47 = vld [vmem:[%s1449_s1 + $0x330] sm:$0xff]  ;;  %v772_v49 = vld [vmem:[%s1449_s1 + $0x228] sm:$0xff]  ;;  %v790_v54 = vld [vmem:[%s1449_s1 + $0x2a0] sm:$0xff] }
  0x36   : >> { %443 = vmatpush.msrb.mxu1 %v799_v10  ;;  %543 = vmatpush.msrb.mxu3 %v839_v12  ;;  %v791_v50 = vld [vmem:[%s1449_s1 + $0x2a8] sm:$0xff]  ;;  %v831_v52 = vld [vmem:[%s1449_s1 + $0x3b0] sm:$0xff]  ;;  %v810_v55 = vld [vmem:[%s1449_s1 + $0x320] sm:$0xff] }
  0x37   : >> { %495 = vmatpush.msrb.mxu2 %v819_v11  ;;  %395 = vmatpush.msrb.mxu0 %v779_v13  ;;  %v811_v51 = vld [vmem:[%s1449_s1 + $0x328] sm:$0xff]  ;;  %v201_v57 = vld [vmem:[%s1203_s11 + $0x11] sm:$0xff]  ;;  %v829_v62 = vld [vmem:[%s1449_s1 + $0x3a0] sm:$0xff] }
  0x38   : >> { %444 = vmatpush.msrb.mxu1 %v798_v14  ;;  %544 = vmatpush.msrb.mxu3 %v838_v16  ;;  %v830_v56 = vld [vmem:[%s1449_s1 + $0x3a8] sm:$0xff]  ;;  %v273_v58 = vld [vmem:[%s1203_s11 + $0x12] sm:$0xff]  ;;  %v767_v10 = vld [vmem:[%s1449_s1 + $0x200] sm:$0xff] }
  0x39   : >> { %496 = vmatpush.msrb.mxu2 %v818_v15  ;;  %235 = vmatmul.f32.vlgmr.msra.gmra.mxu0 %v199_v17  ;;  %v770_v59 = vld [vmem:[%s1449_s1 + $0x218] sm:$0xff]  ;;  %v182_v63 = vld [vmem:[%s1203_s11 + $0x10] sm:$0xff]  ;;  %v768_v6 = vld [vmem:[%s1449_s1 + $0x208] sm:$0xff] }
  0x3a   : >> { %307 = vmatmul.f32.vlgmr.msra.gmra.mxu2 %v271_v18  ;;  %396 = vmatpush.msrb.mxu0 %v778_v19  ;;  %v789_v60 = vld [vmem:[%s1449_s1 + $0x298] sm:$0xff]  ;;  %v747_v1 = vld [vmem:[%s1203_s11 + $0x30] sm:$0xff]  ;;  %v787_v7 = vld [vmem:[%s1449_s1 + $0x288] sm:$0xff] }
  0x3b   : >> { %445 = vmatpush.msrb.mxu1 %v797_v20  ;;  %497 = vmatpush.msrb.mxu2 %v817_v21  ;;  %v809_v61 = vld [vmem:[%s1449_s1 + $0x318] sm:$0xff]  ;;  %v769_v2 = vld [vmem:[%s1449_s1 + $0x210] sm:$0xff]  ;;  %v807_v8 = vld [vmem:[%s1449_s1 + $0x308] sm:$0xff] }
  0x3c   : >> { %545 = vmatpush.msrb.mxu3 %v837_v22  ;;  %261 = vmatmul.f32.vlgmr.msra.gmra.mxu1 %v180_v23  ;;  %v788_v3 = vld [vmem:[%s1449_s1 + $0x290] sm:$0xff]  ;;  %v828_v5 = vld [vmem:[%s1449_s1 + $0x398] sm:$0xff]  ;;  %v786_v11 = vld [vmem:[%s1449_s1 + $0x280] sm:$0xff] }
  0x3d   : >> { %359 = vmatmul.f32.vlgmr.msra.gmra.mxu3 %v745_v24  ;;  %397 = vmatpush.msrb.mxu0 %v777_v25  ;;  %v808_v4 = vld [vmem:[%s1449_s1 + $0x310] sm:$0xff]  ;;  %v806_v12 = vld [vmem:[%s1449_s1 + $0x300] sm:$0xff]  ;;  %v826_v13 = vld [vmem:[%s1449_s1 + $0x388] sm:$0xff] }
  0x3e   : >> { %446 = vmatpush.msrb.mxu1 %v796_v26  ;;  %498 = vmatpush.msrb.mxu2 %v816_v27  ;;  %v827_v9 = vld [vmem:[%s1449_s1 + $0x390] sm:$0xff]  ;;  %v764_v14 = vld [vmem:[%s1203_s11 + $0x21] sm:$0xff]  ;;  %v859_v16 = vld [vmem:[%s1449_s1 + $0x478] sm:$0xff] }
  0x3f   : >> { %546 = vmatpush.msrb.mxu3 %v836_v28  ;;  %398 = vmatpush.msrb.mxu0 %v776_v29  ;;  %v803_v15 = vld [vmem:[%s1203_s11 + $0x40] sm:$0xff]  ;;  %v858_v20 = vld [vmem:[%s1449_s1 + $0x470] sm:$0xff]  ;;  %v857_v21 = vld [vmem:[%s1449_s1 + $0x468] sm:$0xff] }
  0x40   : >> { %447 = vmatpush.msrb.mxu1 %v795_v30  ;;  %499 = vmatpush.msrb.mxu2 %v815_v31  ;;  %v825_v17 = vld [vmem:[%s1449_s1 + $0x380] sm:$0xff]  ;;  %v765_v23 = vld [vmem:[%s1203_s11 + $0x29] sm:$0xff]  ;;  %v855_v25 = vld [vmem:[%s1449_s1 + $0x458] sm:$0xff] }
  0x41   : >> { %547 = vmatpush.msrb.mxu3 %v835_v32  ;;  %399 = vmatpush.msrb.mxu0 %v775_v33  ;;  %v783_v18 = vld [vmem:[%s1203_s11 + $0x22] sm:$0xff]  ;;  %v784_v26 = vld [vmem:[%s1203_s11 + $0x2a] sm:$0xff]  ;;  %v851_v33 = vld [vmem:[%s1449_s1 + $0x438] sm:$0xff] }
  0x42   : >> { %448 = vmatpush.msrb.mxu1 %v794_v34  ;;  %500 = vmatpush.msrb.mxu2 %v814_v35  ;;  %v822_v19 = vld [vmem:[%s1203_s11 + $0x41] sm:$0xff]  ;;  %v823_v27 = vld [vmem:[%s1203_s11 + $0x49] sm:$0xff]  ;;  %v766_v31 = vld [vmem:[%s1203_s11 + $0x31] sm:$0xff] }
  0x43   : >> { %548 = vmatpush.msrb.mxu3 %v834_v36  ;;  %238 = vmatmul.f32.gmra.mxu0 %v200_v37  ;;  %v856_v22 = vld [vmem:[%s1449_s1 + $0x460] sm:$0xff]  ;;  %v804_v24 = vld [vmem:[%s1203_s11 + $0x48] sm:$0xff]  ;;  %v854_v28 = vld [vmem:[%s1449_s1 + $0x450] sm:$0xff] }
  0x44   : >> { %310 = vmatmul.f32.gmra.mxu2 %v272_v38  ;;  %400 = vmatpush.msrb.mxu0 %v774_v39  ;;  %v853_v29 = vld [vmem:[%s1449_s1 + $0x448] sm:$0xff]  ;;  %v852_v30 = vld [vmem:[%s1449_s1 + $0x440] sm:$0xff]  ;;  %v805_v32 = vld [vmem:[%s1203_s11 + $0x50] sm:$0xff] }
  0x45   : >> { %449 = vmatpush.msrb.mxu1 %v793_v40  ;;  %501 = vmatpush.msrb.mxu2 %v813_v41  ;;  %v785_v34 = vld [vmem:[%s1203_s11 + $0x32] sm:$0xff]  ;;  %v849_v37 = vld [vmem:[%s1449_s1 + $0x428] sm:$0xff]  ;;  %v848_v38 = vld [vmem:[%s1449_s1 + $0x420] sm:$0xff] }
  0x46   : >> { %549 = vmatpush.msrb.mxu3 %v833_v42  ;;  %264 = vmatmul.f32.gmra.mxu1 %v181_v43  ;;  %v824_v35 = vld [vmem:[%s1203_s11 + $0x51] sm:$0xff]  ;;  %v845_v41 = vld [vmem:[%s1449_s1 + $0x408] sm:$0xff]  ;;  %v844_v42 = vld [vmem:[%s1449_s1 + $0x400] sm:$0xff] }
  0x47   : >> { %362 = vmatmul.f32.gmra.mxu3 %v746_v44  ;;  %401 = vmatpush.msrb.mxu0 %v773_v45  ;;  %v850_v36 = vld [vmem:[%s1449_s1 + $0x430] sm:$0xff]  ;;  %v847_v39 = vld [vmem:[%s1449_s1 + $0x418] sm:$0xff]  ;;  %v841_v43 = vld [vmem:[%s1203_s11 + $0x42] sm:$0xff] }
  0x48   : >> { %450 = vmatpush.msrb.mxu1 %v792_v46  ;;  %502 = vmatpush.msrb.mxu2 %v812_v47  ;;  %v846_v40 = vld [vmem:[%s1449_s1 + $0x410] sm:$0xff] }
  0x49   : >> { %550 = vmatpush.msrb.mxu3 %v832_v48  ;;  %402 = vmatpush.msrb.mxu0 %v772_v49  ;;  %v842_v44 = vld [vmem:[%s1203_s11 + $0x4a] sm:$0xff]  ;;  %v843_v45 = vld [vmem:[%s1203_s11 + $0x52] sm:$0xff]  ;;  %s629_s11 = smul.u32 24, %s926_s24  ;;  %s177_s24 = sadd.s32 1, %s926_s24  }
  0x4a   : >> { %451 = vmatpush.msrb.mxu1 %v791_v50  ;;  %503 = vmatpush.msrb.mxu2 %v811_v51  ;;  %p174_p4 = scmp.ge.s32.totalorder %s177_s24, 24  }
  0x4b   : >> { %551 = vmatpush.msrb.mxu3 %v831_v52  ;;  %403 = vmatpush.msrb.mxu0 %v771_v53  ;;  %s630_s19 = scalar_lea.vmem %s969_s23, %s629_s11 }
  0x4c   : >> { %452 = vmatpush.msrb.mxu1 %v790_v54  ;;  %504 = vmatpush.msrb.mxu2 %v810_v55 }
  0x4d   : >> { %552 = vmatpush.msrb.mxu3 %v830_v56  ;;  %241 = vmatmul.f32.gmra.mxu0 %v201_v57 }
  0x4e   : >> { %313 = vmatmul.f32.gmra.mxu2 %v273_v58  ;;  %404 = vmatpush.msrb.mxu0 %v770_v59 }
  0x4f   : >> { %453 = vmatpush.msrb.mxu1 %v789_v60  ;;  %505 = vmatpush.msrb.mxu2 %v809_v61 }
  0x50   : >> { %553 = vmatpush.msrb.mxu3 %v829_v62  ;;  %267 = vmatmul.f32.gmra.mxu1 %v182_v63 }
  0x51   : >> { %365 = vmatmul.f32.gmra.mxu3 %v747_v1  ;;  %405 = vmatpush.msrb.mxu0 %v769_v2 }
  0x52   : >> { %454 = vmatpush.msrb.mxu1 %v788_v3  ;;  %506 = vmatpush.msrb.mxu2 %v808_v4 }
  0x53   : >> { %554 = vmatpush.msrb.mxu3 %v828_v5  ;;  %406 = vmatpush.msrb.mxu0 %v768_v6 }
  0x54   : >> { %455 = vmatpush.msrb.mxu1 %v787_v7  ;;  %507 = vmatpush.msrb.mxu2 %v807_v8 }
  0x55   : >> { %555 = vmatpush.msrb.mxu3 %v827_v9  ;;  %407 = vmatpush.msrb.mxu0 %v767_v10 }
  0x56   : >> { %456 = vmatpush.msrb.mxu1 %v786_v11  ;;  %508 = vmatpush.msrb.mxu2 %v806_v12 }
  0x57   : >> { %556 = vmatpush.msrb.mxu3 %v826_v13  ;;  %408 = vmatmul.f32.vlgmr.msrb.gmra.mxu0 %v764_v14 }
  0x58   : >> { %509 = vmatmul.f32.vlgmr.msrb.gmra.mxu2 %v803_v15  ;;  %591 = vmatpush.msra.mxu0 %v859_v16 }
  0x59   : >> { %862 = vmatpush.msra.mxu1 %v859_v16  ;;  %863 = vmatpush.msra.mxu2 %v859_v16 }
  0x5a   : >> { %557 = vmatpush.msrb.mxu3 %v825_v17  ;;  %457 = vmatmul.f32.vlgmr.msrb.gmra.mxu1 %v783_v18 }
  0x5b   : >> { %558 = vmatmul.f32.vlgmr.msrb.gmra.mxu3 %v822_v19  ;;  %592 = vmatpush.msra.mxu0 %v858_v20 }
  0x5c   : >> { %864 = vmatpush.msra.mxu1 %v858_v20  ;;  %865 = vmatpush.msra.mxu2 %v858_v20 }
  0x5d   : >> { %593 = vmatpush.msra.mxu0 %v857_v21 }
  0x5e   : >> { %866 = vmatpush.msra.mxu1 %v857_v21  ;;  %867 = vmatpush.msra.mxu2 %v857_v21 }
  0x5f   : >> { %594 = vmatpush.msra.mxu0 %v856_v22 }
  0x60   : >> { %868 = vmatpush.msra.mxu1 %v856_v22  ;;  %869 = vmatpush.msra.mxu2 %v856_v22 }
  0x61   : >> { %411 = vmatmul.f32.gmra.mxu0 %v765_v23  ;;  %512 = vmatmul.f32.gmra.mxu2 %v804_v24  ;;  %v621_v23 = vperm.slane %v959_v0, 0 }
  0x62   : >> { %595 = vmatpush.msra.mxu0 %v855_v25  ;;  %870 = vmatpush.msra.mxu1 %v855_v25 }
  0x63   : >> { %871 = vmatpush.msra.mxu2 %v855_v25  ;;  %460 = vmatmul.f32.gmra.mxu1 %v784_v26 }
  0x64   : >> { %561 = vmatmul.f32.gmra.mxu3 %v823_v27  ;;  %596 = vmatpush.msra.mxu0 %v854_v28 }
  0x65   : >> { %872 = vmatpush.msra.mxu1 %v854_v28  ;;  %873 = vmatpush.msra.mxu2 %v854_v28 }
  0x66   : >> { %597 = vmatpush.msra.mxu0 %v853_v29 }
  0x67   : >> { %874 = vmatpush.msra.mxu1 %v853_v29  ;;  %875 = vmatpush.msra.mxu2 %v853_v29 }
  0x68   : >> { %598 = vmatpush.msra.mxu0 %v852_v30 }
  0x69   : >> { %876 = vmatpush.msra.mxu1 %v852_v30  ;;  %877 = vmatpush.msra.mxu2 %v852_v30 }
  0x6a   : >> { %414 = vmatmul.f32.gmra.mxu0 %v766_v31  ;;  %515 = vmatmul.f32.gmra.mxu2 %v805_v32 }
  0x6b   : >> { %599 = vmatpush.msra.mxu0 %v851_v33  ;;  %878 = vmatpush.msra.mxu1 %v851_v33 }
  0x6c   : >> { %879 = vmatpush.msra.mxu2 %v851_v33  ;;  %463 = vmatmul.f32.gmra.mxu1 %v785_v34 }
  0x6d   : >> { %564 = vmatmul.f32.gmra.mxu3 %v824_v35  ;;  %600 = vmatpush.msra.mxu0 %v850_v36 }
  0x6e   : >> { %880 = vmatpush.msra.mxu1 %v850_v36  ;;  %881 = vmatpush.msra.mxu2 %v850_v36 }
  0x6f   : >> { %601 = vmatpush.msra.mxu0 %v849_v37 }
  0x70   : >> { %882 = vmatpush.msra.mxu1 %v849_v37  ;;  %883 = vmatpush.msra.mxu2 %v849_v37 }
  0x71   : >> { %602 = vmatpush.msra.mxu0 %v848_v38 }
  0x72   : >> { %884 = vmatpush.msra.mxu1 %v848_v38  ;;  %885 = vmatpush.msra.mxu2 %v848_v38 }
  0x73   : >> { %603 = vmatpush.msra.mxu0 %v847_v39 }
  0x74   : >> { %886 = vmatpush.msra.mxu1 %v847_v39  ;;  %887 = vmatpush.msra.mxu2 %v847_v39 }
  0x75   : >> { %604 = vmatpush.msra.mxu0 %v846_v40 }
  0x76   : >> { %888 = vmatpush.msra.mxu1 %v846_v40  ;;  %889 = vmatpush.msra.mxu2 %v846_v40 }
  0x77   : >> { %605 = vmatpush.msra.mxu0 %v845_v41 }
  0x78   : >> { %890 = vmatpush.msra.mxu1 %v845_v41  ;;  %891 = vmatpush.msra.mxu2 %v845_v41 }
  0x79   : >> { %606 = vmatpush.msra.mxu0 %v844_v42 }
  0x7a   : >> { %892 = vmatpush.msra.mxu1 %v844_v42  ;;  %893 = vmatpush.msra.mxu2 %v844_v42 }
  0x7b   : >> { %607 = vmatmul.f32.vlgmr.msra.gmra.mxu0 %v841_v43  ;;  %610 = vmatmul.f32.vlgmr.msra.gmra.mxu1 %v842_v44 }
  0x7c   : >> { %613 = vmatmul.f32.vlgmr.msra.gmra.mxu2 %v843_v45 }
  0xb6   : >> { %v236_v46 = vpop.f32.mrf.mxu0 }
  0xb9   : >> { %v262_v47 = vpop.f32.mrf.mxu1 }
  0xba   : >> { %v263_v60 = vadd.f32 %v262_v47, %v236_v46 }
  0xbd   : >> { %v308_v48 = vpop.f32.mrf.mxu2 }
  0xbe   : >> { %v317_v1 = vadd.f32 %v308_v48, %v263_v60 }
  0xc0   : >> { %v239_v49 = vpop.f32.mrf.mxu0  ;;  %v360_v50 = vpop.f32.mrf.mxu3 }
  0xc1   : >> { %v369_v6 = vadd.f32 %v360_v50, %v317_v1 }
  0xc3   : >> { %v265_v51 = vpop.f32.mrf.mxu1 }
  0xc4   : >> { %v266_v62 = vadd.f32 %v265_v51, %v239_v49 }
  0xc7   : >> { %v311_v52 = vpop.f32.mrf.mxu2 }
  0xc8   : >> { %v318_v4 = vadd.f32 %v311_v52, %v266_v62 }
  0xca   : >> { %v242_v53 = vpop.f32.mrf.mxu0  ;;  %v363_v54 = vpop.f32.mrf.mxu3 }
  0xcb   : >> { %v370_v7 = vadd.f32 %v363_v54, %v318_v4 }
  0xcd   : >> { %v268_v55 = vpop.f32.mrf.mxu1 }
  0xce   : >> { %v269_v5 = vadd.f32 %v268_v55, %v242_v53 }
  0xd1   : >> { %v314_v56 = vpop.f32.mrf.mxu2 }
  0xd2   : >> { %v319_v10 = vadd.f32 %v314_v56, %v269_v5 }
  0xd4   : >> { %v409_v57 = vpop.f32.mrf.mxu0  ;;  %v366_v58 = vpop.f32.mrf.mxu3 }
  0xd5   : >> { %v418_v8 = vadd.f32 %v409_v57, %v369_v6  ;;  %v371_v16 = vadd.f32 %v366_v58, %v319_v10 }
  0xd7   : >> { %v458_v59 = vpop.f32.mrf.mxu1 }
  0xd8   : >> { %v467_v13 = vadd.f32 %v458_v59, %v418_v8 }
  0xdb   : >> { %v510_v61 = vpop.f32.mrf.mxu2 }
  0xdc   : >> { %v519_v18 = vadd.f32 %v510_v61, %v467_v13 }
  0xde   : >> { %v412_v63 = vpop.f32.mrf.mxu0  ;;  %v559_v2 = vpop.f32.mrf.mxu3 }
  0xdf   : >> { %v419_v11 = vadd.f32 %v412_v63, %v370_v7  ;;  %v568_v21 = vadd.f32 %v559_v2, %v519_v18 }
  0xe0   : >> { %v461_v3 = vpop.f32.mrf.mxu1 }
  0xe1   : >> { %v468_v17 = vadd.f32 %v461_v3, %v419_v11 }
  0xe4   : >> { %v513_v9 = vpop.f32.mrf.mxu2 }
  0xe5   : >> { %v520_v19 = vadd.f32 %v513_v9, %v468_v17 }
  0xe7   : >> { %v415_v12 = vpop.f32.mrf.mxu0  ;;  %v562_v14 = vpop.f32.mrf.mxu3 }
  0xe8   : >> { %v420_v20 = vadd.f32 %v415_v12, %v371_v16  ;;  %v569_v24 = vadd.f32 %v562_v14, %v520_v19 }
  0xe9   : >> { %v464_v15 = vpop.f32.mrf.mxu1 }
  0xea   : >> { %v469_v25 = vadd.f32 %v464_v15, %v420_v20 }
  0xed   : >> { %v516_v22 = vpop.f32.mrf.mxu2 }
  0xee   : >> { %v521_v29 = vadd.f32 %v516_v22, %v469_v25 }
  0xf0   : >> { %v565_v31 = vpop.f32.mrf.mxu3 }
  0xf1   : >> { %v570_v35 = vadd.f32 %v565_v31, %v521_v29 }
  0xf8   : >> { %v608_v26 = vpop.f32.mrf.mxu0  ;;  %v611_v28 = vpop.f32.mrf.mxu1 }
  0xf9   : >> { %v617_v27 = vadd.f32 %v608_v26, %v568_v21  ;;  %v618_v30 = vadd.f32 %v611_v28, %v569_v24 }
  0xfb   : >> { %v623_v32 = vadd.f32 %v621_v23, %v617_v27  ;;  %v624_v33 = vadd.f32 %v621_v23, %v618_v30 }
  0xfd   : >> { %v626_v34 = vmax.f32 %v623_v32, 0.0  ;;  %v627_v36 = vmax.f32 %v624_v33, 0.0 }
  0xff   : >> { %631 = vst [vmem:[%s630_s19] sm:$0xff] %v626_v34  ;;  %v614_v37 = vpop.f32.mrf.mxu2 }
 0x100   : >> { %632 = vst [vmem:[%s630_s19 + $0x8] sm:$0xff] %v627_v36  ;;  %v619_v38 = vadd.f32 %v614_v37, %v570_v35 }
 0x102   : >> { %v625_v39 = vadd.f32 %v621_v23, %v619_v38  ;;  %176 = sbr.rel (!%p174_p4) target bundleno = 16 (0x10), region = 81 }
 0x104   : >> { %v628_v40 = vmax.f32 %v625_v39, 0.0 }
 0x106   : >> { %633 = vst [vmem:[%s630_s19 + $0x10] sm:$0xff] %v628_v40 }
 0x107 PF: > { %s13_s12 = sadd.s32 1, %s922_s12  }
 0x108   : > { %p10_p5 = scmp.ge.s32.totalorder %s13_s12, 4  }
 0x10a   :  { %12 = sbr.rel (!%p10_p5) target bundleno = 1 (0x1), region = 92 }

// kernel: net_forward.13
= control target key start
LH: loop header
LB: loop body
LE: loop exit
PB: predicated region body
PF: predicated region fallthrough
CT: control target
= control target key end

     0   :  { %s1733_s6 = smov 0   ;;  %s2838_s0 = inlined_call_operand.vmem [shape: f32[2,60,30,128], index: 0, kind: input, shape index: {}]   ;;  %s2839_s1 = inlined_call_operand.vmem [shape: f32[2,30,30,64], index: 1, kind: output, shape index: {}]  }
   0x1 LB: > { %s1342_s7 = sadd.s32 4294967295, %s1720_s6   ;;  %p1346_p0 = scmp.ge.s32.totalorder %s1720_s6, 1  ;;  %s1720_s6 = sphi %s1733_s6, %s11_s6  }
   0x2   : > { %p87_p1 = scmp.lt.s32.totalorder %s1720_s6, 3 }
   0x4   : > { %p88_p2 = pnand %p1346_p0, %p87_p1 }
   0x5   : > { %p107_p3 = scmp.lt.s32.totalorder (!%p88_p2), %s1342_s7, 1  ;;  %s1722_s12 = smov (!%p88_p2), 64  }
   0x6   : > { %91 = sbr.rel (%p88_p2) target bundleno = 450 (0x1c2), region = 24 }
   0xb   : > { %s2841_s7 = smov (!%p107_p3, %s1342_s7), 1  ;;  %vm150_vm0 = vcmask 523264   ;;  %vm154_vm1 = vcmask 521216  }
   0xc   : > { %s1703_s8 = smul.u32 1920, %s2841_s7 }
   0xd   : > { %s1704_s13 = smul.u32 960, %s2841_s7 }
   0xe   : > { %s1747_s11 = scalar_lea.vmem %s2838_s0, %s1703_s8 }
   0xf   : > { %v119_v0 = vld [vmem:[%s1747_s11 + $0x10] sm:$0xff]  ;;  %v117_v2 = vld [vmem:[%s1747_s11] sm:$0xff]  ;;  %v120_v6 = vld [vmem:[%s1747_s11 + $0x18] sm:$0x3f]  ;;  %s1979_s16 = scalar_lea.vmem %s2839_s1, %s1704_s13 }
  0x10   : > { %v1351_v1 = vld [vmem:[%s1747_s11 + $0x30] sm:$0xff]  ;;  %v1349_v4 = vld [vmem:[%s1747_s11 + $0x20] sm:$0xff]  ;;  %v1352_v7 = vld [vmem:[%s1747_s11 + $0x38] sm:$0x3f] }
  0x11   : > { %v1752_v3 = vmax.f32 %v119_v0, %v1351_v1  ;;  %v1755_v5 = vmax.f32 %v117_v2, %v1349_v4  ;;  %v1353_v8 = vld [vmem:[%s1747_s11 + $0x40] sm:$0xff]  ;;  %v118_v10 = vld [vmem:[%s1747_s11 + $0x8] sm:$0xff]  ;;  %v1769_v13 = vmax.f32 %v120_v6, %v1352_v7  ;;  %v1356_v18 = vld [vmem:[%s1747_s11 + $0x58] sm:$0x3f] }
  0x12   : > { %v1357_v9 = vld [vmem:[%s1747_s11 + $0x60] sm:$0xff]  ;;  %v1350_v11 = vld [vmem:[%s1747_s11 + $0x28] sm:$0xff]  ;;  %v1360_v19 = vld [vmem:[%s1747_s11 + $0x78] sm:$0x3f] }
  0x13   : > { %138 = vrot.lane.b32.xlu1 %v1752_v3, %s1722_s12  ;;  %134 = vrot.lane.b32.xlu0 %v1755_v5, %s1722_s12  ;;  %v1767_v12 = vmax.f32 %v1353_v8, %v1357_v9  ;;  %v1773_v14 = vmax.f32 %v118_v10, %v1350_v11  ;;  %v1354_v15 = vld [vmem:[%s1747_s11 + $0x48] sm:$0xff]  ;;  %v1355_v20 = vld [vmem:[%s1747_s11 + $0x50] sm:$0xff]  ;;  %v1787_v22 = vmax.f32 %v1356_v18, %v1360_v19 }
  0x14   : > { %v1358_v16 = vld [vmem:[%s1747_s11 + $0x68] sm:$0xff]  ;;  %v1359_v21 = vld [vmem:[%s1747_s11 + $0x70] sm:$0xff]  ;;  %v1365_v24 = vld [vmem:[%s1747_s11 + $0x80] sm:$0xff] }
  0x15   : > { %174 = vrot.lane.b32.xlu2 %v1767_v12, %s1722_s12  ;;  %v1779_v17 = vmax.f32 %v1354_v15, %v1358_v16  ;;  %v1791_v23 = vmax.f32 %v1355_v20, %v1359_v21  ;;  %v1369_v25 = vld [vmem:[%s1747_s11 + $0xa0] sm:$0xff]  ;;  %v1367_v27 = vld [vmem:[%s1747_s11 + $0x90] sm:$0xff]  ;;  %v1366_v29 = vld [vmem:[%s1747_s11 + $0x88] sm:$0xff] }
  0x16   : > { %v1797_v26 = vmax.f32 %v1365_v24, %v1369_v25  ;;  %v1371_v28 = vld [vmem:[%s1747_s11 + $0xb0] sm:$0xff]  ;;  %v1370_v30 = vld [vmem:[%s1747_s11 + $0xa8] sm:$0xff]  ;;  %v1368_v33 = vld [vmem:[%s1747_s11 + $0x98] sm:$0x3f] }
  0x17   : > { %v1805_v31 = vmax.f32 %v1367_v27, %v1371_v28  ;;  %v1809_v32 = vmax.f32 %v1366_v29, %v1370_v30  ;;  %v1372_v34 = vld [vmem:[%s1747_s11 + $0xb8] sm:$0x3f]  ;;  %v1378_v36 = vld [vmem:[%s1747_s11 + $0xc8] sm:$0xff]  ;;  %v1377_v38 = vld [vmem:[%s1747_s11 + $0xc0] sm:$0xff] }
  0x18   : > { %v1815_v35 = vmax.f32 %v1368_v33, %v1372_v34  ;;  %v1382_v37 = vld [vmem:[%s1747_s11 + $0xe8] sm:$0xff]  ;;  %v1381_v39 = vld [vmem:[%s1747_s11 + $0xe0] sm:$0xff]  ;;  %v1379_v42 = vld [vmem:[%s1747_s11 + $0xd0] sm:$0xff] }
  0x19   : > { %v1823_v40 = vmax.f32 %v1378_v36, %v1382_v37  ;;  %v1827_v41 = vmax.f32 %v1377_v38, %v1381_v39  ;;  %v1383_v43 = vld [vmem:[%s1747_s11 + $0xf0] sm:$0xff]  ;;  %v1389_v45 = vld [vmem:[%s1747_s11 + $0x100] sm:$0xff]  ;;  %v1380_v47 = vld [vmem:[%s1747_s11 + $0xd8] sm:$0x3f] }
  0x1a   : > { %v1833_v44 = vmax.f32 %v1379_v42, %v1383_v43  ;;  %v1393_v46 = vld [vmem:[%s1747_s11 + $0x120] sm:$0xff]  ;;  %v1384_v48 = vld [vmem:[%s1747_s11 + $0xf8] sm:$0x3f]  ;;  %v1390_v51 = vld [vmem:[%s1747_s11 + $0x108] sm:$0xff] }
  0x1b   : > { %140 = vrot.lane.b32.xlu1 %v1769_v13, %s1722_s12  ;;  %136 = vrot.lane.b32.xlu0 %v1773_v14, %s1722_s12  ;;  %v1841_v49 = vmax.f32 %v1389_v45, %v1393_v46  ;;  %v1845_v50 = vmax.f32 %v1380_v47, %v1384_v48  ;;  %v1394_v52 = vld [vmem:[%s1747_s11 + $0x128] sm:$0xff]  ;;  %v1392_v54 = vld [vmem:[%s1747_s11 + $0x118] sm:$0x3f] }
  0x1c   : > { %v1851_v53 = vmax.f32 %v1390_v51, %v1394_v52  ;;  %v1396_v55 = vld [vmem:[%s1747_s11 + $0x138] sm:$0x3f]  ;;  %v1391_v56 = vld [vmem:[%s1747_s11 + $0x110] sm:$0xff]  ;;  %v1401_v60 = vld [vmem:[%s1747_s11 + $0x140] sm:$0xff] }
  0x1d   : > { %176 = vrot.lane.b32.xlu2 %v1779_v17, %s1722_s12  ;;  %v1395_v57 = vld [vmem:[%s1747_s11 + $0x130] sm:$0xff]  ;;  %v1859_v58 = vmax.f32 %v1392_v54, %v1396_v55  ;;  %v1405_v61 = vld [vmem:[%s1747_s11 + $0x160] sm:$0xff]  ;;  %v1402_v1 = vld [vmem:[%s1747_s11 + $0x148] sm:$0xff] }
  0x1e   : > { %v1863_v59 = vmax.f32 %v1391_v56, %v1395_v57  ;;  %v1869_v62 = vmax.f32 %v1401_v60, %v1405_v61  ;;  %v1403_v63 = vld [vmem:[%s1747_s11 + $0x150] sm:$0xff]  ;;  %v1406_v2 = vld [vmem:[%s1747_s11 + $0x168] sm:$0xff]  ;;  %v1404_v7 = vld [vmem:[%s1747_s11 + $0x158] sm:$0x3f] }
  0x1f   : > { %v1407_v0 = vld [vmem:[%s1747_s11 + $0x170] sm:$0xff]  ;;  %v1881_v6 = vmax.f32 %v1402_v1, %v1406_v2  ;;  %v1408_v8 = vld [vmem:[%s1747_s11 + $0x178] sm:$0x3f]  ;;  %v1414_v10 = vld [vmem:[%s1747_s11 + $0x188] sm:$0xff] }
  0x20   : > { %v1877_v4 = vmax.f32 %v1403_v63, %v1407_v0  ;;  %v1887_v9 = vmax.f32 %v1404_v7, %v1408_v8  ;;  %v1418_v11 = vld [vmem:[%s1747_s11 + $0x1a8] sm:$0xff]  ;;  %v1413_v15 = vld [vmem:[%s1747_s11 + $0x180] sm:$0xff]  ;;  %v1415_v20 = vld [vmem:[%s1747_s11 + $0x190] sm:$0xff] }
  0x21   : > { %v1417_v16 = vld [vmem:[%s1747_s11 + $0x1a0] sm:$0xff]  ;;  %v1895_v18 = vmax.f32 %v1414_v10, %v1418_v11  ;;  %v1419_v21 = vld [vmem:[%s1747_s11 + $0x1b0] sm:$0xff]  ;;  %v1416_v28 = vld [vmem:[%s1747_s11 + $0x198] sm:$0x3f] }
  0x22   : > { %v1899_v19 = vmax.f32 %v1413_v15, %v1417_v16  ;;  %v1905_v24 = vmax.f32 %v1415_v20, %v1419_v21  ;;  %v1425_v25 = vld [vmem:[%s1747_s11 + $0x1c0] sm:$0xff]  ;;  %v1420_v29 = vld [vmem:[%s1747_s11 + $0x1b8] sm:$0x3f]  ;;  %v1426_v34 = vld [vmem:[%s1747_s11 + $0x1c8] sm:$0xff] }
  0x23   : > { %180 = vrot.lane.b32.xlu1 %v1787_v22, %s1722_s12  ;;  %178 = vrot.lane.b32.xlu0 %v1791_v23, %s1722_s12  ;;  %v1429_v27 = vld [vmem:[%s1747_s11 + $0x1e0] sm:$0xff]  ;;  %v1917_v33 = vmax.f32 %v1416_v28, %v1420_v29  ;;  %v1430_v36 = vld [vmem:[%s1747_s11 + $0x1e8] sm:$0xff] }
  0x24   : > { %v1913_v30 = vmax.f32 %v1425_v25, %v1429_v27  ;;  %v1923_v37 = vmax.f32 %v1426_v34, %v1430_v36  ;;  %v1428_v38 = vld [vmem:[%s1747_s11 + $0x1d8] sm:$0x3f]  ;;  %v1427_v42 = vld [vmem:[%s1747_s11 + $0x1d0] sm:$0xff]  ;;  %v1437_v47 = vld [vmem:[%s1747_s11 + $0x200] sm:$0xff] }
  0x25   : > { %213 = vrot.lane.b32.xlu2 %v1797_v26, %s1722_s12  ;;  %v1432_v39 = vld [vmem:[%s1747_s11 + $0x1f8] sm:$0x3f]  ;;  %v1431_v43 = vld [vmem:[%s1747_s11 + $0x1f0] sm:$0xff]  ;;  %v1441_v48 = vld [vmem:[%s1747_s11 + $0x220] sm:$0xff] }
  0x26   : > { %v1931_v45 = vmax.f32 %v1428_v38, %v1432_v39  ;;  %v1935_v46 = vmax.f32 %v1427_v42, %v1431_v43  ;;  %v1941_v51 = vmax.f32 %v1437_v47, %v1441_v48  ;;  %v1439_v52 = vld [vmem:[%s1747_s11 + $0x210] sm:$0xff]  ;;  %v1438_v55 = vld [vmem:[%s1747_s11 + $0x208] sm:$0xff]  ;;  %v1440_v61 = vld [vmem:[%s1747_s11 + $0x218] sm:$0x3f] }
  0x27   : > { %v1443_v54 = vld [vmem:[%s1747_s11 + $0x230] sm:$0xff]  ;;  %v1442_v56 = vld [vmem:[%s1747_s11 + $0x228] sm:$0xff]  ;;  %v1444_v63 = vld [vmem:[%s1747_s11 + $0x238] sm:$0x3f] }
  0x28   : > { %v1949_v57 = vmax.f32 %v1439_v52, %v1443_v54  ;;  %v1953_v60 = vmax.f32 %v1438_v55, %v1442_v56  ;;  %v1959_v0 = vmax.f32 %v1440_v61, %v1444_v63  ;;  %v1450_v1 = vld [vmem:[%s1747_s11 + $0x248] sm:$0xff]  ;;  %v1449_v7 = vld [vmem:[%s1747_s11 + $0x240] sm:$0xff]  ;;  %v1451_v15 = vld [vmem:[%s1747_s11 + $0x250] sm:$0xff] }
  0x29   : > { %v1454_v2 = vld [vmem:[%s1747_s11 + $0x268] sm:$0xff]  ;;  %v1453_v8 = vld [vmem:[%s1747_s11 + $0x260] sm:$0xff]  ;;  %v1455_v16 = vld [vmem:[%s1747_s11 + $0x270] sm:$0xff] }
  0x2a   : > { %v1968_v10 = vmax.f32 %v1450_v1, %v1454_v2  ;;  %v1972_v11 = vmax.f32 %v1449_v7, %v1453_v8  ;;  %v1984_v25 = vmax.f32 %v1451_v15, %v1455_v16  ;;  %v1461_v27 = vld [vmem:[%s1747_s11 + $0x280] sm:$0xff]  ;;  %v1452_v29 = vld [vmem:[%s1747_s11 + $0x258] sm:$0x3f]  ;;  %v1462_v38 = vld [vmem:[%s1747_s11 + $0x288] sm:$0xff] }
  0x2b   : > { %217 = vrot.lane.b32.xlu1 %v1805_v31, %s1722_s12  ;;  %215 = vrot.lane.b32.xlu0 %v1809_v32, %s1722_s12  ;;  %v1465_v28 = vld [vmem:[%s1747_s11 + $0x2a0] sm:$0xff]  ;;  %v1456_v34 = vld [vmem:[%s1747_s11 + $0x278] sm:$0x3f] }
  0x2c   : > { %v1998_v36 = vmax.f32 %v1452_v29, %v1456_v34  ;;  %v1466_v39 = vld [vmem:[%s1747_s11 + $0x2a8] sm:$0xff]  ;;  %v1464_v48 = vld [vmem:[%s1747_s11 + $0x298] sm:$0x3f]  ;;  %v1463_v54 = vld [vmem:[%s1747_s11 + $0x290] sm:$0xff] }
  0x2d   : > { %219 = vrot.lane.b32.xlu2 %v1815_v35, %s1722_s12  ;;  %v2005_v47 = vmax.f32 %v1462_v38, %v1466_v39  ;;  %v1468_v52 = vld [vmem:[%s1747_s11 + $0x2b8] sm:$0x3f]  ;;  %v1467_v55 = vld [vmem:[%s1747_s11 + $0x2b0] sm:$0xff]  ;;  %v1473_v61 = vld [vmem:[%s1747_s11 + $0x2c0] sm:$0xff] }
  0x2e   : > { %v2019_v56 = vmax.f32 %v1463_v54, %v1467_v55  ;;  %v1477_v63 = vld [vmem:[%s1747_s11 + $0x2e0] sm:$0xff]  ;;  %v1475_v8 = vld [vmem:[%s1747_s11 + $0x2d0] sm:$0xff]  ;;  %v1476_v38 = vld [vmem:[%s1747_s11 + $0x2d8] sm:$0x3f] }
  0x2f   : > { %v2026_v7 = vmax.f32 %v1473_v61, %v1477_v63  ;;  %v1479_v15 = vld [vmem:[%s1747_s11 + $0x2f0] sm:$0xff]  ;;  %v1480_v39 = vld [vmem:[%s1747_s11 + $0x2f8] sm:$0x3f]  ;;  %v1485_v54 = vld [vmem:[%s1747_s11 + $0x300] sm:$0xff] }
  0x30   : > { %v2038_v29 = vmax.f32 %v1475_v8, %v1479_v15  ;;  %v1487_v8 = vld [vmem:[%s1747_s11 + $0x310] sm:$0xff] }
  0x31   : > { %v1491_v15 = vld [vmem:[%s1747_s11 + $0x330] sm:$0xff] }
  0x33   : > { %254 = vrot.lane.b32.xlu1 %v1823_v40, %s1722_s12  ;;  %252 = vrot.lane.b32.xlu0 %v1827_v41, %s1722_s12 }
  0x35   : > { %256 = vrot.lane.b32.xlu2 %v1833_v44, %s1722_s12 }
  0x3b   : > { %291 = vrot.lane.b32.xlu1 %v1841_v49, %s1722_s12  ;;  %258 = vrot.lane.b32.xlu0 %v1845_v50, %s1722_s12 }
  0x3d   : > { %293 = vrot.lane.b32.xlu2 %v1851_v53, %s1722_s12 }
  0x43   : > { %297 = vrot.lane.b32.xlu1 %v1859_v58, %s1722_s12  ;;  %295 = vrot.lane.b32.xlu0 %v1863_v59, %s1722_s12 }
  0x45   : > { %330 = vrot.lane.b32.xlu2 %v1869_v62, %s1722_s12 }
  0x4b   : > { %334 = vrot.lane.b32.xlu1 %v1877_v4, %s1722_s12  ;;  %332 = vrot.lane.b32.xlu0 %v1881_v6, %s1722_s12 }
  0x4d   : > { %336 = vrot.lane.b32.xlu2 %v1887_v9, %s1722_s12 }
  0x53   : > { %371 = vrot.lane.b32.xlu1 %v1895_v18, %s1722_s12  ;;  %369 = vrot.lane.b32.xlu0 %v1899_v19, %s1722_s12 }
  0x55   : > { %373 = vrot.lane.b32.xlu2 %v1905_v24, %s1722_s12 }
  0x5b   : > { %408 = vrot.lane.b32.xlu1 %v1913_v30, %s1722_s12  ;;  %375 = vrot.lane.b32.xlu0 %v1917_v33, %s1722_s12 }
  0x5d   : > { %410 = vrot.lane.b32.xlu2 %v1923_v37, %s1722_s12 }
  0x63   : > { %414 = vrot.lane.b32.xlu1 %v1931_v45, %s1722_s12  ;;  %412 = vrot.lane.b32.xlu0 %v1935_v46, %s1722_s12 }
  0x65   : > { %447 = vrot.lane.b32.xlu2 %v1941_v51, %s1722_s12 }
  0x6b   : > { %451 = vrot.lane.b32.xlu1 %v1949_v57, %s1722_s12  ;;  %449 = vrot.lane.b32.xlu0 %v1953_v60, %s1722_s12 }
  0x6d   : > { %453 = vrot.lane.b32.xlu2 %v1959_v0, %s1722_s12 }
  0x6f   : > { %v175_v20 = vpop.permute.xlu2 %174 }
  0x70   : > { %v186_v21 = vmax.f32 %v1767_v12, %v175_v20  ;;  %v1994_v12 = vmax.f32 %v1461_v27, %v1465_v28  ;;  %v1474_v20 = vld [vmem:[%s1747_s11 + $0x2c8] sm:$0xff] }
  0x72   : > { %1361 = vst.msk [vmem:[%s1979_s16 + $0x20] sm:$0xff] %vm150_vm0, %v186_v21  ;;  %v1478_v21 = vld [vmem:[%s1747_s11 + $0x2e8] sm:$0xff] }
  0x73   : > { %488 = vrot.lane.b32.xlu1 %v1968_v10, %s1722_s12  ;;  %486 = vrot.lane.b32.xlu0 %v1972_v11, %s1722_s12  ;;  %v2044_v34 = vmax.f32 %v1474_v20, %v1478_v21  ;;  %v1497_v20 = vld [vmem:[%s1747_s11 + $0x340] sm:$0xff] }
  0x74   : > { %v1501_v21 = vld [vmem:[%s1747_s11 + $0x360] sm:$0xff] }
  0x75   : > { %490 = vrot.lane.b32.xlu2 %v1984_v25, %s1722_s12 }
  0x77   : > { %v177_v42 = vpop.permute.xlu2 %176 }
  0x78   : > { %v187_v43 = vmax.f32 %v1779_v17, %v177_v42  ;;  %v2015_v17 = vmax.f32 %v1464_v48, %v1468_v52  ;;  %v1490_v48 = vld [vmem:[%s1747_s11 + $0x328] sm:$0xff] }
  0x7a   : > { %1362 = vst.msk [vmem:[%s1979_s16 + $0x28] sm:$0xff] %vm150_vm0, %v187_v43  ;;  %v1486_v43 = vld [vmem:[%s1747_s11 + $0x308] sm:$0xff] }
  0x7b   : > { %525 = vrot.lane.b32.xlu1 %v1994_v12, %s1722_s12  ;;  %492 = vrot.lane.b32.xlu0 %v1998_v36, %s1722_s12 }
  0x7d   : > { %527 = vrot.lane.b32.xlu2 %v2005_v47, %s1722_s12 }
  0x7f   : > { %v214_v1 = vpop.permute.xlu2 %213 }
  0x80   : > { %v225_v2 = vmax.f32 %v1797_v26, %v214_v1  ;;  %v2065_v1 = vmax.f32 %v1486_v43, %v1490_v48  ;;  %v1498_v43 = vld [vmem:[%s1747_s11 + $0x348] sm:$0xff] }
  0x81   : > { %v1502_v48 = vld [vmem:[%s1747_s11 + $0x368] sm:$0xff] }
  0x82   : > { %1373 = vst.msk [vmem:[%s1979_s16 + $0x40] sm:$0xff] %vm150_vm0, %v225_v2 }
  0x83   : > { %531 = vrot.lane.b32.xlu1 %v2015_v17, %s1722_s12  ;;  %529 = vrot.lane.b32.xlu0 %v2019_v56, %s1722_s12 }
  0x85   : > { %v139_v16 = vpop.permute.xlu1 %138  ;;  %v135_v27 = vpop.permute.xlu0 %134  ;;  %564 = vrot.lane.b32.xlu2 %v2026_v7, %s1722_s12 }
  0x86   : > { %v148_v26 = vmax.f32 %v1752_v3, %v139_v16  ;;  %v146_v28 = vmax.f32 %v1755_v5, %v135_v27  ;;  %v2053_v5 = vmax.f32 %v1476_v38, %v1480_v39  ;;  %v1488_v27 = vld [vmem:[%s1747_s11 + $0x318] sm:$0x3f] }
  0x87   : > { %v220_v3 = vpop.permute.xlu2 %219 }
  0x88   : > { %153 = vst.msk [vmem:[%s1979_s16 + $0x10] sm:$0xff] %vm150_vm0, %v148_v26  ;;  %v228_v42 = vmax.f32 %v1815_v35, %v220_v3  ;;  %v1489_v35 = vld [vmem:[%s1747_s11 + $0x320] sm:$0xff]  ;;  %v2092_v3 = vmax.f32 %v1497_v20, %v1501_v21 }
  0x89   : > { %151 = vst.msk [vmem:[%s1979_s16] sm:$0xff] %vm150_vm0, %v146_v28  ;;  %v2071_v2 = vmax.f32 %v1485_v54, %v1489_v35  ;;  %v1492_v28 = vld [vmem:[%s1747_s11 + $0x338] sm:$0x3f]  ;;  %v1509_v20 = vld [vmem:[%s1747_s11 + $0x380] sm:$0xff] }
  0x8a   : > { %1376 = vst.msk [vmem:[%s1979_s16 + $0x58] sm:$0x3f] %vm154_vm1, %v228_v42  ;;  %v2098_v42 = vmax.f32 %v1488_v27, %v1492_v28  ;;  %v1500_v54 = vld [vmem:[%s1747_s11 + $0x358] sm:$0x3f]  ;;  %v1513_v21 = vld [vmem:[%s1747_s11 + $0x3a0] sm:$0xff]  ;;  %v1511_v27 = vld [vmem:[%s1747_s11 + $0x390] sm:$0xff] }
  0x8b   : > { %568 = vrot.lane.b32.xlu1 %v2038_v29, %s1722_s12  ;;  %566 = vrot.lane.b32.xlu0 %v2044_v34, %s1722_s12  ;;  %v1504_v35 = vld [vmem:[%s1747_s11 + $0x378] sm:$0x3f]  ;;  %v1515_v28 = vld [vmem:[%s1747_s11 + $0x3b0] sm:$0xff] }
  0x8d   : > { %v141_v52 = vpop.permute.xlu1 %140  ;;  %v137_v61 = vpop.permute.xlu0 %136  ;;  %570 = vrot.lane.b32.xlu2 %v2053_v5, %s1722_s12 }
  0x8e   : > { %v149_v55 = vmax.f32 %v1769_v13, %v141_v52  ;;  %v147_v63 = vmax.f32 %v1773_v14, %v137_v61  ;;  %v2080_v14 = vmax.f32 %v1487_v8, %v1491_v15  ;;  %v1499_v61 = vld [vmem:[%s1747_s11 + $0x350] sm:$0xff] }
  0x8f   : > { %v257_v13 = vpop.permute.xlu2 %256 }
  0x90   : > { %155 = vst.msk [vmem:[%s1979_s16 + $0x18] sm:$0x3f] %vm154_vm1, %v149_v55  ;;  %v266_v16 = vmax.f32 %v1833_v44, %v257_v13  ;;  %v2119_v13 = vmax.f32 %v1500_v54, %v1504_v35  ;;  %v1512_v54 = vld [vmem:[%s1747_s11 + $0x398] sm:$0x3f] }
  0x91   : > { %152 = vst.msk [vmem:[%s1979_s16 + $0x8] sm:$0xff] %vm150_vm0, %v147_v63  ;;  %v1503_v63 = vld [vmem:[%s1747_s11 + $0x370] sm:$0xff]  ;;  %v1516_v35 = vld [vmem:[%s1747_s11 + $0x3b8] sm:$0x3f] }
  0x92   : > { %1387 = vst.msk [vmem:[%s1979_s16 + $0x70] sm:$0xff] %vm150_vm0, %v266_v16  ;;  %v2125_v16 = vmax.f32 %v1499_v61, %v1503_v63  ;;  %v1522_v61 = vld [vmem:[%s1747_s11 + $0x3c8] sm:$0xff] }
  0x93   : > { %605 = vrot.lane.b32.xlu1 %v2065_v1, %s1722_s12  ;;  %603 = vrot.lane.b32.xlu0 %v2071_v2, %s1722_s12  ;;  %v1526_v63 = vld [vmem:[%s1747_s11 + $0x3e8] sm:$0xff] }
  0x95   : > { %v181_v26 = vpop.permute.xlu1 %180  ;;  %v179_v38 = vpop.permute.xlu0 %178  ;;  %607 = vrot.lane.b32.xlu2 %v2080_v14, %s1722_s12 }
  0x96   : > { %v189_v44 = vmax.f32 %v1787_v22, %v181_v26  ;;  %v188_v39 = vmax.f32 %v1791_v23, %v179_v38  ;;  %v2107_v23 = vmax.f32 %v1498_v43, %v1502_v48  ;;  %v1510_v38 = vld [vmem:[%s1747_s11 + $0x388] sm:$0xff] }
  0x97   : > { %v294_v22 = vpop.permute.xlu2 %293 }
  0x98   : > { %1364 = vst.msk [vmem:[%s1979_s16 + $0x38] sm:$0x3f] %vm154_vm1, %v189_v44  ;;  %v304_v52 = vmax.f32 %v1851_v53, %v294_v22  ;;  %v2146_v22 = vmax.f32 %v1511_v27, %v1515_v28  ;;  %v1523_v27 = vld [vmem:[%s1747_s11 + $0x3d0] sm:$0xff] }
  0x99   : > { %1363 = vst.msk [vmem:[%s1979_s16 + $0x30] sm:$0xff] %vm150_vm0, %v188_v39  ;;  %v1514_v39 = vld [vmem:[%s1747_s11 + $0x3a8] sm:$0xff]  ;;  %v1527_v28 = vld [vmem:[%s1747_s11 + $0x3f0] sm:$0xff] }
  0x9a   : > { %1398 = vst.msk [vmem:[%s1979_s16 + $0x88] sm:$0xff] %vm150_vm0, %v304_v52  ;;  %v2152_v52 = vmax.f32 %v1510_v38, %v1514_v39  ;;  %v1533_v38 = vld [vmem:[%s1747_s11 + $0x400] sm:$0xff] }
  0x9b   : > { %642 = vrot.lane.b32.xlu1 %v2092_v3, %s1722_s12  ;;  %609 = vrot.lane.b32.xlu0 %v2098_v42, %s1722_s12  ;;  %v1537_v39 = vld [vmem:[%s1747_s11 + $0x420] sm:$0xff] }
  0x9d   : > { %v218_v55 = vpop.permute.xlu1 %217  ;;  %v216_v8 = vpop.permute.xlu0 %215  ;;  %644 = vrot.lane.b32.xlu2 %v2107_v23, %s1722_s12 }
  0x9e   : > { %v227_v53 = vmax.f32 %v1805_v31, %v218_v55  ;;  %v226_v15 = vmax.f32 %v1809_v32, %v216_v8  ;;  %v2134_v32 = vmax.f32 %v1509_v20, %v1513_v21  ;;  %v1521_v8 = vld [vmem:[%s1747_s11 + $0x3c0] sm:$0xff] }
  0x9f   : > { %v331_v31 = vpop.permute.xlu2 %330 }
  0xa0   : > { %1375 = vst.msk [vmem:[%s1979_s16 + $0x50] sm:$0xff] %vm150_vm0, %v227_v53  ;;  %v342_v26 = vmax.f32 %v1869_v62, %v331_v31  ;;  %v2173_v31 = vmax.f32 %v1522_v61, %v1526_v63  ;;  %v1534_v61 = vld [vmem:[%s1747_s11 + $0x408] sm:$0xff] }
  0xa1   : > { %1374 = vst.msk [vmem:[%s1979_s16 + $0x48] sm:$0xff] %vm150_vm0, %v226_v15  ;;  %v1525_v15 = vld [vmem:[%s1747_s11 + $0x3e0] sm:$0xff]  ;;  %v1538_v63 = vld [vmem:[%s1747_s11 + $0x428] sm:$0xff] }
  0xa2   : > { %1409 = vst.msk [vmem:[%s1979_s16 + $0xa0] sm:$0xff] %vm150_vm0, %v342_v26  ;;  %v2179_v26 = vmax.f32 %v1521_v8, %v1525_v15  ;;  %v1536_v8 = vld [vmem:[%s1747_s11 + $0x418] sm:$0x3f] }
  0xa3   : > { %648 = vrot.lane.b32.xlu1 %v2119_v13, %s1722_s12  ;;  %646 = vrot.lane.b32.xlu0 %v2125_v16, %s1722_s12  ;;  %v1540_v15 = vld [vmem:[%s1747_s11 + $0x438] sm:$0x3f] }
  0xa5   : > { %v255_v44 = vpop.permute.xlu1 %254  ;;  %v253_v43 = vpop.permute.xlu0 %252  ;;  %681 = vrot.lane.b32.xlu2 %v2134_v32, %s1722_s12 }
  0xa6   : > { %v265_v62 = vmax.f32 %v1823_v40, %v255_v44  ;;  %v264_v48 = vmax.f32 %v1827_v41, %v253_v43  ;;  %v2161_v41 = vmax.f32 %v1512_v54, %v1516_v35  ;;  %v1524_v43 = vld [vmem:[%s1747_s11 + $0x3d8] sm:$0x3f] }
  0xa7   : > { %v337_v40 = vpop.permute.xlu2 %336 }
  0xa8   : > { %1386 = vst.msk [vmem:[%s1979_s16 + $0x68] sm:$0xff] %vm150_vm0, %v265_v62  ;;  %v345_v55 = vmax.f32 %v1887_v9, %v337_v40  ;;  %v2200_v40 = vmax.f32 %v1533_v38, %v1537_v39  ;;  %v1545_v38 = vld [vmem:[%s1747_s11 + $0x440] sm:$0xff] }
  0xa9   : > { %1385 = vst.msk [vmem:[%s1979_s16 + $0x60] sm:$0xff] %vm150_vm0, %v264_v48  ;;  %v1528_v48 = vld [vmem:[%s1747_s11 + $0x3f8] sm:$0x3f]  ;;  %v1549_v39 = vld [vmem:[%s1747_s11 + $0x460] sm:$0xff] }
  0xaa   : > { %1412 = vst.msk [vmem:[%s1979_s16 + $0xb8] sm:$0x3f] %vm154_vm1, %v345_v55  ;;  %v2206_v55 = vmax.f32 %v1524_v43, %v1528_v48  ;;  %v1547_v43 = vld [vmem:[%s1747_s11 + $0x450] sm:$0xff] }
  0xab   : > { %685 = vrot.lane.b32.xlu1 %v2146_v22, %s1722_s12  ;;  %683 = vrot.lane.b32.xlu0 %v2152_v52, %s1722_s12  ;;  %v1551_v48 = vld [vmem:[%s1747_s11 + $0x470] sm:$0xff] }
  0xad   : > { %v292_v53 = vpop.permute.xlu1 %291  ;;  %v259_v20 = vpop.permute.xlu0 %258  ;;  %687 = vrot.lane.b32.xlu2 %v2161_v41, %s1722_s12 }
  0xae   : > { %v303_v9 = vmax.f32 %v1841_v49, %v292_v53  ;;  %v267_v21 = vmax.f32 %v1845_v50, %v259_v20  ;;  %v2188_v50 = vmax.f32 %v1523_v27, %v1527_v28  ;;  %v1535_v20 = vld [vmem:[%s1747_s11 + $0x410] sm:$0xff] }
  0xaf   : > { %v374_v49 = vpop.permute.xlu2 %373 }
  0xb0   : > { %1397 = vst.msk [vmem:[%s1979_s16 + $0x80] sm:$0xff] %vm150_vm0, %v303_v9  ;;  %v383_v44 = vmax.f32 %v1905_v24, %v374_v49  ;;  %v2227_v49 = vmax.f32 %v1536_v8, %v1540_v15  ;;  %v1548_v8 = vld [vmem:[%s1747_s11 + $0x458] sm:$0x3f] }
  0xb1   : > { %1388 = vst.msk [vmem:[%s1979_s16 + $0x78] sm:$0x3f] %vm154_vm1, %v267_v21  ;;  %v1539_v21 = vld [vmem:[%s1747_s11 + $0x430] sm:$0xff]  ;;  %v1552_v15 = vld [vmem:[%s1747_s11 + $0x478] sm:$0x3f] }
  0xb2   : > { %1423 = vst.msk [vmem:[%s1979_s16 + $0xd0] sm:$0xff] %vm150_vm0, %v383_v44  ;;  %v2233_v44 = vmax.f32 %v1535_v20, %v1539_v21  ;;  %v1558_v20 = vld [vmem:[%s1747_s11 + $0x488] sm:$0xff] }
  0xb3   : > { %722 = vrot.lane.b32.xlu1 %v2173_v31, %s1722_s12  ;;  %720 = vrot.lane.b32.xlu0 %v2179_v26, %s1722_s12  ;;  %v1562_v21 = vld [vmem:[%s1747_s11 + $0x4a8] sm:$0xff] }
  0xb5   : > { %v298_v62 = vpop.permute.xlu1 %297  ;;  %v296_v54 = vpop.permute.xlu0 %295  ;;  %724 = vrot.lane.b32.xlu2 %v2188_v50, %s1722_s12 }
  0xb6   : > { %v306_v24 = vmax.f32 %v1859_v58, %v298_v62  ;;  %v305_v35 = vmax.f32 %v1863_v59, %v296_v54  ;;  %v2215_v59 = vmax.f32 %v1534_v61, %v1538_v63  ;;  %v1546_v54 = vld [vmem:[%s1747_s11 + $0x448] sm:$0xff] }
  0xb7   : > { %v411_v58 = vpop.permute.xlu2 %410 }
  0xb8   : > { %1400 = vst.msk [vmem:[%s1979_s16 + $0x98] sm:$0x3f] %vm154_vm1, %v306_v24  ;;  %v421_v53 = vmax.f32 %v1923_v37, %v411_v58  ;;  %v2254_v58 = vmax.f32 %v1547_v43, %v1551_v48  ;;  %v1559_v43 = vld [vmem:[%s1747_s11 + $0x490] sm:$0xff] }
  0xb9   : > { %1399 = vst.msk [vmem:[%s1979_s16 + $0x90] sm:$0xff] %vm150_vm0, %v305_v35  ;;  %v1550_v35 = vld [vmem:[%s1747_s11 + $0x468] sm:$0xff]  ;;  %v1563_v48 = vld [vmem:[%s1747_s11 + $0x4b0] sm:$0xff] }
  0xba   : > { %1434 = vst.msk [vmem:[%s1979_s16 + $0xe8] sm:$0xff] %vm150_vm0, %v421_v53  ;;  %v2260_v53 = vmax.f32 %v1546_v54, %v1550_v35  ;;  %v1569_v54 = vld [vmem:[%s1747_s11 + $0x4c0] sm:$0xff] }
  0xbb   : > { %759 = vrot.lane.b32.xlu1 %v2200_v40, %s1722_s12  ;;  %726 = vrot.lane.b32.xlu0 %v2206_v55, %s1722_s12  ;;  %v1573_v35 = vld [vmem:[%s1747_s11 + $0x4e0] sm:$0xff] }
  0xbd   : > { %v335_v9 = vpop.permute.xlu1 %334  ;;  %v333_v27 = vpop.permute.xlu0 %332  ;;  %761 = vrot.lane.b32.xlu2 %v2215_v59, %s1722_s12 }
  0xbe   : > { %v344_v37 = vmax.f32 %v1877_v4, %v335_v9  ;;  %v343_v28 = vmax.f32 %v1881_v6, %v333_v27  ;;  %v2242_v6 = vmax.f32 %v1545_v38, %v1549_v39  ;;  %v1557_v27 = vld [vmem:[%s1747_s11 + $0x480] sm:$0xff] }
  0xbf   : > { %v448_v4 = vpop.permute.xlu2 %447 }
  0xc0   : > { %1411 = vst.msk [vmem:[%s1979_s16 + $0xb0] sm:$0xff] %vm150_vm0, %v344_v37  ;;  %v459_v62 = vmax.f32 %v1941_v51, %v448_v4  ;;  %v2281_v4 = vmax.f32 %v1558_v20, %v1562_v21  ;;  %v1570_v20 = vld [vmem:[%s1747_s11 + $0x4c8] sm:$0xff] }
  0xc1   : > { %1410 = vst.msk [vmem:[%s1979_s16 + $0xa8] sm:$0xff] %vm150_vm0, %v343_v28  ;;  %v1561_v28 = vld [vmem:[%s1747_s11 + $0x4a0] sm:$0xff]  ;;  %v1574_v21 = vld [vmem:[%s1747_s11 + $0x4e8] sm:$0xff] }
  0xc2   : > { %1445 = vst.msk [vmem:[%s1979_s16 + $0x100] sm:$0xff] %vm150_vm0, %v459_v62  ;;  %v2287_v62 = vmax.f32 %v1557_v27, %v1561_v28  ;;  %v1572_v27 = vld [vmem:[%s1747_s11 + $0x4d8] sm:$0x3f] }
  0xc3   : > { %765 = vrot.lane.b32.xlu1 %v2227_v49, %s1722_s12  ;;  %763 = vrot.lane.b32.xlu0 %v2233_v44, %s1722_s12  ;;  %v1576_v28 = vld [vmem:[%s1747_s11 + $0x4f8] sm:$0x3f] }
  0xc5   : > { %v372_v24 = vpop.permute.xlu1 %371  ;;  %v370_v61 = vpop.permute.xlu0 %369  ;;  %798 = vrot.lane.b32.xlu2 %v2242_v6, %s1722_s12 }
  0xc6   : > { %v382_v51 = vmax.f32 %v1895_v18, %v372_v24  ;;  %v381_v63 = vmax.f32 %v1899_v19, %v370_v61  ;;  %v2269_v19 = vmax.f32 %v1548_v8, %v1552_v15  ;;  %v1560_v61 = vld [vmem:[%s1747_s11 + $0x498] sm:$0x3f] }
  0xc7   : > { %v454_v18 = vpop.permute.xlu2 %453 }
  0xc8   : > { %1422 = vst.msk [vmem:[%s1979_s16 + $0xc8] sm:$0xff] %vm150_vm0, %v382_v51  ;;  %v462_v9 = vmax.f32 %v1959_v0, %v454_v18  ;;  %v2308_v18 = vmax.f32 %v1569_v54, %v1573_v35  ;;  %v1581_v54 = vld [vmem:[%s1747_s11 + $0x500] sm:$0xff] }
  0xc9   : > { %1421 = vst.msk [vmem:[%s1979_s16 + $0xc0] sm:$0xff] %vm150_vm0, %v381_v63  ;;  %v1564_v63 = vld [vmem:[%s1747_s11 + $0x4b8] sm:$0x3f]  ;;  %v1585_v35 = vld [vmem:[%s1747_s11 + $0x520] sm:$0xff] }
  0xca   : > { %1448 = vst.msk [vmem:[%s1979_s16 + $0x118] sm:$0x3f] %vm154_vm1, %v462_v9  ;;  %v2314_v9 = vmax.f32 %v1560_v61, %v1564_v63  ;;  %v1583_v61 = vld [vmem:[%s1747_s11 + $0x510] sm:$0xff] }
  0xcb   : > { %802 = vrot.lane.b32.xlu1 %v2254_v58, %s1722_s12  ;;  %800 = vrot.lane.b32.xlu0 %v2260_v53, %s1722_s12  ;;  %v1587_v63 = vld [vmem:[%s1747_s11 + $0x530] sm:$0xff] }
  0xcd   : > { %v409_v37 = vpop.permute.xlu1 %408  ;;  %v376_v38 = vpop.permute.xlu0 %375  ;;  %804 = vrot.lane.b32.xlu2 %v2269_v19, %s1722_s12 }
  0xce   : > { %v420_v0 = vmax.f32 %v1913_v30, %v409_v37  ;;  %v384_v39 = vmax.f32 %v1917_v33, %v376_v38  ;;  %v2296_v33 = vmax.f32 %v1559_v43, %v1563_v48  ;;  %v1571_v38 = vld [vmem:[%s1747_s11 + $0x4d0] sm:$0xff] }
  0xcf   : > { %v491_v30 = vpop.permute.xlu2 %490 }
  0xd0   : > { %1433 = vst.msk [vmem:[%s1979_s16 + $0xe0] sm:$0xff] %vm150_vm0, %v420_v0  ;;  %v500_v24 = vmax.f32 %v1984_v25, %v491_v30  ;;  %v2335_v30 = vmax.f32 %v1572_v27, %v1576_v28  ;;  %v1584_v27 = vld [vmem:[%s1747_s11 + $0x518] sm:$0x3f] }
  0xd1   : > { %1424 = vst.msk [vmem:[%s1979_s16 + $0xd8] sm:$0x3f] %vm154_vm1, %v384_v39  ;;  %v1575_v39 = vld [vmem:[%s1747_s11 + $0x4f0] sm:$0xff]  ;;  %v1588_v28 = vld [vmem:[%s1747_s11 + $0x538] sm:$0x3f] }
  0xd2   : > { %1459 = vst.msk [vmem:[%s1979_s16 + $0x130] sm:$0xff] %vm150_vm0, %v500_v24  ;;  %v2341_v24 = vmax.f32 %v1571_v38, %v1575_v39  ;;  %v1594_v38 = vld [vmem:[%s1747_s11 + $0x548] sm:$0xff] }
  0xd3   : > { %839 = vrot.lane.b32.xlu1 %v2281_v4, %s1722_s12  ;;  %837 = vrot.lane.b32.xlu0 %v2287_v62, %s1722_s12  ;;  %v1598_v39 = vld [vmem:[%s1747_s11 + $0x568] sm:$0xff] }
  0xd5   : > { %v415_v51 = vpop.permute.xlu1 %414  ;;  %v413_v8 = vpop.permute.xlu0 %412  ;;  %841 = vrot.lane.b32.xlu2 %v2296_v33, %s1722_s12 }
  0xd6   : > { %v423_v25 = vmax.f32 %v1931_v45, %v415_v51  ;;  %v422_v15 = vmax.f32 %v1935_v46, %v413_v8  ;;  %v2323_v46 = vmax.f32 %v1570_v20, %v1574_v21  ;;  %v1582_v8 = vld [vmem:[%s1747_s11 + $0x508] sm:$0xff] }
  0xd7   : > { %v528_v45 = vpop.permute.xlu2 %527 }
  0xd8   : > { %1436 = vst.msk [vmem:[%s1979_s16 + $0xf8] sm:$0x3f] %vm154_vm1, %v423_v25  ;;  %v538_v37 = vmax.f32 %v2005_v47, %v528_v45  ;;  %v2362_v45 = vmax.f32 %v1583_v61, %v1587_v63  ;;  %v1595_v61 = vld [vmem:[%s1747_s11 + $0x550] sm:$0xff] }
  0xd9   : > { %1435 = vst.msk [vmem:[%s1979_s16 + $0xf0] sm:$0xff] %vm150_vm0, %v422_v15  ;;  %v1586_v15 = vld [vmem:[%s1747_s11 + $0x528] sm:$0xff]  ;;  %v1599_v63 = vld [vmem:[%s1747_s11 + $0x570] sm:$0xff] }
  0xda   : > { %1470 = vst.msk [vmem:[%s1979_s16 + $0x148] sm:$0xff] %vm150_vm0, %v538_v37  ;;  %v2368_v37 = vmax.f32 %v1582_v8, %v1586_v15  ;;  %v1605_v8 = vld [vmem:[%s1747_s11 + $0x580] sm:$0xff] }
  0xdb   : > { %876 = vrot.lane.b32.xlu1 %v2308_v18, %s1722_s12  ;;  %843 = vrot.lane.b32.xlu0 %v2314_v9, %s1722_s12  ;;  %v1609_v15 = vld [vmem:[%s1747_s11 + $0x5a0] sm:$0xff] }
  0xdd   : > { %v452_v0 = vpop.permute.xlu1 %451  ;;  %v450_v43 = vpop.permute.xlu0 %449  ;;  %878 = vrot.lane.b32.xlu2 %v2323_v46, %s1722_s12 }
  0xde   : > { %v461_v47 = vmax.f32 %v1949_v57, %v452_v0  ;;  %v460_v48 = vmax.f32 %v1953_v60, %v450_v43  ;;  %v2350_v60 = vmax.f32 %v1581_v54, %v1585_v35  ;;  %v1593_v43 = vld [vmem:[%s1747_s11 + $0x540] sm:$0xff] }
  0xdf   : > { %v565_v57 = vpop.permute.xlu2 %564 }
  0xe0   : > { %1447 = vst.msk [vmem:[%s1979_s16 + $0x110] sm:$0xff] %vm150_vm0, %v461_v47  ;;  %v576_v51 = vmax.f32 %v2026_v7, %v565_v57  ;;  %v2389_v57 = vmax.f32 %v1594_v38, %v1598_v39  ;;  %v1606_v38 = vld [vmem:[%s1747_s11 + $0x588] sm:$0xff] }
  0xe1   : > { %1446 = vst.msk [vmem:[%s1979_s16 + $0x108] sm:$0xff] %vm150_vm0, %v460_v48  ;;  %v1597_v48 = vld [vmem:[%s1747_s11 + $0x560] sm:$0xff]  ;;  %v1610_v39 = vld [vmem:[%s1747_s11 + $0x5a8] sm:$0xff] }
  0xe2   : > { %1481 = vst.msk [vmem:[%s1979_s16 + $0x160] sm:$0xff] %vm150_vm0, %v576_v51  ;;  %v2395_v51 = vmax.f32 %v1593_v43, %v1597_v48  ;;  %v1608_v43 = vld [vmem:[%s1747_s11 + $0x598] sm:$0x3f] }
  0xe3   : > { %882 = vrot.lane.b32.xlu1 %v2335_v30, %s1722_s12  ;;  %880 = vrot.lane.b32.xlu0 %v2341_v24, %s1722_s12  ;;  %v1612_v48 = vld [vmem:[%s1747_s11 + $0x5b8] sm:$0x3f] }
  0xe5   : > { %v489_v25 = vpop.permute.xlu1 %488  ;;  %v487_v20 = vpop.permute.xlu0 %486  ;;  %915 = vrot.lane.b32.xlu2 %v2350_v60, %s1722_s12 }
  0xe6   : > { %v499_v7 = vmax.f32 %v1968_v10, %v489_v25  ;;  %v498_v21 = vmax.f32 %v1972_v11, %v487_v20  ;;  %v2377_v11 = vmax.f32 %v1584_v27, %v1588_v28  ;;  %v1596_v20 = vld [vmem:[%s1747_s11 + $0x558] sm:$0x3f] }
  0xe7   : > { %v571_v10 = vpop.permute.xlu2 %570 }
  0xe8   : > { %1458 = vst.msk [vmem:[%s1979_s16 + $0x128] sm:$0xff] %vm150_vm0, %v499_v7  ;;  %v579_v0 = vmax.f32 %v2053_v5, %v571_v10  ;;  %v2416_v10 = vmax.f32 %v1605_v8, %v1609_v15  ;;  %v1617_v8 = vld [vmem:[%s1747_s11 + $0x5c0] sm:$0xff] }
  0xe9   : > { %1457 = vst.msk [vmem:[%s1979_s16 + $0x120] sm:$0xff] %vm150_vm0, %v498_v21  ;;  %v1600_v21 = vld [vmem:[%s1747_s11 + $0x578] sm:$0x3f]  ;;  %v1621_v15 = vld [vmem:[%s1747_s11 + $0x5e0] sm:$0xff] }
  0xea   : > { %1484 = vst.msk [vmem:[%s1979_s16 + $0x178] sm:$0x3f] %vm154_vm1, %v579_v0  ;;  %v2422_v0 = vmax.f32 %v1596_v20, %v1600_v21  ;;  %v1619_v20 = vld [vmem:[%s1747_s11 + $0x5d0] sm:$0xff] }
  0xeb   : > { %919 = vrot.lane.b32.xlu1 %v2362_v45, %s1722_s12  ;;  %917 = vrot.lane.b32.xlu0 %v2368_v37, %s1722_s12  ;;  %v1623_v21 = vld [vmem:[%s1747_s11 + $0x5f0] sm:$0xff] }
  0xed   : > { %v526_v47 = vpop.permute.xlu1 %525  ;;  %v493_v54 = vpop.permute.xlu0 %492  ;;  %921 = vrot.lane.b32.xlu2 %v2377_v11, %s1722_s12 }
  0xee   : > { %v537_v5 = vmax.f32 %v1994_v12, %v526_v47  ;;  %v501_v35 = vmax.f32 %v1998_v36, %v493_v54  ;;  %v2404_v36 = vmax.f32 %v1595_v61, %v1599_v63  ;;  %v1607_v54 = vld [vmem:[%s1747_s11 + $0x590] sm:$0xff] }
  0xef   : > { %v608_v12 = vpop.permute.xlu2 %607 }
  0xf0   : > { %1469 = vst.msk [vmem:[%s1979_s16 + $0x140] sm:$0xff] %vm150_vm0, %v537_v5  ;;  %v617_v25 = vmax.f32 %v2080_v14, %v608_v12  ;;  %v2443_v12 = vmax.f32 %v1608_v43, %v1612_v48  ;;  %v1620_v43 = vld [vmem:[%s1747_s11 + $0x5d8] sm:$0x3f] }
  0xf1   : > { %1460 = vst.msk [vmem:[%s1979_s16 + $0x138] sm:$0x3f] %vm154_vm1, %v501_v35  ;;  %v1611_v35 = vld [vmem:[%s1747_s11 + $0x5b0] sm:$0xff]  ;;  %v1624_v48 = vld [vmem:[%s1747_s11 + $0x5f8] sm:$0x3f] }
  0xf2   : > { %1495 = vst.msk [vmem:[%s1979_s16 + $0x190] sm:$0xff] %vm150_vm0, %v617_v25  ;;  %v2449_v25 = vmax.f32 %v1607_v54, %v1611_v35  ;;  %v1630_v54 = vld [vmem:[%s1747_s11 + $0x608] sm:$0xff] }
  0xf3   : > { %956 = vrot.lane.b32.xlu1 %v2389_v57, %s1722_s12  ;;  %954 = vrot.lane.b32.xlu0 %v2395_v51, %s1722_s12  ;;  %v1634_v35 = vld [vmem:[%s1747_s11 + $0x628] sm:$0xff] }
  0xf5   : > { %v532_v7 = vpop.permute.xlu1 %531  ;;  %v530_v27 = vpop.permute.xlu0 %529  ;;  %958 = vrot.lane.b32.xlu2 %v2404_v36, %s1722_s12 }
  0xf6   : > { %v540_v14 = vmax.f32 %v2015_v17, %v532_v7  ;;  %v539_v28 = vmax.f32 %v2019_v56, %v530_v27  ;;  %v2431_v56 = vmax.f32 %v1606_v38, %v1610_v39  ;;  %v1618_v27 = vld [vmem:[%s1747_s11 + $0x5c8] sm:$0xff] }
  0xf7   : > { %v645_v17 = vpop.permute.xlu2 %644 }
  0xf8   : > { %1472 = vst.msk [vmem:[%s1979_s16 + $0x158] sm:$0x3f] %vm154_vm1, %v540_v14  ;;  %v655_v47 = vmax.f32 %v2107_v23, %v645_v17  ;;  %v2470_v17 = vmax.f32 %v1619_v20, %v1623_v21  ;;  %v1631_v20 = vld [vmem:[%s1747_s11 + $0x610] sm:$0xff] }
  0xf9   : > { %1471 = vst.msk [vmem:[%s1979_s16 + $0x150] sm:$0xff] %vm150_vm0, %v539_v28  ;;  %v1622_v28 = vld [vmem:[%s1747_s11 + $0x5e8] sm:$0xff]  ;;  %v1635_v21 = vld [vmem:[%s1747_s11 + $0x630] sm:$0xff] }
  0xfa   : > { %1506 = vst.msk [vmem:[%s1979_s16 + $0x1a8] sm:$0xff] %vm150_vm0, %v655_v47  ;;  %v2476_v47 = vmax.f32 %v1618_v27, %v1622_v28  ;;  %v1641_v27 = vld [vmem:[%s1747_s11 + $0x640] sm:$0xff] }
  0xfb   : > { %993 = vrot.lane.b32.xlu1 %v2416_v10, %s1722_s12  ;;  %960 = vrot.lane.b32.xlu0 %v2422_v0, %s1722_s12  ;;  %v1645_v28 = vld [vmem:[%s1747_s11 + $0x660] sm:$0xff] }
  0xfd   : > { %v569_v5 = vpop.permute.xlu1 %568  ;;  %v567_v61 = vpop.permute.xlu0 %566  ;;  %995 = vrot.lane.b32.xlu2 %v2431_v56, %s1722_s12 }
  0xfe   : > { %v578_v23 = vmax.f32 %v2038_v29, %v569_v5  ;;  %v577_v63 = vmax.f32 %v2044_v34, %v567_v61  ;;  %v2458_v34 = vmax.f32 %v1617_v8, %v1621_v15  ;;  %v1629_v61 = vld [vmem:[%s1747_s11 + $0x600] sm:$0xff] }
  0xff   : > { %v682_v29 = vpop.permute.xlu2 %681 }
 0x100   : > { %1483 = vst.msk [vmem:[%s1979_s16 + $0x170] sm:$0xff] %vm150_vm0, %v578_v23  ;;  %v693_v7 = vmax.f32 %v2134_v32, %v682_v29  ;;  %v2497_v29 = vmax.f32 %v1630_v54, %v1634_v35  ;;  %v1642_v54 = vld [vmem:[%s1747_s11 + $0x648] sm:$0xff] }
 0x101   : > { %1482 = vst.msk [vmem:[%s1979_s16 + $0x168] sm:$0xff] %vm150_vm0, %v577_v63  ;;  %v1633_v63 = vld [vmem:[%s1747_s11 + $0x620] sm:$0xff]  ;;  %v1646_v35 = vld [vmem:[%s1747_s11 + $0x668] sm:$0xff] }
 0x102   : > { %1517 = vst.msk [vmem:[%s1979_s16 + $0x1c0] sm:$0xff] %vm150_vm0, %v693_v7  ;;  %v2503_v7 = vmax.f32 %v1629_v61, %v1633_v63  ;;  %v1644_v61 = vld [vmem:[%s1747_s11 + $0x658] sm:$0x3f] }
 0x103   : > { %999 = vrot.lane.b32.xlu1 %v2443_v12, %s1722_s12  ;;  %997 = vrot.lane.b32.xlu0 %v2449_v25, %s1722_s12  ;;  %v1648_v63 = vld [vmem:[%s1747_s11 + $0x678] sm:$0x3f] }
 0x105   : > { %v606_v14 = vpop.permute.xlu1 %605  ;;  %v604_v38 = vpop.permute.xlu0 %603  ;;  %1032 = vrot.lane.b32.xlu2 %v2458_v34, %s1722_s12 }
 0x106   : > { %v616_v32 = vmax.f32 %v2065_v1, %v606_v14  ;;  %v615_v39 = vmax.f32 %v2071_v2, %v604_v38  ;;  %v2485_v2 = vmax.f32 %v1620_v43, %v1624_v48  ;;  %v1632_v38 = vld [vmem:[%s1747_s11 + $0x618] sm:$0x3f] }
 0x107   : > { %v688_v1 = vpop.permute.xlu2 %687 }
 0x108   : > { %1494 = vst.msk [vmem:[%s1979_s16 + $0x188] sm:$0xff] %vm150_vm0, %v616_v32  ;;  %v696_v5 = vmax.f32 %v2161_v41, %v688_v1  ;;  %v2524_v1 = vmax.f32 %v1641_v27, %v1645_v28  ;;  %v1653_v27 = vld [vmem:[%s1747_s11 + $0x680] sm:$0xff] }
 0x109   : > { %1493 = vst.msk [vmem:[%s1979_s16 + $0x180] sm:$0xff] %vm150_vm0, %v615_v39  ;;  %v1636_v39 = vld [vmem:[%s1747_s11 + $0x638] sm:$0x3f]  ;;  %v1657_v28 = vld [vmem:[%s1747_s11 + $0x6a0] sm:$0xff] }
 0x10a   : > { %1520 = vst.msk [vmem:[%s1979_s16 + $0x1d8] sm:$0x3f] %vm154_vm1, %v696_v5  ;;  %v2530_v5 = vmax.f32 %v1632_v38, %v1636_v39  ;;  %v1655_v38 = vld [vmem:[%s1747_s11 + $0x690] sm:$0xff] }
 0x10b   : > { %1036 = vrot.lane.b32.xlu1 %v2470_v17, %s1722_s12  ;;  %1034 = vrot.lane.b32.xlu0 %v2476_v47, %s1722_s12  ;;  %v1659_v39 = vld [vmem:[%s1747_s11 + $0x6b0] sm:$0xff] }
 0x10d   : > { %v643_v23 = vpop.permute.xlu1 %642  ;;  %v610_v8 = vpop.permute.xlu0 %609  ;;  %1038 = vrot.lane.b32.xlu2 %v2485_v2, %s1722_s12 }
 0x10e   : > { %v654_v41 = vmax.f32 %v2092_v3, %v643_v23  ;;  %v618_v15 = vmax.f32 %v2098_v42, %v610_v8  ;;  %v2512_v42 = vmax.f32 %v1631_v20, %v1635_v21  ;;  %v1643_v8 = vld [vmem:[%s1747_s11 + $0x650] sm:$0xff] }
 0x10f   : > { %v725_v3 = vpop.permute.xlu2 %724 }
 0x110   : > { %1505 = vst.msk [vmem:[%s1979_s16 + $0x1a0] sm:$0xff] %vm150_vm0, %v654_v41  ;;  %v734_v14 = vmax.f32 %v2188_v50, %v725_v3  ;;  %v2551_v3 = vmax.f32 %v1644_v61, %v1648_v63  ;;  %v1656_v61 = vld [vmem:[%s1747_s11 + $0x698] sm:$0x3f] }
 0x111   : > { %1496 = vst.msk [vmem:[%s1979_s16 + $0x198] sm:$0x3f] %vm154_vm1, %v618_v15  ;;  %v1647_v15 = vld [vmem:[%s1747_s11 + $0x670] sm:$0xff]  ;;  %v1660_v63 = vld [vmem:[%s1747_s11 + $0x6b8] sm:$0x3f] }
 0x112   : > { %1531 = vst.msk [vmem:[%s1979_s16 + $0x1f0] sm:$0xff] %vm150_vm0, %v734_v14  ;;  %v2557_v14 = vmax.f32 %v1643_v8, %v1647_v15  ;;  %v1666_v8 = vld [vmem:[%s1747_s11 + $0x6c8] sm:$0xff] }
 0x113   : > { %1073 = vrot.lane.b32.xlu1 %v2497_v29, %s1722_s12  ;;  %1071 = vrot.lane.b32.xlu0 %v2503_v7, %s1722_s12  ;;  %v1670_v15 = vld [vmem:[%s1747_s11 + $0x6e8] sm:$0xff] }
 0x115   : > { %v649_v32 = vpop.permute.xlu1 %648  ;;  %v647_v43 = vpop.permute.xlu0 %646  ;;  %1075 = vrot.lane.b32.xlu2 %v2512_v42, %s1722_s12 }
 0x116   : > { %v657_v50 = vmax.f32 %v2119_v13, %v649_v32  ;;  %v656_v48 = vmax.f32 %v2125_v16, %v647_v43  ;;  %v2539_v16 = vmax.f32 %v1642_v54, %v1646_v35  ;;  %v1654_v43 = vld [vmem:[%s1747_s11 + $0x688] sm:$0xff] }
 0x117   : > { %v762_v13 = vpop.permute.xlu2 %761 }
 0x118   : > { %1508 = vst.msk [vmem:[%s1979_s16 + $0x1b8] sm:$0x3f] %vm154_vm1, %v657_v50  ;;  %v772_v23 = vmax.f32 %v2215_v59, %v762_v13  ;;  %v2578_v13 = vmax.f32 %v1655_v38, %v1659_v39  ;;  %v1667_v38 = vld [vmem:[%s1747_s11 + $0x6d0] sm:$0xff] }
 0x119   : > { %1507 = vst.msk [vmem:[%s1979_s16 + $0x1b0] sm:$0xff] %vm150_vm0, %v656_v48  ;;  %v1658_v48 = vld [vmem:[%s1747_s11 + $0x6a8] sm:$0xff]  ;;  %v1671_v39 = vld [vmem:[%s1747_s11 + $0x6f0] sm:$0xff] }
 0x11a   : > { %1542 = vst.msk [vmem:[%s1979_s16 + $0x208] sm:$0xff] %vm150_vm0, %v772_v23  ;;  %v2584_v23 = vmax.f32 %v1654_v43, %v1658_v48  ;;  %v1677_v43 = vld [vmem:[%s1747_s11 + $0x700] sm:$0xff] }
 0x11b   : > { %1110 = vrot.lane.b32.xlu1 %v2524_v1, %s1722_s12  ;;  %1077 = vrot.lane.b32.xlu0 %v2530_v5, %s1722_s12  ;;  %v1681_v48 = vld [vmem:[%s1747_s11 + $0x720] sm:$0xff] }
 0x11d   : > { %v686_v41 = vpop.permute.xlu1 %685  ;;  %v684_v20 = vpop.permute.xlu0 %683  ;;  %1112 = vrot.lane.b32.xlu2 %v2539_v16, %s1722_s12 }
 0x11e   : > { %v695_v59 = vmax.f32 %v2146_v22, %v686_v41  ;;  %v694_v21 = vmax.f32 %v2152_v52, %v684_v20  ;;  %v2566_v52 = vmax.f32 %v1653_v27, %v1657_v28  ;;  %v1665_v20 = vld [vmem:[%s1747_s11 + $0x6c0] sm:$0xff] }
 0x11f   : > { %v799_v22 = vpop.permute.xlu2 %798 }
 0x120   : > { %1519 = vst.msk [vmem:[%s1979_s16 + $0x1d0] sm:$0xff] %vm150_vm0, %v695_v59  ;;  %v810_v32 = vmax.f32 %v2242_v6, %v799_v22  ;;  %v2605_v22 = vmax.f32 %v1666_v8, %v1670_v15  ;;  %v1678_v8 = vld [vmem:[%s1747_s11 + $0x708] sm:$0xff] }
 0x121   : > { %1518 = vst.msk [vmem:[%s1979_s16 + $0x1c8] sm:$0xff] %vm150_vm0, %v694_v21  ;;  %v1669_v21 = vld [vmem:[%s1747_s11 + $0x6e0] sm:$0xff]  ;;  %v1682_v15 = vld [vmem:[%s1747_s11 + $0x728] sm:$0xff] }
 0x122   : > { %1553 = vst.msk [vmem:[%s1979_s16 + $0x220] sm:$0xff] %vm150_vm0, %v810_v32  ;;  %v2611_v32 = vmax.f32 %v1665_v20, %v1669_v21  ;;  %v1680_v20 = vld [vmem:[%s1747_s11 + $0x718] sm:$0x3f] }
 0x123   : > { %1116 = vrot.lane.b32.xlu1 %v2551_v3, %s1722_s12  ;;  %1114 = vrot.lane.b32.xlu0 %v2557_v14, %s1722_s12  ;;  %v1684_v21 = vld [vmem:[%s1747_s11 + $0x738] sm:$0x3f] }
 0x125   : > { %v723_v50 = vpop.permute.xlu1 %722  ;;  %v721_v54 = vpop.permute.xlu0 %720  ;;  %1149 = vrot.lane.b32.xlu2 %v2566_v52, %s1722_s12 }
 0x126   : > { %v733_v6 = vmax.f32 %v2173_v31, %v723_v50  ;;  %v732_v35 = vmax.f32 %v2179_v26, %v721_v54  ;;  %v2593_v26 = vmax.f32 %v1656_v61, %v1660_v63  ;;  %v1668_v54 = vld [vmem:[%s1747_s11 + $0x6d8] sm:$0x3f] }
 0x127   : > { %v805_v31 = vpop.permute.xlu2 %804 }
 0x128   : > { %1530 = vst.msk [vmem:[%s1979_s16 + $0x1e8] sm:$0xff] %vm150_vm0, %v733_v6  ;;  %v813_v41 = vmax.f32 %v2269_v19, %v805_v31  ;;  %v2632_v31 = vmax.f32 %v1677_v43, %v1681_v48  ;;  %v1689_v43 = vld [vmem:[%s1747_s11 + $0x740] sm:$0xff] }
 0x129   : > { %1529 = vst.msk [vmem:[%s1979_s16 + $0x1e0] sm:$0xff] %vm150_vm0, %v732_v35  ;;  %v1672_v35 = vld [vmem:[%s1747_s11 + $0x6f8] sm:$0x3f]  ;;  %v1693_v48 = vld [vmem:[%s1747_s11 + $0x760] sm:$0xff] }
 0x12a   : > { %1556 = vst.msk [vmem:[%s1979_s16 + $0x238] sm:$0x3f] %vm154_vm1, %v813_v41  ;;  %v2638_v41 = vmax.f32 %v1668_v54, %v1672_v35  ;;  %v1691_v54 = vld [vmem:[%s1747_s11 + $0x750] sm:$0xff] }
 0x12b   : > { %1153 = vrot.lane.b32.xlu1 %v2578_v13, %s1722_s12  ;;  %1151 = vrot.lane.b32.xlu0 %v2584_v23, %s1722_s12  ;;  %v1695_v35 = vld [vmem:[%s1747_s11 + $0x770] sm:$0xff] }
 0x12d   : > { %v760_v59 = vpop.permute.xlu1 %759  ;;  %v727_v27 = vpop.permute.xlu0 %726  ;;  %1155 = vrot.lane.b32.xlu2 %v2593_v26, %s1722_s12 }
 0x12e   : > { %v771_v19 = vmax.f32 %v2200_v40, %v760_v59  ;;  %v735_v28 = vmax.f32 %v2206_v55, %v727_v27  ;;  %v2620_v55 = vmax.f32 %v1667_v38, %v1671_v39  ;;  %v1679_v27 = vld [vmem:[%s1747_s11 + $0x710] sm:$0xff] }
 0x12f   : > { %v842_v40 = vpop.permute.xlu2 %841 }
 0x130   : > { %1541 = vst.msk [vmem:[%s1979_s16 + $0x200] sm:$0xff] %vm150_vm0, %v771_v19  ;;  %v851_v50 = vmax.f32 %v2296_v33, %v842_v40  ;;  %v2659_v40 = vmax.f32 %v1680_v20, %v1684_v21  ;;  %v1692_v20 = vld [vmem:[%s1747_s11 + $0x758] sm:$0x3f] }
 0x131   : > { %1532 = vst.msk [vmem:[%s1979_s16 + $0x1f8] sm:$0x3f] %vm154_vm1, %v735_v28  ;;  %v1683_v28 = vld [vmem:[%s1747_s11 + $0x730] sm:$0xff]  ;;  %v1696_v21 = vld [vmem:[%s1747_s11 + $0x778] sm:$0x3f] }
 0x132   : > { %1567 = vst.msk [vmem:[%s1979_s16 + $0x250] sm:$0xff] %vm150_vm0, %v851_v50  ;;  %v2665_v50 = vmax.f32 %v1679_v27, %v1683_v28 }
 0x133   : > { %1190 = vrot.lane.b32.xlu1 %v2605_v22, %s1722_s12  ;;  %1188 = vrot.lane.b32.xlu0 %v2611_v32, %s1722_s12 }
 0x135   : > { %v766_v6 = vpop.permute.xlu1 %765  ;;  %v764_v61 = vpop.permute.xlu0 %763  ;;  %1192 = vrot.lane.b32.xlu2 %v2620_v55, %s1722_s12 }
 0x136   : > { %v774_v33 = vmax.f32 %v2227_v49, %v766_v6  ;;  %v773_v63 = vmax.f32 %v2233_v44, %v764_v61  ;;  %v2647_v44 = vmax.f32 %v1678_v8, %v1682_v15  ;;  %v1690_v61 = vld [vmem:[%s1747_s11 + $0x748] sm:$0xff] }
 0x137   : > { %v879_v49 = vpop.permute.xlu2 %878 }
 0x138   : > { %1544 = vst.msk [vmem:[%s1979_s16 + $0x218] sm:$0x3f] %vm154_vm1, %v774_v33  ;;  %v889_v59 = vmax.f32 %v2323_v46, %v879_v49  ;;  %v2686_v49 = vmax.f32 %v1691_v54, %v1695_v35 }
 0x139   : > { %1543 = vst.msk [vmem:[%s1979_s16 + $0x210] sm:$0xff] %vm150_vm0, %v773_v63  ;;  %v1694_v63 = vld [vmem:[%s1747_s11 + $0x768] sm:$0xff] }
 0x13a   : > { %1578 = vst.msk [vmem:[%s1979_s16 + $0x268] sm:$0xff] %vm150_vm0, %v889_v59  ;;  %v2692_v59 = vmax.f32 %v1690_v61, %v1694_v63 }
 0x13b   : > { %1227 = vrot.lane.b32.xlu1 %v2632_v31, %s1722_s12  ;;  %1194 = vrot.lane.b32.xlu0 %v2638_v41, %s1722_s12 }
 0x13d   : > { %v803_v19 = vpop.permute.xlu1 %802  ;;  %v801_v38 = vpop.permute.xlu0 %800  ;;  %1229 = vrot.lane.b32.xlu2 %v2647_v44, %s1722_s12 }
 0x13e   : > { %v812_v46 = vmax.f32 %v2254_v58, %v803_v19  ;;  %v811_v39 = vmax.f32 %v2260_v53, %v801_v38  ;;  %v2674_v53 = vmax.f32 %v1689_v43, %v1693_v48 }
 0x13f   : > { %v916_v58 = vpop.permute.xlu2 %915 }
 0x140   : > { %1555 = vst.msk [vmem:[%s1979_s16 + $0x230] sm:$0xff] %vm150_vm0, %v812_v46  ;;  %v927_v6 = vmax.f32 %v2350_v60, %v916_v58 }
 0x141   : > { %1554 = vst.msk [vmem:[%s1979_s16 + $0x228] sm:$0xff] %vm150_vm0, %v811_v39 }
 0x142   : > { %1589 = vst.msk [vmem:[%s1979_s16 + $0x280] sm:$0xff] %vm150_vm0, %v927_v6 }
 0x143   : > { %1233 = vrot.lane.b32.xlu1 %v2659_v40, %s1722_s12  ;;  %1231 = vrot.lane.b32.xlu0 %v2665_v50, %s1722_s12 }
 0x145   : > { %v840_v33 = vpop.permute.xlu1 %839  ;;  %v838_v8 = vpop.permute.xlu0 %837  ;;  %1266 = vrot.lane.b32.xlu2 %v2674_v53, %s1722_s12 }
 0x146   : > { %v850_v60 = vmax.f32 %v2281_v4, %v840_v33  ;;  %v849_v15 = vmax.f32 %v2287_v62, %v838_v8  ;;  %v2701_v62 = vmax.f32 %v1692_v20, %v1696_v21 }
 0x147   : > { %v922_v4 = vpop.permute.xlu2 %921 }
 0x148   : > { %1566 = vst.msk [vmem:[%s1979_s16 + $0x248] sm:$0xff] %vm150_vm0, %v850_v60  ;;  %v930_v19 = vmax.f32 %v2377_v11, %v922_v4 }
 0x149   : > { %1565 = vst.msk [vmem:[%s1979_s16 + $0x240] sm:$0xff] %vm150_vm0, %v849_v15 }
 0x14a   : > { %1592 = vst.msk [vmem:[%s1979_s16 + $0x298] sm:$0x3f] %vm154_vm1, %v930_v19 }
 0x14b   : > { %1270 = vrot.lane.b32.xlu1 %v2686_v49, %s1722_s12  ;;  %1268 = vrot.lane.b32.xlu0 %v2692_v59, %s1722_s12 }
 0x14d   : > { %v877_v27 = vpop.permute.xlu1 %876  ;;  %v844_v46 = vpop.permute.xlu0 %843  ;;  %1272 = vrot.lane.b32.xlu2 %v2701_v62, %s1722_s12 }
 0x14e   : > { %v888_v28 = vmax.f32 %v2308_v18, %v877_v27  ;;  %v852_v38 = vmax.f32 %v2314_v9, %v844_v46 }
 0x14f   : > { %v959_v11 = vpop.permute.xlu2 %958 }
 0x150   : > { %1577 = vst.msk [vmem:[%s1979_s16 + $0x260] sm:$0xff] %vm150_vm0, %v888_v28  ;;  %v968_v39 = vmax.f32 %v2404_v36, %v959_v11 }
 0x151   : > { %1568 = vst.msk [vmem:[%s1979_s16 + $0x258] sm:$0x3f] %vm154_vm1, %v852_v38 }
 0x152   : > { %1603 = vst.msk [vmem:[%s1979_s16 + $0x2b0] sm:$0xff] %vm150_vm0, %v968_v39 }
 0x155   : > { %v883_v43 = vpop.permute.xlu1 %882  ;;  %v881_v48 = vpop.permute.xlu0 %880 }
 0x156   : > { %v891_v18 = vmax.f32 %v2335_v30, %v883_v43  ;;  %v890_v9 = vmax.f32 %v2341_v24, %v881_v48 }
 0x157   : > { %v996_v58 = vpop.permute.xlu2 %995 }
 0x158   : > { %1580 = vst.msk [vmem:[%s1979_s16 + $0x278] sm:$0x3f] %vm154_vm1, %v891_v18  ;;  %v1006_v6 = vmax.f32 %v2431_v56, %v996_v58 }
 0x159   : > { %1579 = vst.msk [vmem:[%s1979_s16 + $0x270] sm:$0xff] %vm150_vm0, %v890_v9 }
 0x15a   : > { %1614 = vst.msk [vmem:[%s1979_s16 + $0x2c8] sm:$0xff] %vm150_vm0, %v1006_v6 }
 0x15d   : > { %v920_v36 = vpop.permute.xlu1 %919  ;;  %v918_v30 = vpop.permute.xlu0 %917 }
 0x15e   : > { %v929_v54 = vmax.f32 %v2362_v45, %v920_v36  ;;  %v928_v35 = vmax.f32 %v2368_v37, %v918_v30 }
 0x15f   : > { %v1033_v24 = vpop.permute.xlu2 %1032 }
 0x160   : > { %1591 = vst.msk [vmem:[%s1979_s16 + $0x290] sm:$0xff] %vm150_vm0, %v929_v54  ;;  %v1044_v33 = vmax.f32 %v2458_v34, %v1033_v24 }
 0x161   : > { %1590 = vst.msk [vmem:[%s1979_s16 + $0x288] sm:$0xff] %vm150_vm0, %v928_v35 }
 0x162   : > { %1625 = vst.msk [vmem:[%s1979_s16 + $0x2e0] sm:$0xff] %vm150_vm0, %v1044_v33 }
 0x165   : > { %v957_v56 = vpop.permute.xlu1 %956  ;;  %v955_v45 = vpop.permute.xlu0 %954 }
 0x166   : > { %v967_v61 = vmax.f32 %v2389_v57, %v957_v56  ;;  %v966_v63 = vmax.f32 %v2395_v51, %v955_v45 }
 0x167   : > { %v1039_v37 = vpop.permute.xlu2 %1038 }
 0x168   : > { %1602 = vst.msk [vmem:[%s1979_s16 + $0x2a8] sm:$0xff] %vm150_vm0, %v967_v61  ;;  %v1047_v60 = vmax.f32 %v2485_v2, %v1039_v37 }
 0x169   : > { %1601 = vst.msk [vmem:[%s1979_s16 + $0x2a0] sm:$0xff] %vm150_vm0, %v966_v63 }
 0x16a   : > { %1628 = vst.msk [vmem:[%s1979_s16 + $0x2f8] sm:$0x3f] %vm154_vm1, %v1047_v60 }
 0x16d   : > { %v994_v34 = vpop.permute.xlu1 %993  ;;  %v961_v57 = vpop.permute.xlu0 %960 }
 0x16e   : > { %v1005_v8 = vmax.f32 %v2416_v10, %v994_v34  ;;  %v969_v15 = vmax.f32 %v2422_v0, %v961_v57 }
 0x16f   : > { %v1076_v51 = vpop.permute.xlu2 %1075 }
 0x170   : > { %1613 = vst.msk [vmem:[%s1979_s16 + $0x2c0] sm:$0xff] %vm150_vm0, %v1005_v8  ;;  %v1085_v20 = vmax.f32 %v2512_v42, %v1076_v51 }
 0x171   : > { %1604 = vst.msk [vmem:[%s1979_s16 + $0x2b8] sm:$0x3f] %vm154_vm1, %v969_v15 }
 0x172   : > { %1639 = vst.msk [vmem:[%s1979_s16 + $0x310] sm:$0xff] %vm150_vm0, %v1085_v20 }
 0x175   : > { %v1000_v2 = vpop.permute.xlu1 %999  ;;  %v998_v10 = vpop.permute.xlu0 %997 }
 0x176   : > { %v1008_v21 = vmax.f32 %v2443_v12, %v1000_v2  ;;  %v1007_v4 = vmax.f32 %v2449_v25, %v998_v10 }
 0x177   : > { %v1113_v0 = vpop.permute.xlu2 %1112 }
 0x178   : > { %1616 = vst.msk [vmem:[%s1979_s16 + $0x2d8] sm:$0x3f] %vm154_vm1, %v1008_v21  ;;  %v1123_v19 = vmax.f32 %v2539_v16, %v1113_v0 }
 0x179   : > { %1615 = vst.msk [vmem:[%s1979_s16 + $0x2d0] sm:$0xff] %vm150_vm0, %v1007_v4 }
 0x17a   : > { %1650 = vst.msk [vmem:[%s1979_s16 + $0x328] sm:$0xff] %vm150_vm0, %v1123_v19 }
 0x17d   : > { %v1037_v42 = vpop.permute.xlu1 %1036  ;;  %v1035_v12 = vpop.permute.xlu0 %1034 }
 0x17e   : > { %v1046_v27 = vmax.f32 %v2470_v17, %v1037_v42  ;;  %v1045_v28 = vmax.f32 %v2476_v47, %v1035_v12 }
 0x17f   : > { %v1150_v25 = vpop.permute.xlu2 %1149 }
 0x180   : > { %1627 = vst.msk [vmem:[%s1979_s16 + $0x2f0] sm:$0xff] %vm150_vm0, %v1046_v27  ;;  %v1161_v46 = vmax.f32 %v2566_v52, %v1150_v25 }
 0x181   : > { %1626 = vst.msk [vmem:[%s1979_s16 + $0x2e8] sm:$0xff] %vm150_vm0, %v1045_v28 }
 0x182   : > { %1661 = vst.msk [vmem:[%s1979_s16 + $0x340] sm:$0xff] %vm150_vm0, %v1161_v46 }
 0x185   : > { %v1074_v16 = vpop.permute.xlu1 %1073  ;;  %v1072_v17 = vpop.permute.xlu0 %1071 }
 0x186   : > { %v1084_v38 = vmax.f32 %v2497_v29, %v1074_v16  ;;  %v1083_v11 = vmax.f32 %v2503_v7, %v1072_v17 }
 0x187   : > { %v1156_v47 = vpop.permute.xlu2 %1155 }
 0x188   : > { %1638 = vst.msk [vmem:[%s1979_s16 + $0x308] sm:$0xff] %vm150_vm0, %v1084_v38  ;;  %v1164_v39 = vmax.f32 %v2593_v26, %v1156_v47 }
 0x189   : > { %1637 = vst.msk [vmem:[%s1979_s16 + $0x300] sm:$0xff] %vm150_vm0, %v1083_v11 }
 0x18a   : > { %1664 = vst.msk [vmem:[%s1979_s16 + $0x358] sm:$0x3f] %vm154_vm1, %v1164_v39 }
 0x18d   : > { %v1111_v52 = vpop.permute.xlu1 %1110  ;;  %v1078_v29 = vpop.permute.xlu0 %1077 }
 0x18e   : > { %v1122_v43 = vmax.f32 %v2524_v1, %v1111_v52  ;;  %v1086_v18 = vmax.f32 %v2530_v5, %v1078_v29 }
 0x18f   : > { %v1193_v7 = vpop.permute.xlu2 %1192 }
 0x190   : > { %1649 = vst.msk [vmem:[%s1979_s16 + $0x320] sm:$0xff] %vm150_vm0, %v1122_v43  ;;  %v1202_v48 = vmax.f32 %v2620_v55, %v1193_v7 }
 0x191   : > { %1640 = vst.msk [vmem:[%s1979_s16 + $0x318] sm:$0x3f] %vm154_vm1, %v1086_v18 }
 0x192   : > { %1675 = vst.msk [vmem:[%s1979_s16 + $0x370] sm:$0xff] %vm150_vm0, %v1202_v48 }
 0x195   : > { %v1117_v26 = vpop.permute.xlu1 %1116  ;;  %v1115_v1 = vpop.permute.xlu0 %1114 }
 0x196   : > { %v1125_v9 = vmax.f32 %v2551_v3, %v1117_v26  ;;  %v1124_v58 = vmax.f32 %v2557_v14, %v1115_v1 }
 0x197   : > { %v1230_v5 = vpop.permute.xlu2 %1229 }
 0x198   : > { %1652 = vst.msk [vmem:[%s1979_s16 + $0x338] sm:$0x3f] %vm154_vm1, %v1125_v9  ;;  %v1240_v6 = vmax.f32 %v2647_v44, %v1230_v5 }
 0x199   : > { %1651 = vst.msk [vmem:[%s1979_s16 + $0x330] sm:$0xff] %vm150_vm0, %v1124_v58 }
 0x19a   : > { %1686 = vst.msk [vmem:[%s1979_s16 + $0x388] sm:$0xff] %vm150_vm0, %v1240_v6 }
 0x19d   : > { %v1154_v55 = vpop.permute.xlu1 %1153  ;;  %v1152_v3 = vpop.permute.xlu0 %1151 }
 0x19e   : > { %v1163_v36 = vmax.f32 %v2578_v13, %v1154_v55  ;;  %v1162_v54 = vmax.f32 %v2584_v23, %v1152_v3 }
 0x19f   : > { %v1267_v14 = vpop.permute.xlu2 %1266 }
 0x1a0   : > { %1663 = vst.msk [vmem:[%s1979_s16 + $0x350] sm:$0xff] %vm150_vm0, %v1163_v36  ;;  %v1278_v30 = vmax.f32 %v2674_v53, %v1267_v14 }
 0x1a1   : > { %1662 = vst.msk [vmem:[%s1979_s16 + $0x348] sm:$0xff] %vm150_vm0, %v1162_v54 }
 0x1a2   : > { %1697 = vst.msk [vmem:[%s1979_s16 + $0x3a0] sm:$0xff] %vm150_vm0, %v1278_v30 }
 0x1a5   : > { %v1191_v44 = vpop.permute.xlu1 %1190  ;;  %v1189_v24 = vpop.permute.xlu0 %1188 }
 0x1a6   : > { %v1201_v35 = vmax.f32 %v2605_v22, %v1191_v44  ;;  %v1200_v13 = vmax.f32 %v2611_v32, %v1189_v24 }
 0x1a7   : > { %v1273_v23 = vpop.permute.xlu2 %1272 }
 0x1a8   : > { %1674 = vst.msk [vmem:[%s1979_s16 + $0x368] sm:$0xff] %vm150_vm0, %v1201_v35  ;;  %v1281_v33 = vmax.f32 %v2701_v62, %v1273_v23 }
 0x1a9   : > { %1673 = vst.msk [vmem:[%s1979_s16 + $0x360] sm:$0xff] %vm150_vm0, %v1200_v13 }
 0x1aa   : > { %1700 = vst.msk [vmem:[%s1979_s16 + $0x3b8] sm:$0x3f] %vm154_vm1, %v1281_v33 }
 0x1ad   : > { %v1228_v53 = vpop.permute.xlu1 %1227  ;;  %v1195_v22 = vpop.permute.xlu0 %1194 }
 0x1ae   : > { %v1239_v56 = vmax.f32 %v2632_v31, %v1228_v53  ;;  %v1203_v61 = vmax.f32 %v2638_v41, %v1195_v22 }
 0x1b0   : > { %1685 = vst.msk [vmem:[%s1979_s16 + $0x380] sm:$0xff] %vm150_vm0, %v1239_v56 }
 0x1b1   : > { %1676 = vst.msk [vmem:[%s1979_s16 + $0x378] sm:$0x3f] %vm154_vm1, %v1203_v61 }
 0x1b5   : > { %v1234_v32 = vpop.permute.xlu1 %1233  ;;  %v1232_v63 = vpop.permute.xlu0 %1231 }
 0x1b6   : > { %v1242_v45 = vmax.f32 %v2659_v40, %v1234_v32  ;;  %v1241_v62 = vmax.f32 %v2665_v50, %v1232_v63 }
 0x1b8   : > { %1688 = vst.msk [vmem:[%s1979_s16 + $0x398] sm:$0x3f] %vm154_vm1, %v1242_v45 }
 0x1b9   : > { %1687 = vst.msk [vmem:[%s1979_s16 + $0x390] sm:$0xff] %vm150_vm0, %v1241_v62 }
 0x1bd   : > { %v1271_v37 = vpop.permute.xlu1 %1270  ;;  %v1269_v60 = vpop.permute.xlu0 %1268 }
 0x1be   : > { %v1280_v31 = vmax.f32 %v2686_v49, %v1271_v37  ;;  %v1279_v41 = vmax.f32 %v2692_v59, %v1269_v60 }
 0x1c0   : > { %1699 = vst.msk [vmem:[%s1979_s16 + $0x3b0] sm:$0xff] %vm150_vm0, %v1280_v31 }
 0x1c1   : > { %1698 = vst.msk [vmem:[%s1979_s16 + $0x3a8] sm:$0xff] %vm150_vm0, %v1279_v41 }
 0x1c2 PF: > { %s11_s6 = sadd.s32 1, %s1720_s6  }
 0x1c3   : > { %p8_p4 = scmp.ge.s32.totalorder %s11_s6, 4  }
 0x1c5   :  { %10 = sbr.rel (!%p8_p4) target bundleno = 1 (0x1), region = 142 }

// kernel: net_forward.18
= control target key start
LH: loop header
LB: loop body
LE: loop exit
PB: predicated region body
PF: predicated region fallthrough
CT: control target
= control target key end

     0   :  { %s520_s6 = smov 0   ;;  %s651_s0 = inlined_call_operand.vmem [shape: f32[2,22,11,256], index: 0, kind: input, shape index: {}]   ;;  %s652_s1 = inlined_call_operand.vmem [shape: f32[2,11,11,128], index: 1, kind: output, shape index: {}]  }
   0x1 LB: > { %s379_s7 = sadd.s32 4294967295, %s508_s6   ;;  %p383_p0 = scmp.ge.s32.totalorder %s508_s6, 1  ;;  %s508_s6 = sphi %s520_s6, %s11_s6  }
   0x2   : > { %p87_p1 = scmp.lt.s32.totalorder %s508_s6, 3 }
   0x4   : > { %p88_p2 = pnand %p383_p0, %p87_p1 }
   0x5   : > { %p107_p3 = scmp.lt.s32.totalorder (!%p88_p2), %s379_s7, 1 }
   0x6   : > { %91 = sbr.rel (%p88_p2) target bundleno = 53 (0x35), region = 24 }
   0xb   : > { %s654_s7 = smov (!%p107_p3, %s379_s7), 1 }
   0xc   : > { %s492_s8 = smul.u32 704, %s654_s7 }
   0xd   : > { %s493_s12 = smul.u32 176, %s654_s7 }
   0xe   : > { %s531_s11 = scalar_lea.vmem %s651_s0, %s492_s8 }
   0xf   : > { %v117_v0 = vld [vmem:[%s531_s11] sm:$0xff]  ;;  %v118_v1 = vld [vmem:[%s531_s11 + $0x8] sm:$0xff]  ;;  %v119_v5 = vld [vmem:[%s531_s11 + $0x10] sm:$0x7]  ;;  %s545_s15 = scalar_lea.vmem %s652_s1, %s493_s12 }
  0x10   : > { %v386_v2 = vld [vmem:[%s531_s11 + $0x20] sm:$0xff]  ;;  %v387_v3 = vld [vmem:[%s531_s11 + $0x28] sm:$0xff]  ;;  %v120_v6 = vld [vmem:[%s531_s11 + $0x18] sm:$0x7] }
  0x11   : > { %v126_v4 = vmax.f32 %v117_v0, %v386_v2  ;;  %v127_v7 = vmax.f32 %v118_v1, %v387_v3  ;;  %v388_v8 = vld [vmem:[%s531_s11 + $0x30] sm:$0x7]  ;;  %v389_v9 = vld [vmem:[%s531_s11 + $0x38] sm:$0x7]  ;;  %v390_v10 = vld [vmem:[%s531_s11 + $0x40] sm:$0xff] }
  0x12   : > { %v128_v11 = vmax.f32 %v119_v5, %v388_v8  ;;  %v129_v12 = vmax.f32 %v120_v6, %v389_v9  ;;  %v391_v13 = vld [vmem:[%s531_s11 + $0x48] sm:$0xff]  ;;  %v394_v14 = vld [vmem:[%s531_s11 + $0x60] sm:$0xff]  ;;  %v392_v19 = vld [vmem:[%s531_s11 + $0x50] sm:$0x7] }
  0x13   : > { %v395_v15 = vld [vmem:[%s531_s11 + $0x68] sm:$0xff]  ;;  %v130_v16 = vmax.f32 %v126_v4, %v127_v7  ;;  %v144_v17 = vmax.f32 %v390_v10, %v394_v14  ;;  %v393_v20 = vld [vmem:[%s531_s11 + $0x58] sm:$0x7]  ;;  %v396_v21 = vld [vmem:[%s531_s11 + $0x70] sm:$0x7] }
  0x14   : > { %v145_v18 = vmax.f32 %v391_v13, %v395_v15  ;;  %v131_v22 = vmax.f32 %v128_v11, %v129_v12  ;;  %v397_v23 = vld [vmem:[%s531_s11 + $0x78] sm:$0x7]  ;;  %v146_v24 = vmax.f32 %v392_v19, %v396_v21  ;;  %v400_v25 = vld [vmem:[%s531_s11 + $0x80] sm:$0xff]  ;;  %v401_v26 = vld [vmem:[%s531_s11 + $0x88] sm:$0xff] }
  0x15   : > { %132 = vst [vmem:[%s545_s15] sm:$0xff] %v130_v16  ;;  %v147_v28 = vmax.f32 %v393_v20, %v397_v23  ;;  %v404_v29 = vld [vmem:[%s531_s11 + $0xa0] sm:$0xff]  ;;  %v405_v30 = vld [vmem:[%s531_s11 + $0xa8] sm:$0xff]  ;;  %v402_v31 = vld [vmem:[%s531_s11 + $0x90] sm:$0x7] }
  0x16   : > { %v148_v27 = vmax.f32 %v144_v17, %v145_v18  ;;  %133 = vst [vmem:[%s545_s15 + $0x8] sm:$0x7] %v131_v22  ;;  %v163_v32 = vmax.f32 %v400_v25, %v404_v29  ;;  %v164_v33 = vmax.f32 %v401_v26, %v405_v30  ;;  %v403_v34 = vld [vmem:[%s531_s11 + $0x98] sm:$0x7]  ;;  %v406_v35 = vld [vmem:[%s531_s11 + $0xb0] sm:$0x7] }
  0x17   : > { %v149_v36 = vmax.f32 %v146_v24, %v147_v28  ;;  %v407_v37 = vld [vmem:[%s531_s11 + $0xb8] sm:$0x7]  ;;  %v165_v38 = vmax.f32 %v402_v31, %v406_v35  ;;  %v410_v39 = vld [vmem:[%s531_s11 + $0xc0] sm:$0xff]  ;;  %v411_v40 = vld [vmem:[%s531_s11 + $0xc8] sm:$0xff] }
  0x18   : > { %398 = vst [vmem:[%s545_s15 + $0x10] sm:$0xff] %v148_v27  ;;  %v167_v41 = vmax.f32 %v163_v32, %v164_v33  ;;  %v166_v42 = vmax.f32 %v403_v34, %v407_v37  ;;  %v414_v43 = vld [vmem:[%s531_s11 + $0xe0] sm:$0xff]  ;;  %v415_v44 = vld [vmem:[%s531_s11 + $0xe8] sm:$0xff]  ;;  %v412_v45 = vld [vmem:[%s531_s11 + $0xd0] sm:$0x7] }
  0x19   : > { %399 = vst [vmem:[%s545_s15 + $0x18] sm:$0x7] %v149_v36  ;;  %v182_v46 = vmax.f32 %v410_v39, %v414_v43  ;;  %v183_v47 = vmax.f32 %v411_v40, %v415_v44  ;;  %v413_v48 = vld [vmem:[%s531_s11 + $0xd8] sm:$0x7]  ;;  %v416_v49 = vld [vmem:[%s531_s11 + $0xf0] sm:$0x7] }
  0x1a   : > { %408 = vst [vmem:[%s545_s15 + $0x20] sm:$0xff] %v167_v41  ;;  %v168_v50 = vmax.f32 %v165_v38, %v166_v42  ;;  %v417_v51 = vld [vmem:[%s531_s11 + $0xf8] sm:$0x7]  ;;  %v184_v52 = vmax.f32 %v412_v45, %v416_v49  ;;  %v420_v53 = vld [vmem:[%s531_s11 + $0x100] sm:$0xff]  ;;  %v421_v54 = vld [vmem:[%s531_s11 + $0x108] sm:$0xff] }
  0x1b   : > { %v186_v55 = vmax.f32 %v182_v46, %v183_v47  ;;  %v185_v56 = vmax.f32 %v413_v48, %v417_v51  ;;  %v424_v57 = vld [vmem:[%s531_s11 + $0x120] sm:$0xff]  ;;  %v425_v58 = vld [vmem:[%s531_s11 + $0x128] sm:$0xff]  ;;  %v422_v59 = vld [vmem:[%s531_s11 + $0x110] sm:$0x7] }
  0x1c   : > { %409 = vst [vmem:[%s545_s15 + $0x28] sm:$0x7] %v168_v50  ;;  %v201_v60 = vmax.f32 %v420_v53, %v424_v57  ;;  %v202_v61 = vmax.f32 %v421_v54, %v425_v58  ;;  %v423_v62 = vld [vmem:[%s531_s11 + $0x118] sm:$0x7]  ;;  %v426_v63 = vld [vmem:[%s531_s11 + $0x130] sm:$0x7] }
  0x1d   : > { %418 = vst [vmem:[%s545_s15 + $0x30] sm:$0xff] %v186_v55  ;;  %v187_v0 = vmax.f32 %v184_v52, %v185_v56  ;;  %v427_v1 = vld [vmem:[%s531_s11 + $0x138] sm:$0x7]  ;;  %v203_v2 = vmax.f32 %v422_v59, %v426_v63  ;;  %v430_v3 = vld [vmem:[%s531_s11 + $0x140] sm:$0xff]  ;;  %v431_v4 = vld [vmem:[%s531_s11 + $0x148] sm:$0xff] }
  0x1e   : > { %v205_v5 = vmax.f32 %v201_v60, %v202_v61  ;;  %v204_v6 = vmax.f32 %v423_v62, %v427_v1  ;;  %v434_v7 = vld [vmem:[%s531_s11 + $0x160] sm:$0xff]  ;;  %v435_v8 = vld [vmem:[%s531_s11 + $0x168] sm:$0xff]  ;;  %v432_v9 = vld [vmem:[%s531_s11 + $0x150] sm:$0x7] }
  0x1f   : > { %419 = vst [vmem:[%s545_s15 + $0x38] sm:$0x7] %v187_v0  ;;  %v220_v10 = vmax.f32 %v430_v3, %v434_v7  ;;  %v221_v11 = vmax.f32 %v431_v4, %v435_v8  ;;  %v433_v12 = vld [vmem:[%s531_s11 + $0x158] sm:$0x7]  ;;  %v436_v13 = vld [vmem:[%s531_s11 + $0x170] sm:$0x7] }
  0x20   : > { %428 = vst [vmem:[%s545_s15 + $0x40] sm:$0xff] %v205_v5  ;;  %v206_v14 = vmax.f32 %v203_v2, %v204_v6  ;;  %v437_v15 = vld [vmem:[%s531_s11 + $0x178] sm:$0x7]  ;;  %v222_v16 = vmax.f32 %v432_v9, %v436_v13  ;;  %v440_v17 = vld [vmem:[%s531_s11 + $0x180] sm:$0xff]  ;;  %v441_v18 = vld [vmem:[%s531_s11 + $0x188] sm:$0xff] }
  0x21   : > { %v224_v19 = vmax.f32 %v220_v10, %v221_v11  ;;  %v223_v20 = vmax.f32 %v433_v12, %v437_v15  ;;  %v444_v21 = vld [vmem:[%s531_s11 + $0x1a0] sm:$0xff]  ;;  %v445_v22 = vld [vmem:[%s531_s11 + $0x1a8] sm:$0xff]  ;;  %v442_v23 = vld [vmem:[%s531_s11 + $0x190] sm:$0x7] }
  0x22   : > { %429 = vst [vmem:[%s545_s15 + $0x48] sm:$0x7] %v206_v14  ;;  %v239_v24 = vmax.f32 %v440_v17, %v444_v21  ;;  %v240_v25 = vmax.f32 %v441_v18, %v445_v22  ;;  %v443_v26 = vld [vmem:[%s531_s11 + $0x198] sm:$0x7]  ;;  %v446_v27 = vld [vmem:[%s531_s11 + $0x1b0] sm:$0x7] }
  0x23   : > { %438 = vst [vmem:[%s545_s15 + $0x50] sm:$0xff] %v224_v19  ;;  %v225_v28 = vmax.f32 %v222_v16, %v223_v20  ;;  %v447_v29 = vld [vmem:[%s531_s11 + $0x1b8] sm:$0x7]  ;;  %v241_v30 = vmax.f32 %v442_v23, %v446_v27  ;;  %v450_v31 = vld [vmem:[%s531_s11 + $0x1c0] sm:$0xff]  ;;  %v451_v32 = vld [vmem:[%s531_s11 + $0x1c8] sm:$0xff] }
  0x24   : > { %v243_v33 = vmax.f32 %v239_v24, %v240_v25  ;;  %v242_v34 = vmax.f32 %v443_v26, %v447_v29  ;;  %v454_v35 = vld [vmem:[%s531_s11 + $0x1e0] sm:$0xff]  ;;  %v455_v36 = vld [vmem:[%s531_s11 + $0x1e8] sm:$0xff]  ;;  %v452_v37 = vld [vmem:[%s531_s11 + $0x1d0] sm:$0x7] }
  0x25   : > { %439 = vst [vmem:[%s545_s15 + $0x58] sm:$0x7] %v225_v28  ;;  %v258_v38 = vmax.f32 %v450_v31, %v454_v35  ;;  %v259_v39 = vmax.f32 %v451_v32, %v455_v36  ;;  %v453_v40 = vld [vmem:[%s531_s11 + $0x1d8] sm:$0x7]  ;;  %v456_v41 = vld [vmem:[%s531_s11 + $0x1f0] sm:$0x7] }
  0x26   : > { %448 = vst [vmem:[%s545_s15 + $0x60] sm:$0xff] %v243_v33  ;;  %v244_v42 = vmax.f32 %v241_v30, %v242_v34  ;;  %v457_v43 = vld [vmem:[%s531_s11 + $0x1f8] sm:$0x7]  ;;  %v260_v44 = vmax.f32 %v452_v37, %v456_v41  ;;  %v460_v45 = vld [vmem:[%s531_s11 + $0x200] sm:$0xff]  ;;  %v461_v46 = vld [vmem:[%s531_s11 + $0x208] sm:$0xff] }
  0x27   : > { %v262_v47 = vmax.f32 %v258_v38, %v259_v39  ;;  %v261_v48 = vmax.f32 %v453_v40, %v457_v43  ;;  %v464_v49 = vld [vmem:[%s531_s11 + $0x220] sm:$0xff]  ;;  %v465_v50 = vld [vmem:[%s531_s11 + $0x228] sm:$0xff]  ;;  %v462_v51 = vld [vmem:[%s531_s11 + $0x210] sm:$0x7] }
  0x28   : > { %449 = vst [vmem:[%s545_s15 + $0x68] sm:$0x7] %v244_v42  ;;  %v277_v52 = vmax.f32 %v460_v45, %v464_v49  ;;  %v278_v53 = vmax.f32 %v461_v46, %v465_v50  ;;  %v463_v54 = vld [vmem:[%s531_s11 + $0x218] sm:$0x7]  ;;  %v466_v55 = vld [vmem:[%s531_s11 + $0x230] sm:$0x7] }
  0x29   : > { %458 = vst [vmem:[%s545_s15 + $0x70] sm:$0xff] %v262_v47  ;;  %v263_v56 = vmax.f32 %v260_v44, %v261_v48  ;;  %v467_v57 = vld [vmem:[%s531_s11 + $0x238] sm:$0x7]  ;;  %v279_v58 = vmax.f32 %v462_v51, %v466_v55  ;;  %v470_v59 = vld [vmem:[%s531_s11 + $0x240] sm:$0xff]  ;;  %v471_v60 = vld [vmem:[%s531_s11 + $0x248] sm:$0xff] }
  0x2a   : > { %v281_v61 = vmax.f32 %v277_v52, %v278_v53  ;;  %v280_v62 = vmax.f32 %v463_v54, %v467_v57  ;;  %v474_v63 = vld [vmem:[%s531_s11 + $0x260] sm:$0xff]  ;;  %v475_v0 = vld [vmem:[%s531_s11 + $0x268] sm:$0xff]  ;;  %v472_v1 = vld [vmem:[%s531_s11 + $0x250] sm:$0x7] }
  0x2b   : > { %459 = vst [vmem:[%s545_s15 + $0x78] sm:$0x7] %v263_v56  ;;  %v296_v2 = vmax.f32 %v470_v59, %v474_v63  ;;  %v297_v3 = vmax.f32 %v471_v60, %v475_v0  ;;  %v473_v4 = vld [vmem:[%s531_s11 + $0x258] sm:$0x7]  ;;  %v476_v5 = vld [vmem:[%s531_s11 + $0x270] sm:$0x7] }
  0x2c   : > { %468 = vst [vmem:[%s545_s15 + $0x80] sm:$0xff] %v281_v61  ;;  %v282_v6 = vmax.f32 %v279_v58, %v280_v62  ;;  %v477_v7 = vld [vmem:[%s531_s11 + $0x278] sm:$0x7]  ;;  %v298_v8 = vmax.f32 %v472_v1, %v476_v5  ;;  %v480_v9 = vld [vmem:[%s531_s11 + $0x280] sm:$0xff]  ;;  %v481_v10 = vld [vmem:[%s531_s11 + $0x288] sm:$0xff] }
  0x2d   : > { %v300_v11 = vmax.f32 %v296_v2, %v297_v3  ;;  %v299_v12 = vmax.f32 %v473_v4, %v477_v7  ;;  %v484_v13 = vld [vmem:[%s531_s11 + $0x2a0] sm:$0xff]  ;;  %v485_v14 = vld [vmem:[%s531_s11 + $0x2a8] sm:$0xff]  ;;  %v482_v15 = vld [vmem:[%s531_s11 + $0x290] sm:$0x7] }
  0x2e   : > { %469 = vst [vmem:[%s545_s15 + $0x88] sm:$0x7] %v282_v6  ;;  %v315_v16 = vmax.f32 %v480_v9, %v484_v13  ;;  %v316_v17 = vmax.f32 %v481_v10, %v485_v14  ;;  %v483_v18 = vld [vmem:[%s531_s11 + $0x298] sm:$0x7]  ;;  %v486_v19 = vld [vmem:[%s531_s11 + $0x2b0] sm:$0x7] }
  0x2f   : > { %478 = vst [vmem:[%s545_s15 + $0x90] sm:$0xff] %v300_v11  ;;  %v301_v20 = vmax.f32 %v298_v8, %v299_v12  ;;  %v487_v21 = vld [vmem:[%s531_s11 + $0x2b8] sm:$0x7]  ;;  %v317_v22 = vmax.f32 %v482_v15, %v486_v19 }
  0x30   : > { %v319_v23 = vmax.f32 %v315_v16, %v316_v17  ;;  %v318_v24 = vmax.f32 %v483_v18, %v487_v21 }
  0x31   : > { %479 = vst [vmem:[%s545_s15 + $0x98] sm:$0x7] %v301_v20 }
  0x32   : > { %488 = vst [vmem:[%s545_s15 + $0xa0] sm:$0xff] %v319_v23  ;;  %v320_v25 = vmax.f32 %v317_v22, %v318_v24 }
  0x34   : > { %489 = vst [vmem:[%s545_s15 + $0xa8] sm:$0x7] %v320_v25 }
  0x35 PF: > { %s11_s6 = sadd.s32 1, %s508_s6  }
  0x36   : > { %p8_p4 = scmp.ge.s32.totalorder %s11_s6, 4  }
  0x38   :  { %10 = sbr.rel (!%p8_p4) target bundleno = 1 (0x1), region = 85 }

// kernel: net_forward.17
= control target key start
LH: loop header
LB: loop body
LE: loop exit
PB: predicated region body
PF: predicated region fallthrough
CT: control target
= control target key end

     0   :  { %s944_s12 = smov 0   ;;  %s1447_s0 = inlined_call_operand.vmem [shape: f32[2,24,24,128], index: 0, kind: input, shape index: {}]   ;;  %s1448_s1 = inlined_call_operand.vmem [shape: f32[9,128,128], index: 1, kind: input, shape index: {}]   ;;  %s1449_s2 = inlined_call_operand.vmem [shape: f32[1,128], index: 2, kind: input, shape index: {}]   ;;  %s1450_s3 = inlined_call_operand.vmem [shape: f32[2,22,22,128], index: 3, kind: output, shape index: {}]  }
   0x1 LB: > { %s703_s13 = sadd.s32 4294967295, %s918_s12   ;;  %p707_p0 = scmp.ge.s32.totalorder %s918_s12, 1  ;;  %s918_s12 = sphi %s944_s12, %s13_s12  }
   0x2   : > { %p137_p1 = scmp.lt.s32.totalorder %s918_s12, 3 }
   0x4   : > { %p138_p2 = pnand %p707_p0, %p137_p1 }
   0x5   : > { %p161_p3 = scmp.lt.s32.totalorder (!%p138_p2), %s703_s13, 1  ;;  %s967_s24 = smov (!%p138_p2), 0  }
   0x6   : > { %141 = sbr.rel (%p138_p2) target bundleno = 263 (0x107), region = 32 }
   0xb   : > { %v955_v0 = vld [vmem:[%s1449_s2] sm:$0x1]  ;;  %s1452_s13 = smov (!%p161_p3, %s703_s13), 1 }
   0xc   : > { %s890_s16 = smul.u32 576, %s1452_s13 }
   0xd   : > { %s891_s17 = smul.u32 528, %s1452_s13 }
   0xe   : > { %s960_s20 = scalar_lea.vmem %s1447_s0, %s890_s16 }
   0xf   : > { %s965_s23 = scalar_lea.vmem %s1450_s3, %s891_s17 }
  0x10 LB: >> { %v725_v1 = vld [vmem:[%s1448_s1 + $0xf8] sm:$0xff]  ;;  %v724_v4 = vld [vmem:[%s1448_s1 + $0xf0] sm:$0xff]  ;;  %v723_v8 = vld [vmem:[%s1448_s1 + $0xe8] sm:$0xff]  ;;  %s178_s18 = smul.u32 24, %s922_s24  ;;  %s177_s24 = sadd.s32 1, %s922_s24   ;;  %s922_s24 = sphi %s967_s24, %s177_s24  }
  0x11   : >> { %v198_v2 = vld [vmem:[%s1448_s1 + $0x78] sm:$0xff]  ;;  %219 = vmatpush.msra.mxu0 %v725_v1  ;;  %v197_v5 = vld [vmem:[%s1448_s1 + $0x70] sm:$0xff]  ;;  %v196_v9 = vld [vmem:[%s1448_s1 + $0x68] sm:$0xff]  ;;  %p174_p4 = scmp.ge.s32.totalorder %s177_s24, 22  }
  0x12   : >> { %v741_v3 = vld [vmem:[%s1448_s1 + $0x178] sm:$0xff]  ;;  %245 = vmatpush.msra.mxu1 %v198_v2  ;;  %v740_v6 = vld [vmem:[%s1448_s1 + $0x170] sm:$0xff]  ;;  %v739_v10 = vld [vmem:[%s1448_s1 + $0x168] sm:$0xff]  ;;  %s1201_s11 = scalar_lea.vmem %s960_s20, %s178_s18 }
  0x13   : >> { %291 = vmatpush.msra.mxu2 %v741_v3  ;;  %v760_v7 = vld [vmem:[%s1448_s1 + $0x1f8] sm:$0xff]  ;;  %220 = vmatpush.msra.mxu0 %v724_v4  ;;  %v759_v11 = vld [vmem:[%s1448_s1 + $0x1f0] sm:$0xff]  ;;  %v722_v12 = vld [vmem:[%s1448_s1 + $0xe0] sm:$0xff] }
  0x14   : >> { %246 = vmatpush.msra.mxu1 %v197_v5  ;;  %343 = vmatpush.msra.mxu3 %v760_v7  ;;  %v195_v13 = vld [vmem:[%s1448_s1 + $0x60] sm:$0xff]  ;;  %v758_v15 = vld [vmem:[%s1448_s1 + $0x1e8] sm:$0xff]  ;;  %v721_v16 = vld [vmem:[%s1448_s1 + $0xd8] sm:$0xff] }
  0x15   : >> { %292 = vmatpush.msra.mxu2 %v740_v6  ;;  %221 = vmatpush.msra.mxu0 %v723_v8  ;;  %v738_v14 = vld [vmem:[%s1448_s1 + $0x160] sm:$0xff]  ;;  %v194_v17 = vld [vmem:[%s1448_s1 + $0x58] sm:$0xff]  ;;  %v720_v20 = vld [vmem:[%s1448_s1 + $0xd0] sm:$0xff] }
  0x16   : >> { %247 = vmatpush.msra.mxu1 %v196_v9  ;;  %344 = vmatpush.msra.mxu3 %v759_v11  ;;  %v737_v18 = vld [vmem:[%s1448_s1 + $0x158] sm:$0xff]  ;;  %v757_v19 = vld [vmem:[%s1448_s1 + $0x1e0] sm:$0xff]  ;;  %v193_v21 = vld [vmem:[%s1448_s1 + $0x50] sm:$0xff] }
  0x17   : >> { %293 = vmatpush.msra.mxu2 %v739_v10  ;;  %222 = vmatpush.msra.mxu0 %v722_v12  ;;  %v736_v22 = vld [vmem:[%s1448_s1 + $0x150] sm:$0xff]  ;;  %v756_v23 = vld [vmem:[%s1448_s1 + $0x1d8] sm:$0xff]  ;;  %v719_v24 = vld [vmem:[%s1448_s1 + $0xc8] sm:$0xff] }
  0x18   : >> { %248 = vmatpush.msra.mxu1 %v195_v13  ;;  %345 = vmatpush.msra.mxu3 %v758_v15  ;;  %v192_v25 = vld [vmem:[%s1448_s1 + $0x48] sm:$0xff]  ;;  %v755_v27 = vld [vmem:[%s1448_s1 + $0x1d0] sm:$0xff]  ;;  %v718_v28 = vld [vmem:[%s1448_s1 + $0xc0] sm:$0xff] }
  0x19   : >> { %294 = vmatpush.msra.mxu2 %v738_v14  ;;  %223 = vmatpush.msra.mxu0 %v721_v16  ;;  %v735_v26 = vld [vmem:[%s1448_s1 + $0x148] sm:$0xff]  ;;  %v191_v29 = vld [vmem:[%s1448_s1 + $0x40] sm:$0xff]  ;;  %v717_v32 = vld [vmem:[%s1448_s1 + $0xb8] sm:$0xff] }
  0x1a   : >> { %249 = vmatpush.msra.mxu1 %v194_v17  ;;  %346 = vmatpush.msra.mxu3 %v757_v19  ;;  %v734_v30 = vld [vmem:[%s1448_s1 + $0x140] sm:$0xff]  ;;  %v754_v31 = vld [vmem:[%s1448_s1 + $0x1c8] sm:$0xff]  ;;  %v190_v33 = vld [vmem:[%s1448_s1 + $0x38] sm:$0xff] }
  0x1b   : >> { %295 = vmatpush.msra.mxu2 %v737_v18  ;;  %224 = vmatpush.msra.mxu0 %v720_v20  ;;  %v733_v34 = vld [vmem:[%s1448_s1 + $0x138] sm:$0xff]  ;;  %v753_v35 = vld [vmem:[%s1448_s1 + $0x1c0] sm:$0xff]  ;;  %v716_v36 = vld [vmem:[%s1448_s1 + $0xb0] sm:$0xff] }
  0x1c   : >> { %250 = vmatpush.msra.mxu1 %v193_v21  ;;  %347 = vmatpush.msra.mxu3 %v756_v23  ;;  %v189_v37 = vld [vmem:[%s1448_s1 + $0x30] sm:$0xff]  ;;  %v752_v39 = vld [vmem:[%s1448_s1 + $0x1b8] sm:$0xff]  ;;  %v715_v40 = vld [vmem:[%s1448_s1 + $0xa8] sm:$0xff] }
  0x1d   : >> { %296 = vmatpush.msra.mxu2 %v736_v22  ;;  %225 = vmatpush.msra.mxu0 %v719_v24  ;;  %v732_v38 = vld [vmem:[%s1448_s1 + $0x130] sm:$0xff]  ;;  %v188_v41 = vld [vmem:[%s1448_s1 + $0x28] sm:$0xff]  ;;  %v714_v44 = vld [vmem:[%s1448_s1 + $0xa0] sm:$0xff] }
  0x1e   : >> { %251 = vmatpush.msra.mxu1 %v192_v25  ;;  %348 = vmatpush.msra.mxu3 %v755_v27  ;;  %v731_v42 = vld [vmem:[%s1448_s1 + $0x128] sm:$0xff]  ;;  %v751_v43 = vld [vmem:[%s1448_s1 + $0x1b0] sm:$0xff]  ;;  %v187_v45 = vld [vmem:[%s1448_s1 + $0x20] sm:$0xff] }
  0x1f   : >> { %297 = vmatpush.msra.mxu2 %v735_v26  ;;  %226 = vmatpush.msra.mxu0 %v718_v28  ;;  %v730_v46 = vld [vmem:[%s1448_s1 + $0x120] sm:$0xff]  ;;  %v750_v47 = vld [vmem:[%s1448_s1 + $0x1a8] sm:$0xff]  ;;  %v713_v48 = vld [vmem:[%s1448_s1 + $0x98] sm:$0xff] }
  0x20   : >> { %252 = vmatpush.msra.mxu1 %v191_v29  ;;  %349 = vmatpush.msra.mxu3 %v754_v31  ;;  %v186_v49 = vld [vmem:[%s1448_s1 + $0x18] sm:$0xff]  ;;  %v749_v51 = vld [vmem:[%s1448_s1 + $0x1a0] sm:$0xff]  ;;  %v712_v52 = vld [vmem:[%s1448_s1 + $0x90] sm:$0xff] }
  0x21   : >> { %298 = vmatpush.msra.mxu2 %v734_v30  ;;  %227 = vmatpush.msra.mxu0 %v717_v32  ;;  %v729_v50 = vld [vmem:[%s1448_s1 + $0x118] sm:$0xff]  ;;  %v185_v53 = vld [vmem:[%s1448_s1 + $0x10] sm:$0xff]  ;;  %v711_v56 = vld [vmem:[%s1448_s1 + $0x88] sm:$0xff] }
  0x22   : >> { %253 = vmatpush.msra.mxu1 %v190_v33  ;;  %350 = vmatpush.msra.mxu3 %v753_v35  ;;  %v728_v54 = vld [vmem:[%s1448_s1 + $0x110] sm:$0xff]  ;;  %v748_v55 = vld [vmem:[%s1448_s1 + $0x198] sm:$0xff]  ;;  %v184_v57 = vld [vmem:[%s1448_s1 + $0x8] sm:$0xff] }
  0x23   : >> { %299 = vmatpush.msra.mxu2 %v733_v34  ;;  %228 = vmatpush.msra.mxu0 %v716_v36  ;;  %v727_v58 = vld [vmem:[%s1448_s1 + $0x108] sm:$0xff]  ;;  %v747_v59 = vld [vmem:[%s1448_s1 + $0x190] sm:$0xff]  ;;  %v710_v60 = vld [vmem:[%s1448_s1 + $0x80] sm:$0xff] }
  0x24   : >> { %254 = vmatpush.msra.mxu1 %v189_v37  ;;  %351 = vmatpush.msra.mxu3 %v752_v39  ;;  %v183_v61 = vld [vmem:[%s1448_s1] sm:$0xff]  ;;  %v746_v63 = vld [vmem:[%s1448_s1 + $0x188] sm:$0xff]  ;;  %v779_v1 = vld [vmem:[%s1448_s1 + $0x278] sm:$0xff] }
  0x25   : >> { %300 = vmatpush.msra.mxu2 %v732_v38  ;;  %229 = vmatpush.msra.mxu0 %v715_v40  ;;  %v726_v62 = vld [vmem:[%s1448_s1 + $0x100] sm:$0xff]  ;;  %v798_v2 = vld [vmem:[%s1448_s1 + $0x2f8] sm:$0xff]  ;;  %v778_v5 = vld [vmem:[%s1448_s1 + $0x270] sm:$0xff] }
  0x26   : >> { %255 = vmatpush.msra.mxu1 %v188_v41  ;;  %352 = vmatpush.msra.mxu3 %v751_v43  ;;  %v817_v3 = vld [vmem:[%s1448_s1 + $0x378] sm:$0xff]  ;;  %v745_v4 = vld [vmem:[%s1448_s1 + $0x180] sm:$0xff]  ;;  %v797_v6 = vld [vmem:[%s1448_s1 + $0x2f0] sm:$0xff] }
  0x27   : >> { %301 = vmatpush.msra.mxu2 %v731_v42  ;;  %230 = vmatpush.msra.mxu0 %v714_v44  ;;  %v816_v7 = vld [vmem:[%s1448_s1 + $0x370] sm:$0xff]  ;;  %v836_v8 = vld [vmem:[%s1448_s1 + $0x3f8] sm:$0xff]  ;;  %v777_v9 = vld [vmem:[%s1448_s1 + $0x268] sm:$0xff] }
  0x28   : >> { %256 = vmatpush.msra.mxu1 %v187_v45  ;;  %353 = vmatpush.msra.mxu3 %v750_v47  ;;  %v796_v10 = vld [vmem:[%s1448_s1 + $0x2e8] sm:$0xff]  ;;  %v835_v12 = vld [vmem:[%s1448_s1 + $0x3f0] sm:$0xff]  ;;  %v776_v13 = vld [vmem:[%s1448_s1 + $0x260] sm:$0xff] }
  0x29   : >> { %302 = vmatpush.msra.mxu2 %v730_v46  ;;  %231 = vmatpush.msra.mxu0 %v713_v48  ;;  %v815_v11 = vld [vmem:[%s1448_s1 + $0x368] sm:$0xff]  ;;  %v795_v14 = vld [vmem:[%s1448_s1 + $0x2e0] sm:$0xff]  ;;  %v775_v19 = vld [vmem:[%s1448_s1 + $0x258] sm:$0xff] }
  0x2a   : >> { %257 = vmatpush.msra.mxu1 %v186_v49  ;;  %354 = vmatpush.msra.mxu3 %v749_v51  ;;  %v814_v15 = vld [vmem:[%s1448_s1 + $0x360] sm:$0xff]  ;;  %v834_v16 = vld [vmem:[%s1448_s1 + $0x3e8] sm:$0xff]  ;;  %v794_v20 = vld [vmem:[%s1448_s1 + $0x2d8] sm:$0xff] }
  0x2b   : >> { %303 = vmatpush.msra.mxu2 %v729_v50  ;;  %232 = vmatpush.msra.mxu0 %v712_v52  ;;  %v199_v17 = vld [vmem:[%s1201_s11 + $0x1] sm:$0xff]  ;;  %v813_v21 = vld [vmem:[%s1448_s1 + $0x358] sm:$0xff]  ;;  %v774_v25 = vld [vmem:[%s1448_s1 + $0x250] sm:$0xff] }
  0x2c   : >> { %258 = vmatpush.msra.mxu1 %v185_v53  ;;  %355 = vmatpush.msra.mxu3 %v748_v55  ;;  %v271_v18 = vld [vmem:[%s1201_s11 + $0x2] sm:$0xff]  ;;  %v742_v24 = vld [vmem:[%s1201_s11 + $0x18] sm:$0xff]  ;;  %v793_v26 = vld [vmem:[%s1448_s1 + $0x2d0] sm:$0xff] }
  0x2d   : >> { %304 = vmatpush.msra.mxu2 %v728_v54  ;;  %233 = vmatpush.msra.mxu0 %v711_v56  ;;  %v833_v22 = vld [vmem:[%s1448_s1 + $0x3e0] sm:$0xff]  ;;  %v812_v27 = vld [vmem:[%s1448_s1 + $0x350] sm:$0xff]  ;;  %v832_v28 = vld [vmem:[%s1448_s1 + $0x3d8] sm:$0xff] }
  0x2e   : >> { %259 = vmatpush.msra.mxu1 %v184_v57  ;;  %356 = vmatpush.msra.mxu3 %v747_v59  ;;  %v180_v23 = vld [vmem:[%s1201_s11] sm:$0xff]  ;;  %v773_v29 = vld [vmem:[%s1448_s1 + $0x248] sm:$0xff]  ;;  %v831_v32 = vld [vmem:[%s1448_s1 + $0x3d0] sm:$0xff] }
  0x2f   : >> { %305 = vmatpush.msra.mxu2 %v727_v58  ;;  %234 = vmatpush.msra.mxu0 %v710_v60  ;;  %v792_v30 = vld [vmem:[%s1448_s1 + $0x2c8] sm:$0xff]  ;;  %v772_v33 = vld [vmem:[%s1448_s1 + $0x240] sm:$0xff]  ;;  %v771_v39 = vld [vmem:[%s1448_s1 + $0x238] sm:$0xff] }
  0x30   : >> { %260 = vmatpush.msra.mxu1 %v183_v61  ;;  %357 = vmatpush.msra.mxu3 %v746_v63  ;;  %v811_v31 = vld [vmem:[%s1448_s1 + $0x348] sm:$0xff]  ;;  %v791_v34 = vld [vmem:[%s1448_s1 + $0x2c0] sm:$0xff]  ;;  %v790_v40 = vld [vmem:[%s1448_s1 + $0x2b8] sm:$0xff] }
  0x31   : >> { %306 = vmatpush.msra.mxu2 %v726_v62  ;;  %392 = vmatpush.msrb.mxu0 %v779_v1  ;;  %v810_v35 = vld [vmem:[%s1448_s1 + $0x340] sm:$0xff]  ;;  %v830_v36 = vld [vmem:[%s1448_s1 + $0x3c8] sm:$0xff]  ;;  %v809_v41 = vld [vmem:[%s1448_s1 + $0x338] sm:$0xff] }
  0x32   : >> { %441 = vmatpush.msrb.mxu1 %v798_v2  ;;  %358 = vmatpush.msra.mxu3 %v745_v4  ;;  %v200_v37 = vld [vmem:[%s1201_s11 + $0x9] sm:$0xff]  ;;  %v829_v42 = vld [vmem:[%s1448_s1 + $0x3c0] sm:$0xff]  ;;  %v828_v48 = vld [vmem:[%s1448_s1 + $0x3b8] sm:$0xff] }
  0x33   : >> { %493 = vmatpush.msrb.mxu2 %v817_v3  ;;  %393 = vmatpush.msrb.mxu0 %v778_v5  ;;  %v272_v38 = vld [vmem:[%s1201_s11 + $0xa] sm:$0xff]  ;;  %v743_v44 = vld [vmem:[%s1201_s11 + $0x20] sm:$0xff]  ;;  %v273_v58 = vld [vmem:[%s1201_s11 + $0x12] sm:$0x3f] }
  0x34   : >> { %442 = vmatpush.msrb.mxu1 %v797_v6  ;;  %542 = vmatpush.msrb.mxu3 %v836_v8  ;;  %v181_v43 = vld [vmem:[%s1201_s11 + $0x8] sm:$0xff]  ;;  %v770_v45 = vld [vmem:[%s1448_s1 + $0x230] sm:$0xff]  ;;  %v768_v53 = vld [vmem:[%s1448_s1 + $0x220] sm:$0xff] }
  0x35   : >> { %494 = vmatpush.msrb.mxu2 %v816_v7  ;;  %394 = vmatpush.msrb.mxu0 %v777_v9  ;;  %v789_v46 = vld [vmem:[%s1448_s1 + $0x2b0] sm:$0xff]  ;;  %v769_v49 = vld [vmem:[%s1448_s1 + $0x228] sm:$0xff]  ;;  %v787_v54 = vld [vmem:[%s1448_s1 + $0x2a0] sm:$0xff] }
  0x36   : >> { %443 = vmatpush.msrb.mxu1 %v796_v10  ;;  %543 = vmatpush.msrb.mxu3 %v835_v12  ;;  %v808_v47 = vld [vmem:[%s1448_s1 + $0x330] sm:$0xff]  ;;  %v788_v50 = vld [vmem:[%s1448_s1 + $0x2a8] sm:$0xff]  ;;  %v806_v55 = vld [vmem:[%s1448_s1 + $0x320] sm:$0xff] }
  0x37   : >> { %495 = vmatpush.msrb.mxu2 %v815_v11  ;;  %395 = vmatpush.msrb.mxu0 %v776_v13  ;;  %v807_v51 = vld [vmem:[%s1448_s1 + $0x328] sm:$0xff]  ;;  %v827_v52 = vld [vmem:[%s1448_s1 + $0x3b0] sm:$0xff]  ;;  %v767_v59 = vld [vmem:[%s1448_s1 + $0x218] sm:$0xff] }
  0x38   : >> { %444 = vmatpush.msrb.mxu1 %v795_v14  ;;  %544 = vmatpush.msrb.mxu3 %v834_v16  ;;  %v826_v56 = vld [vmem:[%s1448_s1 + $0x3a8] sm:$0xff]  ;;  %v201_v57 = vld [vmem:[%s1201_s11 + $0x11] sm:$0x3f]  ;;  %v786_v60 = vld [vmem:[%s1448_s1 + $0x298] sm:$0xff] }
  0x39   : >> { %496 = vmatpush.msrb.mxu2 %v814_v15  ;;  %235 = vmatmul.f32.vlgmr.msra.gmra.mxu0 %v199_v17  ;;  %v805_v61 = vld [vmem:[%s1448_s1 + $0x318] sm:$0xff]  ;;  %v825_v62 = vld [vmem:[%s1448_s1 + $0x3a0] sm:$0xff]  ;;  %v182_v63 = vld [vmem:[%s1201_s11 + $0x10] sm:$0x3f] }
  0x3a   : >> { %307 = vmatmul.f32.vlgmr.msra.gmra.mxu2 %v271_v18  ;;  %396 = vmatpush.msrb.mxu0 %v775_v19  ;;  %v744_v1 = vld [vmem:[%s1201_s11 + $0x28] sm:$0x3f]  ;;  %v766_v2 = vld [vmem:[%s1448_s1 + $0x210] sm:$0xff]  ;;  %v824_v5 = vld [vmem:[%s1448_s1 + $0x398] sm:$0xff] }
  0x3b   : >> { %445 = vmatpush.msrb.mxu1 %v794_v20  ;;  %497 = vmatpush.msrb.mxu2 %v813_v21  ;;  %v785_v3 = vld [vmem:[%s1448_s1 + $0x290] sm:$0xff]  ;;  %v765_v6 = vld [vmem:[%s1448_s1 + $0x208] sm:$0xff]  ;;  %v764_v10 = vld [vmem:[%s1448_s1 + $0x200] sm:$0xff] }
  0x3c   : >> { %545 = vmatpush.msrb.mxu3 %v833_v22  ;;  %261 = vmatmul.f32.vlgmr.msra.gmra.mxu1 %v180_v23  ;;  %v804_v4 = vld [vmem:[%s1448_s1 + $0x310] sm:$0xff]  ;;  %v784_v7 = vld [vmem:[%s1448_s1 + $0x288] sm:$0xff]  ;;  %v783_v11 = vld [vmem:[%s1448_s1 + $0x280] sm:$0xff] }
  0x3d   : >> { %359 = vmatmul.f32.vlgmr.msra.gmra.mxu3 %v742_v24  ;;  %397 = vmatpush.msrb.mxu0 %v774_v25  ;;  %v803_v8 = vld [vmem:[%s1448_s1 + $0x308] sm:$0xff]  ;;  %v823_v9 = vld [vmem:[%s1448_s1 + $0x390] sm:$0xff]  ;;  %v802_v12 = vld [vmem:[%s1448_s1 + $0x300] sm:$0xff] }
  0x3e   : >> { %446 = vmatpush.msrb.mxu1 %v793_v26  ;;  %498 = vmatpush.msrb.mxu2 %v812_v27  ;;  %v822_v13 = vld [vmem:[%s1448_s1 + $0x388] sm:$0xff]  ;;  %v761_v14 = vld [vmem:[%s1201_s11 + $0x19] sm:$0xff]  ;;  %v799_v15 = vld [vmem:[%s1201_s11 + $0x30] sm:$0xff] }
  0x3f   : >> { %546 = vmatpush.msrb.mxu3 %v832_v28  ;;  %398 = vmatpush.msrb.mxu0 %v773_v29  ;;  %v855_v16 = vld [vmem:[%s1448_s1 + $0x478] sm:$0xff]  ;;  %v821_v17 = vld [vmem:[%s1448_s1 + $0x380] sm:$0xff]  ;;  %v854_v20 = vld [vmem:[%s1448_s1 + $0x470] sm:$0xff] }
  0x40   : >> { %447 = vmatpush.msrb.mxu1 %v792_v30  ;;  %499 = vmatpush.msrb.mxu2 %v811_v31  ;;  %v780_v18 = vld [vmem:[%s1201_s11 + $0x1a] sm:$0xff]  ;;  %v818_v19 = vld [vmem:[%s1201_s11 + $0x31] sm:$0xff]  ;;  %v853_v21 = vld [vmem:[%s1448_s1 + $0x468] sm:$0xff] }
  0x41   : >> { %547 = vmatpush.msrb.mxu3 %v831_v32  ;;  %399 = vmatpush.msrb.mxu0 %v772_v33  ;;  %v852_v22 = vld [vmem:[%s1448_s1 + $0x460] sm:$0xff]  ;;  %v800_v24 = vld [vmem:[%s1201_s11 + $0x38] sm:$0xff]  ;;  %v850_v28 = vld [vmem:[%s1448_s1 + $0x450] sm:$0xff] }
  0x42   : >> { %448 = vmatpush.msrb.mxu1 %v791_v34  ;;  %500 = vmatpush.msrb.mxu2 %v810_v35  ;;  %v762_v23 = vld [vmem:[%s1201_s11 + $0x21] sm:$0xff]  ;;  %v851_v25 = vld [vmem:[%s1448_s1 + $0x458] sm:$0xff]  ;;  %v763_v31 = vld [vmem:[%s1201_s11 + $0x29] sm:$0x3f] }
  0x43   : >> { %548 = vmatpush.msrb.mxu3 %v830_v36  ;;  %238 = vmatmul.f32.gmra.mxu0 %v200_v37  ;;  %v781_v26 = vld [vmem:[%s1201_s11 + $0x22] sm:$0xff]  ;;  %v819_v27 = vld [vmem:[%s1201_s11 + $0x39] sm:$0xff]  ;;  %v782_v34 = vld [vmem:[%s1201_s11 + $0x2a] sm:$0x3f] }
  0x44   : >> { %310 = vmatmul.f32.gmra.mxu2 %v272_v38  ;;  %400 = vmatpush.msrb.mxu0 %v771_v39  ;;  %v849_v29 = vld [vmem:[%s1448_s1 + $0x448] sm:$0xff]  ;;  %v848_v30 = vld [vmem:[%s1448_s1 + $0x440] sm:$0xff]  ;;  %v847_v33 = vld [vmem:[%s1448_s1 + $0x438] sm:$0xff] }
  0x45   : >> { %449 = vmatpush.msrb.mxu1 %v790_v40  ;;  %501 = vmatpush.msrb.mxu2 %v809_v41  ;;  %v801_v32 = vld [vmem:[%s1201_s11 + $0x40] sm:$0x3f]  ;;  %v846_v36 = vld [vmem:[%s1448_s1 + $0x430] sm:$0xff]  ;;  %v845_v37 = vld [vmem:[%s1448_s1 + $0x428] sm:$0xff] }
  0x46   : >> { %549 = vmatpush.msrb.mxu3 %v829_v42  ;;  %264 = vmatmul.f32.gmra.mxu1 %v181_v43  ;;  %v820_v35 = vld [vmem:[%s1201_s11 + $0x41] sm:$0x3f]  ;;  %v843_v39 = vld [vmem:[%s1448_s1 + $0x418] sm:$0xff]  ;;  %v842_v40 = vld [vmem:[%s1448_s1 + $0x410] sm:$0xff] }
  0x47   : >> { %362 = vmatmul.f32.gmra.mxu3 %v743_v44  ;;  %401 = vmatpush.msrb.mxu0 %v770_v45  ;;  %v844_v38 = vld [vmem:[%s1448_s1 + $0x420] sm:$0xff]  ;;  %v841_v41 = vld [vmem:[%s1448_s1 + $0x408] sm:$0xff]  ;;  %v837_v43 = vld [vmem:[%s1201_s11 + $0x32] sm:$0xff] }
  0x48   : >> { %450 = vmatpush.msrb.mxu1 %v789_v46  ;;  %502 = vmatpush.msrb.mxu2 %v808_v47  ;;  %v840_v42 = vld [vmem:[%s1448_s1 + $0x400] sm:$0xff] }
  0x49   : >> { %550 = vmatpush.msrb.mxu3 %v828_v48  ;;  %402 = vmatpush.msrb.mxu0 %v769_v49  ;;  %v838_v44 = vld [vmem:[%s1201_s11 + $0x3a] sm:$0xff]  ;;  %v839_v45 = vld [vmem:[%s1201_s11 + $0x42] sm:$0x3f]  ;;  %s629_s11 = scalar_lea.vmem %s965_s23, %s178_s18 }
  0x4a   : >> { %451 = vmatpush.msrb.mxu1 %v788_v50  ;;  %503 = vmatpush.msrb.mxu2 %v807_v51 }
  0x4b   : >> { %551 = vmatpush.msrb.mxu3 %v827_v52  ;;  %403 = vmatpush.msrb.mxu0 %v768_v53 }
  0x4c   : >> { %452 = vmatpush.msrb.mxu1 %v787_v54  ;;  %504 = vmatpush.msrb.mxu2 %v806_v55 }
  0x4d   : >> { %552 = vmatpush.msrb.mxu3 %v826_v56  ;;  %241 = vmatmul.f32.gmra.mxu0 %v201_v57 }
  0x4e   : >> { %313 = vmatmul.f32.gmra.mxu2 %v273_v58  ;;  %404 = vmatpush.msrb.mxu0 %v767_v59 }
  0x4f   : >> { %453 = vmatpush.msrb.mxu1 %v786_v60  ;;  %505 = vmatpush.msrb.mxu2 %v805_v61 }
  0x50   : >> { %553 = vmatpush.msrb.mxu3 %v825_v62  ;;  %267 = vmatmul.f32.gmra.mxu1 %v182_v63 }
  0x51   : >> { %365 = vmatmul.f32.gmra.mxu3 %v744_v1  ;;  %405 = vmatpush.msrb.mxu0 %v766_v2 }
  0x52   : >> { %454 = vmatpush.msrb.mxu1 %v785_v3  ;;  %506 = vmatpush.msrb.mxu2 %v804_v4 }
  0x53   : >> { %554 = vmatpush.msrb.mxu3 %v824_v5  ;;  %406 = vmatpush.msrb.mxu0 %v765_v6 }
  0x54   : >> { %455 = vmatpush.msrb.mxu1 %v784_v7  ;;  %507 = vmatpush.msrb.mxu2 %v803_v8 }
  0x55   : >> { %555 = vmatpush.msrb.mxu3 %v823_v9  ;;  %407 = vmatpush.msrb.mxu0 %v764_v10 }
  0x56   : >> { %456 = vmatpush.msrb.mxu1 %v783_v11  ;;  %508 = vmatpush.msrb.mxu2 %v802_v12 }
  0x57   : >> { %556 = vmatpush.msrb.mxu3 %v822_v13  ;;  %408 = vmatmul.f32.vlgmr.msrb.gmra.mxu0 %v761_v14 }
  0x58   : >> { %509 = vmatmul.f32.vlgmr.msrb.gmra.mxu2 %v799_v15  ;;  %591 = vmatpush.msra.mxu0 %v855_v16 }
  0x59   : >> { %858 = vmatpush.msra.mxu1 %v855_v16  ;;  %859 = vmatpush.msra.mxu2 %v855_v16 }
  0x5a   : >> { %557 = vmatpush.msrb.mxu3 %v821_v17  ;;  %457 = vmatmul.f32.vlgmr.msrb.gmra.mxu1 %v780_v18 }
  0x5b   : >> { %558 = vmatmul.f32.vlgmr.msrb.gmra.mxu3 %v818_v19  ;;  %592 = vmatpush.msra.mxu0 %v854_v20 }
  0x5c   : >> { %860 = vmatpush.msra.mxu1 %v854_v20  ;;  %861 = vmatpush.msra.mxu2 %v854_v20 }
  0x5d   : >> { %593 = vmatpush.msra.mxu0 %v853_v21 }
  0x5e   : >> { %862 = vmatpush.msra.mxu1 %v853_v21  ;;  %863 = vmatpush.msra.mxu2 %v853_v21 }
  0x5f   : >> { %594 = vmatpush.msra.mxu0 %v852_v22 }
  0x60   : >> { %864 = vmatpush.msra.mxu1 %v852_v22  ;;  %865 = vmatpush.msra.mxu2 %v852_v22 }
  0x61   : >> { %411 = vmatmul.f32.gmra.mxu0 %v762_v23  ;;  %512 = vmatmul.f32.gmra.mxu2 %v800_v24  ;;  %v621_v23 = vperm.slane %v955_v0, 0 }
  0x62   : >> { %595 = vmatpush.msra.mxu0 %v851_v25  ;;  %866 = vmatpush.msra.mxu1 %v851_v25 }
  0x63   : >> { %867 = vmatpush.msra.mxu2 %v851_v25  ;;  %460 = vmatmul.f32.gmra.mxu1 %v781_v26 }
  0x64   : >> { %561 = vmatmul.f32.gmra.mxu3 %v819_v27  ;;  %596 = vmatpush.msra.mxu0 %v850_v28 }
  0x65   : >> { %868 = vmatpush.msra.mxu1 %v850_v28  ;;  %869 = vmatpush.msra.mxu2 %v850_v28 }
  0x66   : >> { %597 = vmatpush.msra.mxu0 %v849_v29 }
  0x67   : >> { %870 = vmatpush.msra.mxu1 %v849_v29  ;;  %871 = vmatpush.msra.mxu2 %v849_v29 }
  0x68   : >> { %598 = vmatpush.msra.mxu0 %v848_v30 }
  0x69   : >> { %872 = vmatpush.msra.mxu1 %v848_v30  ;;  %873 = vmatpush.msra.mxu2 %v848_v30 }
  0x6a   : >> { %414 = vmatmul.f32.gmra.mxu0 %v763_v31  ;;  %515 = vmatmul.f32.gmra.mxu2 %v801_v32 }
  0x6b   : >> { %599 = vmatpush.msra.mxu0 %v847_v33  ;;  %874 = vmatpush.msra.mxu1 %v847_v33 }
  0x6c   : >> { %875 = vmatpush.msra.mxu2 %v847_v33  ;;  %463 = vmatmul.f32.gmra.mxu1 %v782_v34 }
  0x6d   : >> { %564 = vmatmul.f32.gmra.mxu3 %v820_v35  ;;  %600 = vmatpush.msra.mxu0 %v846_v36 }
  0x6e   : >> { %876 = vmatpush.msra.mxu1 %v846_v36  ;;  %877 = vmatpush.msra.mxu2 %v846_v36 }
  0x6f   : >> { %601 = vmatpush.msra.mxu0 %v845_v37 }
  0x70   : >> { %878 = vmatpush.msra.mxu1 %v845_v37  ;;  %879 = vmatpush.msra.mxu2 %v845_v37 }
  0x71   : >> { %602 = vmatpush.msra.mxu0 %v844_v38 }
  0x72   : >> { %880 = vmatpush.msra.mxu1 %v844_v38  ;;  %881 = vmatpush.msra.mxu2 %v844_v38 }
  0x73   : >> { %603 = vmatpush.msra.mxu0 %v843_v39 }
  0x74   : >> { %882 = vmatpush.msra.mxu1 %v843_v39  ;;  %883 = vmatpush.msra.mxu2 %v843_v39 }
  0x75   : >> { %604 = vmatpush.msra.mxu0 %v842_v40 }
  0x76   : >> { %884 = vmatpush.msra.mxu1 %v842_v40  ;;  %885 = vmatpush.msra.mxu2 %v842_v40 }
  0x77   : >> { %605 = vmatpush.msra.mxu0 %v841_v41 }
  0x78   : >> { %886 = vmatpush.msra.mxu1 %v841_v41  ;;  %887 = vmatpush.msra.mxu2 %v841_v41 }
  0x79   : >> { %606 = vmatpush.msra.mxu0 %v840_v42 }
  0x7a   : >> { %888 = vmatpush.msra.mxu1 %v840_v42  ;;  %889 = vmatpush.msra.mxu2 %v840_v42 }
  0x7b   : >> { %607 = vmatmul.f32.vlgmr.msra.gmra.mxu0 %v837_v43  ;;  %610 = vmatmul.f32.vlgmr.msra.gmra.mxu1 %v838_v44 }
  0x7c   : >> { %613 = vmatmul.f32.vlgmr.msra.gmra.mxu2 %v839_v45 }
  0xb6   : >> { %v236_v46 = vpop.f32.mrf.mxu0 }
  0xb9   : >> { %v262_v47 = vpop.f32.mrf.mxu1 }
  0xba   : >> { %v263_v60 = vadd.f32 %v262_v47, %v236_v46 }
  0xbd   : >> { %v308_v48 = vpop.f32.mrf.mxu2 }
  0xbe   : >> { %v317_v1 = vadd.f32 %v308_v48, %v263_v60 }
  0xc0   : >> { %v239_v49 = vpop.f32.mrf.mxu0  ;;  %v360_v50 = vpop.f32.mrf.mxu3 }
  0xc1   : >> { %v369_v6 = vadd.f32 %v360_v50, %v317_v1 }
  0xc3   : >> { %v265_v51 = vpop.f32.mrf.mxu1 }
  0xc4   : >> { %v266_v62 = vadd.f32 %v265_v51, %v239_v49 }
  0xc7   : >> { %v311_v52 = vpop.f32.mrf.mxu2 }
  0xc8   : >> { %v318_v4 = vadd.f32 %v311_v52, %v266_v62 }
  0xca   : >> { %v242_v53 = vpop.f32.mrf.mxu0  ;;  %v363_v54 = vpop.f32.mrf.mxu3 }
  0xcb   : >> { %v370_v7 = vadd.f32 %v363_v54, %v318_v4 }
  0xcd   : >> { %v268_v55 = vpop.f32.mrf.mxu1 }
  0xce   : >> { %v269_v5 = vadd.f32 %v268_v55, %v242_v53 }
  0xd1   : >> { %v314_v56 = vpop.f32.mrf.mxu2 }
  0xd2   : >> { %v319_v10 = vadd.f32 %v314_v56, %v269_v5 }
  0xd4   : >> { %v409_v57 = vpop.f32.mrf.mxu0  ;;  %v366_v58 = vpop.f32.mrf.mxu3 }
  0xd5   : >> { %v418_v8 = vadd.f32 %v409_v57, %v369_v6  ;;  %v371_v16 = vadd.f32 %v366_v58, %v319_v10 }
  0xd7   : >> { %v458_v59 = vpop.f32.mrf.mxu1 }
  0xd8   : >> { %v467_v13 = vadd.f32 %v458_v59, %v418_v8 }
  0xdb   : >> { %v510_v61 = vpop.f32.mrf.mxu2 }
  0xdc   : >> { %v519_v18 = vadd.f32 %v510_v61, %v467_v13 }
  0xde   : >> { %v412_v63 = vpop.f32.mrf.mxu0  ;;  %v559_v2 = vpop.f32.mrf.mxu3 }
  0xdf   : >> { %v419_v11 = vadd.f32 %v412_v63, %v370_v7  ;;  %v568_v21 = vadd.f32 %v559_v2, %v519_v18 }
  0xe0   : >> { %v461_v3 = vpop.f32.mrf.mxu1 }
  0xe1   : >> { %v468_v17 = vadd.f32 %v461_v3, %v419_v11 }
  0xe4   : >> { %v513_v9 = vpop.f32.mrf.mxu2 }
  0xe5   : >> { %v520_v19 = vadd.f32 %v513_v9, %v468_v17 }
  0xe7   : >> { %v415_v12 = vpop.f32.mrf.mxu0  ;;  %v562_v14 = vpop.f32.mrf.mxu3 }
  0xe8   : >> { %v420_v20 = vadd.f32 %v415_v12, %v371_v16  ;;  %v569_v24 = vadd.f32 %v562_v14, %v520_v19 }
  0xe9   : >> { %v464_v15 = vpop.f32.mrf.mxu1 }
  0xea   : >> { %v469_v25 = vadd.f32 %v464_v15, %v420_v20 }
  0xed   : >> { %v516_v22 = vpop.f32.mrf.mxu2 }
  0xee   : >> { %v521_v29 = vadd.f32 %v516_v22, %v469_v25 }
  0xf0   : >> { %v565_v31 = vpop.f32.mrf.mxu3 }
  0xf1   : >> { %v570_v35 = vadd.f32 %v565_v31, %v521_v29 }
  0xf8   : >> { %v608_v26 = vpop.f32.mrf.mxu0  ;;  %v611_v28 = vpop.f32.mrf.mxu1 }
  0xf9   : >> { %v617_v27 = vadd.f32 %v608_v26, %v568_v21  ;;  %v618_v30 = vadd.f32 %v611_v28, %v569_v24 }
  0xfb   : >> { %v623_v32 = vadd.f32 %v621_v23, %v617_v27  ;;  %v624_v33 = vadd.f32 %v621_v23, %v618_v30 }
  0xfd   : >> { %v626_v34 = vmax.f32 %v623_v32, 0.0  ;;  %v627_v36 = vmax.f32 %v624_v33, 0.0 }
  0xff   : >> { %630 = vst [vmem:[%s629_s11] sm:$0xff] %v626_v34  ;;  %v614_v37 = vpop.f32.mrf.mxu2 }
 0x100   : >> { %631 = vst [vmem:[%s629_s11 + $0x8] sm:$0xff] %v627_v36  ;;  %v619_v38 = vadd.f32 %v614_v37, %v570_v35 }
 0x102   : >> { %v625_v39 = vadd.f32 %v621_v23, %v619_v38  ;;  %176 = sbr.rel (!%p174_p4) target bundleno = 16 (0x10), region = 81 }
 0x104   : >> { %v628_v40 = vmax.f32 %v625_v39, 0.0 }
 0x106   : >> { %632 = vst [vmem:[%s629_s11 + $0x10] sm:$0x3f] %v628_v40 }
 0x107 PF: > { %s13_s12 = sadd.s32 1, %s918_s12  }
 0x108   : > { %p10_p5 = scmp.ge.s32.totalorder %s13_s12, 4  }
 0x10a   :  { %12 = sbr.rel (!%p10_p5) target bundleno = 1 (0x1), region = 92 }

// kernel: net_forward.21
= control target key start
LH: loop header
LB: loop body
LE: loop exit
PB: predicated region body
PF: predicated region fallthrough
CT: control target
= control target key end

     0   :  { %v115_v2 = vmov 0.0   ;;  %s194_s0 = inlined_call_operand.vmem [shape: f32[2,128], index: 0, kind: input, shape index: {}]   ;;  %s195_s1 = inlined_call_operand.vmem [shape: f32[128,128], index: 1, kind: input, shape index: {}]   ;;  %s196_s2 = inlined_call_operand.vmem [shape: f32[1,128], index: 2, kind: input, shape index: {}]   ;;  %s197_s3 = inlined_call_operand.hbm [shape: f32[2,128], index: 3, kind: output, shape index: {}]  }
   0x1   :  { %v37_v0 = vld [vmem:[%s195_s1 + $0x78] sm:$0xff]  ;;  %v36_v1 = vld [vmem:[%s195_s1 + $0x70] sm:$0xff]  ;;  %19 = vst [vmem:[#allocation2] sm:$0x3] %v115_v2  ;;  %v35_v3 = vld [vmem:[%s195_s1 + $0x68] sm:$0xff] }
   0x2   :  { %38 = vmatpush.msra.mxu0 %v37_v0  ;;  %v34_v4 = vld [vmem:[%s195_s1 + $0x60] sm:$0xff] }
   0x4   :  { %39 = vmatpush.msra.mxu0 %v36_v1 }
   0x6   :  { %40 = vmatpush.msra.mxu0 %v35_v3 }
   0x7   :  { %8 = vsyncpa [#allocation3], 0  ;;  %v33_v5 = vld [vmem:[%s195_s1 + $0x58] sm:$0xff]  ;;  %v32_v6 = vld [vmem:[%s195_s1 + $0x50] sm:$0xff]  ;;  %s116_s21 = smov [#allocation2]  }
   0x8   :  { %41 = vmatpush.msra.mxu0 %v34_v4  ;;  %v31_v7 = vld [vmem:[%s195_s1 + $0x48] sm:$0xff]  ;;  %v30_v8 = vld [vmem:[%s195_s1 + $0x40] sm:$0xff]  ;;  %v29_v9 = vld [vmem:[%s195_s1 + $0x38] sm:$0xff]  ;;  %s75_s22 = sshll.u32 %s116_s21, 4  ;;  %s76_s22 = int_to_ptr.vmem [resolvable:$true] %s75_s22 }
   0x9   :  { %v28_v10 = vld [vmem:[%s195_s1 + $0x30] sm:$0xff]  ;;  %v27_v11 = vld [vmem:[%s195_s1 + $0x28] sm:$0xff]  ;;  %v26_v12 = vld [vmem:[%s195_s1 + $0x20] sm:$0xff] }
   0xa   :  { %42 = vmatpush.msra.mxu0 %v33_v5  ;;  %v25_v13 = vld [vmem:[%s195_s1 + $0x18] sm:$0xff]  ;;  %v24_v14 = vld [vmem:[%s195_s1 + $0x10] sm:$0xff]  ;;  %v23_v15 = vld [vmem:[%s195_s1 + $0x8] sm:$0xff] }
   0xb   :  { %v22_v16 = vld [vmem:[%s195_s1] sm:$0xff]  ;;  %s77_s1 = sshll.u32 %s197_s3, 4  ;;  %s78_s1 = int_to_ptr.hbm [resolvable:$true] %s77_s1 }
   0xc   :  { %43 = vmatpush.msra.mxu0 %v32_v6  ;;  %v21_v17 = vld [vmem:[%s194_s0] sm:$0x3] }
   0xd   :  { %v20_v18 = vld [vmem:[#allocation2] sm:$0x3] }
   0xe   :  { %44 = vmatpush.msra.mxu0 %v31_v7  ;;  %v88_v21 = vld [vmem:[%s196_s2] ss:$0 sm:$0xff] }
  0x10   :  { %45 = vmatpush.msra.mxu0 %v30_v8 }
  0x12   :  { %46 = vmatpush.msra.mxu0 %v29_v9 }
  0x14   :  { %47 = vmatpush.msra.mxu0 %v28_v10 }
  0x16   :  { %48 = vmatpush.msra.mxu0 %v27_v11 }
  0x18   :  { %49 = vmatpush.msra.mxu0 %v26_v12 }
  0x1a   :  { %50 = vmatpush.msra.mxu0 %v25_v13 }
  0x1c   :  { %51 = vmatpush.msra.mxu0 %v24_v14 }
  0x1e   :  { %52 = vmatpush.msra.mxu0 %v23_v15 }
  0x20   :  { %53 = vmatpush.msra.mxu0 %v22_v16 }
  0x21   :  { %54 = vmatmul.f32.vlgmr.msra.gmra.mxu0 %v21_v17 }
  0x9e   :  { %v55_v19 = vpop.f32.mrf.mxu0 }
  0x9f   :  { %v58_v20 = vadd.f32 %v55_v19, %v20_v18 }
  0xa1   :  { %59 = vst [vmem:[#allocation2] sm:$0x3] %v58_v20 }
  0xa8   :  { %v63_v22 = vld [vmem:[#allocation2] sm:$0x3] }
  0xa9   :  { %v68_v23 = vadd.f32 %v88_v21, %v63_v22 }
  0xab   :  { %69 = vst [vmem:[#allocation2] sm:$0x3] %v68_v23 }
  0xac   :  { %80 = dma.vmem_to_hbm [thread:$0]  %s76_s22, 32, %s78_s1, [#allocation3]  }
  0xad   :  { %113 = dma.done.wait [#allocation3], 32  }
  0xae   :  { %114 = vsyncadd [#allocation3], 4294967264 }
  0xaf   :  { %85 = vsyncpa [#allocation3], 1 }

// kernel: net_forward.20
= control target key start
LH: loop header
LB: loop body
LE: loop exit
PB: predicated region body
PF: predicated region fallthrough
CT: control target
= control target key end

     0   :  { %s428_s1 = inlined_call_operand.vmem [shape: f32[512,128], index: 1, kind: input, shape index: {}]   ;;  %s429_s0 = inlined_call_operand.vmem [shape: f32[2,512], index: 0, kind: input, shape index: {}]   ;;  %s430_s2 = inlined_call_operand.vmem [shape: f32[1,128], index: 2, kind: input, shape index: {}]   ;;  %s431_s3 = inlined_call_operand.vmem [shape: f32[2,128], index: 3, kind: output, shape index: {}]  }
   0x1   :  { %v68_v0 = vld [vmem:[%s428_s1 + $0x178] sm:$0xff]  ;;  %v67_v1 = vld [vmem:[%s428_s1 + $0x170] sm:$0xff]  ;;  %v66_v5 = vld [vmem:[%s428_s1 + $0x168] sm:$0xff] }
   0x2   :  { %v84_v2 = vld [vmem:[%s428_s1 + $0x1f8] sm:$0xff]  ;;  %135 = vmatpush.msra.mxu2 %v68_v0  ;;  %v83_v6 = vld [vmem:[%s428_s1 + $0x1f0] sm:$0xff]  ;;  %v82_v9 = vld [vmem:[%s428_s1 + $0x1e8] sm:$0xff] }
   0x3   :  { %155 = vmatpush.msra.mxu3 %v84_v2  ;;  %v36_v3 = vld [vmem:[%s428_s1 + $0x78] sm:$0xff]  ;;  %v35_v7 = vld [vmem:[%s428_s1 + $0x70] sm:$0xff]  ;;  %v34_v10 = vld [vmem:[%s428_s1 + $0x68] sm:$0xff] }
   0x4   :  { %v52_v4 = vld [vmem:[%s428_s1 + $0xf8] sm:$0xff]  ;;  %95 = vmatpush.msra.mxu0 %v36_v3  ;;  %v51_v8 = vld [vmem:[%s428_s1 + $0xf0] sm:$0xff]  ;;  %136 = vmatpush.msra.mxu2 %v67_v1  ;;  %v65_v11 = vld [vmem:[%s428_s1 + $0x160] sm:$0xff] }
   0x5   :  { %115 = vmatpush.msra.mxu1 %v52_v4  ;;  %156 = vmatpush.msra.mxu3 %v83_v6  ;;  %v50_v12 = vld [vmem:[%s428_s1 + $0xe8] sm:$0xff]  ;;  %v81_v13 = vld [vmem:[%s428_s1 + $0x1e0] sm:$0xff]  ;;  %v64_v16 = vld [vmem:[%s428_s1 + $0x158] sm:$0xff] }
   0x6   :  { %96 = vmatpush.msra.mxu0 %v35_v7  ;;  %137 = vmatpush.msra.mxu2 %v66_v5  ;;  %v33_v14 = vld [vmem:[%s428_s1 + $0x60] sm:$0xff]  ;;  %v80_v17 = vld [vmem:[%s428_s1 + $0x1d8] sm:$0xff]  ;;  %v63_v20 = vld [vmem:[%s428_s1 + $0x150] sm:$0xff]  ;;  %v194_v5 = vmov 0.0  }
   0x7   :  { %116 = vmatpush.msra.mxu1 %v51_v8  ;;  %157 = vmatpush.msra.mxu3 %v82_v9  ;;  %v49_v15 = vld [vmem:[%s428_s1 + $0xe0] sm:$0xff]  ;;  %v32_v18 = vld [vmem:[%s428_s1 + $0x58] sm:$0xff]  ;;  %v79_v21 = vld [vmem:[%s428_s1 + $0x1d0] sm:$0xff]  ;;  %18 = vst [vmem:[%s431_s3] sm:$0x3] %v194_v5 }
   0x8   :  { %97 = vmatpush.msra.mxu0 %v34_v10  ;;  %138 = vmatpush.msra.mxu2 %v65_v11  ;;  %v48_v19 = vld [vmem:[%s428_s1 + $0xd8] sm:$0xff]  ;;  %v31_v22 = vld [vmem:[%s428_s1 + $0x50] sm:$0xff]  ;;  %v62_v24 = vld [vmem:[%s428_s1 + $0x148] sm:$0xff] }
   0x9   :  { %117 = vmatpush.msra.mxu1 %v50_v12  ;;  %158 = vmatpush.msra.mxu3 %v81_v13  ;;  %v47_v23 = vld [vmem:[%s428_s1 + $0xd0] sm:$0xff]  ;;  %v78_v25 = vld [vmem:[%s428_s1 + $0x1c8] sm:$0xff]  ;;  %v61_v28 = vld [vmem:[%s428_s1 + $0x140] sm:$0xff] }
   0xa   :  { %98 = vmatpush.msra.mxu0 %v33_v14  ;;  %139 = vmatpush.msra.mxu2 %v64_v16  ;;  %v30_v26 = vld [vmem:[%s428_s1 + $0x48] sm:$0xff]  ;;  %v77_v29 = vld [vmem:[%s428_s1 + $0x1c0] sm:$0xff]  ;;  %v60_v32 = vld [vmem:[%s428_s1 + $0x138] sm:$0xff] }
   0xb   :  { %118 = vmatpush.msra.mxu1 %v49_v15  ;;  %159 = vmatpush.msra.mxu3 %v80_v17  ;;  %v46_v27 = vld [vmem:[%s428_s1 + $0xc8] sm:$0xff]  ;;  %v29_v30 = vld [vmem:[%s428_s1 + $0x40] sm:$0xff]  ;;  %v76_v33 = vld [vmem:[%s428_s1 + $0x1b8] sm:$0xff] }
   0xc   :  { %99 = vmatpush.msra.mxu0 %v32_v18  ;;  %140 = vmatpush.msra.mxu2 %v63_v20  ;;  %v45_v31 = vld [vmem:[%s428_s1 + $0xc0] sm:$0xff]  ;;  %v28_v34 = vld [vmem:[%s428_s1 + $0x38] sm:$0xff]  ;;  %v59_v36 = vld [vmem:[%s428_s1 + $0x130] sm:$0xff] }
   0xd   :  { %119 = vmatpush.msra.mxu1 %v48_v19  ;;  %160 = vmatpush.msra.mxu3 %v79_v21  ;;  %v44_v35 = vld [vmem:[%s428_s1 + $0xb8] sm:$0xff]  ;;  %v75_v37 = vld [vmem:[%s428_s1 + $0x1b0] sm:$0xff]  ;;  %v58_v40 = vld [vmem:[%s428_s1 + $0x128] sm:$0xff] }
   0xe   :  { %100 = vmatpush.msra.mxu0 %v31_v22  ;;  %141 = vmatpush.msra.mxu2 %v62_v24  ;;  %v27_v38 = vld [vmem:[%s428_s1 + $0x30] sm:$0xff]  ;;  %v74_v41 = vld [vmem:[%s428_s1 + $0x1a8] sm:$0xff]  ;;  %v20_v44 = vld [vmem:[%s429_s0] sm:$0xff] }
   0xf   :  { %120 = vmatpush.msra.mxu1 %v47_v23  ;;  %161 = vmatpush.msra.mxu3 %v78_v25  ;;  %v43_v39 = vld [vmem:[%s428_s1 + $0xb0] sm:$0xff]  ;;  %v26_v42 = vld [vmem:[%s428_s1 + $0x28] sm:$0xff]  ;;  %v57_v45 = vld [vmem:[%s428_s1 + $0x120] sm:$0xff]  ;;  %86 = vst [vmem:[#allocation1] ss:$4 sm:$0xff] %v20_v44 }
  0x10   :  { %101 = vmatpush.msra.mxu0 %v30_v26  ;;  %142 = vmatpush.msra.mxu2 %v61_v28  ;;  %v42_v43 = vld [vmem:[%s428_s1 + $0xa8] sm:$0xff]  ;;  %v73_v46 = vld [vmem:[%s428_s1 + $0x1a0] sm:$0xff]  ;;  %v56_v49 = vld [vmem:[%s428_s1 + $0x118] sm:$0xff] }
  0x11   :  { %121 = vmatpush.msra.mxu1 %v46_v27  ;;  %162 = vmatpush.msra.mxu3 %v77_v29  ;;  %v25_v47 = vld [vmem:[%s428_s1 + $0x20] sm:$0xff]  ;;  %v72_v50 = vld [vmem:[%s428_s1 + $0x198] sm:$0xff]  ;;  %v55_v53 = vld [vmem:[%s428_s1 + $0x110] sm:$0xff] }
  0x12   :  { %102 = vmatpush.msra.mxu0 %v29_v30  ;;  %143 = vmatpush.msra.mxu2 %v60_v32  ;;  %v41_v48 = vld [vmem:[%s428_s1 + $0xa0] sm:$0xff]  ;;  %v24_v51 = vld [vmem:[%s428_s1 + $0x18] sm:$0xff]  ;;  %v71_v54 = vld [vmem:[%s428_s1 + $0x190] sm:$0xff] }
  0x13   :  { %122 = vmatpush.msra.mxu1 %v45_v31  ;;  %163 = vmatpush.msra.mxu3 %v76_v33  ;;  %v40_v52 = vld [vmem:[%s428_s1 + $0x98] sm:$0xff]  ;;  %v23_v55 = vld [vmem:[%s428_s1 + $0x10] sm:$0xff]  ;;  %v54_v57 = vld [vmem:[%s428_s1 + $0x108] sm:$0xff] }
  0x14   :  { %103 = vmatpush.msra.mxu0 %v28_v34  ;;  %144 = vmatpush.msra.mxu2 %v59_v36  ;;  %v39_v56 = vld [vmem:[%s428_s1 + $0x90] sm:$0xff]  ;;  %v70_v58 = vld [vmem:[%s428_s1 + $0x188] sm:$0xff]  ;;  %v53_v61 = vld [vmem:[%s428_s1 + $0x100] sm:$0xff] }
  0x15   :  { %123 = vmatpush.msra.mxu1 %v44_v35  ;;  %164 = vmatpush.msra.mxu3 %v75_v37  ;;  %v22_v59 = vld [vmem:[%s428_s1 + $0x8] sm:$0xff]  ;;  %v69_v62 = vld [vmem:[%s428_s1 + $0x180] sm:$0xff] }
  0x16   :  { %104 = vmatpush.msra.mxu0 %v27_v38  ;;  %145 = vmatpush.msra.mxu2 %v58_v40  ;;  %v38_v60 = vld [vmem:[%s428_s1 + $0x88] sm:$0xff]  ;;  %v89_v63 = vld.sshfl [vmem:[#allocation1 + $0x10] sm:$0xff pattern:$0x73625140]  ;;  %v21_v1 = vld [vmem:[%s428_s1] sm:$0xff] }
  0x17   :  { %124 = vmatpush.msra.mxu1 %v43_v39  ;;  %165 = vmatpush.msra.mxu3 %v74_v41  ;;  %v90_v0 = vld.sshfl [vmem:[#allocation1 + $0x18] sm:$0xff pattern:$0x73625140]  ;;  %v37_v2 = vld [vmem:[%s428_s1 + $0x80] sm:$0xff] }
  0x18   :  { %105 = vmatpush.msra.mxu0 %v26_v42  ;;  %146 = vmatpush.msra.mxu2 %v57_v45  ;;  %v87_v3 = vld.sshfl [vmem:[#allocation1] sm:$0xff pattern:$0x73625140]  ;;  %v88_v4 = vld.sshfl [vmem:[#allocation1 + $0x8] sm:$0xff pattern:$0x73625140] }
  0x19   :  { %125 = vmatpush.msra.mxu1 %v42_v43  ;;  %166 = vmatpush.msra.mxu3 %v73_v46  ;;  %v19_v12 = vld [vmem:[%s431_s3] sm:$0x3] }
  0x1a   :  { %106 = vmatpush.msra.mxu0 %v25_v47  ;;  %147 = vmatpush.msra.mxu2 %v56_v49  ;;  %v193_v15 = vld [vmem:[%s430_s2] ss:$0 sm:$0xff] }
  0x1b   :  { %126 = vmatpush.msra.mxu1 %v41_v48  ;;  %167 = vmatpush.msra.mxu3 %v72_v50 }
  0x1c   :  { %107 = vmatpush.msra.mxu0 %v24_v51  ;;  %148 = vmatpush.msra.mxu2 %v55_v53 }
  0x1d   :  { %127 = vmatpush.msra.mxu1 %v40_v52  ;;  %168 = vmatpush.msra.mxu3 %v71_v54 }
  0x1e   :  { %108 = vmatpush.msra.mxu0 %v23_v55  ;;  %149 = vmatpush.msra.mxu2 %v54_v57 }
  0x1f   :  { %128 = vmatpush.msra.mxu1 %v39_v56  ;;  %169 = vmatpush.msra.mxu3 %v70_v58 }
  0x20   :  { %109 = vmatpush.msra.mxu0 %v22_v59  ;;  %150 = vmatpush.msra.mxu2 %v53_v61 }
  0x21   :  { %129 = vmatpush.msra.mxu1 %v38_v60  ;;  %170 = vmatpush.msra.mxu3 %v69_v62 }
  0x22   :  { %151 = vmatmul.f32.vlgmr.msra.gmra.mxu2 %v89_v63  ;;  %171 = vmatmul.f32.vlgmr.msra.gmra.mxu3 %v90_v0 }
  0x23   :  { %110 = vmatpush.msra.mxu0 %v21_v1  ;;  %130 = vmatpush.msra.mxu1 %v37_v2 }
  0x24   :  { %111 = vmatmul.f32.vlgmr.msra.gmra.mxu0 %v87_v3  ;;  %131 = vmatmul.f32.vlgmr.msra.gmra.mxu1 %v88_v4 }
  0xa1   :  { %v112_v6 = vpop.f32.mrf.mxu0  ;;  %v132_v7 = vpop.f32.mrf.mxu1 }
  0xa2   :  { %v133_v8 = vadd.f32 %v132_v7, %v112_v6 }
  0xa5   :  { %v152_v9 = vpop.f32.mrf.mxu2  ;;  %v172_v10 = vpop.f32.mrf.mxu3 }
  0xa6   :  { %v153_v11 = vadd.f32 %v152_v9, %v133_v8 }
  0xa8   :  { %v173_v13 = vadd.f32 %v172_v10, %v153_v11 }
  0xaa   :  { %v175_v14 = vadd.f32 %v173_v13, %v19_v12 }
  0xac   :  { %176 = vst [vmem:[%s431_s3] sm:$0x3] %v175_v14 }
  0xb3   :  { %v180_v16 = vld [vmem:[%s431_s3] sm:$0x3] }
  0xb4   :  { %v185_v17 = vadd.f32 %v193_v15, %v180_v16 }
  0xb6   :  { %v186_v18 = vmax.f32 %v185_v17, 0.0 }
  0xb8   :  { %187 = vst [vmem:[%s431_s3] sm:$0x3] %v186_v18 }

// kernel: net_forward.19
= control target key start
LH: loop header
LB: loop body
LE: loop exit
PB: predicated region body
PF: predicated region fallthrough
CT: control target
= control target key end

     0   :  { %8 = vsyncpa [#allocation3], 0  ;;  %s1964_s0 = inlined_call_operand.vmem [shape: f32[2,15488], index: 0, kind: input, shape index: {}]   ;;  %s1965_s1 = inlined_call_operand.hbm [shape: f32[15488,512], index: 1, kind: input, shape index: {}]   ;;  %s1966_s2 = inlined_call_operand.vmem [shape: f32[1,512], index: 2, kind: input, shape index: {}]   ;;  %s1967_s3 = inlined_call_operand.vmem [shape: f32[2,512], index: 3, kind: output, shape index: {}]  }
   0x1   :  { %10 = vsyncpa [#allocation3 + $0x1], 0  ;;  %s1426_s12 = smov 0   ;;  %s1428_s13 = smov 0  }
   0x2   :  { %s1430_s14 = smov 0   ;;  %s1432_s15 = smov 0  }
   0x3   :  { %s1434_s16 = smov 0   ;;  %s1436_s17 = smov 0  }
   0x4   :  { %s1438_s18 = smov 0   ;;  %s1440_s19 = smov 0  }
   0x5 LB: > { %s1210_s20 = sadd.s32 4294967295, %s1400_s19   ;;  %s25_s21 = sadd.s32 1, %s1392_s17  ;;  %s1400_s19 = sphi %s1440_s19, %s16_s19   ;;  %s1396_s18 = sphi %s1438_s18, %s1979_s18   ;;  %s1392_s17 = sphi %s1436_s17, %s1978_s17   ;;  %s1388_s16 = sphi %s1434_s16, %s1977_s16   ;;  %s1384_s15 = sphi %s1432_s15, %s1976_s15   ;;  %s1380_s14 = sphi %s1430_s14, %s1975_s14   ;;  %s1376_s13 = sphi %s1428_s13, %s1974_s13   ;;  %s1372_s12 = sphi %s1426_s12, %s1973_s12  }
   0x6   : > { %p26_p0 = scmp.ge.s32.totalorder %s25_s21, 11  ;;  %s28_s22 = sadd.s32 1, %s1396_s18 }
   0x7   : > { %s63_s23 = sadd.s32 1, %s1380_s14  ;;  %p70_p1 = scmp.ne.s32.totalorder %s1380_s14, %s1376_s13 }
   0x8   : > { %s1981_s21 = smov (%p26_p0, %s25_s21), 0  ;;  %s1983_s22 = smov (!%p26_p0, %s28_s22), %s1396_s18 }
   0x9   : > { %s58_s24 = ssub.s32 %s1392_s17, %s1981_s21  ;;  %p71_p2 = scmp.eq.s32.totalorder %s1400_s19, 0 }
   0xa   : > { %p30_p3 = scmp.ge.s32.totalorder %s1983_s22, 2  ;;  %p76_p4 = scmp.ne.s32.totalorder %s1376_s13, %s1372_s12 }
   0xb   : > { %p1477_p5 = por %p71_p2, %p70_p1  ;;  %p77_p6 = scmp.eq.s32.totalorder %s1210_s20, 0 }
   0xc   : > { %s1985_s22 = smov (%p30_p3, %s1983_s22), 0  ;;  %p1235_p8 = scmp.lt.s32.totalorder %s1400_s19, 22 }
   0xd   : > { %1970 = sst [smem:[#allocation5_spill]] %s1985_s22  ;;  %p1483_p7 = por %p77_p6, %p76_p4 }
   0xe   : > { %s59_s27 = ssub.s32 %s1396_s18, %s1985_s22  ;;  %s161_s29 = sand.u32 1, %s1380_s14  }
   0xf   : > { %s60_s28 = sor.u32 %s59_s27, %s58_s24  ;;  %s1227_s30 = smul.u32 2816, %s161_s29 }
  0x10   : > { %p61_p9 = scmp.eq.s32.totalorder %s60_s28, 0  ;;  %s1214_s4 = sshll.u32 %s1396_s18, 1 }
  0x11   : > { %s1226_s6 = smul.u32 704, %s1392_s17  ;;  %s165_s7 = scalar_lea.vmem [#allocation2], %s1227_s30 }
  0x12   : > { %s1493_s5 = scalar_select %p61_p9, %s1380_s14, %s63_s23  }
  0x13   : > { %s176_s8 = sshll.u32 %s165_s7, 4  ;;  %p1232_p10 = pnand %p1235_p8, %p1477_p5  ;;  %s177_s8 = int_to_ptr.vmem [resolvable:$true] %s176_s8 }
  0x14   : > { %s171_s9 = sadd.s32 %s1226_s6, %s1214_s4  ;;  %s162_s27 = scalar_lea.sflag [#allocation3], %s161_s29 }
  0x15   : > { %s1216_s10 = sshll.u32 %s171_s9, 3  ;;  %s1402_s28 = smov 512  }
  0x16   : > { %s173_s20 = scalar_lea.hbm %s1965_s1, %s1216_s10  ;;  %s1403_s23 = smov 256  }
  0x17   : > { %s174_s24 = sshll.u32 %s173_s20, 4  ;;  %s1404_s22 = smov 16   ;;  %s175_s24 = int_to_ptr.hbm [resolvable:$true] %s174_s24 }
  0x18   : > { %1234 = dma.hbm_to_vmem [thread:$0]  (!%p1232_p10), %s175_s24, 45056, %s177_s8, %s162_s27, %s1402_s28, %s1403_s23, %s1404_s22  }
  0x19   : > { %p1217_p11 = scmp.ge.s32.totalorder %s1400_s19, 1  ;;  %p192_p12 = scmp.lt.s32.totalorder %s1400_s19, 23 }
  0x1b   : > { %p193_p13 = pnand %p1217_p11, %p192_p12 }
  0x1c   : > { %s198_s25 = sand.u32 (!%p193_p13), 1, %s1376_s13  }
  0x1d   : > { %196 = sbr.rel (%p193_p13) target bundleno = 393 (0x189), region = 32  ;;  %s199_s4 = scalar_lea.sflag (!%p193_p13), [#allocation3], %s198_s25 }
  0x1e   : > { %s1228_s30 = smul.u32 (!%p193_p13), 2816, %s198_s25 }
  0x20   : > { %s1504_s6 = scalar_lea.vmem (!%p193_p13), [#allocation2], %s1228_s30 }
  0x22   : > { %1367 = dma.done.wait (%p1483_p7), %s199_s4, 45056  }
  0x23   : > { %1369 = vsyncadd (%p1483_p7), %s199_s4, 4294922240  ;;  %s235_s29 = smul.u32 11, %s1384_s15  ;;  %s1219_s22 = sshll.u32 %s1388_s16, 1 }
  0x24   : > { %p244_p0 = scmp.lt.s32.totalorder %s1219_s22, 3  ;;  %p1222_p2 = scmp.ne.s32.totalorder %s1384_s15, 0 }
  0x25   : > { %p236_p1 = scmp.lt.s32.totalorder %s235_s29, 120 }
  0x26   : > { %s1987_s22 = smov (!%p244_p0, %s1219_s22), 3  ;;  %257 = sbr.rel (%p1222_p2) target bundleno = 45 (0x2d), region = 40 }
  0x27   : > { %s1989_s29 = smov (!%p236_p1, %s235_s29), 120  ;;  %s246_s9 = scalar_lea.vmem %s1966_s2, %s1987_s22 }
  0x28   : > { %s1221_s10 = sshll.u32 %s1987_s22, 1  ;;  %s1218_s11 = sshll.u32 %s1989_s29, 1 }
  0x29   : > { %s1522_s20 = scalar_lea.vmem %s1967_s3, %s1221_s10  ;;  %s1527_s27 = scalar_lea.vmem %s1964_s0, %s1218_s11 }
  0x2b   : > { %v1405_v0 = vmov 0.0  }
  0x2c   : > { %258 = vst [vmem:[%s1522_s20] sm:$0xf] %v1405_v0 }
  0x2d PF: > { %v293_v1 = vld [vmem:[%s1504_s6 + $0xf0] sm:$0xff]  ;;  %v291_v3 = vld [vmem:[%s1504_s6 + $0xe0] sm:$0xff]  ;;  %vm1087_vm0 = vcmask 1041408   ;;  %p1223_p3 = scmp.ne.s32.totalorder %s1384_s15, 10 }
  0x2e   : > { %v357_v2 = vld [vmem:[%s1504_s6 + $0x2f0] sm:$0xff]  ;;  %644 = vmatpush.msra.mxu0 %v293_v1  ;;  %v355_v5 = vld [vmem:[%s1504_s6 + $0x2e0] sm:$0xff] }
  0x2f   : > { %684 = vmatpush.msra.mxu2 %v357_v2  ;;  %v325_v4 = vld [vmem:[%s1504_s6 + $0x1f0] sm:$0xff]  ;;  %v323_v7 = vld [vmem:[%s1504_s6 + $0x1e0] sm:$0xff] }
  0x30   : > { %664 = vmatpush.msra.mxu1 %v325_v4  ;;  %v289_v6 = vld [vmem:[%s1504_s6 + $0xd0] sm:$0xff]  ;;  %645 = vmatpush.msra.mxu0 %v291_v3  ;;  %v287_v11 = vld [vmem:[%s1504_s6 + $0xc0] sm:$0xff] }
  0x31   : > { %v353_v8 = vld [vmem:[%s1504_s6 + $0x2d0] sm:$0xff]  ;;  %685 = vmatpush.msra.mxu2 %v355_v5  ;;  %v351_v12 = vld [vmem:[%s1504_s6 + $0x2c0] sm:$0xff] }
  0x32   : > { %v321_v9 = vld [vmem:[%s1504_s6 + $0x1d0] sm:$0xff]  ;;  %665 = vmatpush.msra.mxu1 %v323_v7  ;;  %646 = vmatpush.msra.mxu0 %v289_v6  ;;  %v319_v13 = vld [vmem:[%s1504_s6 + $0x1c0] sm:$0xff] }
  0x33   : > { %v389_v10 = vld [vmem:[%s1504_s6 + $0x3f0] sm:$0xff]  ;;  %686 = vmatpush.msra.mxu2 %v353_v8  ;;  %v387_v14 = vld [vmem:[%s1504_s6 + $0x3e0] sm:$0xff] }
  0x34   : > { %704 = vmatpush.msra.mxu3 %v389_v10  ;;  %666 = vmatpush.msra.mxu1 %v321_v9  ;;  %v285_v15 = vld [vmem:[%s1504_s6 + $0xb0] sm:$0xff]  ;;  %v383_v19 = vld [vmem:[%s1504_s6 + $0x3c0] sm:$0xff] }
  0x35   : > { %v349_v16 = vld [vmem:[%s1504_s6 + $0x2b0] sm:$0xff]  ;;  %647 = vmatpush.msra.mxu0 %v287_v11  ;;  %687 = vmatpush.msra.mxu2 %v351_v12  ;;  %v283_v20 = vld [vmem:[%s1504_s6 + $0xa0] sm:$0xff] }
  0x36   : > { %705 = vmatpush.msra.mxu3 %v387_v14  ;;  %v385_v17 = vld [vmem:[%s1504_s6 + $0x3d0] sm:$0xff]  ;;  %667 = vmatpush.msra.mxu1 %v319_v13  ;;  %v347_v21 = vld [vmem:[%s1504_s6 + $0x2a0] sm:$0xff] }
  0x37   : > { %v317_v18 = vld [vmem:[%s1504_s6 + $0x1b0] sm:$0xff]  ;;  %648 = vmatpush.msra.mxu0 %v285_v15  ;;  %688 = vmatpush.msra.mxu2 %v349_v16  ;;  %v315_v22 = vld [vmem:[%s1504_s6 + $0x1a0] sm:$0xff] }
  0x38   : > { %706 = vmatpush.msra.mxu3 %v385_v17  ;;  %v381_v23 = vld [vmem:[%s1504_s6 + $0x3b0] sm:$0xff]  ;;  %668 = vmatpush.msra.mxu1 %v317_v18  ;;  %v379_v27 = vld [vmem:[%s1504_s6 + $0x3a0] sm:$0xff]  ;;  %v260_v18 = vld [vmem:[%s1527_s27] sm:$0xff] }
  0x39   : > { %v281_v24 = vld [vmem:[%s1504_s6 + $0x90] sm:$0xff]  ;;  %649 = vmatpush.msra.mxu0 %v283_v20  ;;  %689 = vmatpush.msra.mxu2 %v347_v21  ;;  %v279_v28 = vld [vmem:[%s1504_s6 + $0x80] sm:$0xff]  ;;  %618 = vst [vmem:[#allocation1] ss:$4 sm:$0xff] %v260_v18 }
  0x3a   : > { %v345_v25 = vld [vmem:[%s1504_s6 + $0x290] sm:$0xff]  ;;  %707 = vmatpush.msra.mxu3 %v383_v19  ;;  %669 = vmatpush.msra.mxu1 %v315_v22  ;;  %v343_v29 = vld [vmem:[%s1504_s6 + $0x280] sm:$0xff] }
  0x3b   : > { %v313_v26 = vld [vmem:[%s1504_s6 + $0x190] sm:$0xff]  ;;  %650 = vmatpush.msra.mxu0 %v281_v24  ;;  %690 = vmatpush.msra.mxu2 %v345_v25  ;;  %v311_v30 = vld [vmem:[%s1504_s6 + $0x180] sm:$0xff] }
  0x3c   : > { %708 = vmatpush.msra.mxu3 %v381_v23  ;;  %v377_v31 = vld [vmem:[%s1504_s6 + $0x390] sm:$0xff]  ;;  %670 = vmatpush.msra.mxu1 %v313_v26  ;;  %v375_v35 = vld [vmem:[%s1504_s6 + $0x380] sm:$0xff] }
  0x3d   : > { %v277_v32 = vld [vmem:[%s1504_s6 + $0x70] sm:$0xff]  ;;  %651 = vmatpush.msra.mxu0 %v279_v28  ;;  %691 = vmatpush.msra.mxu2 %v343_v29  ;;  %v275_v36 = vld [vmem:[%s1504_s6 + $0x60] sm:$0xff] }
  0x3e   : > { %v341_v33 = vld [vmem:[%s1504_s6 + $0x270] sm:$0xff]  ;;  %709 = vmatpush.msra.mxu3 %v379_v27  ;;  %671 = vmatpush.msra.mxu1 %v311_v30  ;;  %v339_v37 = vld [vmem:[%s1504_s6 + $0x260] sm:$0xff] }
  0x3f   : > { %v309_v34 = vld [vmem:[%s1504_s6 + $0x170] sm:$0xff]  ;;  %652 = vmatpush.msra.mxu0 %v277_v32  ;;  %692 = vmatpush.msra.mxu2 %v341_v33  ;;  %v307_v38 = vld [vmem:[%s1504_s6 + $0x160] sm:$0xff] }
  0x40   : > { %710 = vmatpush.msra.mxu3 %v377_v31  ;;  %v373_v39 = vld [vmem:[%s1504_s6 + $0x370] sm:$0xff]  ;;  %672 = vmatpush.msra.mxu1 %v309_v34  ;;  %v371_v43 = vld [vmem:[%s1504_s6 + $0x360] sm:$0xff] }
  0x41   : > { %v273_v40 = vld [vmem:[%s1504_s6 + $0x50] sm:$0xff]  ;;  %653 = vmatpush.msra.mxu0 %v275_v36  ;;  %693 = vmatpush.msra.mxu2 %v339_v37  ;;  %v271_v44 = vld [vmem:[%s1504_s6 + $0x40] sm:$0xff] }
  0x42   : > { %v337_v41 = vld [vmem:[%s1504_s6 + $0x250] sm:$0xff]  ;;  %711 = vmatpush.msra.mxu3 %v375_v35  ;;  %673 = vmatpush.msra.mxu1 %v307_v38  ;;  %v335_v45 = vld [vmem:[%s1504_s6 + $0x240] sm:$0xff]  ;;  %v262_v38 = vld [vmem:[%s1527_s27 + $0x10] sm:$0x3f] }
  0x43   : > { %v305_v42 = vld [vmem:[%s1504_s6 + $0x150] sm:$0xff]  ;;  %654 = vmatpush.msra.mxu0 %v273_v40  ;;  %694 = vmatpush.msra.mxu2 %v337_v41  ;;  %v303_v46 = vld [vmem:[%s1504_s6 + $0x140] sm:$0xff]  ;;  %v1635_v40 = vld.sshfl [vmem:[#allocation1] sm:$0xff pattern:$0x73625140] }
  0x44   : > { %712 = vmatpush.msra.mxu3 %v373_v39  ;;  %v369_v47 = vld [vmem:[%s1504_s6 + $0x350] sm:$0xff]  ;;  %674 = vmatpush.msra.mxu1 %v305_v42  ;;  %v367_v51 = vld [vmem:[%s1504_s6 + $0x340] sm:$0xff]  ;;  %v1633_v39 = vld.sshfl [vmem:[#allocation1 + $0x10] sm:$0xff pattern:$0x73625140] }
  0x45   : > { %v269_v48 = vld [vmem:[%s1504_s6 + $0x30] sm:$0xff]  ;;  %655 = vmatpush.msra.mxu0 %v271_v44  ;;  %695 = vmatpush.msra.mxu2 %v335_v45  ;;  %v267_v52 = vld [vmem:[%s1504_s6 + $0x20] sm:$0xff] }
  0x46   : > { %v333_v49 = vld [vmem:[%s1504_s6 + $0x230] sm:$0xff]  ;;  %713 = vmatpush.msra.mxu3 %v371_v43  ;;  %675 = vmatpush.msra.mxu1 %v303_v46  ;;  %v331_v53 = vld [vmem:[%s1504_s6 + $0x220] sm:$0xff] }
  0x47   : > { %v301_v50 = vld [vmem:[%s1504_s6 + $0x130] sm:$0xff]  ;;  %656 = vmatpush.msra.mxu0 %v269_v48  ;;  %696 = vmatpush.msra.mxu2 %v333_v49  ;;  %v299_v54 = vld [vmem:[%s1504_s6 + $0x120] sm:$0xff] }
  0x48   : > { %714 = vmatpush.msra.mxu3 %v369_v47  ;;  %v365_v55 = vld [vmem:[%s1504_s6 + $0x330] sm:$0xff]  ;;  %676 = vmatpush.msra.mxu1 %v301_v50  ;;  %v363_v59 = vld [vmem:[%s1504_s6 + $0x320] sm:$0xff] }
  0x49   : > { %v265_v56 = vld [vmem:[%s1504_s6 + $0x10] sm:$0xff]  ;;  %657 = vmatpush.msra.mxu0 %v267_v52  ;;  %697 = vmatpush.msra.mxu2 %v331_v53  ;;  %v263_v60 = vld [vmem:[%s1504_s6] sm:$0xff] }
  0x4a   : > { %v329_v57 = vld [vmem:[%s1504_s6 + $0x210] sm:$0xff]  ;;  %715 = vmatpush.msra.mxu3 %v367_v51  ;;  %677 = vmatpush.msra.mxu1 %v299_v54  ;;  %v327_v61 = vld [vmem:[%s1504_s6 + $0x200] sm:$0xff] }
  0x4b   : > { %v297_v58 = vld [vmem:[%s1504_s6 + $0x110] sm:$0xff]  ;;  %658 = vmatpush.msra.mxu0 %v265_v56  ;;  %698 = vmatpush.msra.mxu2 %v329_v57  ;;  %v295_v0 = vld [vmem:[%s1504_s6 + $0x100] sm:$0xff] }
  0x4c   : > { %716 = vmatpush.msra.mxu3 %v365_v55  ;;  %v421_v62 = vld [vmem:[%s1504_s6 + $0x4f0] sm:$0xff]  ;;  %678 = vmatpush.msra.mxu1 %v297_v58  ;;  %v419_v2 = vld [vmem:[%s1504_s6 + $0x4e0] sm:$0xff] }
  0x4d   : > { %v485_v63 = vld [vmem:[%s1504_s6 + $0x6f0] sm:$0xff]  ;;  %659 = vmatpush.msra.mxu0 %v263_v60  ;;  %699 = vmatpush.msra.mxu2 %v327_v61  ;;  %v483_v4 = vld [vmem:[%s1504_s6 + $0x6e0] sm:$0xff] }
  0x4e   : > { %717 = vmatpush.msra.mxu3 %v363_v59  ;;  %v361_v1 = vld [vmem:[%s1504_s6 + $0x310] sm:$0xff]  ;;  %v359_v5 = vld [vmem:[%s1504_s6 + $0x300] sm:$0xff]  ;;  %679 = vmatpush.msra.mxu1 %v295_v0 }
  0x4f   : > { %v453_v3 = vld [vmem:[%s1504_s6 + $0x5f0] sm:$0xff]  ;;  %724 = vmatpush.msrb.mxu0 %v421_v62  ;;  %764 = vmatpush.msrb.mxu2 %v485_v63  ;;  %v451_v7 = vld [vmem:[%s1504_s6 + $0x5e0] sm:$0xff] }
  0x50   : > { %718 = vmatpush.msra.mxu3 %v361_v1  ;;  %v417_v6 = vld [vmem:[%s1504_s6 + $0x4d0] sm:$0xff]  ;;  %744 = vmatpush.msrb.mxu1 %v453_v3  ;;  %v415_v10 = vld [vmem:[%s1504_s6 + $0x4c0] sm:$0xff] }
  0x51   : > { %725 = vmatpush.msrb.mxu0 %v419_v2  ;;  %v481_v8 = vld [vmem:[%s1504_s6 + $0x6d0] sm:$0xff]  ;;  %765 = vmatpush.msrb.mxu2 %v483_v4  ;;  %v479_v12 = vld [vmem:[%s1504_s6 + $0x6c0] sm:$0xff] }
  0x52   : > { %v517_v9 = vld [vmem:[%s1504_s6 + $0x7f0] sm:$0xff]  ;;  %719 = vmatpush.msra.mxu3 %v359_v5  ;;  %745 = vmatpush.msrb.mxu1 %v451_v7  ;;  %v515_v13 = vld [vmem:[%s1504_s6 + $0x7e0] sm:$0xff] }
  0x53   : > { %v449_v11 = vld [vmem:[%s1504_s6 + $0x5d0] sm:$0xff]  ;;  %726 = vmatpush.msrb.mxu0 %v417_v6  ;;  %766 = vmatpush.msrb.mxu2 %v481_v8  ;;  %v447_v15 = vld [vmem:[%s1504_s6 + $0x5c0] sm:$0xff] }
  0x54   : > { %784 = vmatpush.msrb.mxu3 %v517_v9  ;;  %v413_v14 = vld [vmem:[%s1504_s6 + $0x4b0] sm:$0xff]  ;;  %746 = vmatpush.msrb.mxu1 %v449_v11  ;;  %v411_v19 = vld [vmem:[%s1504_s6 + $0x4a0] sm:$0xff] }
  0x55   : > { %727 = vmatpush.msrb.mxu0 %v415_v10  ;;  %v477_v16 = vld [vmem:[%s1504_s6 + $0x6b0] sm:$0xff]  ;;  %767 = vmatpush.msrb.mxu2 %v479_v12  ;;  %v475_v21 = vld [vmem:[%s1504_s6 + $0x6a0] sm:$0xff] }
  0x56   : > { %v513_v17 = vld [vmem:[%s1504_s6 + $0x7d0] sm:$0xff]  ;;  %785 = vmatpush.msrb.mxu3 %v515_v13  ;;  %747 = vmatpush.msrb.mxu1 %v447_v15  ;;  %v511_v22 = vld [vmem:[%s1504_s6 + $0x7c0] sm:$0xff] }
  0x57   : > { %v445_v20 = vld [vmem:[%s1504_s6 + $0x5b0] sm:$0xff]  ;;  %728 = vmatpush.msrb.mxu0 %v413_v14  ;;  %768 = vmatpush.msrb.mxu2 %v477_v16  ;;  %v443_v24 = vld [vmem:[%s1504_s6 + $0x5a0] sm:$0xff] }
  0x58   : > { %786 = vmatpush.msrb.mxu3 %v513_v17  ;;  %v409_v23 = vld [vmem:[%s1504_s6 + $0x490] sm:$0xff]  ;;  %748 = vmatpush.msrb.mxu1 %v445_v20  ;;  %v407_v26 = vld [vmem:[%s1504_s6 + $0x480] sm:$0xff] }
  0x59   : > { %v473_v25 = vld [vmem:[%s1504_s6 + $0x690] sm:$0xff]  ;;  %729 = vmatpush.msrb.mxu0 %v411_v19  ;;  %769 = vmatpush.msrb.mxu2 %v475_v21  ;;  %v471_v29 = vld [vmem:[%s1504_s6 + $0x680] sm:$0xff] }
  0x5a   : > { %v441_v27 = vld [vmem:[%s1504_s6 + $0x590] sm:$0xff]  ;;  %787 = vmatpush.msrb.mxu3 %v511_v22  ;;  %v439_v31 = vld [vmem:[%s1504_s6 + $0x580] sm:$0xff]  ;;  %749 = vmatpush.msrb.mxu1 %v443_v24  ;;  %v294_v22 = vld [vmem:[%s1504_s6 + $0xf8] sm:$0xff] }
  0x5b   : > { %v509_v28 = vld [vmem:[%s1504_s6 + $0x7b0] sm:$0xff]  ;;  %730 = vmatpush.msrb.mxu0 %v409_v23  ;;  %v507_v33 = vld [vmem:[%s1504_s6 + $0x7a0] sm:$0xff]  ;;  %770 = vmatpush.msrb.mxu2 %v473_v25 }
  0x5c   : > { %v405_v30 = vld [vmem:[%s1504_s6 + $0x470] sm:$0xff]  ;;  %v261_v34 = vld [vmem:[%s1527_s27 + $0x8] sm:$0xff]  ;;  %788 = vmatpush.msrb.mxu3 %v509_v28  ;;  %750 = vmatpush.msrb.mxu1 %v441_v27  ;;  %v292_v27 = vld [vmem:[%s1504_s6 + $0xe8] sm:$0xff] }
  0x5d   : > { %v469_v32 = vld [vmem:[%s1504_s6 + $0x670] sm:$0xff]  ;;  %v403_v35 = vld [vmem:[%s1504_s6 + $0x460] sm:$0xff]  ;;  %620 = vst [vmem:[#allocation1 + $0x20] ss:$4 sm:$0xff] %v261_v34  ;;  %731 = vmatpush.msrb.mxu0 %v407_v26  ;;  %771 = vmatpush.msrb.mxu2 %v471_v29 }
  0x5e   : > { %v437_v36 = vld [vmem:[%s1504_s6 + $0x570] sm:$0xff]  ;;  %789 = vmatpush.msrb.mxu3 %v507_v33  ;;  %v1639_v42 = vld.sshfl [vmem:[#allocation1 + $0x8] sm:$0xff pattern:$0x73625140]  ;;  %751 = vmatpush.msrb.mxu1 %v439_v31  ;;  %v290_v31 = vld [vmem:[%s1504_s6 + $0xd8] sm:$0xff] }
  0x5f   : > { %v505_v37 = vld [vmem:[%s1504_s6 + $0x790] sm:$0xff]  ;;  %732 = vmatpush.msrb.mxu0 %v405_v30  ;;  %v467_v43 = vld [vmem:[%s1504_s6 + $0x660] sm:$0xff]  ;;  %772 = vmatpush.msrb.mxu2 %v469_v32 }
  0x60   : > { %v1637_v41 = vld.sshfl [vmem:[#allocation1 + $0x18] sm:$0xff pattern:$0x73625140]  ;;  %v503_v44 = vld [vmem:[%s1504_s6 + $0x780] sm:$0xff]  ;;  %790 = vmatpush.msrb.mxu3 %v505_v37  ;;  %752 = vmatpush.msrb.mxu1 %v437_v36 }
  0x61   : > { %629 = vst [vmem:[#allocation1] ss:$4 sm:$0xff] %v262_v38  ;;  %v401_v45 = vld [vmem:[%s1504_s6 + $0x450] sm:$0xff]  ;;  %v435_v46 = vld [vmem:[%s1504_s6 + $0x560] sm:$0xff]  ;;  %733 = vmatpush.msrb.mxu0 %v403_v35  ;;  %773 = vmatpush.msrb.mxu2 %v467_v43  ;;  %v288_v35 = vld [vmem:[%s1504_s6 + $0xc8] sm:$0xff] }
  0x62   : > { %v465_v47 = vld [vmem:[%s1504_s6 + $0x650] sm:$0xff]  ;;  %791 = vmatpush.msrb.mxu3 %v503_v44  ;;  %v399_v49 = vld [vmem:[%s1504_s6 + $0x440] sm:$0xff]  ;;  %753 = vmatpush.msrb.mxu1 %v435_v46  ;;  %v286_v43 = vld [vmem:[%s1504_s6 + $0xb8] sm:$0xff] }
  0x63   : > { %v501_v48 = vld [vmem:[%s1504_s6 + $0x770] sm:$0xff]  ;;  %734 = vmatpush.msrb.mxu0 %v401_v45  ;;  %v463_v51 = vld [vmem:[%s1504_s6 + $0x640] sm:$0xff]  ;;  %774 = vmatpush.msrb.mxu2 %v465_v47  ;;  %v284_v47 = vld [vmem:[%s1504_s6 + $0xa8] sm:$0xff] }
  0x64   : > { %v433_v50 = vld [vmem:[%s1504_s6 + $0x550] sm:$0xff]  ;;  %v499_v52 = vld [vmem:[%s1504_s6 + $0x760] sm:$0xff]  ;;  %792 = vmatpush.msrb.mxu3 %v501_v48  ;;  %700 = vmatmul.f32.vlgmr.msra.gmra.mxu2 %v1633_v39  ;;  %v1678_v12 = vld.sshfl [vmem:[#allocation1 + $0x30] sm:$0xff pattern:$0x73625140] }
  0x65   : > { %v397_v53 = vld [vmem:[%s1504_s6 + $0x430] sm:$0xff]  ;;  %v431_v54 = vld [vmem:[%s1504_s6 + $0x540] sm:$0xff]  ;;  %735 = vmatpush.msrb.mxu0 %v399_v49  ;;  %754 = vmatpush.msrb.mxu1 %v433_v50  ;;  %v1685_v17 = vld.sshfl [vmem:[#allocation1 + $0x20] sm:$0xff pattern:$0x73625140] }
  0x66   : > { %v461_v55 = vld [vmem:[%s1504_s6 + $0x630] sm:$0xff]  ;;  %775 = vmatpush.msrb.mxu2 %v463_v51  ;;  %793 = vmatpush.msrb.mxu3 %v499_v52  ;;  %v395_v57 = vld [vmem:[%s1504_s6 + $0x420] sm:$0xff]  ;;  %v282_v51 = vld [vmem:[%s1504_s6 + $0x98] sm:$0xff] }
  0x67   : > { %v497_v56 = vld [vmem:[%s1504_s6 + $0x750] sm:$0xff]  ;;  %736 = vmatpush.msrb.mxu0 %v397_v53  ;;  %755 = vmatpush.msrb.mxu1 %v431_v54  ;;  %v459_v59 = vld [vmem:[%s1504_s6 + $0x620] sm:$0xff] }
  0x68   : > { %v429_v58 = vld [vmem:[%s1504_s6 + $0x530] sm:$0xff]  ;;  %v495_v60 = vld [vmem:[%s1504_s6 + $0x740] sm:$0xff]  ;;  %776 = vmatpush.msrb.mxu2 %v461_v55  ;;  %794 = vmatpush.msrb.mxu3 %v497_v56  ;;  %v280_v55 = vld [vmem:[%s1504_s6 + $0x88] sm:$0xff] }
  0x69   : > { %v393_v61 = vld [vmem:[%s1504_s6 + $0x410] sm:$0xff]  ;;  %737 = vmatpush.msrb.mxu0 %v395_v57  ;;  %756 = vmatpush.msrb.mxu1 %v429_v58  ;;  %v427_v62 = vld [vmem:[%s1504_s6 + $0x520] sm:$0xff] }
  0x6a   : > { %v457_v63 = vld [vmem:[%s1504_s6 + $0x610] sm:$0xff]  ;;  %777 = vmatpush.msrb.mxu2 %v459_v59  ;;  %795 = vmatpush.msrb.mxu3 %v495_v60  ;;  %v391_v0 = vld [vmem:[%s1504_s6 + $0x400] sm:$0xff]  ;;  %v278_v59 = vld [vmem:[%s1504_s6 + $0x78] sm:$0xff] }
  0x6b   : > { %738 = vmatpush.msrb.mxu0 %v393_v61  ;;  %v425_v1 = vld [vmem:[%s1504_s6 + $0x510] sm:$0xff]  ;;  %757 = vmatpush.msrb.mxu1 %v427_v62  ;;  %v455_v2 = vld [vmem:[%s1504_s6 + $0x600] sm:$0xff] }
  0x6c   : > { %778 = vmatpush.msrb.mxu2 %v457_v63  ;;  %v493_v3 = vld [vmem:[%s1504_s6 + $0x730] sm:$0xff]  ;;  %660 = vmatmul.f32.vlgmr.msra.gmra.mxu0 %v1635_v40  ;;  %v423_v6 = vld [vmem:[%s1504_s6 + $0x500] sm:$0xff]  ;;  %v276_v63 = vld [vmem:[%s1504_s6 + $0x68] sm:$0xff] }
  0x6d   : > { %720 = vmatmul.f32.vlgmr.msra.gmra.mxu3 %v1637_v41  ;;  %v549_v4 = vld [vmem:[%s1504_s6 + $0x8f0] sm:$0xff]  ;;  %739 = vmatpush.msrb.mxu0 %v391_v0  ;;  %v491_v7 = vld [vmem:[%s1504_s6 + $0x720] sm:$0xff] }
  0x6e   : > { %758 = vmatpush.msrb.mxu1 %v425_v1  ;;  %v613_v5 = vld [vmem:[%s1504_s6 + $0xaf0] sm:$0xff]  ;;  %779 = vmatpush.msrb.mxu2 %v455_v2  ;;  %v547_v8 = vld [vmem:[%s1504_s6 + $0x8e0] sm:$0xff] }
  0x6f   : > { %796 = vmatpush.msrb.mxu3 %v493_v3  ;;  %680 = vmatmul.f32.vlgmr.msra.gmra.mxu1 %v1639_v42  ;;  %v581_v9 = vld [vmem:[%s1504_s6 + $0x9f0] sm:$0xff]  ;;  %v611_v10 = vld [vmem:[%s1504_s6 + $0xae0] sm:$0xff]  ;;  %v274_v3 = vld [vmem:[%s1504_s6 + $0x58] sm:$0xff] }
  0x70   : > { %804 = vmatpush.msra.mxu0 %v549_v4  ;;  %844 = vmatpush.msra.mxu2 %v613_v5  ;;  %v489_v11 = vld [vmem:[%s1504_s6 + $0x710] sm:$0xff]  ;;  %v579_v14 = vld [vmem:[%s1504_s6 + $0x9e0] sm:$0xff] }
  0x71   : > { %759 = vmatpush.msrb.mxu1 %v423_v6  ;;  %797 = vmatpush.msrb.mxu3 %v491_v7  ;;  %v545_v13 = vld [vmem:[%s1504_s6 + $0x8d0] sm:$0xff]  ;;  %v487_v16 = vld [vmem:[%s1504_s6 + $0x700] sm:$0xff]  ;;  %v272_v7 = vld [vmem:[%s1504_s6 + $0x48] sm:$0xff] }
  0x72   : > { %805 = vmatpush.msra.mxu0 %v547_v8  ;;  %845 = vmatpush.msra.mxu2 %v611_v10  ;;  %v609_v15 = vld [vmem:[%s1504_s6 + $0xad0] sm:$0xff]  ;;  %v543_v19 = vld [vmem:[%s1504_s6 + $0x8c0] sm:$0xff] }
  0x73   : > { %824 = vmatpush.msra.mxu1 %v581_v9  ;;  %798 = vmatpush.msrb.mxu3 %v489_v11  ;;  %v1687_v18 = vld.sshfl [vmem:[#allocation1 + $0x38] sm:$0xff pattern:$0x73625140]  ;;  %v607_v21 = vld [vmem:[%s1504_s6 + $0xac0] sm:$0xff]  ;;  %v270_v11 = vld [vmem:[%s1504_s6 + $0x38] sm:$0xff] }
  0x74   : > { %780 = vmatmul.f32.vlgmr.msrb.gmra.mxu2 %v1678_v12  ;;  %806 = vmatpush.msra.mxu0 %v545_v13  ;;  %v577_v20 = vld [vmem:[%s1504_s6 + $0x9d0] sm:$0xff]  ;;  %v1695_v23 = vld.sshfl [vmem:[#allocation1 + $0x28] sm:$0xff pattern:$0x73625140] }
  0x75   : > { %825 = vmatpush.msra.mxu1 %v579_v14  ;;  %846 = vmatpush.msra.mxu2 %v609_v15  ;;  %v541_v24 = vld [vmem:[%s1504_s6 + $0x8b0] sm:$0xff]  ;;  %v575_v25 = vld [vmem:[%s1504_s6 + $0x9c0] sm:$0xff]  ;;  %v1746_v13 = vld.sshfl [vmem:[#allocation1] sm:$0xff pattern:$0x73625140] }
  0x76   : > { %799 = vmatpush.msrb.mxu3 %v487_v16  ;;  %740 = vmatmul.f32.vlgmr.msrb.gmra.mxu0 %v1685_v17  ;;  %v605_v26 = vld [vmem:[%s1504_s6 + $0xab0] sm:$0xff]  ;;  %v539_v28 = vld [vmem:[%s1504_s6 + $0x8a0] sm:$0xff]  ;;  %v1748_v14 = vld.sshfl [vmem:[#allocation1 + $0x10] sm:$0xff pattern:$0x73625140] }
  0x77   : > { %800 = vmatmul.f32.vlgmr.msrb.gmra.mxu3 %v1687_v18  ;;  %807 = vmatpush.msra.mxu0 %v543_v19  ;;  %v573_v29 = vld [vmem:[%s1504_s6 + $0x9b0] sm:$0xff]  ;;  %v603_v30 = vld [vmem:[%s1504_s6 + $0xaa0] sm:$0xff]  ;;  %v326_v15 = vld [vmem:[%s1504_s6 + $0x1f8] sm:$0xff] }
  0x78   : > { %826 = vmatpush.msra.mxu1 %v577_v20  ;;  %847 = vmatpush.msra.mxu2 %v607_v21  ;;  %v537_v32 = vld [vmem:[%s1504_s6 + $0x890] sm:$0xff]  ;;  %v571_v33 = vld [vmem:[%s1504_s6 + $0x9a0] sm:$0xff]  ;;  %v268_v19 = vld [vmem:[%s1504_s6 + $0x28] sm:$0xff] }
  0x79   : > { %864 = vmatpush.msra.mxu3 %v294_v22  ;;  %760 = vmatmul.f32.vlgmr.msrb.gmra.mxu1 %v1695_v23  ;;  %v601_v34 = vld [vmem:[%s1504_s6 + $0xa90] sm:$0xff]  ;;  %v535_v36 = vld [vmem:[%s1504_s6 + $0x880] sm:$0xff]  ;;  %v324_v21 = vld [vmem:[%s1504_s6 + $0x1e8] sm:$0xff] }
  0x7a   : > { %808 = vmatpush.msra.mxu0 %v541_v24  ;;  %827 = vmatpush.msra.mxu1 %v575_v25  ;;  %v569_v37 = vld [vmem:[%s1504_s6 + $0x990] sm:$0xff]  ;;  %v599_v38 = vld [vmem:[%s1504_s6 + $0xa80] sm:$0xff]  ;;  %v358_v22 = vld [vmem:[%s1504_s6 + $0x2f8] sm:$0xff] }
  0x7b   : > { %848 = vmatpush.msra.mxu2 %v605_v26  ;;  %865 = vmatpush.msra.mxu3 %v292_v27  ;;  %v533_v44 = vld [vmem:[%s1504_s6 + $0x870] sm:$0xff]  ;;  %v567_v45 = vld [vmem:[%s1504_s6 + $0x980] sm:$0xff]  ;;  %v266_v24 = vld [vmem:[%s1504_s6 + $0x18] sm:$0xff] }
  0x7c   : > { %809 = vmatpush.msra.mxu0 %v539_v28  ;;  %828 = vmatpush.msra.mxu1 %v573_v29  ;;  %v597_v46 = vld [vmem:[%s1504_s6 + $0xa70] sm:$0xff]  ;;  %v531_v48 = vld [vmem:[%s1504_s6 + $0x860] sm:$0xff]  ;;  %v322_v25 = vld [vmem:[%s1504_s6 + $0x1d8] sm:$0xff] }
  0x7d   : > { %849 = vmatpush.msra.mxu2 %v603_v30  ;;  %866 = vmatpush.msra.mxu3 %v290_v31  ;;  %v565_v49 = vld [vmem:[%s1504_s6 + $0x970] sm:$0xff]  ;;  %v595_v50 = vld [vmem:[%s1504_s6 + $0xa60] sm:$0xff]  ;;  %v390_v26 = vld [vmem:[%s1504_s6 + $0x3f8] sm:$0xff] }
  0x7e   : > { %810 = vmatpush.msra.mxu0 %v537_v32  ;;  %829 = vmatpush.msra.mxu1 %v571_v33  ;;  %v529_v52 = vld [vmem:[%s1504_s6 + $0x850] sm:$0xff]  ;;  %v563_v53 = vld [vmem:[%s1504_s6 + $0x960] sm:$0xff]  ;;  %v356_v27 = vld [vmem:[%s1504_s6 + $0x2e8] sm:$0xff] }
  0x7f   : > { %850 = vmatpush.msra.mxu2 %v601_v34  ;;  %867 = vmatpush.msra.mxu3 %v288_v35  ;;  %v593_v54 = vld [vmem:[%s1504_s6 + $0xa50] sm:$0xff]  ;;  %v527_v56 = vld [vmem:[%s1504_s6 + $0x840] sm:$0xff]  ;;  %v264_v28 = vld [vmem:[%s1504_s6 + $0x8] sm:$0xff] }
  0x80   : > { %811 = vmatpush.msra.mxu0 %v535_v36  ;;  %830 = vmatpush.msra.mxu1 %v569_v37  ;;  %v561_v57 = vld [vmem:[%s1504_s6 + $0x950] sm:$0xff]  ;;  %v591_v58 = vld [vmem:[%s1504_s6 + $0xa40] sm:$0xff]  ;;  %v320_v29 = vld [vmem:[%s1504_s6 + $0x1c8] sm:$0xff] }
  0x81   : > { %851 = vmatpush.msra.mxu2 %v599_v38  ;;  %868 = vmatpush.msra.mxu3 %v286_v43  ;;  %v525_v60 = vld [vmem:[%s1504_s6 + $0x830] sm:$0xff]  ;;  %v559_v61 = vld [vmem:[%s1504_s6 + $0x940] sm:$0xff]  ;;  %v388_v30 = vld [vmem:[%s1504_s6 + $0x3e8] sm:$0xff] }
  0x82   : > { %812 = vmatpush.msra.mxu0 %v533_v44  ;;  %831 = vmatpush.msra.mxu1 %v567_v45  ;;  %v589_v62 = vld [vmem:[%s1504_s6 + $0xa30] sm:$0xff]  ;;  %v523_v0 = vld [vmem:[%s1504_s6 + $0x820] sm:$0xff]  ;;  %v354_v31 = vld [vmem:[%s1504_s6 + $0x2d8] sm:$0xff] }
  0x83   : > { %852 = vmatpush.msra.mxu2 %v597_v46  ;;  %869 = vmatpush.msra.mxu3 %v284_v47  ;;  %v557_v1 = vld [vmem:[%s1504_s6 + $0x930] sm:$0xff]  ;;  %v587_v2 = vld [vmem:[%s1504_s6 + $0xa20] sm:$0xff]  ;;  %v422_v32 = vld [vmem:[%s1504_s6 + $0x4f8] sm:$0xff] }
  0x84   : > { %813 = vmatpush.msra.mxu0 %v531_v48  ;;  %832 = vmatpush.msra.mxu1 %v565_v49  ;;  %v521_v4 = vld [vmem:[%s1504_s6 + $0x810] sm:$0xff]  ;;  %v555_v5 = vld [vmem:[%s1504_s6 + $0x920] sm:$0xff]  ;;  %v318_v33 = vld [vmem:[%s1504_s6 + $0x1b8] sm:$0xff] }
  0x85   : > { %853 = vmatpush.msra.mxu2 %v595_v50  ;;  %870 = vmatpush.msra.mxu3 %v282_v51  ;;  %v585_v6 = vld [vmem:[%s1504_s6 + $0xa10] sm:$0xff]  ;;  %v519_v8 = vld [vmem:[%s1504_s6 + $0x800] sm:$0xff]  ;;  %v386_v34 = vld [vmem:[%s1504_s6 + $0x3d8] sm:$0xff] }
  0x86   : > { %814 = vmatpush.msra.mxu0 %v529_v52  ;;  %833 = vmatpush.msra.mxu1 %v563_v53  ;;  %v553_v9 = vld [vmem:[%s1504_s6 + $0x910] sm:$0xff]  ;;  %v583_v10 = vld [vmem:[%s1504_s6 + $0xa00] sm:$0xff]  ;;  %v352_v35 = vld [vmem:[%s1504_s6 + $0x2c8] sm:$0xff] }
  0x87   : > { %854 = vmatpush.msra.mxu2 %v593_v54  ;;  %871 = vmatpush.msra.mxu3 %v280_v55  ;;  %v551_v16 = vld [vmem:[%s1504_s6 + $0x900] sm:$0xff]  ;;  %v420_v36 = vld [vmem:[%s1504_s6 + $0x4e8] sm:$0xff]  ;;  %v350_v43 = vld [vmem:[%s1504_s6 + $0x2b8] sm:$0xff] }
  0x88   : > { %815 = vmatpush.msra.mxu0 %v527_v56  ;;  %834 = vmatpush.msra.mxu1 %v561_v57  ;;  %v1754_v20 = vld.sshfl [vmem:[#allocation1 + $0x8] sm:$0xff pattern:$0x73625140]  ;;  %v316_v37 = vld [vmem:[%s1504_s6 + $0x1a8] sm:$0xff]  ;;  %v418_v44 = vld [vmem:[%s1504_s6 + $0x4d8] sm:$0xff] }
  0x89   : > { %855 = vmatpush.msra.mxu2 %v591_v58  ;;  %872 = vmatpush.msra.mxu3 %v278_v59  ;;  %v384_v38 = vld [vmem:[%s1504_s6 + $0x3c8] sm:$0xff]  ;;  %v314_v45 = vld [vmem:[%s1504_s6 + $0x198] sm:$0xff] }
  0x8a   : > { %816 = vmatpush.msra.mxu0 %v525_v60  ;;  %835 = vmatpush.msra.mxu1 %v559_v61  ;;  %v382_v46 = vld [vmem:[%s1504_s6 + $0x3b8] sm:$0xff]  ;;  %v348_v47 = vld [vmem:[%s1504_s6 + $0x2a8] sm:$0xff] }
  0x8b   : > { %856 = vmatpush.msra.mxu2 %v589_v62  ;;  %873 = vmatpush.msra.mxu3 %v276_v63  ;;  %v416_v48 = vld [vmem:[%s1504_s6 + $0x4c8] sm:$0xff]  ;;  %v346_v51 = vld [vmem:[%s1504_s6 + $0x298] sm:$0xff] }
  0x8c   : > { %817 = vmatpush.msra.mxu0 %v523_v0  ;;  %836 = vmatpush.msra.mxu1 %v557_v1  ;;  %v312_v49 = vld [vmem:[%s1504_s6 + $0x188] sm:$0xff]  ;;  %v414_v52 = vld [vmem:[%s1504_s6 + $0x4b8] sm:$0xff] }
  0x8d   : > { %857 = vmatpush.msra.mxu2 %v587_v2  ;;  %874 = vmatpush.msra.mxu3 %v274_v3  ;;  %v380_v50 = vld [vmem:[%s1504_s6 + $0x3a8] sm:$0xff]  ;;  %v310_v53 = vld [vmem:[%s1504_s6 + $0x178] sm:$0xff] }
  0x8e   : > { %818 = vmatpush.msra.mxu0 %v521_v4  ;;  %837 = vmatpush.msra.mxu1 %v555_v5  ;;  %v378_v54 = vld [vmem:[%s1504_s6 + $0x398] sm:$0xff]  ;;  %v344_v55 = vld [vmem:[%s1504_s6 + $0x288] sm:$0xff] }
  0x8f   : > { %858 = vmatpush.msra.mxu2 %v585_v6  ;;  %875 = vmatpush.msra.mxu3 %v272_v7  ;;  %v412_v56 = vld [vmem:[%s1504_s6 + $0x4a8] sm:$0xff]  ;;  %v342_v59 = vld [vmem:[%s1504_s6 + $0x278] sm:$0xff] }
  0x90   : > { %819 = vmatpush.msra.mxu0 %v519_v8  ;;  %838 = vmatpush.msra.mxu1 %v553_v9  ;;  %v308_v57 = vld [vmem:[%s1504_s6 + $0x168] sm:$0xff]  ;;  %v410_v60 = vld [vmem:[%s1504_s6 + $0x498] sm:$0xff] }
  0x91   : > { %859 = vmatpush.msra.mxu2 %v583_v10  ;;  %876 = vmatpush.msra.mxu3 %v270_v11  ;;  %v376_v58 = vld [vmem:[%s1504_s6 + $0x388] sm:$0xff]  ;;  %v306_v61 = vld [vmem:[%s1504_s6 + $0x158] sm:$0xff] }
  0x92   : > { %820 = vmatmul.f32.vlgmr.msra.gmra.mxu0 %v1746_v13  ;;  %860 = vmatmul.f32.vlgmr.msra.gmra.mxu2 %v1748_v14  ;;  %v374_v62 = vld [vmem:[%s1504_s6 + $0x378] sm:$0xff]  ;;  %v340_v63 = vld [vmem:[%s1504_s6 + $0x268] sm:$0xff] }
  0x93   : > { %884 = vmatpush.msrb.mxu0 %v326_v15  ;;  %839 = vmatpush.msra.mxu1 %v551_v16  ;;  %v408_v0 = vld [vmem:[%s1504_s6 + $0x488] sm:$0xff]  ;;  %v338_v3 = vld [vmem:[%s1504_s6 + $0x258] sm:$0xff] }
  0x94   : > { %877 = vmatpush.msra.mxu3 %v268_v19  ;;  %840 = vmatmul.f32.vlgmr.msra.gmra.mxu1 %v1754_v20  ;;  %v304_v1 = vld [vmem:[%s1504_s6 + $0x148] sm:$0xff]  ;;  %v406_v4 = vld [vmem:[%s1504_s6 + $0x478] sm:$0xff] }
  0x95   : > { %885 = vmatpush.msrb.mxu0 %v324_v21  ;;  %904 = vmatpush.msrb.mxu1 %v358_v22  ;;  %v372_v2 = vld [vmem:[%s1504_s6 + $0x368] sm:$0xff]  ;;  %v302_v5 = vld [vmem:[%s1504_s6 + $0x138] sm:$0xff] }
  0x96   : > { %878 = vmatpush.msra.mxu3 %v266_v24  ;;  %924 = vmatpush.msrb.mxu2 %v390_v26  ;;  %v370_v6 = vld [vmem:[%s1504_s6 + $0x358] sm:$0xff]  ;;  %v336_v7 = vld [vmem:[%s1504_s6 + $0x248] sm:$0xff] }
  0x97   : > { %886 = vmatpush.msrb.mxu0 %v322_v25  ;;  %905 = vmatpush.msrb.mxu1 %v356_v27  ;;  %v404_v8 = vld [vmem:[%s1504_s6 + $0x468] sm:$0xff]  ;;  %v334_v11 = vld [vmem:[%s1504_s6 + $0x238] sm:$0xff] }
  0x98   : > { %879 = vmatpush.msra.mxu3 %v264_v28  ;;  %925 = vmatpush.msrb.mxu2 %v388_v30  ;;  %v300_v9 = vld [vmem:[%s1504_s6 + $0x128] sm:$0xff]  ;;  %v402_v15 = vld [vmem:[%s1504_s6 + $0x458] sm:$0xff] }
  0x99   : > { %887 = vmatpush.msrb.mxu0 %v320_v29  ;;  %906 = vmatpush.msrb.mxu1 %v354_v31  ;;  %v368_v10 = vld [vmem:[%s1504_s6 + $0x348] sm:$0xff]  ;;  %v298_v16 = vld [vmem:[%s1504_s6 + $0x118] sm:$0xff] }
  0x9a   : > { %944 = vmatpush.msrb.mxu3 %v422_v32  ;;  %926 = vmatpush.msrb.mxu2 %v386_v34  ;;  %v366_v19 = vld [vmem:[%s1504_s6 + $0x338] sm:$0xff]  ;;  %v332_v21 = vld [vmem:[%s1504_s6 + $0x228] sm:$0xff] }
  0x9b   : > { %888 = vmatpush.msrb.mxu0 %v318_v33  ;;  %907 = vmatpush.msrb.mxu1 %v352_v35  ;;  %v400_v22 = vld [vmem:[%s1504_s6 + $0x448] sm:$0xff]  ;;  %v330_v26 = vld [vmem:[%s1504_s6 + $0x218] sm:$0xff] }
  0x9c   : > { %945 = vmatpush.msrb.mxu3 %v420_v36  ;;  %927 = vmatpush.msrb.mxu2 %v384_v38  ;;  %v296_v24 = vld [vmem:[%s1504_s6 + $0x108] sm:$0xff]  ;;  %v398_v27 = vld [vmem:[%s1504_s6 + $0x438] sm:$0xff] }
  0x9d   : > { %889 = vmatpush.msrb.mxu0 %v316_v37  ;;  %908 = vmatpush.msrb.mxu1 %v350_v43  ;;  %v364_v25 = vld [vmem:[%s1504_s6 + $0x328] sm:$0xff]  ;;  %v454_v28 = vld [vmem:[%s1504_s6 + $0x5f8] sm:$0xff] }
  0x9e   : > { %946 = vmatpush.msrb.mxu3 %v418_v44  ;;  %928 = vmatpush.msrb.mxu2 %v382_v46  ;;  %v362_v29 = vld [vmem:[%s1504_s6 + $0x318] sm:$0xff]  ;;  %v328_v30 = vld [vmem:[%s1504_s6 + $0x208] sm:$0xff] }
  0x9f   : > { %890 = vmatpush.msrb.mxu0 %v314_v45  ;;  %909 = vmatpush.msrb.mxu1 %v348_v47  ;;  %v396_v31 = vld [vmem:[%s1504_s6 + $0x428] sm:$0xff]  ;;  %v486_v33 = vld [vmem:[%s1504_s6 + $0x6f8] sm:$0xff] }
  0xa0   : > { %947 = vmatpush.msrb.mxu3 %v416_v48  ;;  %929 = vmatpush.msrb.mxu2 %v380_v50  ;;  %v452_v32 = vld [vmem:[%s1504_s6 + $0x5e8] sm:$0xff]  ;;  %v394_v35 = vld [vmem:[%s1504_s6 + $0x418] sm:$0xff] }
  0xa1   : > { %891 = vmatpush.msrb.mxu0 %v312_v49  ;;  %910 = vmatpush.msrb.mxu1 %v346_v51  ;;  %v360_v34 = vld [vmem:[%s1504_s6 + $0x308] sm:$0xff]  ;;  %v450_v36 = vld [vmem:[%s1504_s6 + $0x5d8] sm:$0xff] }
  0xa2   : > { %948 = vmatpush.msrb.mxu3 %v414_v52  ;;  %930 = vmatpush.msrb.mxu2 %v378_v54  ;;  %v484_v37 = vld [vmem:[%s1504_s6 + $0x6e8] sm:$0xff]  ;;  %v518_v38 = vld [vmem:[%s1504_s6 + $0x7f8] sm:$0xff] }
  0xa3   : > { %892 = vmatpush.msrb.mxu0 %v310_v53  ;;  %911 = vmatpush.msrb.mxu1 %v344_v55  ;;  %v392_v43 = vld [vmem:[%s1504_s6 + $0x408] sm:$0xff]  ;;  %v482_v45 = vld [vmem:[%s1504_s6 + $0x6d8] sm:$0xff] }
  0xa4   : > { %949 = vmatpush.msrb.mxu3 %v412_v56  ;;  %931 = vmatpush.msrb.mxu2 %v376_v58  ;;  %v448_v44 = vld [vmem:[%s1504_s6 + $0x5c8] sm:$0xff]  ;;  %v550_v47 = vld [vmem:[%s1504_s6 + $0x8f8] sm:$0xff] }
  0xa5   : > { %893 = vmatpush.msrb.mxu0 %v308_v57  ;;  %912 = vmatpush.msrb.mxu1 %v342_v59  ;;  %v516_v46 = vld [vmem:[%s1504_s6 + $0x7e8] sm:$0xff]  ;;  %v446_v48 = vld [vmem:[%s1504_s6 + $0x5b8] sm:$0xff] }
  0xa6   : > { %950 = vmatpush.msrb.mxu3 %v410_v60  ;;  %932 = vmatpush.msrb.mxu2 %v374_v62  ;;  %v480_v49 = vld [vmem:[%s1504_s6 + $0x6c8] sm:$0xff]  ;;  %v514_v50 = vld [vmem:[%s1504_s6 + $0x7d8] sm:$0xff] }
  0xa7   : > { %894 = vmatpush.msrb.mxu0 %v306_v61  ;;  %913 = vmatpush.msrb.mxu1 %v340_v63  ;;  %v548_v51 = vld [vmem:[%s1504_s6 + $0x8e8] sm:$0xff]  ;;  %v478_v53 = vld [vmem:[%s1504_s6 + $0x6b8] sm:$0xff] }
  0xa8   : > { %951 = vmatpush.msrb.mxu3 %v408_v0  ;;  %933 = vmatpush.msrb.mxu2 %v372_v2  ;;  %v444_v52 = vld [vmem:[%s1504_s6 + $0x5a8] sm:$0xff]  ;;  %v442_v55 = vld [vmem:[%s1504_s6 + $0x598] sm:$0xff] }
  0xa9   : > { %895 = vmatpush.msrb.mxu0 %v304_v1  ;;  %914 = vmatpush.msrb.mxu1 %v338_v3  ;;  %v512_v54 = vld [vmem:[%s1504_s6 + $0x7c8] sm:$0xff]  ;;  %v510_v57 = vld [vmem:[%s1504_s6 + $0x7b8] sm:$0xff] }
  0xaa   : > { %952 = vmatpush.msrb.mxu3 %v406_v4  ;;  %934 = vmatpush.msrb.mxu2 %v370_v6  ;;  %v476_v56 = vld [vmem:[%s1504_s6 + $0x6a8] sm:$0xff]  ;;  %v474_v60 = vld [vmem:[%s1504_s6 + $0x698] sm:$0xff] }
  0xab   : > { %896 = vmatpush.msrb.mxu0 %v302_v5  ;;  %915 = vmatpush.msrb.mxu1 %v336_v7  ;;  %v544_v58 = vld [vmem:[%s1504_s6 + $0x8c8] sm:$0xff]  ;;  %v542_v62 = vld [vmem:[%s1504_s6 + $0x8b8] sm:$0xff] }
  0xac   : > { %953 = vmatpush.msrb.mxu3 %v404_v8  ;;  %935 = vmatpush.msrb.mxu2 %v368_v10  ;;  %v440_v59 = vld [vmem:[%s1504_s6 + $0x588] sm:$0xff]  ;;  %v438_v63 = vld [vmem:[%s1504_s6 + $0x578] sm:$0xff] }
  0xad   : > { %897 = vmatpush.msrb.mxu0 %v300_v9  ;;  %916 = vmatpush.msrb.mxu1 %v334_v11  ;;  %v508_v61 = vld [vmem:[%s1504_s6 + $0x7a8] sm:$0xff]  ;;  %v506_v1 = vld [vmem:[%s1504_s6 + $0x798] sm:$0xff] }
  0xae   : > { %954 = vmatpush.msrb.mxu3 %v402_v15  ;;  %936 = vmatpush.msrb.mxu2 %v366_v19  ;;  %v472_v0 = vld [vmem:[%s1504_s6 + $0x688] sm:$0xff]  ;;  %v470_v4 = vld [vmem:[%s1504_s6 + $0x678] sm:$0xff] }
  0xaf   : > { %898 = vmatpush.msrb.mxu0 %v298_v16  ;;  %917 = vmatpush.msrb.mxu1 %v332_v21  ;;  %v540_v2 = vld [vmem:[%s1504_s6 + $0x8a8] sm:$0xff]  ;;  %v538_v6 = vld [vmem:[%s1504_s6 + $0x898] sm:$0xff] }
  0xb0   : > { %955 = vmatpush.msrb.mxu3 %v400_v22  ;;  %937 = vmatpush.msrb.mxu2 %v364_v25  ;;  %v436_v3 = vld [vmem:[%s1504_s6 + $0x568] sm:$0xff]  ;;  %v434_v7 = vld [vmem:[%s1504_s6 + $0x558] sm:$0xff] }
  0xb1   : > { %899 = vmatpush.msrb.mxu0 %v296_v24  ;;  %918 = vmatpush.msrb.mxu1 %v330_v26  ;;  %v504_v5 = vld [vmem:[%s1504_s6 + $0x788] sm:$0xff]  ;;  %v502_v9 = vld [vmem:[%s1504_s6 + $0x778] sm:$0xff] }
  0xb2   : > { %956 = vmatpush.msrb.mxu3 %v398_v27  ;;  %938 = vmatpush.msrb.mxu2 %v362_v29  ;;  %v468_v8 = vld [vmem:[%s1504_s6 + $0x668] sm:$0xff]  ;;  %v466_v15 = vld [vmem:[%s1504_s6 + $0x658] sm:$0xff] }
  0xb3   : > { %964 = vmatpush.msra.mxu0 %v454_v28  ;;  %919 = vmatpush.msrb.mxu1 %v328_v30  ;;  %v536_v10 = vld [vmem:[%s1504_s6 + $0x888] sm:$0xff]  ;;  %v534_v19 = vld [vmem:[%s1504_s6 + $0x878] sm:$0xff] }
  0xb4   : > { %957 = vmatpush.msrb.mxu3 %v396_v31  ;;  %939 = vmatpush.msrb.mxu2 %v360_v34  ;;  %v432_v11 = vld [vmem:[%s1504_s6 + $0x548] sm:$0xff]  ;;  %v430_v21 = vld [vmem:[%s1504_s6 + $0x538] sm:$0xff] }
  0xb5   : > { %965 = vmatpush.msra.mxu0 %v452_v32  ;;  %984 = vmatpush.msra.mxu1 %v486_v33  ;;  %v500_v16 = vld [vmem:[%s1504_s6 + $0x768] sm:$0xff]  ;;  %v498_v24 = vld [vmem:[%s1504_s6 + $0x758] sm:$0xff] }
  0xb6   : > { %958 = vmatpush.msrb.mxu3 %v394_v35  ;;  %1004 = vmatpush.msra.mxu2 %v518_v38  ;;  %v464_v22 = vld [vmem:[%s1504_s6 + $0x648] sm:$0xff]  ;;  %v462_v27 = vld [vmem:[%s1504_s6 + $0x638] sm:$0xff] }
  0xb7   : > { %966 = vmatpush.msra.mxu0 %v450_v36  ;;  %985 = vmatpush.msra.mxu1 %v484_v37  ;;  %v532_v25 = vld [vmem:[%s1504_s6 + $0x868] sm:$0xff]  ;;  %v530_v29 = vld [vmem:[%s1504_s6 + $0x858] sm:$0xff] }
  0xb8   : > { %959 = vmatpush.msrb.mxu3 %v392_v43  ;;  %1005 = vmatpush.msra.mxu2 %v516_v46  ;;  %v428_v26 = vld [vmem:[%s1504_s6 + $0x528] sm:$0xff]  ;;  %v426_v30 = vld [vmem:[%s1504_s6 + $0x518] sm:$0xff] }
  0xb9   : > { %880 = vmatmul.f32.vlgmr.msra.gmra.mxu3 %v1635_v40  ;;  %967 = vmatpush.msra.mxu0 %v448_v44  ;;  %v546_v40 = vld [vmem:[%s1504_s6 + $0x8d8] sm:$0xff]  ;;  %v496_v28 = vld [vmem:[%s1504_s6 + $0x748] sm:$0xff] }
  0xba   : > { %986 = vmatpush.msra.mxu1 %v482_v45  ;;  %1024 = vmatpush.msra.mxu3 %v550_v47  ;;  %v460_v31 = vld [vmem:[%s1504_s6 + $0x628] sm:$0xff]  ;;  %v494_v32 = vld [vmem:[%s1504_s6 + $0x738] sm:$0xff] }
  0xbb   : > { %968 = vmatpush.msra.mxu0 %v446_v48  ;;  %1006 = vmatpush.msra.mxu2 %v514_v50  ;;  %v528_v33 = vld [vmem:[%s1504_s6 + $0x848] sm:$0xff]  ;;  %v458_v35 = vld [vmem:[%s1504_s6 + $0x618] sm:$0xff] }
  0xbc   : > { %987 = vmatpush.msra.mxu1 %v480_v49  ;;  %1025 = vmatpush.msra.mxu3 %v548_v51  ;;  %v424_v34 = vld [vmem:[%s1504_s6 + $0x508] sm:$0xff]  ;;  %v526_v37 = vld [vmem:[%s1504_s6 + $0x838] sm:$0xff] }
  0xbd   : > { %969 = vmatpush.msra.mxu0 %v444_v52  ;;  %1007 = vmatpush.msra.mxu2 %v512_v54  ;;  %v492_v36 = vld [vmem:[%s1504_s6 + $0x728] sm:$0xff]  ;;  %v582_v38 = vld [vmem:[%s1504_s6 + $0x9f8] sm:$0xff] }
  0xbe   : > { %988 = vmatpush.msra.mxu1 %v478_v53  ;;  %1026 = vmatpush.msra.mxu3 %v546_v40  ;;  %v490_v43 = vld [vmem:[%s1504_s6 + $0x718] sm:$0xff]  ;;  %v524_v44 = vld [vmem:[%s1504_s6 + $0x828] sm:$0xff] }
  0xbf   : > { %970 = vmatpush.msra.mxu0 %v442_v55  ;;  %1008 = vmatpush.msra.mxu2 %v510_v57  ;;  %v580_v45 = vld [vmem:[%s1504_s6 + $0x9e8] sm:$0xff]  ;;  %v578_v47 = vld [vmem:[%s1504_s6 + $0x9d8] sm:$0xff] }
  0xc0   : > { %989 = vmatpush.msra.mxu1 %v476_v56  ;;  %1027 = vmatpush.msra.mxu3 %v544_v58  ;;  %v488_v46 = vld [vmem:[%s1504_s6 + $0x708] sm:$0xff]  ;;  %v610_v50 = vld [vmem:[%s1504_s6 + $0xad8] sm:$0xff] }
  0xc1   : > { %971 = vmatpush.msra.mxu0 %v440_v59  ;;  %1009 = vmatpush.msra.mxu2 %v508_v61  ;;  %v612_v48 = vld [vmem:[%s1504_s6 + $0xae8] sm:$0xff]  ;;  %v574_v51 = vld [vmem:[%s1504_s6 + $0x9b8] sm:$0xff] }
  0xc2   : > { %990 = vmatpush.msra.mxu1 %v474_v60  ;;  %1028 = vmatpush.msra.mxu3 %v542_v62  ;;  %v520_v49 = vld [vmem:[%s1504_s6 + $0x808] sm:$0xff]  ;;  %v606_v53 = vld [vmem:[%s1504_s6 + $0xab8] sm:$0xff] }
  0xc3   : > { %972 = vmatpush.msra.mxu0 %v438_v63  ;;  %1010 = vmatpush.msra.mxu2 %v506_v1  ;;  %v608_v52 = vld [vmem:[%s1504_s6 + $0xac8] sm:$0xff]  ;;  %v570_v54 = vld [vmem:[%s1504_s6 + $0x998] sm:$0xff] }
  0xc4   : > { %991 = vmatpush.msra.mxu1 %v472_v0  ;;  %1029 = vmatpush.msra.mxu3 %v540_v2  ;;  %v602_v40 = vld [vmem:[%s1504_s6 + $0xa98] sm:$0xff]  ;;  %v564_v56 = vld [vmem:[%s1504_s6 + $0x968] sm:$0xff] }
  0xc5   : > { %973 = vmatpush.msra.mxu0 %v436_v3  ;;  %1011 = vmatpush.msra.mxu2 %v504_v5  ;;  %v566_v55 = vld [vmem:[%s1504_s6 + $0x978] sm:$0xff]  ;;  %v596_v59 = vld [vmem:[%s1504_s6 + $0xa68] sm:$0xff] }
  0xc6   : > { %992 = vmatpush.msra.mxu1 %v470_v4  ;;  %1030 = vmatpush.msra.mxu3 %v538_v6  ;;  %v598_v57 = vld [vmem:[%s1504_s6 + $0xa78] sm:$0xff]  ;;  %v560_v60 = vld [vmem:[%s1504_s6 + $0x948] sm:$0xff] }
  0xc7   : > { %974 = vmatpush.msra.mxu0 %v434_v7  ;;  %1012 = vmatpush.msra.mxu2 %v502_v9  ;;  %v562_v58 = vld [vmem:[%s1504_s6 + $0x958] sm:$0xff]  ;;  %v592_v63 = vld [vmem:[%s1504_s6 + $0xa48] sm:$0xff] }
  0xc8   : > { %993 = vmatpush.msra.mxu1 %v468_v8  ;;  %1031 = vmatpush.msra.mxu3 %v536_v10  ;;  %v594_v61 = vld [vmem:[%s1504_s6 + $0xa58] sm:$0xff]  ;;  %v556_v0 = vld [vmem:[%s1504_s6 + $0x928] sm:$0xff] }
  0xc9   : > { %975 = vmatpush.msra.mxu0 %v432_v11  ;;  %1013 = vmatpush.msra.mxu2 %v500_v16  ;;  %v558_v62 = vld [vmem:[%s1504_s6 + $0x938] sm:$0xff]  ;;  %v588_v3 = vld [vmem:[%s1504_s6 + $0xa28] sm:$0xff] }
  0xca   : > { %994 = vmatpush.msra.mxu1 %v466_v15  ;;  %1032 = vmatpush.msra.mxu3 %v534_v19  ;;  %v590_v1 = vld [vmem:[%s1504_s6 + $0xa38] sm:$0xff]  ;;  %v552_v4 = vld [vmem:[%s1504_s6 + $0x908] sm:$0xff] }
  0xcb   : > { %976 = vmatpush.msra.mxu0 %v430_v21  ;;  %1014 = vmatpush.msra.mxu2 %v498_v24  ;;  %v554_v2 = vld [vmem:[%s1504_s6 + $0x918] sm:$0xff]  ;;  %v584_v6 = vld [vmem:[%s1504_s6 + $0xa08] sm:$0xff] }
  0xcc   : > { %995 = vmatpush.msra.mxu1 %v464_v22  ;;  %1033 = vmatpush.msra.mxu3 %v532_v25  ;;  %v586_v5 = vld [vmem:[%s1504_s6 + $0xa18] sm:$0xff] }
  0xcd   : > { %977 = vmatpush.msra.mxu0 %v428_v26  ;;  %1015 = vmatpush.msra.mxu2 %v496_v28 }
  0xce   : > { %996 = vmatpush.msra.mxu1 %v462_v27  ;;  %1034 = vmatpush.msra.mxu3 %v530_v29 }
  0xcf   : > { %940 = vmatmul.f32.vlgmr.msrb.gmra.mxu2 %v1637_v41  ;;  %978 = vmatpush.msra.mxu0 %v426_v30  ;;  %v456_v41 = vld [vmem:[%s1504_s6 + $0x608] sm:$0xff] }
  0xd0   : > { %997 = vmatpush.msra.mxu1 %v460_v31  ;;  %1016 = vmatpush.msra.mxu2 %v494_v32 }
  0xd1   : > { %1035 = vmatpush.msra.mxu3 %v528_v33  ;;  %900 = vmatmul.f32.vlgmr.msrb.gmra.mxu0 %v1639_v42  ;;  %v614_v42 = vld [vmem:[%s1504_s6 + $0xaf8] sm:$0xff] }
  0xd2   : > { %960 = vmatmul.f32.vlgmr.msrb.gmra.mxu3 %v1685_v17  ;;  %979 = vmatpush.msra.mxu0 %v424_v34  ;;  %v522_v17 = vld [vmem:[%s1504_s6 + $0x818] sm:$0xff] }
  0xd3   : > { %998 = vmatpush.msra.mxu1 %v458_v35  ;;  %1017 = vmatpush.msra.mxu2 %v492_v36 }
  0xd4   : > { %1036 = vmatpush.msra.mxu3 %v526_v37  ;;  %920 = vmatmul.f32.vlgmr.msrb.gmra.mxu1 %v1633_v39  ;;  %v576_v39 = vld [vmem:[%s1504_s6 + $0x9c8] sm:$0xff] }
  0xd5   : > { %1044 = vmatpush.msrb.mxu0 %v582_v38  ;;  %999 = vmatpush.msra.mxu1 %v456_v41 }
  0xd6   : > { %1018 = vmatpush.msra.mxu2 %v490_v43  ;;  %1037 = vmatpush.msra.mxu3 %v524_v44 }
  0xd7   : > { %1045 = vmatpush.msrb.mxu0 %v580_v45  ;;  %1064 = vmatpush.msrb.mxu1 %v614_v42 }
  0xd8   : > { %1019 = vmatpush.msra.mxu2 %v488_v46  ;;  %1038 = vmatpush.msra.mxu3 %v522_v17 }
  0xd9   : > { %1020 = vmatmul.f32.vlgmr.msra.gmra.mxu2 %v1687_v18  ;;  %1046 = vmatpush.msrb.mxu0 %v578_v47  ;;  %v572_v18 = vld [vmem:[%s1504_s6 + $0x9a8] sm:$0xff] }
  0xda   : > { %1065 = vmatpush.msrb.mxu1 %v612_v48  ;;  %1039 = vmatpush.msra.mxu3 %v520_v49 }
  0xdb   : > { %980 = vmatmul.f32.vlgmr.msra.gmra.mxu0 %v1695_v23  ;;  %1040 = vmatmul.f32.vlgmr.msra.gmra.mxu3 %v1746_v13  ;;  %v604_v23 = vld [vmem:[%s1504_s6 + $0xaa8] sm:$0xff] }
  0xdc   : > { %1047 = vmatpush.msrb.mxu0 %v576_v39  ;;  %1066 = vmatpush.msrb.mxu1 %v610_v50  ;;  %v568_v13 = vld [vmem:[%s1504_s6 + $0x988] sm:$0xff] }
  0xdd   : > { %1000 = vmatmul.f32.vlgmr.msra.gmra.mxu1 %v1678_v12  ;;  %v600_v12 = vld [vmem:[%s1504_s6 + $0xa88] sm:$0xff] }
  0xde   : > { %1048 = vmatpush.msrb.mxu0 %v574_v51  ;;  %1067 = vmatpush.msrb.mxu1 %v608_v52 }
  0xe0   : > { %1049 = vmatpush.msrb.mxu0 %v572_v18  ;;  %1068 = vmatpush.msrb.mxu1 %v606_v53  ;;  %v259_v53 = vld [vmem:[%s1522_s20] sm:$0xf] }
  0xe2   : > { %1050 = vmatpush.msrb.mxu0 %v570_v54  ;;  %1069 = vmatpush.msrb.mxu1 %v604_v23 }
  0xe4   : > { %1051 = vmatpush.msrb.mxu0 %v568_v13  ;;  %1070 = vmatpush.msrb.mxu1 %v602_v40 }
  0xe6   : > { %1052 = vmatpush.msrb.mxu0 %v566_v55  ;;  %1071 = vmatpush.msrb.mxu1 %v600_v12 }
  0xe7   : > { %v701_v9 = vpop.f32.mrf.mxu2 }
  0xe8   : > { %1053 = vmatpush.msrb.mxu0 %v564_v56  ;;  %1072 = vmatpush.msrb.mxu1 %v598_v57 }
  0xe9   : > { %v661_v7 = vpop.f32.mrf.mxu0 }
  0xea   : > { %1054 = vmatpush.msrb.mxu0 %v562_v58  ;;  %1073 = vmatpush.msrb.mxu1 %v596_v59 }
  0xec   : > { %1055 = vmatpush.msrb.mxu0 %v560_v60  ;;  %1074 = vmatpush.msrb.mxu1 %v594_v61  ;;  %v681_v8 = vpop.f32.mrf.mxu1 }
  0xed   : > { %v682_v29 = vadd.f32 %v681_v8, %v661_v7 }
  0xee   : > { %1056 = vmatpush.msrb.mxu0 %v558_v62  ;;  %1075 = vmatpush.msrb.mxu1 %v592_v63 }
  0xef   : > { %v702_v31 = vadd.f32 %v701_v9, %v682_v29 }
  0xf0   : > { %1057 = vmatpush.msrb.mxu0 %v556_v0  ;;  %1076 = vmatpush.msrb.mxu1 %v590_v1  ;;  %v721_v10 = vpop.f32.mrf.mxu3 }
  0xf1   : > { %v722_v33 = vadd.f32 %v721_v10, %v702_v31 }
  0xf2   : > { %1058 = vmatpush.msrb.mxu0 %v554_v2  ;;  %1077 = vmatpush.msrb.mxu1 %v588_v3 }
  0xf3   : > { %v741_v11 = vpop.f32.mrf.mxu0 }
  0xf4   : > { %1059 = vmatpush.msrb.mxu0 %v552_v4  ;;  %1078 = vmatpush.msrb.mxu1 %v586_v5  ;;  %v742_v36 = vadd.f32 %v741_v11, %v722_v33 }
  0xf5   : > { %1060 = vmatmul.f32.vlgmr.msrb.gmra.mxu0 %v1754_v20 }
  0xf6   : > { %1079 = vmatpush.msrb.mxu1 %v584_v6  ;;  %v761_v15 = vpop.f32.mrf.mxu1 }
  0xf7   : > { %1080 = vmatmul.f32.vlgmr.msrb.gmra.mxu1 %v1748_v14  ;;  %v781_v16 = vpop.f32.mrf.mxu2  ;;  %v762_v41 = vadd.f32 %v761_v15, %v742_v36 }
  0xf9   : > { %v782_v45 = vadd.f32 %v781_v16, %v762_v41 }
  0xfa   : > { %v801_v21 = vpop.f32.mrf.mxu3 }
  0xfb   : > { %v802_v17 = vadd.f32 %v801_v21, %v782_v45 }
 0x10f   : > { %v821_v19 = vpop.f32.mrf.mxu0 }
 0x110   : > { %v822_v48 = vadd.f32 %v821_v19, %v802_v17 }
 0x111   : > { %v841_v22 = vpop.f32.mrf.mxu1 }
 0x112   : > { %v842_v51 = vadd.f32 %v841_v22, %v822_v48 }
 0x115   : > { %v861_v24 = vpop.f32.mrf.mxu2 }
 0x116   : > { %v862_v18 = vadd.f32 %v861_v24, %v842_v51 }
 0x13c   : > { %v881_v26 = vpop.f32.mrf.mxu3 }
 0x14e   : > { %v901_v25 = vpop.f32.mrf.mxu0 }
 0x14f   : > { %v902_v27 = vadd.f32 %v901_v25, %v881_v26 }
 0x151   : > { %v921_v28 = vpop.f32.mrf.mxu1 }
 0x152   : > { %v922_v20 = vadd.f32 %v921_v28, %v902_v27  ;;  %v941_v30 = vpop.f32.mrf.mxu2 }
 0x154   : > { %v942_v14 = vadd.f32 %v941_v30, %v922_v20 }
 0x155   : > { %v961_v32 = vpop.f32.mrf.mxu3 }
 0x156   : > { %v962_v34 = vadd.f32 %v961_v32, %v942_v14 }
 0x158   : > { %v981_v35 = vpop.f32.mrf.mxu0 }
 0x159   : > { %v982_v37 = vadd.f32 %v981_v35, %v962_v34 }
 0x15a   : > { %v1001_v38 = vpop.f32.mrf.mxu1 }
 0x15b   : > { %v1002_v43 = vadd.f32 %v1001_v38, %v982_v37 }
 0x15c   : > { %v1021_v44 = vpop.f32.mrf.mxu2 }
 0x15d   : > { %v1022_v42 = vadd.f32 %v1021_v44, %v1002_v43 }
 0x15e   : > { %v1041_v46 = vpop.f32.mrf.mxu3 }
 0x15f   : > { %v1042_v47 = vadd.f32 %v1041_v46, %v1022_v42 }
 0x172   : > { %v1061_v49 = vpop.f32.mrf.mxu0 }
 0x173   : > { %v1062_v39 = vadd.f32 %v1061_v49, %v1042_v47 }
 0x174   : > { %v1081_v50 = vpop.f32.mrf.mxu1 }
 0x175   : > { %v1082_v52 = vadd.f32 %v1081_v50, %v1062_v39 }
 0x177   : > { %v1086_v54 = vrot.slane %v1082_v52, 6 }
 0x178   : > { %1095 = sbr.rel (%p1223_p3) target bundleno = 393 (0x189), region = 44 }
 0x179   : > { %v1088_v23 = vsel %vm1087_vm0, %v862_v18, %v1086_v54 }
 0x17a   : > { %v1090_v13 = vadd.f32 %v1088_v23, %v259_v53 }
 0x17c   : > { %1091 = vst [vmem:[%s1522_s20] sm:$0xf] %v1090_v13 }
 0x17d   : > { %v1097_v40 = vld [vmem:[%s246_s9] sm:$0x3] }
 0x17e   : > { %v1099_v55 = vperm.slane %v1097_v40, 0  ;;  %v1100_v12 = vperm.slane %v1097_v40, 1 }
 0x180   : > { %v1101_v57 = vrot.slane %v1100_v12, 6 }
 0x182   : > { %v1102_v58 = vsel %vm1087_vm0, %v1099_v55, %v1101_v57 }
 0x183   : > { %v1096_v56 = vld [vmem:[%s1522_s20] sm:$0xf] }
 0x184   : > { %v1104_v59 = vadd.f32 %v1102_v58, %v1096_v56 }
 0x186   : > { %v1105_v60 = vmax.f32 %v1104_v59, 0.0 }
 0x188   : > { %1106 = vst [vmem:[%s1522_s20] sm:$0xf] %v1105_v60 }
 0x189 PF: > { %s16_s19 = sadd.s32 1, %s1400_s19   ;;  %s1972_s25 = sld [smem:[#allocation5_spill]] }
 0x18a   : > { %p13_p4 = scmp.ge.s32.totalorder %s16_s19, 24   ;;  %s1973_s12 = smov %s1376_s13 }
 0x18b   : > { %s1974_s13 = smov %s1380_s14  ;;  %s1975_s14 = smov %s1493_s5 }
 0x18c   : > { %s1976_s15 = smov %s1392_s17  ;;  %s1977_s16 = smov %s1396_s18 }
 0x18d   : > { %s1978_s17 = smov %s1981_s21  ;;  %15 = sbr.rel (!%p13_p4) target bundleno = 5 (0x5), region = 87 }
 0x18f   : > { %s1979_s18 = smov %s1972_s25 }
 0x192   :  { %1129 = vsyncpa [#allocation3], 1 }
 0x193   :  { %1131 = vsyncpa [#allocation3 + $0x1], 1 }

</bundles_post_ra>
